<compile_context>
chip_gen: v7x
topology: tpu7x:2x2x1
jax: 0.10.0
libtpu: 0.0.40
codegen_flags: <defaults>
</compile_context>

<pallas_src>
import math

import jax
import jax.numpy as jnp
from jax.experimental import pallas as pl
from jax.experimental.pallas import tpu as pltpu

CPAD = 128  # lane-dense padded output-channel width for conv kernels

_SEQ = pltpu.CompilerParams(dimension_semantics=("arbitrary",))


# ----------------------------- Pallas kernels ------------------------------

def conv_lrelu_kernel(p_ref, w_ref, b_ref, o_ref):
    # patches [M, K] @ w [K, CPAD] + b [1, CPAD], fused leaky_relu(0.2).
    y = jnp.dot(p_ref[...], w_ref[...], preferred_element_type=jnp.float32)
    y = y + b_ref[...]
    o_ref[...] = jnp.where(y > 0, y, 0.2 * y)


def conv_lrelu_bn_kernel(p_ref, w_ref, g_ref, be_ref, o_ref):
    # conv (bias=False) + leaky_relu(0.2) + training-mode BatchNorm, fused.
    # Whole activation is resident in this single block, so the batch
    # statistics (biased variance, eps=1e-5) are exact.
    y = jnp.dot(p_ref[...], w_ref[...], preferred_element_type=jnp.float32)
    y = jnp.where(y > 0, y, 0.2 * y)
    mean = jnp.mean(y, axis=0, keepdims=True)
    d = y - mean
    var = jnp.mean(d * d, axis=0, keepdims=True)
    o_ref[...] = d * jax.lax.rsqrt(var + 1e-5) * g_ref[...] + be_ref[...]


def conv_fc_sigmoid_kernel(p_ref, w_ref, b_ref, wr_ref, sel_ref, bfc_ref, o_ref):
    # conv4 + leaky_relu + NCHW-order flatten + Linear(512->1) + sigmoid.
    # The NCHW flatten is folded into wr (FC weight reordered per spatial
    # position) and sel (per-batch row-group summation matrix), so everything
    # stays 2-D and on the VPU/MXU.
    z = jnp.dot(p_ref[...], w_ref[...], preferred_element_type=jnp.float32)
    z = z + b_ref[...]
    z = jnp.where(z > 0, z, 0.2 * z)                       # [N*HW, Cout]
    prod = z * wr_ref[...]                                 # [N*HW, Cout]
    per_b = jnp.dot(sel_ref[...], prod,
                    preferred_element_type=jnp.float32)    # [N, Cout]
    y = jnp.sum(per_b, axis=1, keepdims=True) + bfc_ref[...]  # [N, 1]
    # numerically stable sigmoid
    ey = jnp.exp(-jnp.abs(y))
    o_ref[...] = jnp.where(y >= 0, 1.0 / (1.0 + ey), ey / (1.0 + ey))


# ------------------------------ glue / wrappers -----------------------------

def im2col(x_nhwc, k, stride, pad):
    """Extract k x k patches (kh-major, kw, then Cin) -> [N*Ho*Wo, k*k*Cin].

    Done in the XLA wrapper (fused into one slice/stack fusion by XLA): the
    stride-2 gather has no layout-safe single-op in-kernel equivalent.
    """
    N, H, W, C = x_nhwc.shape
    xp = jnp.pad(x_nhwc, ((0, 0), (pad, pad), (pad, pad), (0, 0)))
    Ho = (H + 2 * pad - k) // stride + 1
    Wo = (W + 2 * pad - k) // stride + 1
    cols = []
    for i in range(k):
        for j in range(k):
            cols.append(xp[:, i:i + stride * Ho:stride, j:j + stride * Wo:stride, :])
    p = jnp.stack(cols, axis=3)              # [N, Ho, Wo, k*k, C]
    return p.reshape(N * Ho * Wo, k * k * C), (N, Ho, Wo)


def _w_mat(w_torch):
    cout, cin, kh, kw = w_torch.shape
    return jnp.transpose(w_torch, (2, 3, 1, 0)).reshape(kh * kw * cin, cout)


def _w_mat_padded(w_torch, cpad):
    wm = _w_mat(w_torch)
    return jnp.zeros((wm.shape[0], cpad), jnp.float32).at[:, :wm.shape[1]].set(wm)


def _vec_padded(v, cpad):
    return jnp.zeros((1, cpad), jnp.float32).at[:, :v.shape[0]].set(v.reshape(1, -1))


def conv2d_lrelu(x_nhwc, w_torch, bias):
    """Conv2d(k=3, s=2, p=1) + leaky_relu(0.2); lane-dense (128-padded) output."""
    Cout = w_torch.shape[0]
    patches, (N, Ho, Wo) = im2col(x_nhwc, 3, 2, 1)
    M, K = patches.shape
    out = pl.pallas_call(
        conv_lrelu_kernel,
        out_shape=jax.ShapeDtypeStruct((M, CPAD), jnp.float32),
        grid=(1,),
        in_specs=[
            pl.BlockSpec((M, K), lambda i: (0, 0)),
            pl.BlockSpec((K, CPAD), lambda i: (0, 0)),
            pl.BlockSpec((1, CPAD), lambda i: (0, 0)),
        ],
        out_specs=pl.BlockSpec((M, CPAD), lambda i: (0, 0)),
        compiler_params=_SEQ,
    )(patches, _w_mat_padded(w_torch, CPAD), _vec_padded(bias, CPAD))
    return out[:, :Cout].reshape(N, Ho, Wo, Cout)


def conv2d_lrelu_bn(x_nhwc, w_torch, gamma, beta):
    """Conv2d(bias=False) + leaky_relu(0.2) + BatchNorm (batch stats), fused."""
    Cout = w_torch.shape[0]
    patches, (N, Ho, Wo) = im2col(x_nhwc, 3, 2, 1)
    M, K = patches.shape
    out = pl.pallas_call(
        conv_lrelu_bn_kernel,
        out_shape=jax.ShapeDtypeStruct((M, CPAD), jnp.float32),
        grid=(1,),
        in_specs=[
            pl.BlockSpec((M, K), lambda i: (0, 0)),
            pl.BlockSpec((K, CPAD), lambda i: (0, 0)),
            pl.BlockSpec((1, CPAD), lambda i: (0, 0)),
            pl.BlockSpec((1, CPAD), lambda i: (0, 0)),
        ],
        out_specs=pl.BlockSpec((M, CPAD), lambda i: (0, 0)),
        compiler_params=_SEQ,
    )(patches, _w_mat_padded(w_torch, CPAD),
      _vec_padded(gamma, CPAD), _vec_padded(beta, CPAD))
    return out[:, :Cout].reshape(N, Ho, Wo, Cout)


def conv2d_fc_sigmoid(x_nhwc, w_torch, bias, w_fc, b_fc):
    """conv4 + leaky_relu + NCHW flatten + fc1 + sigmoid in one pallas_call."""
    Cout = w_torch.shape[0]                         # 32
    patches, (N, Ho, Wo) = im2col(x_nhwc, 3, 2, 1)  # Ho = Wo = 4
    M, K = patches.shape                            # M = N * 16
    HW = Ho * Wo
    w_mat = _w_mat(w_torch)                         # [K, Cout]
    # NCHW flatten index = c*HW + h*Wo + w  ->  wr[h*Wo+w, c] = w_fc[0, c*HW + h*Wo + w]
    wr = w_fc.reshape(Cout, HW).T                   # [HW, Cout]
    wr_tiled = jnp.tile(wr, (N, 1))                 # [M, Cout]
    sel = jnp.repeat(jnp.eye(N, dtype=jnp.float32), HW, axis=1)  # [N, M]
    return pl.pallas_call(
        conv_fc_sigmoid_kernel,
        out_shape=jax.ShapeDtypeStruct((N, 1), jnp.float32),
        grid=(1,),
        in_specs=[
            pl.BlockSpec((M, K), lambda i: (0, 0)),
            pl.BlockSpec((K, Cout), lambda i: (0, 0)),
            pl.BlockSpec((1, Cout), lambda i: (0, 0)),
            pl.BlockSpec((M, Cout), lambda i: (0, 0)),
            pl.BlockSpec((N, M), lambda i: (0, 0)),
            pl.BlockSpec((1, 1), lambda i: (0, 0)),
        ],
        out_specs=pl.BlockSpec((N, 1), lambda i: (0, 0)),
        compiler_params=_SEQ,
    )(patches, w_mat, bias.reshape(1, Cout), wr_tiled, sel, b_fc.reshape(1, 1))


# ------------------------------ parameter init ------------------------------

def kaiming_normal_conv(key, cout, cin, k):
    fan_in = cin * k * k
    std = math.sqrt(2.0 / fan_in)
    return std * jax.random.normal(key, (cout, cin, k, k), dtype=jnp.float32)


def xavier_normal_linear(key, out_f, in_f):
    std = math.sqrt(2.0 / (in_f + out_f))
    return std * jax.random.normal(key, (out_f, in_f), dtype=jnp.float32)


def uniform_bias(key, size, fan_in):
    bound = 1.0 / math.sqrt(fan_in)
    return jax.random.uniform(key, (size,), jnp.float32, -bound, bound)


def init_params(key):
    ks = jax.random.split(key, 8)
    return {
        "w1": kaiming_normal_conv(ks[0], 16, 3, 3),
        "b1": uniform_bias(ks[1], 16, 3 * 3 * 3),
        "w2": kaiming_normal_conv(ks[2], 32, 16, 3),        # bias=False
        "g2": jnp.ones((32,), jnp.float32),
        "be2": jnp.zeros((32,), jnp.float32),
        "w3": kaiming_normal_conv(ks[3], 32, 32, 3),         # bias=False
        "g3": jnp.ones((32,), jnp.float32),
        "be3": jnp.zeros((32,), jnp.float32),
        "w4": kaiming_normal_conv(ks[4], 32, 32, 3),
        "b4": uniform_bias(ks[5], 32, 32 * 3 * 3),
        "wfc": xavier_normal_linear(ks[6], 1, 4 * 4 * 32),
        "bfc": uniform_bias(ks[7], 1, 4 * 4 * 32),
    }


# -------------------------------- forward pass -------------------------------

def discriminator_forward(params, x_nchw):
    x = jnp.transpose(x_nchw, (0, 2, 3, 1))                          # NCHW -> NHWC
    x = conv2d_lrelu(x, params["w1"], params["b1"])                  # [N,32,32,16]
    x = conv2d_lrelu_bn(x, params["w2"], params["g2"], params["be2"])  # [N,16,16,32]
    x = conv2d_lrelu_bn(x, params["w3"], params["g3"], params["be3"])  # [N, 8, 8,32]
    return conv2d_fc_sigmoid(x, params["w4"], params["b4"],
                             params["wfc"], params["bfc"])           # [N, 1]


# ------------------------- pure-XLA reference (check) ------------------------

def _reference_forward(params, x):
    def conv(v, w, b=None):
        y = jax.lax.conv_general_dilated(
            v, w, window_strides=(2, 2), padding=((1, 1), (1, 1)),
            dimension_numbers=("NCHW", "OIHW", "NCHW"))
        if b is not None:
            y = y + b.reshape(1, -1, 1, 1)
        return y

    def lrelu(v):
        return jnp.where(v > 0, v, 0.2 * v)

    def bn(v, g, be):
        m = jnp.mean(v, axis=(0, 2, 3), keepdims=True)
        var = jnp.mean((v - m) ** 2, axis=(0, 2, 3), keepdims=True)
        return ((v - m) * jax.lax.rsqrt(var + 1e-5)
                * g.reshape(1, -1, 1, 1) + be.reshape(1, -1, 1, 1))

    y = lrelu(conv(x, params["w1"], params["b1"]))
    y = bn(lrelu(conv(y, params["w2"])), params["g2"], params["be2"])
    y = bn(lrelu(conv(y, params["w3"])), params["g3"], params["be3"])
    y = lrelu(conv(y, params["w4"], params["b4"]))
    flat = y.reshape(y.shape[0], -1)                       # NCHW flatten order
    return jax.nn.sigmoid(flat @ params["wfc"].T + params["bfc"])


if __name__ == "__main__":
    key = jax.random.PRNGKey(0)
    pkey, xkey = jax.random.split(key)
    params = init_params(pkey)

    # Network geometry (fc1 = 4*4*32) requires 64x64 spatial input; batch=2.
    x = jax.random.normal(xkey, (2, 3, 64, 64), dtype=jnp.float32)

    fwd = jax.jit(discriminator_forward)
    out = jax.block_until_ready(fwd(params, x))
    assert out.shape == (2, 1) and out.dtype == jnp.float32
    assert bool(jnp.all(jnp.isfinite(out)))
    assert bool(jnp.all((out >= 0.0) & (out <= 1.0)))

    ref = jax.block_until_ready(jax.jit(_reference_forward)(params, x))
    max_diff = float(jnp.max(jnp.abs(out - ref)))
    assert bool(jnp.allclose(out, ref, atol=1e-3, rtol=1e-3)), \
        f"mismatch vs XLA reference: max|diff|={max_diff}"

    print("KERNEL_OK")
</pallas_src>

<mosaic_0001>
module attributes {stable_mosaic.version = 11 : i64} {
  func.func @conv_lrelu_kernel(%arg0: i32, %arg1: memref<2048x27xf32, #tpu.memory_space<vmem>>, %arg2: memref<27x128xf32, #tpu.memory_space<vmem>>, %arg3: memref<1x128xf32, #tpu.memory_space<vmem>>, %arg4: memref<2048x128xf32, #tpu.memory_space<vmem>>) attributes {dimension_semantics = [#tpu.dimension_semantics<arbitrary>], iteration_bounds = array<i64: 1>, scalar_prefetch = 0 : i64, scratch_operands = 0 : i64, tpu.core_type = #tpu.core_type<tc>, window_params = [{pipeline_mode = #tpu.pipeline_mode<synchronous>, transform_indices = @transform_0, window_bounds = array<i64: 2048, 27>}, {pipeline_mode = #tpu.pipeline_mode<synchronous>, transform_indices = @transform_1, window_bounds = array<i64: 27, 128>}, {pipeline_mode = #tpu.pipeline_mode<synchronous>, transform_indices = @transform_2, window_bounds = array<i64: 1, 128>}, {pipeline_mode = #tpu.pipeline_mode<synchronous>, transform_indices = @transform_3, window_bounds = array<i64: 2048, 128>}]} {
    %c0 = arith.constant 0 : index
    %c0_0 = arith.constant 0 : index
    %0 = vector.load %arg1[%c0, %c0_0] : memref<2048x27xf32, #tpu.memory_space<vmem>>, vector<2048x27xf32>
    %c0_1 = arith.constant 0 : index
    %c0_2 = arith.constant 0 : index
    %1 = vector.load %arg2[%c0_1, %c0_2] : memref<27x128xf32, #tpu.memory_space<vmem>>, vector<27x128xf32>
    %cst = arith.constant dense<0.000000e+00> : vector<2048x128xf32>
    %2 = tpu.matmul %0, %1, %cst {dimension_numbers = #tpu.dot_dimension_numbers<[1], [0], [0], [1], [0, 0, 1, 1], [], []>} : vector<2048x27xf32>, vector<27x128xf32>, vector<2048x128xf32> -> vector<2048x128xf32>
    %c0_3 = arith.constant 0 : index
    %c0_4 = arith.constant 0 : index
    %3 = vector.load %arg3[%c0_3, %c0_4] : memref<1x128xf32, #tpu.memory_space<vmem>>, vector<1x128xf32>
    %4 = vector.broadcast %3 : vector<1x128xf32> to vector<2048x128xf32>
    %5 = arith.addf %2, %4 : vector<2048x128xf32>
    %cst_5 = arith.constant 0.000000e+00 : f32
    %6 = vector.broadcast %cst_5 : f32 to vector<2048x128xf32>
    %7 = arith.cmpf ogt, %5, %6 : vector<2048x128xf32>
    %cst_6 = arith.constant 2.000000e-01 : f32
    %8 = vector.broadcast %cst_6 : f32 to vector<2048x128xf32>
    %9 = arith.mulf %8, %5 : vector<2048x128xf32>
    %10 = arith.select %7, %5, %9 : vector<2048x128xi1>, vector<2048x128xf32>
    %c0_7 = arith.constant 0 : index
    %c0_8 = arith.constant 0 : index
    %11 = vector.load %arg4[%c0_7, %c0_8] : memref<2048x128xf32, #tpu.memory_space<vmem>>, vector<2048x128xf32>
    tpu.vector_store %arg4[%c0_7, %c0_8], %10 {strides = array<i32>} : memref<2048x128xf32, #tpu.memory_space<vmem>>, vector<2048x128xf32>,
    return
  }
  func.func @transform_0(%arg0: i32) -> (i32, i32) {
    %c0_i32 = arith.constant 0 : i32
    %c0_i32_0 = arith.constant 0 : i32
    %c0_i32_1 = arith.constant 0 : i32
    return %c0_i32, %c0_i32_0 : i32, i32
  }
  func.func @transform_1(%arg0: i32) -> (i32, i32) {
    %c0_i32 = arith.constant 0 : i32
    %c0_i32_0 = arith.constant 0 : i32
    %c0_i32_1 = arith.constant 0 : i32
    return %c0_i32, %c0_i32_0 : i32, i32
  }
  func.func @transform_2(%arg0: i32) -> (i32, i32) {
    %c0_i32 = arith.constant 0 : i32
    %c0_i32_0 = arith.constant 0 : i32
    %c0_i32_1 = arith.constant 0 : i32
    return %c0_i32, %c0_i32_0 : i32, i32
  }
  func.func @transform_3(%arg0: i32) -> (i32, i32) {
    %c0_i32 = arith.constant 0 : i32
    %c0_i32_0 = arith.constant 0 : i32
    %c0_i32_1 = arith.constant 0 : i32
    return %c0_i32, %c0_i32_0 : i32, i32
  }
}

module attributes {stable_mosaic.version = 11 : i64} {
  func.func @conv_lrelu_bn_kernel(%arg0: i32, %arg1: memref<512x144xf32, #tpu.memory_space<vmem>>, %arg2: memref<144x128xf32, #tpu.memory_space<vmem>>, %arg3: memref<1x128xf32, #tpu.memory_space<vmem>>, %arg4: memref<1x128xf32, #tpu.memory_space<vmem>>, %arg5: memref<512x128xf32, #tpu.memory_space<vmem>>) attributes {dimension_semantics = [#tpu.dimension_semantics<arbitrary>], iteration_bounds = array<i64: 1>, scalar_prefetch = 0 : i64, scratch_operands = 0 : i64, tpu.core_type = #tpu.core_type<tc>, window_params = [{pipeline_mode = #tpu.pipeline_mode<synchronous>, transform_indices = @transform_0, window_bounds = array<i64: 512, 144>}, {pipeline_mode = #tpu.pipeline_mode<synchronous>, transform_indices = @transform_1, window_bounds = array<i64: 144, 128>}, {pipeline_mode = #tpu.pipeline_mode<synchronous>, transform_indices = @transform_2, window_bounds = array<i64: 1, 128>}, {pipeline_mode = #tpu.pipeline_mode<synchronous>, transform_indices = @transform_3, window_bounds = array<i64: 1, 128>}, {pipeline_mode = #tpu.pipeline_mode<synchronous>, transform_indices = @transform_4, window_bounds = array<i64: 512, 128>}]} {
    %c0 = arith.constant 0 : index
    %c0_0 = arith.constant 0 : index
    %0 = vector.load %arg1[%c0, %c0_0] : memref<512x144xf32, #tpu.memory_space<vmem>>, vector<512x144xf32>
    %c0_1 = arith.constant 0 : index
    %c0_2 = arith.constant 0 : index
    %1 = vector.load %arg2[%c0_1, %c0_2] : memref<144x128xf32, #tpu.memory_space<vmem>>, vector<144x128xf32>
    %cst = arith.constant dense<0.000000e+00> : vector<512x128xf32>
    %2 = tpu.matmul %0, %1, %cst {dimension_numbers = #tpu.dot_dimension_numbers<[1], [0], [0], [1], [0, 0, 1, 1], [], []>} : vector<512x144xf32>, vector<144x128xf32>, vector<512x128xf32> -> vector<512x128xf32>
    %cst_3 = arith.constant 0.000000e+00 : f32
    %3 = vector.broadcast %cst_3 : f32 to vector<512x128xf32>
    %4 = arith.cmpf ogt, %2, %3 : vector<512x128xf32>
    %cst_4 = arith.constant 2.000000e-01 : f32
    %5 = vector.broadcast %cst_4 : f32 to vector<512x128xf32>
    %6 = arith.mulf %5, %2 : vector<512x128xf32>
    %7 = arith.select %4, %2, %6 : vector<512x128xi1>, vector<512x128xf32>
    %cst_5 = arith.constant dense<0.000000e+00> : vector<128xf32>
    %8 = vector.multi_reduction <add>, %7, %cst_5 [0] : vector<512x128xf32> to vector<128xf32>
    %9 = vector.shape_cast %8 : vector<128xf32> to vector<1x128xf32>
    %cst_6 = arith.constant 5.120000e+02 : f32
    %10 = vector.broadcast %cst_6 : f32 to vector<1x128xf32>
    %11 = arith.divf %9, %10 : vector<1x128xf32>
    %12 = vector.broadcast %11 : vector<1x128xf32> to vector<512x128xf32>
    %13 = arith.subf %7, %12 : vector<512x128xf32>
    %14 = arith.mulf %13, %13 : vector<512x128xf32>
    %cst_7 = arith.constant dense<0.000000e+00> : vector<128xf32>
    %15 = vector.multi_reduction <add>, %14, %cst_7 [0] : vector<512x128xf32> to vector<128xf32>
    %16 = vector.shape_cast %15 : vector<128xf32> to vector<1x128xf32>
    %cst_8 = arith.constant 5.120000e+02 : f32
    %17 = vector.broadcast %cst_8 : f32 to vector<1x128xf32>
    %18 = arith.divf %16, %17 : vector<1x128xf32>
    %cst_9 = arith.constant 9.99999974E-6 : f32
    %19 = vector.broadcast %cst_9 : f32 to vector<1x128xf32>
    %20 = arith.addf %18, %19 : vector<1x128xf32>
    %21 = math.rsqrt %20 : vector<1x128xf32>
    %22 = vector.broadcast %21 : vector<1x128xf32> to vector<512x128xf32>
    %23 = arith.mulf %13, %22 : vector<512x128xf32>
    %c0_10 = arith.constant 0 : index
    %c0_11 = arith.constant 0 : index
    %24 = vector.load %arg3[%c0_10, %c0_11] : memref<1x128xf32, #tpu.memory_space<vmem>>, vector<1x128xf32>
    %25 = vector.broadcast %24 : vector<1x128xf32> to vector<512x128xf32>
    %26 = arith.mulf %23, %25 : vector<512x128xf32>
    %c0_12 = arith.constant 0 : index
    %c0_13 = arith.constant 0 : index
    %27 = vector.load %arg4[%c0_12, %c0_13] : memref<1x128xf32, #tpu.memory_space<vmem>>, vector<1x128xf32>
    %28 = vector.broadcast %27 : vector<1x128xf32> to vector<512x128xf32>
    %29 = arith.addf %26, %28 : vector<512x128xf32>
    %c0_14 = arith.constant 0 : index
    %c0_15 = arith.constant 0 : index
    %30 = vector.load %arg5[%c0_14, %c0_15] : memref<512x128xf32, #tpu.memory_space<vmem>>, vector<512x128xf32>
    tpu.vector_store %arg5[%c0_14, %c0_15], %29 {strides = array<i32>} : memref<512x128xf32, #tpu.memory_space<vmem>>, vector<512x128xf32>,
    return
  }
  func.func @transform_0(%arg0: i32) -> (i32, i32) {
    %c0_i32 = arith.constant 0 : i32
    %c0_i32_0 = arith.constant 0 : i32
    %c0_i32_1 = arith.constant 0 : i32
    return %c0_i32, %c0_i32_0 : i32, i32
  }
  func.func @transform_1(%arg0: i32) -> (i32, i32) {
    %c0_i32 = arith.constant 0 : i32
    %c0_i32_0 = arith.constant 0 : i32
    %c0_i32_1 = arith.constant 0 : i32
    return %c0_i32, %c0_i32_0 : i32, i32
  }
  func.func @transform_2(%arg0: i32) -> (i32, i32) {
    %c0_i32 = arith.constant 0 : i32
    %c0_i32_0 = arith.constant 0 : i32
    %c0_i32_1 = arith.constant 0 : i32
    return %c0_i32, %c0_i32_0 : i32, i32
  }
  func.func @transform_3(%arg0: i32) -> (i32, i32) {
    %c0_i32 = arith.constant 0 : i32
    %c0_i32_0 = arith.constant 0 : i32
    %c0_i32_1 = arith.constant 0 : i32
    return %c0_i32, %c0_i32_0 : i32, i32
  }
  func.func @transform_4(%arg0: i32) -> (i32, i32) {
    %c0_i32 = arith.constant 0 : i32
    %c0_i32_0 = arith.constant 0 : i32
    %c0_i32_1 = arith.constant 0 : i32
    return %c0_i32, %c0_i32_0 : i32, i32
  }
}

module attributes {stable_mosaic.version = 11 : i64} {
  func.func @conv_lrelu_bn_kernel(%arg0: i32, %arg1: memref<128x288xf32, #tpu.memory_space<vmem>>, %arg2: memref<288x128xf32, #tpu.memory_space<vmem>>, %arg3: memref<1x128xf32, #tpu.memory_space<vmem>>, %arg4: memref<1x128xf32, #tpu.memory_space<vmem>>, %arg5: memref<128x128xf32, #tpu.memory_space<vmem>>) attributes {dimension_semantics = [#tpu.dimension_semantics<arbitrary>], iteration_bounds = array<i64: 1>, scalar_prefetch = 0 : i64, scratch_operands = 0 : i64, tpu.core_type = #tpu.core_type<tc>, window_params = [{pipeline_mode = #tpu.pipeline_mode<synchronous>, transform_indices = @transform_0, window_bounds = array<i64: 128, 288>}, {pipeline_mode = #tpu.pipeline_mode<synchronous>, transform_indices = @transform_1, window_bounds = array<i64: 288, 128>}, {pipeline_mode = #tpu.pipeline_mode<synchronous>, transform_indices = @transform_2, window_bounds = array<i64: 1, 128>}, {pipeline_mode = #tpu.pipeline_mode<synchronous>, transform_indices = @transform_3, window_bounds = array<i64: 1, 128>}, {pipeline_mode = #tpu.pipeline_mode<synchronous>, transform_indices = @transform_4, window_bounds = array<i64: 128, 128>}]} {
    %c0 = arith.constant 0 : index
    %c0_0 = arith.constant 0 : index
    %0 = vector.load %arg1[%c0, %c0_0] : memref<128x288xf32, #tpu.memory_space<vmem>>, vector<128x288xf32>
    %c0_1 = arith.constant 0 : index
    %c0_2 = arith.constant 0 : index
    %1 = vector.load %arg2[%c0_1, %c0_2] : memref<288x128xf32, #tpu.memory_space<vmem>>, vector<288x128xf32>
    %cst = arith.constant dense<0.000000e+00> : vector<128x128xf32>
    %2 = tpu.matmul %0, %1, %cst {dimension_numbers = #tpu.dot_dimension_numbers<[1], [0], [0], [1], [0, 0, 1, 1], [], []>} : vector<128x288xf32>, vector<288x128xf32>, vector<128x128xf32> -> vector<128x128xf32>
    %cst_3 = arith.constant 0.000000e+00 : f32
    %3 = vector.broadcast %cst_3 : f32 to vector<128x128xf32>
    %4 = arith.cmpf ogt, %2, %3 : vector<128x128xf32>
    %cst_4 = arith.constant 2.000000e-01 : f32
    %5 = vector.broadcast %cst_4 : f32 to vector<128x128xf32>
    %6 = arith.mulf %5, %2 : vector<128x128xf32>
    %7 = arith.select %4, %2, %6 : vector<128x128xi1>, vector<128x128xf32>
    %cst_5 = arith.constant dense<0.000000e+00> : vector<128xf32>
    %8 = vector.multi_reduction <add>, %7, %cst_5 [0] : vector<128x128xf32> to vector<128xf32>
    %9 = vector.shape_cast %8 : vector<128xf32> to vector<1x128xf32>
    %cst_6 = arith.constant 1.280000e+02 : f32
    %10 = vector.broadcast %cst_6 : f32 to vector<1x128xf32>
    %11 = arith.divf %9, %10 : vector<1x128xf32>
    %12 = vector.broadcast %11 : vector<1x128xf32> to vector<128x128xf32>
    %13 = arith.subf %7, %12 : vector<128x128xf32>
    %14 = arith.mulf %13, %13 : vector<128x128xf32>
    %cst_7 = arith.constant dense<0.000000e+00> : vector<128xf32>
    %15 = vector.multi_reduction <add>, %14, %cst_7 [0] : vector<128x128xf32> to vector<128xf32>
    %16 = vector.shape_cast %15 : vector<128xf32> to vector<1x128xf32>
    %cst_8 = arith.constant 1.280000e+02 : f32
    %17 = vector.broadcast %cst_8 : f32 to vector<1x128xf32>
    %18 = arith.divf %16, %17 : vector<1x128xf32>
    %cst_9 = arith.constant 9.99999974E-6 : f32
    %19 = vector.broadcast %cst_9 : f32 to vector<1x128xf32>
    %20 = arith.addf %18, %19 : vector<1x128xf32>
    %21 = math.rsqrt %20 : vector<1x128xf32>
    %22 = vector.broadcast %21 : vector<1x128xf32> to vector<128x128xf32>
    %23 = arith.mulf %13, %22 : vector<128x128xf32>
    %c0_10 = arith.constant 0 : index
    %c0_11 = arith.constant 0 : index
    %24 = vector.load %arg3[%c0_10, %c0_11] : memref<1x128xf32, #tpu.memory_space<vmem>>, vector<1x128xf32>
    %25 = vector.broadcast %24 : vector<1x128xf32> to vector<128x128xf32>
    %26 = arith.mulf %23, %25 : vector<128x128xf32>
    %c0_12 = arith.constant 0 : index
    %c0_13 = arith.constant 0 : index
    %27 = vector.load %arg4[%c0_12, %c0_13] : memref<1x128xf32, #tpu.memory_space<vmem>>, vector<1x128xf32>
    %28 = vector.broadcast %27 : vector<1x128xf32> to vector<128x128xf32>
    %29 = arith.addf %26, %28 : vector<128x128xf32>
    %c0_14 = arith.constant 0 : index
    %c0_15 = arith.constant 0 : index
    %30 = vector.load %arg5[%c0_14, %c0_15] : memref<128x128xf32, #tpu.memory_space<vmem>>, vector<128x128xf32>
    tpu.vector_store %arg5[%c0_14, %c0_15], %29 {strides = array<i32>} : memref<128x128xf32, #tpu.memory_space<vmem>>, vector<128x128xf32>,
    return
  }
  func.func @transform_0(%arg0: i32) -> (i32, i32) {
    %c0_i32 = arith.constant 0 : i32
    %c0_i32_0 = arith.constant 0 : i32
    %c0_i32_1 = arith.constant 0 : i32
    return %c0_i32, %c0_i32_0 : i32, i32
  }
  func.func @transform_1(%arg0: i32) -> (i32, i32) {
    %c0_i32 = arith.constant 0 : i32
    %c0_i32_0 = arith.constant 0 : i32
    %c0_i32_1 = arith.constant 0 : i32
    return %c0_i32, %c0_i32_0 : i32, i32
  }
  func.func @transform_2(%arg0: i32) -> (i32, i32) {
    %c0_i32 = arith.constant 0 : i32
    %c0_i32_0 = arith.constant 0 : i32
    %c0_i32_1 = arith.constant 0 : i32
    return %c0_i32, %c0_i32_0 : i32, i32
  }
  func.func @transform_3(%arg0: i32) -> (i32, i32) {
    %c0_i32 = arith.constant 0 : i32
    %c0_i32_0 = arith.constant 0 : i32
    %c0_i32_1 = arith.constant 0 : i32
    return %c0_i32, %c0_i32_0 : i32, i32
  }
  func.func @transform_4(%arg0: i32) -> (i32, i32) {
    %c0_i32 = arith.constant 0 : i32
    %c0_i32_0 = arith.constant 0 : i32
    %c0_i32_1 = arith.constant 0 : i32
    return %c0_i32, %c0_i32_0 : i32, i32
  }
}

module attributes {stable_mosaic.version = 11 : i64} {
  func.func @conv_fc_sigmoid_kernel(%arg0: i32, %arg1: memref<32x288xf32, #tpu.memory_space<vmem>>, %arg2: memref<288x32xf32, #tpu.memory_space<vmem>>, %arg3: memref<1x32xf32, #tpu.memory_space<vmem>>, %arg4: memref<32x32xf32, #tpu.memory_space<vmem>>, %arg5: memref<2x32xf32, #tpu.memory_space<vmem>>, %arg6: memref<1x1xf32, #tpu.memory_space<vmem>>, %arg7: memref<2x1xf32, #tpu.memory_space<vmem>>) attributes {dimension_semantics = [#tpu.dimension_semantics<arbitrary>], iteration_bounds = array<i64: 1>, scalar_prefetch = 0 : i64, scratch_operands = 0 : i64, tpu.core_type = #tpu.core_type<tc>, window_params = [{pipeline_mode = #tpu.pipeline_mode<synchronous>, transform_indices = @transform_0, window_bounds = array<i64: 32, 288>}, {pipeline_mode = #tpu.pipeline_mode<synchronous>, transform_indices = @transform_1, window_bounds = array<i64: 288, 32>}, {pipeline_mode = #tpu.pipeline_mode<synchronous>, transform_indices = @transform_2, window_bounds = array<i64: 1, 32>}, {pipeline_mode = #tpu.pipeline_mode<synchronous>, transform_indices = @transform_3, window_bounds = array<i64: 32, 32>}, {pipeline_mode = #tpu.pipeline_mode<synchronous>, transform_indices = @transform_4, window_bounds = array<i64: 2, 32>}, {pipeline_mode = #tpu.pipeline_mode<synchronous>, transform_indices = @transform_5, window_bounds = array<i64: 1, 1>}, {pipeline_mode = #tpu.pipeline_mode<synchronous>, transform_indices = @transform_6, window_bounds = array<i64: 2, 1>}]} {
    %c0 = arith.constant 0 : index
    %c0_0 = arith.constant 0 : index
    %0 = vector.load %arg1[%c0, %c0_0] : memref<32x288xf32, #tpu.memory_space<vmem>>, vector<32x288xf32>
    %c0_1 = arith.constant 0 : index
    %c0_2 = arith.constant 0 : index
    %1 = vector.load %arg2[%c0_1, %c0_2] : memref<288x32xf32, #tpu.memory_space<vmem>>, vector<288x32xf32>
    %cst = arith.constant dense<0.000000e+00> : vector<32x32xf32>
    %2 = tpu.matmul %0, %1, %cst {dimension_numbers = #tpu.dot_dimension_numbers<[1], [0], [0], [1], [0, 0, 1, 1], [], []>} : vector<32x288xf32>, vector<288x32xf32>, vector<32x32xf32> -> vector<32x32xf32>
    %c0_3 = arith.constant 0 : index
    %c0_4 = arith.constant 0 : index
    %3 = vector.load %arg3[%c0_3, %c0_4] : memref<1x32xf32, #tpu.memory_space<vmem>>, vector<1x32xf32>
    %4 = vector.broadcast %3 : vector<1x32xf32> to vector<32x32xf32>
    %5 = arith.addf %2, %4 : vector<32x32xf32>
    %cst_5 = arith.constant 0.000000e+00 : f32
    %6 = vector.broadcast %cst_5 : f32 to vector<32x32xf32>
    %7 = arith.cmpf ogt, %5, %6 : vector<32x32xf32>
    %cst_6 = arith.constant 2.000000e-01 : f32
    %8 = vector.broadcast %cst_6 : f32 to vector<32x32xf32>
    %9 = arith.mulf %8, %5 : vector<32x32xf32>
    %10 = arith.select %7, %5, %9 : vector<32x32xi1>, vector<32x32xf32>
    %c0_7 = arith.constant 0 : index
    %c0_8 = arith.constant 0 : index
    %11 = vector.load %arg4[%c0_7, %c0_8] : memref<32x32xf32, #tpu.memory_space<vmem>>, vector<32x32xf32>
    %12 = arith.mulf %10, %11 : vector<32x32xf32>
    %c0_9 = arith.constant 0 : index
    %c0_10 = arith.constant 0 : index
    %13 = vector.load %arg5[%c0_9, %c0_10] : memref<2x32xf32, #tpu.memory_space<vmem>>, vector<2x32xf32>
    %cst_11 = arith.constant dense<0.000000e+00> : vector<2x32xf32>
    %14 = tpu.matmul %13, %12, %cst_11 {dimension_numbers = #tpu.dot_dimension_numbers<[1], [0], [0], [1], [0, 0, 1, 1], [], []>} : vector<2x32xf32>, vector<32x32xf32>, vector<2x32xf32> -> vector<2x32xf32>
    %cst_12 = arith.constant dense<0.000000e+00> : vector<2xf32>
    %15 = vector.multi_reduction <add>, %14, %cst_12 [1] : vector<2x32xf32> to vector<2xf32>
    %16 = vector.shape_cast %15 : vector<2xf32> to vector<2x1xf32>
    %c0_13 = arith.constant 0 : index
    %c0_14 = arith.constant 0 : index
    %17 = vector.load %arg6[%c0_13, %c0_14] : memref<1x1xf32, #tpu.memory_space<vmem>>, vector<1x1xf32>
    %18 = vector.broadcast %17 : vector<1x1xf32> to vector<2x1xf32>
    %19 = arith.addf %16, %18 : vector<2x1xf32>
    %20 = math.absf %19 : vector<2x1xf32>
    %cst_15 = arith.constant 0.000000e+00 : f32
    %21 = vector.broadcast %cst_15 : f32 to vector<2x1xf32>
    %22 = arith.subf %21, %20 : vector<2x1xf32>
    %23 = math.exp %22 : vector<2x1xf32>
    %cst_16 = arith.constant 0.000000e+00 : f32
    %24 = vector.broadcast %cst_16 : f32 to vector<2x1xf32>
    %25 = arith.cmpf oge, %19, %24 : vector<2x1xf32>
    %cst_17 = arith.constant 1.000000e+00 : f32
    %26 = vector.broadcast %cst_17 : f32 to vector<2x1xf32>
    %27 = arith.addf %26, %23 : vector<2x1xf32>
    %cst_18 = arith.constant 1.000000e+00 : f32
    %28 = vector.broadcast %cst_18 : f32 to vector<2x1xf32>
    %29 = arith.divf %28, %27 : vector<2x1xf32>
    %cst_19 = arith.constant 1.000000e+00 : f32
    %30 = vector.broadcast %cst_19 : f32 to vector<2x1xf32>
    %31 = arith.addf %30, %23 : vector<2x1xf32>
    %32 = arith.divf %23, %31 : vector<2x1xf32>
    %33 = arith.select %25, %29, %32 : vector<2x1xi1>, vector<2x1xf32>
    %c0_20 = arith.constant 0 : index
    %c0_21 = arith.constant 0 : index
    %34 = vector.load %arg7[%c0_20, %c0_21] : memref<2x1xf32, #tpu.memory_space<vmem>>, vector<2x1xf32>
    tpu.vector_store %arg7[%c0_20, %c0_21], %33 {strides = array<i32>} : memref<2x1xf32, #tpu.memory_space<vmem>>, vector<2x1xf32>,
    return
  }
  func.func @transform_0(%arg0: i32) -> (i32, i32) {
    %c0_i32 = arith.constant 0 : i32
    %c0_i32_0 = arith.constant 0 : i32
    %c0_i32_1 = arith.constant 0 : i32
    return %c0_i32, %c0_i32_0 : i32, i32
  }
  func.func @transform_1(%arg0: i32) -> (i32, i32) {
    %c0_i32 = arith.constant 0 : i32
    %c0_i32_0 = arith.constant 0 : i32
    %c0_i32_1 = arith.constant 0 : i32
    return %c0_i32, %c0_i32_0 : i32, i32
  }
  func.func @transform_2(%arg0: i32) -> (i32, i32) {
    %c0_i32 = arith.constant 0 : i32
    %c0_i32_0 = arith.constant 0 : i32
    %c0_i32_1 = arith.constant 0 : i32
    return %c0_i32, %c0_i32_0 : i32, i32
  }
  func.func @transform_3(%arg0: i32) -> (i32, i32) {
    %c0_i32 = arith.constant 0 : i32
    %c0_i32_0 = arith.constant 0 : i32
    %c0_i32_1 = arith.constant 0 : i32
    return %c0_i32, %c0_i32_0 : i32, i32
  }
  func.func @transform_4(%arg0: i32) -> (i32, i32) {
    %c0_i32 = arith.constant 0 : i32
    %c0_i32_0 = arith.constant 0 : i32
    %c0_i32_1 = arith.constant 0 : i32
    return %c0_i32, %c0_i32_0 : i32, i32
  }
  func.func @transform_5(%arg0: i32) -> (i32, i32) {
    %c0_i32 = arith.constant 0 : i32
    %c0_i32_0 = arith.constant 0 : i32
    %c0_i32_1 = arith.constant 0 : i32
    return %c0_i32, %c0_i32_0 : i32, i32
  }
  func.func @transform_6(%arg0: i32) -> (i32, i32) {
    %c0_i32 = arith.constant 0 : i32
    %c0_i32_0 = arith.constant 0 : i32
    %c0_i32_1 = arith.constant 0 : i32
    return %c0_i32, %c0_i32_0 : i32, i32
  }
}

</mosaic_0001>

<bundles_post_ra>
// kernel: discriminator_forward.4
= control target key start
LH: loop header
LB: loop body
LE: loop exit
PB: predicated region body
PF: predicated region fallthrough
CT: control target
= control target key end

     0   :  { %vm1050_vm0 = vcmask 1042432   ;;  %vm281_vm1 = vcmask 220160   ;;  %vm4355_vm2 = vmmov 1   ;;  %s6449_s1 = inlined_call_operand.vmem [shape: f32[27,128], index: 1, kind: input, shape index: {}]   ;;  %s6450_s0 = inlined_call_operand.vmem [shape: f32[2048,27], index: 0, kind: input, shape index: {}]   ;;  %s6451_s2 = inlined_call_operand.vmem [shape: f32[1,128], index: 2, kind: input, shape index: {}]   ;;  %s6452_s3 = inlined_call_operand.vmem [shape: f32[2048,128], index: 3, kind: output, shape index: {}]  }
   0x1   :  { %v270_v0 = vld [vmem:[%s6449_s1] sm:$0xff]  ;;  %v271_v1 = vld [vmem:[%s6449_s1 + $0x8] sm:$0xff]  ;;  %v272_v2 = vld [vmem:[%s6449_s1 + $0x10] sm:$0xff] }
   0x2   :  { %v4337_v3 = vpack.c.bf16 %v271_v1, %v270_v0  ;;  %v273_v4 = vld [vmem:[%s6449_s1 + $0x18] sm:$0x7]  ;;  %v14_v5 = vld [vmem:[%s6450_s0] sm:$0xff]  ;;  %vm4342_vm3 = vmpackc.low %vm1050_vm0, %vm4355_vm2 }
   0x3   :  { %v4341_v6 = vpack.c.bf16 %v273_v4, %v272_v2  ;;  %3953 = vmatprep.mubr.msk.f32.mxu0 %vm281_vm1, %v14_v5  ;;  %v142_v7 = vld [vmem:[%s6450_s0 + $0x400] sm:$0xff]  ;;  %v15_v8 = vld [vmem:[%s6450_s0 + $0x8] sm:$0xff]  ;;  %v16_v10 = vld [vmem:[%s6450_s0 + $0x10] sm:$0xff] }
   0x4   :  { %4338 = vmatprep.subr.bf16.mxu0 %v4337_v3  ;;  %4347 = vmatprep.subr.bf16.mxu1 %v4337_v3  ;;  %v143_v9 = vld [vmem:[%s6450_s0 + $0x408] sm:$0xff]  ;;  %v144_v11 = vld [vmem:[%s6450_s0 + $0x410] sm:$0xff]  ;;  %v17_v12 = vld [vmem:[%s6450_s0 + $0x18] sm:$0xff] }
   0x5   :  { %4340 = vmatpush3.bf16.msra.mxu0 %v4337_v3  ;;  %4349 = vmatpush3.bf16.msra.mxu1 %v4337_v3  ;;  %v145_v13 = vld [vmem:[%s6450_s0 + $0x418] sm:$0xff]  ;;  %v18_v14 = vld [vmem:[%s6450_s0 + $0x20] sm:$0xff]  ;;  %v19_v16 = vld [vmem:[%s6450_s0 + $0x28] sm:$0xff] }
   0x6   :  { %4343 = vmatprep.subr.msk.bf16.mxu0 %vm4342_vm3, %v4341_v6  ;;  %4348 = vmatprep.subr.msk.bf16.mxu1 %vm4342_vm3, %v4341_v6  ;;  %v146_v15 = vld [vmem:[%s6450_s0 + $0x420] sm:$0xff]  ;;  %v147_v17 = vld [vmem:[%s6450_s0 + $0x428] sm:$0xff]  ;;  %v20_v18 = vld [vmem:[%s6450_s0 + $0x30] sm:$0xff] }
   0x7   :  { %4145 = vmatprep.mubr.msk.f32.mxu1 %vm281_vm1, %v142_v7  ;;  %v148_v19 = vld [vmem:[%s6450_s0 + $0x430] sm:$0xff]  ;;  %v21_v20 = vld [vmem:[%s6450_s0 + $0x38] sm:$0xff]  ;;  %v22_v22 = vld [vmem:[%s6450_s0 + $0x40] sm:$0xff] }
   0x8   :  { %v149_v21 = vld [vmem:[%s6450_s0 + $0x438] sm:$0xff]  ;;  %v150_v23 = vld [vmem:[%s6450_s0 + $0x440] sm:$0xff]  ;;  %v23_v24 = vld [vmem:[%s6450_s0 + $0x48] sm:$0xff] }
   0x9   :  { %4346 = vmatpush3.bf16.msk.msra.mxu0 %vm4342_vm3, %v4341_v6  ;;  %4350 = vmatpush3.bf16.msk.msra.mxu1 %vm4342_vm3, %v4341_v6  ;;  %v151_v25 = vld [vmem:[%s6450_s0 + $0x448] sm:$0xff]  ;;  %v24_v26 = vld [vmem:[%s6450_s0 + $0x50] sm:$0xff]  ;;  %v25_v28 = vld [vmem:[%s6450_s0 + $0x58] sm:$0xff] }
   0xa   :  { %v152_v27 = vld [vmem:[%s6450_s0 + $0x450] sm:$0xff]  ;;  %v153_v29 = vld [vmem:[%s6450_s0 + $0x458] sm:$0xff]  ;;  %v26_v30 = vld [vmem:[%s6450_s0 + $0x60] sm:$0xff] }
   0xb   :  { %v154_v31 = vld [vmem:[%s6450_s0 + $0x460] sm:$0xff]  ;;  %v27_v32 = vld [vmem:[%s6450_s0 + $0x68] sm:$0xff]  ;;  %v28_v34 = vld [vmem:[%s6450_s0 + $0x70] sm:$0xff] }
   0xc   :  { %3954 = vmatmul.mubr.msk.f32.vlgmr.msra.gmra.mrb[0].mxu0 %vm281_vm1, %v15_v8  ;;  %4146 = vmatmul.mubr.msk.f32.vlgmr.msra.gmra.mrb[0].mxu1 %vm281_vm1, %v143_v9  ;;  %v155_v33 = vld [vmem:[%s6450_s0 + $0x468] sm:$0xff]  ;;  %v156_v35 = vld [vmem:[%s6450_s0 + $0x470] sm:$0xff]  ;;  %v29_v36 = vld [vmem:[%s6450_s0 + $0x78] sm:$0xff] }
   0xd   :  { %3956 = vmatprep.mubr.msk.f32.mxu0 %vm281_vm1, %v16_v10  ;;  %4148 = vmatprep.mubr.msk.f32.mxu1 %vm281_vm1, %v144_v11  ;;  %v157_v37 = vld [vmem:[%s6450_s0 + $0x478] sm:$0xff]  ;;  %v30_v38 = vld [vmem:[%s6450_s0 + $0x80] sm:$0xff]  ;;  %v31_v40 = vld [vmem:[%s6450_s0 + $0x88] sm:$0xff] }
   0xe   :  { %v158_v39 = vld [vmem:[%s6450_s0 + $0x480] sm:$0xff]  ;;  %v159_v41 = vld [vmem:[%s6450_s0 + $0x488] sm:$0xff]  ;;  %v32_v42 = vld [vmem:[%s6450_s0 + $0x90] sm:$0xff] }
   0xf   :  { %v160_v43 = vld [vmem:[%s6450_s0 + $0x490] sm:$0xff]  ;;  %v33_v44 = vld [vmem:[%s6450_s0 + $0x98] sm:$0xff]  ;;  %v34_v46 = vld [vmem:[%s6450_s0 + $0xa0] sm:$0xff] }
  0x10   :  { %3957 = vmatmul.mubr.msk.f32.gmra.mrb[2].mxu0 %vm281_vm1, %v17_v12  ;;  %4149 = vmatmul.mubr.msk.f32.gmra.mrb[2].mxu1 %vm281_vm1, %v145_v13  ;;  %v161_v45 = vld [vmem:[%s6450_s0 + $0x498] sm:$0xff]  ;;  %v162_v47 = vld [vmem:[%s6450_s0 + $0x4a0] sm:$0xff]  ;;  %v35_v48 = vld [vmem:[%s6450_s0 + $0xa8] sm:$0xff] }
  0x11   :  { %3959 = vmatprep.mubr.msk.f32.mxu0 %vm281_vm1, %v18_v14  ;;  %4151 = vmatprep.mubr.msk.f32.mxu1 %vm281_vm1, %v146_v15  ;;  %v163_v49 = vld [vmem:[%s6450_s0 + $0x4a8] sm:$0xff]  ;;  %v36_v50 = vld [vmem:[%s6450_s0 + $0xb0] sm:$0xff]  ;;  %v37_v52 = vld [vmem:[%s6450_s0 + $0xb8] sm:$0xff] }
  0x12   :  { %v164_v51 = vld [vmem:[%s6450_s0 + $0x4b0] sm:$0xff]  ;;  %v165_v53 = vld [vmem:[%s6450_s0 + $0x4b8] sm:$0xff]  ;;  %v38_v54 = vld [vmem:[%s6450_s0 + $0xc0] sm:$0xff] }
  0x13   :  { %v166_v55 = vld [vmem:[%s6450_s0 + $0x4c0] sm:$0xff]  ;;  %v39_v56 = vld [vmem:[%s6450_s0 + $0xc8] sm:$0xff]  ;;  %v40_v58 = vld [vmem:[%s6450_s0 + $0xd0] sm:$0xff] }
  0x14   :  { %3960 = vmatmul.mubr.msk.f32.gmra.mrb[4].mxu0 %vm281_vm1, %v19_v16  ;;  %4152 = vmatmul.mubr.msk.f32.gmra.mrb[4].mxu1 %vm281_vm1, %v147_v17  ;;  %v167_v57 = vld [vmem:[%s6450_s0 + $0x4c8] sm:$0xff]  ;;  %v168_v59 = vld [vmem:[%s6450_s0 + $0x4d0] sm:$0xff]  ;;  %v41_v60 = vld [vmem:[%s6450_s0 + $0xd8] sm:$0xff] }
  0x15   :  { %3962 = vmatprep.mubr.msk.f32.mxu0 %vm281_vm1, %v20_v18  ;;  %4154 = vmatprep.mubr.msk.f32.mxu1 %vm281_vm1, %v148_v19  ;;  %v169_v61 = vld [vmem:[%s6450_s0 + $0x4d8] sm:$0xff]  ;;  %v42_v62 = vld [vmem:[%s6450_s0 + $0xe0] sm:$0xff]  ;;  %v43_v0 = vld [vmem:[%s6450_s0 + $0xe8] sm:$0xff] }
  0x16   :  { %v170_v63 = vld [vmem:[%s6450_s0 + $0x4e0] sm:$0xff]  ;;  %v171_v1 = vld [vmem:[%s6450_s0 + $0x4e8] sm:$0xff]  ;;  %v44_v2 = vld [vmem:[%s6450_s0 + $0xf0] sm:$0xff] }
  0x17   :  { %v172_v3 = vld [vmem:[%s6450_s0 + $0x4f0] sm:$0xff]  ;;  %v45_v4 = vld [vmem:[%s6450_s0 + $0xf8] sm:$0xff]  ;;  %v46_v6 = vld [vmem:[%s6450_s0 + $0x100] sm:$0xff] }
  0x18   :  { %3963 = vmatmul.mubr.msk.f32.gmra.mrb[6].mxu0 %vm281_vm1, %v21_v20  ;;  %4155 = vmatmul.mubr.msk.f32.gmra.mrb[6].mxu1 %vm281_vm1, %v149_v21  ;;  %v173_v5 = vld [vmem:[%s6450_s0 + $0x4f8] sm:$0xff]  ;;  %v174_v7 = vld [vmem:[%s6450_s0 + $0x500] sm:$0xff]  ;;  %v47_v8 = vld [vmem:[%s6450_s0 + $0x108] sm:$0xff] }
  0x19   :  { %3965 = vmatprep.mubr.msk.f32.mxu0 %vm281_vm1, %v22_v22  ;;  %4157 = vmatprep.mubr.msk.f32.mxu1 %vm281_vm1, %v150_v23  ;;  %v175_v9 = vld [vmem:[%s6450_s0 + $0x508] sm:$0xff]  ;;  %v48_v10 = vld [vmem:[%s6450_s0 + $0x110] sm:$0xff]  ;;  %v49_v12 = vld [vmem:[%s6450_s0 + $0x118] sm:$0xff] }
  0x1a   :  { %v176_v11 = vld [vmem:[%s6450_s0 + $0x510] sm:$0xff]  ;;  %v177_v13 = vld [vmem:[%s6450_s0 + $0x518] sm:$0xff]  ;;  %v50_v14 = vld [vmem:[%s6450_s0 + $0x120] sm:$0xff] }
  0x1b   :  { %v178_v15 = vld [vmem:[%s6450_s0 + $0x520] sm:$0xff]  ;;  %v51_v16 = vld [vmem:[%s6450_s0 + $0x128] sm:$0xff]  ;;  %v52_v18 = vld [vmem:[%s6450_s0 + $0x130] sm:$0xff] }
  0x1c   :  { %3966 = vmatmul.mubr.msk.f32.gmra.mrb[8].mxu0 %vm281_vm1, %v23_v24  ;;  %4158 = vmatmul.mubr.msk.f32.gmra.mrb[8].mxu1 %vm281_vm1, %v151_v25  ;;  %v179_v17 = vld [vmem:[%s6450_s0 + $0x528] sm:$0xff]  ;;  %v180_v19 = vld [vmem:[%s6450_s0 + $0x530] sm:$0xff]  ;;  %v53_v20 = vld [vmem:[%s6450_s0 + $0x138] sm:$0xff] }
  0x1d   :  { %3968 = vmatprep.mubr.msk.f32.mxu0 %vm281_vm1, %v24_v26  ;;  %4160 = vmatprep.mubr.msk.f32.mxu1 %vm281_vm1, %v152_v27  ;;  %v181_v21 = vld [vmem:[%s6450_s0 + $0x538] sm:$0xff]  ;;  %v54_v22 = vld [vmem:[%s6450_s0 + $0x140] sm:$0xff]  ;;  %v55_v24 = vld [vmem:[%s6450_s0 + $0x148] sm:$0xff] }
  0x1e   :  { %v182_v23 = vld [vmem:[%s6450_s0 + $0x540] sm:$0xff]  ;;  %v183_v25 = vld [vmem:[%s6450_s0 + $0x548] sm:$0xff]  ;;  %v56_v26 = vld [vmem:[%s6450_s0 + $0x150] sm:$0xff] }
  0x1f   :  { %v184_v27 = vld [vmem:[%s6450_s0 + $0x550] sm:$0xff] }
  0x20   :  { %3969 = vmatmul.mubr.msk.f32.gmra.mrb[10].mxu0 %vm281_vm1, %v25_v28  ;;  %4161 = vmatmul.mubr.msk.f32.gmra.mrb[10].mxu1 %vm281_vm1, %v153_v29  ;;  %v57_v28 = vld [vmem:[%s6450_s0 + $0x158] sm:$0xff] }
  0x21   :  { %3971 = vmatprep.mubr.msk.f32.mxu0 %vm281_vm1, %v26_v30  ;;  %4163 = vmatprep.mubr.msk.f32.mxu1 %vm281_vm1, %v154_v31  ;;  %v185_v29 = vld [vmem:[%s6450_s0 + $0x558] sm:$0xff]  ;;  %v58_v30 = vld [vmem:[%s6450_s0 + $0x160] sm:$0xff] }
  0x22   :  { %v186_v31 = vld [vmem:[%s6450_s0 + $0x560] sm:$0xff] }
  0x24   :  { %3972 = vmatmul.mubr.msk.f32.gmra.mrb[12].mxu0 %vm281_vm1, %v27_v32  ;;  %4164 = vmatmul.mubr.msk.f32.gmra.mrb[12].mxu1 %vm281_vm1, %v155_v33  ;;  %v59_v32 = vld [vmem:[%s6450_s0 + $0x168] sm:$0xff] }
  0x25   :  { %3974 = vmatprep.mubr.msk.f32.mxu0 %vm281_vm1, %v28_v34  ;;  %4166 = vmatprep.mubr.msk.f32.mxu1 %vm281_vm1, %v156_v35  ;;  %v187_v33 = vld [vmem:[%s6450_s0 + $0x568] sm:$0xff]  ;;  %v60_v34 = vld [vmem:[%s6450_s0 + $0x170] sm:$0xff] }
  0x26   :  { %v188_v35 = vld [vmem:[%s6450_s0 + $0x570] sm:$0xff] }
  0x28   :  { %3975 = vmatmul.mubr.msk.f32.gmra.mrb[14].mxu0 %vm281_vm1, %v29_v36  ;;  %4167 = vmatmul.mubr.msk.f32.gmra.mrb[14].mxu1 %vm281_vm1, %v157_v37  ;;  %v61_v36 = vld [vmem:[%s6450_s0 + $0x178] sm:$0xff] }
  0x29   :  { %3977 = vmatprep.mubr.msk.f32.mxu0 %vm281_vm1, %v30_v38  ;;  %4169 = vmatprep.mubr.msk.f32.mxu1 %vm281_vm1, %v158_v39  ;;  %v189_v37 = vld [vmem:[%s6450_s0 + $0x578] sm:$0xff]  ;;  %v62_v38 = vld [vmem:[%s6450_s0 + $0x180] sm:$0xff] }
  0x2a   :  { %v190_v39 = vld [vmem:[%s6450_s0 + $0x580] sm:$0xff] }
  0x2c   :  { %3978 = vmatmul.mubr.msk.f32.gmra.mrb[16].mxu0 %vm281_vm1, %v31_v40  ;;  %4170 = vmatmul.mubr.msk.f32.gmra.mrb[16].mxu1 %vm281_vm1, %v159_v41  ;;  %v63_v40 = vld [vmem:[%s6450_s0 + $0x188] sm:$0xff] }
  0x2d   :  { %3980 = vmatprep.mubr.msk.f32.mxu0 %vm281_vm1, %v32_v42  ;;  %4172 = vmatprep.mubr.msk.f32.mxu1 %vm281_vm1, %v160_v43  ;;  %v191_v41 = vld [vmem:[%s6450_s0 + $0x588] sm:$0xff]  ;;  %v64_v42 = vld [vmem:[%s6450_s0 + $0x190] sm:$0xff] }
  0x2e   :  { %v192_v43 = vld [vmem:[%s6450_s0 + $0x590] sm:$0xff] }
  0x30   :  { %3981 = vmatmul.mubr.msk.f32.gmra.mrb[18].mxu0 %vm281_vm1, %v33_v44  ;;  %4173 = vmatmul.mubr.msk.f32.gmra.mrb[18].mxu1 %vm281_vm1, %v161_v45  ;;  %v65_v44 = vld [vmem:[%s6450_s0 + $0x198] sm:$0xff] }
  0x31   :  { %3983 = vmatprep.mubr.msk.f32.mxu0 %vm281_vm1, %v34_v46  ;;  %4175 = vmatprep.mubr.msk.f32.mxu1 %vm281_vm1, %v162_v47  ;;  %v193_v45 = vld [vmem:[%s6450_s0 + $0x598] sm:$0xff]  ;;  %v66_v46 = vld [vmem:[%s6450_s0 + $0x1a0] sm:$0xff] }
  0x32   :  { %v194_v47 = vld [vmem:[%s6450_s0 + $0x5a0] sm:$0xff] }
  0x34   :  { %3984 = vmatmul.mubr.msk.f32.gmra.mrb[20].mxu0 %vm281_vm1, %v35_v48  ;;  %4176 = vmatmul.mubr.msk.f32.gmra.mrb[20].mxu1 %vm281_vm1, %v163_v49  ;;  %v67_v48 = vld [vmem:[%s6450_s0 + $0x1a8] sm:$0xff] }
  0x35   :  { %3986 = vmatprep.mubr.msk.f32.mxu0 %vm281_vm1, %v36_v50  ;;  %4178 = vmatprep.mubr.msk.f32.mxu1 %vm281_vm1, %v164_v51  ;;  %v195_v49 = vld [vmem:[%s6450_s0 + $0x5a8] sm:$0xff]  ;;  %v68_v50 = vld [vmem:[%s6450_s0 + $0x1b0] sm:$0xff] }
  0x36   :  { %v196_v51 = vld [vmem:[%s6450_s0 + $0x5b0] sm:$0xff] }
  0x38   :  { %3987 = vmatmul.mubr.msk.f32.gmra.mrb[22].mxu0 %vm281_vm1, %v37_v52  ;;  %4179 = vmatmul.mubr.msk.f32.gmra.mrb[22].mxu1 %vm281_vm1, %v165_v53  ;;  %v69_v52 = vld [vmem:[%s6450_s0 + $0x1b8] sm:$0xff] }
  0x39   :  { %3989 = vmatprep.mubr.msk.f32.mxu0 %vm281_vm1, %v38_v54  ;;  %4181 = vmatprep.mubr.msk.f32.mxu1 %vm281_vm1, %v166_v55  ;;  %v197_v53 = vld [vmem:[%s6450_s0 + $0x5b8] sm:$0xff]  ;;  %v70_v54 = vld [vmem:[%s6450_s0 + $0x1c0] sm:$0xff] }
  0x3a   :  { %v198_v55 = vld [vmem:[%s6450_s0 + $0x5c0] sm:$0xff] }
  0x3c   :  { %3990 = vmatmul.mubr.msk.f32.gmra.mrb[24].mxu0 %vm281_vm1, %v39_v56  ;;  %4182 = vmatmul.mubr.msk.f32.gmra.mrb[24].mxu1 %vm281_vm1, %v167_v57  ;;  %v71_v56 = vld [vmem:[%s6450_s0 + $0x1c8] sm:$0xff] }
  0x3d   :  { %3992 = vmatprep.mubr.msk.f32.mxu0 %vm281_vm1, %v40_v58  ;;  %4184 = vmatprep.mubr.msk.f32.mxu1 %vm281_vm1, %v168_v59  ;;  %v199_v57 = vld [vmem:[%s6450_s0 + $0x5c8] sm:$0xff]  ;;  %v72_v58 = vld [vmem:[%s6450_s0 + $0x1d0] sm:$0xff] }
  0x3e   :  { %v200_v59 = vld [vmem:[%s6450_s0 + $0x5d0] sm:$0xff] }
  0x40   :  { %3993 = vmatmul.mubr.msk.f32.gmra.mrb[26].mxu0 %vm281_vm1, %v41_v60  ;;  %4185 = vmatmul.mubr.msk.f32.gmra.mrb[26].mxu1 %vm281_vm1, %v169_v61  ;;  %v73_v60 = vld [vmem:[%s6450_s0 + $0x1d8] sm:$0xff] }
  0x41   :  { %3995 = vmatprep.mubr.msk.f32.mxu0 %vm281_vm1, %v42_v62  ;;  %4187 = vmatprep.mubr.msk.f32.mxu1 %vm281_vm1, %v170_v63  ;;  %v201_v61 = vld [vmem:[%s6450_s0 + $0x5d8] sm:$0xff]  ;;  %v74_v62 = vld [vmem:[%s6450_s0 + $0x1e0] sm:$0xff] }
  0x42   :  { %v202_v63 = vld [vmem:[%s6450_s0 + $0x5e0] sm:$0xff] }
  0x44   :  { %3996 = vmatmul.mubr.msk.f32.gmra.mrb[28].mxu0 %vm281_vm1, %v43_v0  ;;  %4188 = vmatmul.mubr.msk.f32.gmra.mrb[28].mxu1 %vm281_vm1, %v171_v1  ;;  %v75_v0 = vld [vmem:[%s6450_s0 + $0x1e8] sm:$0xff] }
  0x45   :  { %3998 = vmatprep.mubr.msk.f32.mxu0 %vm281_vm1, %v44_v2  ;;  %4190 = vmatprep.mubr.msk.f32.mxu1 %vm281_vm1, %v172_v3  ;;  %v203_v1 = vld [vmem:[%s6450_s0 + $0x5e8] sm:$0xff]  ;;  %v76_v2 = vld [vmem:[%s6450_s0 + $0x1f0] sm:$0xff] }
  0x46   :  { %v204_v3 = vld [vmem:[%s6450_s0 + $0x5f0] sm:$0xff] }
  0x48   :  { %3999 = vmatmul.mubr.msk.f32.gmra.mrb[30].mxu0 %vm281_vm1, %v45_v4  ;;  %4191 = vmatmul.mubr.msk.f32.gmra.mrb[30].mxu1 %vm281_vm1, %v173_v5  ;;  %v77_v4 = vld [vmem:[%s6450_s0 + $0x1f8] sm:$0xff] }
  0x49   :  { %4001 = vmatprep.mubr.msk.f32.mxu0 %vm281_vm1, %v46_v6  ;;  %4193 = vmatprep.mubr.msk.f32.mxu1 %vm281_vm1, %v174_v7  ;;  %v205_v5 = vld [vmem:[%s6450_s0 + $0x5f8] sm:$0xff]  ;;  %v78_v6 = vld [vmem:[%s6450_s0 + $0x200] sm:$0xff] }
  0x4a   :  { %v206_v7 = vld [vmem:[%s6450_s0 + $0x600] sm:$0xff] }
  0x4c   :  { %4002 = vmatmul.mubr.msk.f32.gmra.mrb[32].mxu0 %vm281_vm1, %v47_v8  ;;  %4194 = vmatmul.mubr.msk.f32.gmra.mrb[32].mxu1 %vm281_vm1, %v175_v9  ;;  %v79_v8 = vld [vmem:[%s6450_s0 + $0x208] sm:$0xff] }
  0x4d   :  { %4004 = vmatprep.mubr.msk.f32.mxu0 %vm281_vm1, %v48_v10  ;;  %4196 = vmatprep.mubr.msk.f32.mxu1 %vm281_vm1, %v176_v11  ;;  %v207_v9 = vld [vmem:[%s6450_s0 + $0x608] sm:$0xff]  ;;  %v80_v10 = vld [vmem:[%s6450_s0 + $0x210] sm:$0xff] }
  0x4e   :  { %v208_v11 = vld [vmem:[%s6450_s0 + $0x610] sm:$0xff] }
  0x50   :  { %4005 = vmatmul.mubr.msk.f32.gmra.mrb[34].mxu0 %vm281_vm1, %v49_v12  ;;  %4197 = vmatmul.mubr.msk.f32.gmra.mrb[34].mxu1 %vm281_vm1, %v177_v13  ;;  %v81_v12 = vld [vmem:[%s6450_s0 + $0x218] sm:$0xff] }
  0x51   :  { %4007 = vmatprep.mubr.msk.f32.mxu0 %vm281_vm1, %v50_v14  ;;  %4199 = vmatprep.mubr.msk.f32.mxu1 %vm281_vm1, %v178_v15  ;;  %v209_v13 = vld [vmem:[%s6450_s0 + $0x618] sm:$0xff]  ;;  %v82_v14 = vld [vmem:[%s6450_s0 + $0x220] sm:$0xff] }
  0x52   :  { %v210_v15 = vld [vmem:[%s6450_s0 + $0x620] sm:$0xff] }
  0x54   :  { %4008 = vmatmul.mubr.msk.f32.gmra.mrb[36].mxu0 %vm281_vm1, %v51_v16  ;;  %4200 = vmatmul.mubr.msk.f32.gmra.mrb[36].mxu1 %vm281_vm1, %v179_v17  ;;  %v83_v16 = vld [vmem:[%s6450_s0 + $0x228] sm:$0xff] }
  0x55   :  { %4010 = vmatprep.mubr.msk.f32.mxu0 %vm281_vm1, %v52_v18  ;;  %4202 = vmatprep.mubr.msk.f32.mxu1 %vm281_vm1, %v180_v19  ;;  %v211_v17 = vld [vmem:[%s6450_s0 + $0x628] sm:$0xff]  ;;  %v84_v18 = vld [vmem:[%s6450_s0 + $0x230] sm:$0xff] }
  0x56   :  { %v212_v19 = vld [vmem:[%s6450_s0 + $0x630] sm:$0xff] }
  0x58   :  { %4011 = vmatmul.mubr.msk.f32.gmra.mrb[38].mxu0 %vm281_vm1, %v53_v20  ;;  %4203 = vmatmul.mubr.msk.f32.gmra.mrb[38].mxu1 %vm281_vm1, %v181_v21  ;;  %v85_v20 = vld [vmem:[%s6450_s0 + $0x238] sm:$0xff] }
  0x59   :  { %4013 = vmatprep.mubr.msk.f32.mxu0 %vm281_vm1, %v54_v22  ;;  %4205 = vmatprep.mubr.msk.f32.mxu1 %vm281_vm1, %v182_v23  ;;  %v213_v21 = vld [vmem:[%s6450_s0 + $0x638] sm:$0xff]  ;;  %v86_v22 = vld [vmem:[%s6450_s0 + $0x240] sm:$0xff] }
  0x5a   :  { %v214_v23 = vld [vmem:[%s6450_s0 + $0x640] sm:$0xff] }
  0x5c   :  { %4014 = vmatmul.mubr.msk.f32.gmra.mrb[40].mxu0 %vm281_vm1, %v55_v24  ;;  %4206 = vmatmul.mubr.msk.f32.gmra.mrb[40].mxu1 %vm281_vm1, %v183_v25  ;;  %v87_v24 = vld [vmem:[%s6450_s0 + $0x248] sm:$0xff] }
  0x5d   :  { %4016 = vmatprep.mubr.msk.f32.mxu0 %vm281_vm1, %v56_v26  ;;  %4208 = vmatprep.mubr.msk.f32.mxu1 %vm281_vm1, %v184_v27  ;;  %v215_v25 = vld [vmem:[%s6450_s0 + $0x648] sm:$0xff]  ;;  %v88_v26 = vld [vmem:[%s6450_s0 + $0x250] sm:$0xff] }
  0x5e   :  { %v216_v27 = vld [vmem:[%s6450_s0 + $0x650] sm:$0xff] }
  0x60   :  { %4017 = vmatmul.mubr.msk.f32.gmra.mrb[42].mxu0 %vm281_vm1, %v57_v28  ;;  %4209 = vmatmul.mubr.msk.f32.gmra.mrb[42].mxu1 %vm281_vm1, %v185_v29  ;;  %v89_v28 = vld [vmem:[%s6450_s0 + $0x258] sm:$0xff] }
  0x61   :  { %4019 = vmatprep.mubr.msk.f32.mxu0 %vm281_vm1, %v58_v30  ;;  %4211 = vmatprep.mubr.msk.f32.mxu1 %vm281_vm1, %v186_v31  ;;  %v217_v29 = vld [vmem:[%s6450_s0 + $0x658] sm:$0xff]  ;;  %v90_v30 = vld [vmem:[%s6450_s0 + $0x260] sm:$0xff] }
  0x62   :  { %v218_v31 = vld [vmem:[%s6450_s0 + $0x660] sm:$0xff] }
  0x64   :  { %4020 = vmatmul.mubr.msk.f32.gmra.mrb[44].mxu0 %vm281_vm1, %v59_v32  ;;  %4212 = vmatmul.mubr.msk.f32.gmra.mrb[44].mxu1 %vm281_vm1, %v187_v33  ;;  %v91_v32 = vld [vmem:[%s6450_s0 + $0x268] sm:$0xff] }
  0x65   :  { %4022 = vmatprep.mubr.msk.f32.mxu0 %vm281_vm1, %v60_v34  ;;  %4214 = vmatprep.mubr.msk.f32.mxu1 %vm281_vm1, %v188_v35  ;;  %v219_v33 = vld [vmem:[%s6450_s0 + $0x668] sm:$0xff]  ;;  %v92_v34 = vld [vmem:[%s6450_s0 + $0x270] sm:$0xff] }
  0x66   :  { %v220_v35 = vld [vmem:[%s6450_s0 + $0x670] sm:$0xff] }
  0x68   :  { %4023 = vmatmul.mubr.msk.f32.gmra.mrb[46].mxu0 %vm281_vm1, %v61_v36  ;;  %4215 = vmatmul.mubr.msk.f32.gmra.mrb[46].mxu1 %vm281_vm1, %v189_v37  ;;  %v93_v36 = vld [vmem:[%s6450_s0 + $0x278] sm:$0xff] }
  0x69   :  { %4025 = vmatprep.mubr.msk.f32.mxu0 %vm281_vm1, %v62_v38  ;;  %4217 = vmatprep.mubr.msk.f32.mxu1 %vm281_vm1, %v190_v39  ;;  %v221_v37 = vld [vmem:[%s6450_s0 + $0x678] sm:$0xff]  ;;  %v94_v38 = vld [vmem:[%s6450_s0 + $0x280] sm:$0xff] }
  0x6a   :  { %v222_v39 = vld [vmem:[%s6450_s0 + $0x680] sm:$0xff] }
  0x6c   :  { %4026 = vmatmul.mubr.msk.f32.gmra.mrb[48].mxu0 %vm281_vm1, %v63_v40  ;;  %4218 = vmatmul.mubr.msk.f32.gmra.mrb[48].mxu1 %vm281_vm1, %v191_v41  ;;  %v95_v40 = vld [vmem:[%s6450_s0 + $0x288] sm:$0xff] }
  0x6d   :  { %4028 = vmatprep.mubr.msk.f32.mxu0 %vm281_vm1, %v64_v42  ;;  %4220 = vmatprep.mubr.msk.f32.mxu1 %vm281_vm1, %v192_v43  ;;  %v223_v41 = vld [vmem:[%s6450_s0 + $0x688] sm:$0xff]  ;;  %v96_v42 = vld [vmem:[%s6450_s0 + $0x290] sm:$0xff] }
  0x6e   :  { %v224_v43 = vld [vmem:[%s6450_s0 + $0x690] sm:$0xff] }
  0x70   :  { %4029 = vmatmul.mubr.msk.f32.gmra.mrb[50].mxu0 %vm281_vm1, %v65_v44  ;;  %4221 = vmatmul.mubr.msk.f32.gmra.mrb[50].mxu1 %vm281_vm1, %v193_v45  ;;  %v97_v44 = vld [vmem:[%s6450_s0 + $0x298] sm:$0xff] }
  0x71   :  { %4031 = vmatprep.mubr.msk.f32.mxu0 %vm281_vm1, %v66_v46  ;;  %4223 = vmatprep.mubr.msk.f32.mxu1 %vm281_vm1, %v194_v47  ;;  %v225_v45 = vld [vmem:[%s6450_s0 + $0x698] sm:$0xff]  ;;  %v98_v46 = vld [vmem:[%s6450_s0 + $0x2a0] sm:$0xff] }
  0x72   :  { %v226_v47 = vld [vmem:[%s6450_s0 + $0x6a0] sm:$0xff] }
  0x74   :  { %4032 = vmatmul.mubr.msk.f32.gmra.mrb[52].mxu0 %vm281_vm1, %v67_v48  ;;  %4224 = vmatmul.mubr.msk.f32.gmra.mrb[52].mxu1 %vm281_vm1, %v195_v49  ;;  %v99_v48 = vld [vmem:[%s6450_s0 + $0x2a8] sm:$0xff] }
  0x75   :  { %4034 = vmatprep.mubr.msk.f32.mxu0 %vm281_vm1, %v68_v50  ;;  %4226 = vmatprep.mubr.msk.f32.mxu1 %vm281_vm1, %v196_v51  ;;  %v227_v49 = vld [vmem:[%s6450_s0 + $0x6a8] sm:$0xff]  ;;  %v100_v50 = vld [vmem:[%s6450_s0 + $0x2b0] sm:$0xff] }
  0x76   :  { %v228_v51 = vld [vmem:[%s6450_s0 + $0x6b0] sm:$0xff] }
  0x78   :  { %4035 = vmatmul.mubr.msk.f32.gmra.mrb[54].mxu0 %vm281_vm1, %v69_v52  ;;  %4227 = vmatmul.mubr.msk.f32.gmra.mrb[54].mxu1 %vm281_vm1, %v197_v53  ;;  %v101_v52 = vld [vmem:[%s6450_s0 + $0x2b8] sm:$0xff] }
  0x79   :  { %4037 = vmatprep.mubr.msk.f32.mxu0 %vm281_vm1, %v70_v54  ;;  %4229 = vmatprep.mubr.msk.f32.mxu1 %vm281_vm1, %v198_v55  ;;  %v229_v53 = vld [vmem:[%s6450_s0 + $0x6b8] sm:$0xff]  ;;  %v102_v54 = vld [vmem:[%s6450_s0 + $0x2c0] sm:$0xff] }
  0x7a   :  { %v230_v55 = vld [vmem:[%s6450_s0 + $0x6c0] sm:$0xff] }
  0x7c   :  { %4038 = vmatmul.mubr.msk.f32.gmra.mrb[56].mxu0 %vm281_vm1, %v71_v56  ;;  %4230 = vmatmul.mubr.msk.f32.gmra.mrb[56].mxu1 %vm281_vm1, %v199_v57  ;;  %v103_v56 = vld [vmem:[%s6450_s0 + $0x2c8] sm:$0xff] }
  0x7d   :  { %4040 = vmatprep.mubr.msk.f32.mxu0 %vm281_vm1, %v72_v58  ;;  %4232 = vmatprep.mubr.msk.f32.mxu1 %vm281_vm1, %v200_v59  ;;  %v231_v57 = vld [vmem:[%s6450_s0 + $0x6c8] sm:$0xff]  ;;  %v104_v58 = vld [vmem:[%s6450_s0 + $0x2d0] sm:$0xff] }
  0x7e   :  { %v232_v59 = vld [vmem:[%s6450_s0 + $0x6d0] sm:$0xff] }
  0x80   :  { %4041 = vmatmul.mubr.msk.f32.gmra.mrb[58].mxu0 %vm281_vm1, %v73_v60  ;;  %4233 = vmatmul.mubr.msk.f32.gmra.mrb[58].mxu1 %vm281_vm1, %v201_v61  ;;  %v105_v60 = vld [vmem:[%s6450_s0 + $0x2d8] sm:$0xff] }
  0x81   :  { %4043 = vmatprep.mubr.msk.f32.mxu0 %vm281_vm1, %v74_v62  ;;  %4235 = vmatprep.mubr.msk.f32.mxu1 %vm281_vm1, %v202_v63  ;;  %v233_v61 = vld [vmem:[%s6450_s0 + $0x6d8] sm:$0xff]  ;;  %v106_v62 = vld [vmem:[%s6450_s0 + $0x2e0] sm:$0xff] }
  0x82   :  { %v234_v63 = vld [vmem:[%s6450_s0 + $0x6e0] sm:$0xff] }
  0x84   :  { %4044 = vmatmul.mubr.msk.f32.gmra.mrb[60].mxu0 %vm281_vm1, %v75_v0  ;;  %4236 = vmatmul.mubr.msk.f32.gmra.mrb[60].mxu1 %vm281_vm1, %v203_v1  ;;  %v107_v0 = vld [vmem:[%s6450_s0 + $0x2e8] sm:$0xff] }
  0x85   :  { %4046 = vmatprep.mubr.msk.f32.mxu0 %vm281_vm1, %v76_v2  ;;  %4238 = vmatprep.mubr.msk.f32.mxu1 %vm281_vm1, %v204_v3  ;;  %v235_v1 = vld [vmem:[%s6450_s0 + $0x6e8] sm:$0xff]  ;;  %v108_v2 = vld [vmem:[%s6450_s0 + $0x2f0] sm:$0xff] }
  0x86   :  { %v236_v3 = vld [vmem:[%s6450_s0 + $0x6f0] sm:$0xff] }
  0x88   :  { %4047 = vmatmul.mubr.msk.f32.gmra.mrb[62].mxu0 %vm281_vm1, %v77_v4  ;;  %4239 = vmatmul.mubr.msk.f32.gmra.mrb[62].mxu1 %vm281_vm1, %v205_v5  ;;  %v109_v4 = vld [vmem:[%s6450_s0 + $0x2f8] sm:$0xff] }
  0x89   :  { %4049 = vmatprep.mubr.msk.f32.mxu0 %vm281_vm1, %v78_v6  ;;  %4241 = vmatprep.mubr.msk.f32.mxu1 %vm281_vm1, %v206_v7  ;;  %v237_v5 = vld [vmem:[%s6450_s0 + $0x6f8] sm:$0xff]  ;;  %v110_v6 = vld [vmem:[%s6450_s0 + $0x300] sm:$0xff] }
  0x8a   :  { %v238_v7 = vld [vmem:[%s6450_s0 + $0x700] sm:$0xff] }
  0x8c   :  { %4050 = vmatmul.mubr.msk.f32.gmra.mrb[64].mxu0 %vm281_vm1, %v79_v8  ;;  %4242 = vmatmul.mubr.msk.f32.gmra.mrb[64].mxu1 %vm281_vm1, %v207_v9  ;;  %v111_v8 = vld [vmem:[%s6450_s0 + $0x308] sm:$0xff] }
  0x8d   :  { %4052 = vmatprep.mubr.msk.f32.mxu0 %vm281_vm1, %v80_v10  ;;  %4244 = vmatprep.mubr.msk.f32.mxu1 %vm281_vm1, %v208_v11  ;;  %v239_v9 = vld [vmem:[%s6450_s0 + $0x708] sm:$0xff]  ;;  %v112_v10 = vld [vmem:[%s6450_s0 + $0x310] sm:$0xff] }
  0x8e   :  { %v240_v11 = vld [vmem:[%s6450_s0 + $0x710] sm:$0xff] }
  0x90   :  { %4053 = vmatmul.mubr.msk.f32.gmra.mrb[66].mxu0 %vm281_vm1, %v81_v12  ;;  %4245 = vmatmul.mubr.msk.f32.gmra.mrb[66].mxu1 %vm281_vm1, %v209_v13  ;;  %v113_v12 = vld [vmem:[%s6450_s0 + $0x318] sm:$0xff] }
  0x91   :  { %4055 = vmatprep.mubr.msk.f32.mxu0 %vm281_vm1, %v82_v14  ;;  %4247 = vmatprep.mubr.msk.f32.mxu1 %vm281_vm1, %v210_v15  ;;  %v241_v13 = vld [vmem:[%s6450_s0 + $0x718] sm:$0xff]  ;;  %v114_v14 = vld [vmem:[%s6450_s0 + $0x320] sm:$0xff] }
  0x92   :  { %v242_v15 = vld [vmem:[%s6450_s0 + $0x720] sm:$0xff] }
  0x94   :  { %4056 = vmatmul.mubr.msk.f32.gmra.mrb[68].mxu0 %vm281_vm1, %v83_v16  ;;  %4248 = vmatmul.mubr.msk.f32.gmra.mrb[68].mxu1 %vm281_vm1, %v211_v17  ;;  %v115_v16 = vld [vmem:[%s6450_s0 + $0x328] sm:$0xff] }
  0x95   :  { %4058 = vmatprep.mubr.msk.f32.mxu0 %vm281_vm1, %v84_v18  ;;  %4250 = vmatprep.mubr.msk.f32.mxu1 %vm281_vm1, %v212_v19  ;;  %v243_v17 = vld [vmem:[%s6450_s0 + $0x728] sm:$0xff]  ;;  %v116_v18 = vld [vmem:[%s6450_s0 + $0x330] sm:$0xff] }
  0x96   :  { %v244_v19 = vld [vmem:[%s6450_s0 + $0x730] sm:$0xff] }
  0x98   :  { %4059 = vmatmul.mubr.msk.f32.gmra.mrb[70].mxu0 %vm281_vm1, %v85_v20  ;;  %4251 = vmatmul.mubr.msk.f32.gmra.mrb[70].mxu1 %vm281_vm1, %v213_v21  ;;  %v117_v20 = vld [vmem:[%s6450_s0 + $0x338] sm:$0xff] }
  0x99   :  { %4061 = vmatprep.mubr.msk.f32.mxu0 %vm281_vm1, %v86_v22  ;;  %4253 = vmatprep.mubr.msk.f32.mxu1 %vm281_vm1, %v214_v23  ;;  %v245_v21 = vld [vmem:[%s6450_s0 + $0x738] sm:$0xff]  ;;  %v118_v22 = vld [vmem:[%s6450_s0 + $0x340] sm:$0xff] }
  0x9a   :  { %v246_v23 = vld [vmem:[%s6450_s0 + $0x740] sm:$0xff] }
  0x9c   :  { %4062 = vmatmul.mubr.msk.f32.gmra.mrb[72].mxu0 %vm281_vm1, %v87_v24  ;;  %4254 = vmatmul.mubr.msk.f32.gmra.mrb[72].mxu1 %vm281_vm1, %v215_v25  ;;  %v119_v24 = vld [vmem:[%s6450_s0 + $0x348] sm:$0xff] }
  0x9d   :  { %4064 = vmatprep.mubr.msk.f32.mxu0 %vm281_vm1, %v88_v26  ;;  %4256 = vmatprep.mubr.msk.f32.mxu1 %vm281_vm1, %v216_v27  ;;  %v247_v25 = vld [vmem:[%s6450_s0 + $0x748] sm:$0xff]  ;;  %v120_v26 = vld [vmem:[%s6450_s0 + $0x350] sm:$0xff] }
  0x9e   :  { %v248_v27 = vld [vmem:[%s6450_s0 + $0x750] sm:$0xff] }
  0xa0   :  { %4065 = vmatmul.mubr.msk.f32.gmra.mrb[74].mxu0 %vm281_vm1, %v89_v28  ;;  %4257 = vmatmul.mubr.msk.f32.gmra.mrb[74].mxu1 %vm281_vm1, %v217_v29  ;;  %v5245_v28 = vld [vmem:[%s6451_s2] ss:$0 sm:$0xff]  ;;  %v121_v29 = vld [vmem:[%s6450_s0 + $0x358] sm:$0xff] }
  0xa1   :  { %4067 = vmatprep.mubr.msk.f32.mxu0 %vm281_vm1, %v90_v30  ;;  %4259 = vmatprep.mubr.msk.f32.mxu1 %vm281_vm1, %v218_v31  ;;  %v249_v30 = vld [vmem:[%s6450_s0 + $0x758] sm:$0xff]  ;;  %v122_v31 = vld [vmem:[%s6450_s0 + $0x360] sm:$0xff] }
  0xa4   :  { %4068 = vmatmul.mubr.msk.f32.gmra.mrb[76].mxu0 %vm281_vm1, %v91_v32  ;;  %4260 = vmatmul.mubr.msk.f32.gmra.mrb[76].mxu1 %vm281_vm1, %v219_v33  ;;  %v250_v32 = vld [vmem:[%s6450_s0 + $0x760] sm:$0xff] }
  0xa5   :  { %4070 = vmatprep.mubr.msk.f32.mxu0 %vm281_vm1, %v92_v34  ;;  %4262 = vmatprep.mubr.msk.f32.mxu1 %vm281_vm1, %v220_v35 }
  0xa8   :  { %4071 = vmatmul.mubr.msk.f32.gmra.mrb[78].mxu0 %vm281_vm1, %v93_v36  ;;  %4263 = vmatmul.mubr.msk.f32.gmra.mrb[78].mxu1 %vm281_vm1, %v221_v37 }
  0xa9   :  { %4073 = vmatprep.mubr.msk.f32.mxu0 %vm281_vm1, %v94_v38  ;;  %4265 = vmatprep.mubr.msk.f32.mxu1 %vm281_vm1, %v222_v39  ;;  %v123_v39 = vld [vmem:[%s6450_s0 + $0x368] sm:$0xff] }
  0xac   :  { %4074 = vmatmul.mubr.msk.f32.gmra.mrb[80].mxu0 %vm281_vm1, %v95_v40  ;;  %4266 = vmatmul.mubr.msk.f32.gmra.mrb[80].mxu1 %vm281_vm1, %v223_v41 }
  0xad   :  { %4076 = vmatprep.mubr.msk.f32.mxu0 %vm281_vm1, %v96_v42  ;;  %4268 = vmatprep.mubr.msk.f32.mxu1 %vm281_vm1, %v224_v43  ;;  %v251_v42 = vld [vmem:[%s6450_s0 + $0x768] sm:$0xff]  ;;  %v124_v43 = vld [vmem:[%s6450_s0 + $0x370] sm:$0xff] }
  0xb0   :  { %4077 = vmatmul.mubr.msk.f32.gmra.mrb[82].mxu0 %vm281_vm1, %v97_v44  ;;  %4269 = vmatmul.mubr.msk.f32.gmra.mrb[82].mxu1 %vm281_vm1, %v225_v45  ;;  %v252_v44 = vld [vmem:[%s6450_s0 + $0x770] sm:$0xff] }
  0xb1   :  { %4079 = vmatprep.mubr.msk.f32.mxu0 %vm281_vm1, %v98_v46  ;;  %4271 = vmatprep.mubr.msk.f32.mxu1 %vm281_vm1, %v226_v47 }
  0xb4   :  { %4080 = vmatmul.mubr.msk.f32.gmra.mrb[84].mxu0 %vm281_vm1, %v99_v48  ;;  %4272 = vmatmul.mubr.msk.f32.gmra.mrb[84].mxu1 %vm281_vm1, %v227_v49 }
  0xb5   :  { %4082 = vmatprep.mubr.msk.f32.mxu0 %vm281_vm1, %v100_v50  ;;  %4274 = vmatprep.mubr.msk.f32.mxu1 %vm281_vm1, %v228_v51 }
  0xb8   :  { %4083 = vmatmul.mubr.msk.f32.gmra.mrb[86].mxu0 %vm281_vm1, %v101_v52  ;;  %4275 = vmatmul.mubr.msk.f32.gmra.mrb[86].mxu1 %vm281_vm1, %v229_v53 }
  0xb9   :  { %4085 = vmatprep.mubr.msk.f32.mxu0 %vm281_vm1, %v102_v54  ;;  %4277 = vmatprep.mubr.msk.f32.mxu1 %vm281_vm1, %v230_v55 }
  0xbc   :  { %4086 = vmatmul.mubr.msk.f32.gmra.mrb[88].mxu0 %vm281_vm1, %v103_v56  ;;  %4278 = vmatmul.mubr.msk.f32.gmra.mrb[88].mxu1 %vm281_vm1, %v231_v57 }
  0xbd   :  { %4088 = vmatprep.mubr.msk.f32.mxu0 %vm281_vm1, %v104_v58  ;;  %4280 = vmatprep.mubr.msk.f32.mxu1 %vm281_vm1, %v232_v59  ;;  %v125_v59 = vld [vmem:[%s6450_s0 + $0x378] sm:$0xff] }
  0xc0   :  { %4089 = vmatmul.mubr.msk.f32.gmra.mrb[90].mxu0 %vm281_vm1, %v105_v60  ;;  %4281 = vmatmul.mubr.msk.f32.gmra.mrb[90].mxu1 %vm281_vm1, %v233_v61  ;;  %v253_v60 = vld [vmem:[%s6450_s0 + $0x778] sm:$0xff] }
  0xc1   :  { %4091 = vmatprep.mubr.msk.f32.mxu0 %vm281_vm1, %v106_v62  ;;  %4283 = vmatprep.mubr.msk.f32.mxu1 %vm281_vm1, %v234_v63  ;;  %v126_v63 = vld [vmem:[%s6450_s0 + $0x380] sm:$0xff] }
  0xc4   :  { %4092 = vmatmul.mubr.msk.f32.gmra.mrb[92].mxu0 %vm281_vm1, %v107_v0  ;;  %4284 = vmatmul.mubr.msk.f32.gmra.mrb[92].mxu1 %vm281_vm1, %v235_v1  ;;  %v254_v0 = vld [vmem:[%s6450_s0 + $0x780] sm:$0xff] }
  0xc5   :  { %4094 = vmatprep.mubr.msk.f32.mxu0 %vm281_vm1, %v108_v2  ;;  %4286 = vmatprep.mubr.msk.f32.mxu1 %vm281_vm1, %v236_v3 }
  0xc8   :  { %4095 = vmatmul.mubr.msk.f32.gmra.mrb[94].mxu0 %vm281_vm1, %v109_v4  ;;  %4287 = vmatmul.mubr.msk.f32.gmra.mrb[94].mxu1 %vm281_vm1, %v237_v5 }
  0xc9   :  { %4097 = vmatprep.mubr.msk.f32.mxu0 %vm281_vm1, %v110_v6  ;;  %4289 = vmatprep.mubr.msk.f32.mxu1 %vm281_vm1, %v238_v7 }
  0xcc   :  { %4098 = vmatmul.mubr.msk.f32.gmra.mrb[96].mxu0 %vm281_vm1, %v111_v8  ;;  %4290 = vmatmul.mubr.msk.f32.gmra.mrb[96].mxu1 %vm281_vm1, %v239_v9  ;;  %v127_v9 = vld [vmem:[%s6450_s0 + $0x388] sm:$0xff] }
  0xcd   :  { %4100 = vmatprep.mubr.msk.f32.mxu0 %vm281_vm1, %v112_v10  ;;  %4292 = vmatprep.mubr.msk.f32.mxu1 %vm281_vm1, %v240_v11  ;;  %v255_v10 = vld [vmem:[%s6450_s0 + $0x788] sm:$0xff] }
  0xd0   :  { %4101 = vmatmul.mubr.msk.f32.gmra.mrb[98].mxu0 %vm281_vm1, %v113_v12  ;;  %4293 = vmatmul.mubr.msk.f32.gmra.mrb[98].mxu1 %vm281_vm1, %v241_v13 }
  0xd1   :  { %4103 = vmatprep.mubr.msk.f32.mxu0 %vm281_vm1, %v114_v14  ;;  %4295 = vmatprep.mubr.msk.f32.mxu1 %vm281_vm1, %v242_v15 }
  0xd4   :  { %4104 = vmatmul.mubr.msk.f32.gmra.mrb[100].mxu0 %vm281_vm1, %v115_v16  ;;  %4296 = vmatmul.mubr.msk.f32.gmra.mrb[100].mxu1 %vm281_vm1, %v243_v17  ;;  %v128_v17 = vld [vmem:[%s6450_s0 + $0x390] sm:$0xff] }
  0xd5   :  { %4106 = vmatprep.mubr.msk.f32.mxu0 %vm281_vm1, %v116_v18  ;;  %4298 = vmatprep.mubr.msk.f32.mxu1 %vm281_vm1, %v244_v19  ;;  %v256_v18 = vld [vmem:[%s6450_s0 + $0x790] sm:$0xff] }
  0xd8   :  { %4107 = vmatmul.mubr.msk.f32.gmra.mrb[102].mxu0 %vm281_vm1, %v117_v20  ;;  %4299 = vmatmul.mubr.msk.f32.gmra.mrb[102].mxu1 %vm281_vm1, %v245_v21 }
  0xd9   :  { %4109 = vmatprep.mubr.msk.f32.mxu0 %vm281_vm1, %v118_v22  ;;  %4301 = vmatprep.mubr.msk.f32.mxu1 %vm281_vm1, %v246_v23  ;;  %v129_v23 = vld [vmem:[%s6450_s0 + $0x398] sm:$0xff] }
  0xdc   :  { %4110 = vmatmul.mubr.msk.f32.gmra.mrb[104].mxu0 %vm281_vm1, %v119_v24  ;;  %4302 = vmatmul.mubr.msk.f32.gmra.mrb[104].mxu1 %vm281_vm1, %v247_v25  ;;  %v257_v24 = vld [vmem:[%s6450_s0 + $0x798] sm:$0xff] }
  0xdd   :  { %4112 = vmatprep.mubr.msk.f32.mxu0 %vm281_vm1, %v120_v26  ;;  %4304 = vmatprep.mubr.msk.f32.mxu1 %vm281_vm1, %v248_v27 }
  0xdf   :  { %v3955_v33 = vpop.f32.mrb[0].mxu0  ;;  %v4147_v34 = vpop.f32.mrb[0].mxu1 }
  0xe0   :  { %v1126_v35 = vadd.f32 %v3955_v33, %v5245_v28  ;;  %v1766_v36 = vadd.f32 %v4147_v34, %v5245_v28  ;;  %v1120_v37 = vpop.f32.mrb[1].mxu0  ;;  %4113 = vmatmul.mubr.msk.f32.gmra.mrb[106].mxu0 %vm281_vm1, %v121_v29  ;;  %v1760_v38 = vpop.f32.mrb[1].mxu1  ;;  %4305 = vmatmul.mubr.msk.f32.gmra.mrb[106].mxu1 %vm281_vm1, %v249_v30 }
  0xe1   :  { %v1121_v40 = vadd.f32 %v5245_v28, %v1120_v37  ;;  %v1761_v41 = vadd.f32 %v5245_v28, %v1760_v38  ;;  %4115 = vmatprep.mubr.msk.f32.mxu0 %vm281_vm1, %v122_v31  ;;  %4307 = vmatprep.mubr.msk.f32.mxu1 %vm281_vm1, %v250_v32  ;;  %v258_v37 = vld [vmem:[%s6450_s0 + $0x7a0] sm:$0xff] }
  0xe2   :  { %vm2400_vm4 = vcmp.gt.f32.partialorder %v1126_v35, 0.0  ;;  %v2656_v45 = vmul.f32 0.2, %v1126_v35  ;;  %vm2528_vm5 = vcmp.gt.f32.partialorder %v1766_v36, 0.0  ;;  %v2784_v46 = vmul.f32 0.2, %v1766_v36 }
  0xe3   :  { %vm2399_vm6 = vcmp.gt.f32.partialorder %v1121_v40, 0.0  ;;  %v2655_v47 = vmul.f32 0.2, %v1121_v40  ;;  %vm2527_vm7 = vcmp.gt.f32.partialorder %v1761_v41, 0.0  ;;  %v2783_v48 = vmul.f32 0.2, %v1761_v41 }
  0xe4   :  { %v2912_v49 = vsel %vm2400_vm4, %v1126_v35, %v2656_v45  ;;  %v3040_v50 = vsel %vm2528_vm5, %v1766_v36, %v2784_v46  ;;  %v3958_v51 = vpop.f32.mrb[2].mxu0  ;;  %v4150_v52 = vpop.f32.mrb[2].mxu1  ;;  %4116 = vmatmul.mubr.msk.f32.gmra.mrb[108].mxu0 %vm281_vm1, %v123_v39  ;;  %4308 = vmatmul.mubr.msk.f32.gmra.mrb[108].mxu1 %vm281_vm1, %v251_v42  ;;  %v130_v36 = vld [vmem:[%s6450_s0 + $0x3a0] sm:$0xff]  ;;  %v259_v45 = vld [vmem:[%s6450_s0 + $0x7a8] sm:$0xff] }
  0xe5   :  { %3168 = vst [vmem:[%s6452_s3 + $0x8] sm:$0xff] %v2912_v49  ;;  %3296 = vst [vmem:[%s6452_s3 + $0x408] sm:$0xff] %v3040_v50  ;;  %v2911_v53 = vsel %vm2399_vm6, %v1121_v40, %v2655_v47  ;;  %v3039_v54 = vsel %vm2527_vm7, %v1761_v41, %v2783_v48  ;;  %v1136_v55 = vadd.f32 %v3958_v51, %v5245_v28  ;;  %v1130_v57 = vpop.f32.mrb[3].mxu0  ;;  %v1770_v58 = vpop.f32.mrb[3].mxu1  ;;  %4118 = vmatprep.mubr.msk.f32.mxu0 %vm281_vm1, %v124_v43 }
  0xe6   :  { %v1776_v56 = vadd.f32 %v4150_v52, %v5245_v28  ;;  %3167 = vst [vmem:[%s6452_s3] sm:$0xff] %v2911_v53  ;;  %3295 = vst [vmem:[%s6452_s3 + $0x400] sm:$0xff] %v3039_v54  ;;  %v1131_v61 = vadd.f32 %v5245_v28, %v1130_v57  ;;  %v1771_v62 = vadd.f32 %v5245_v28, %v1770_v58  ;;  %4310 = vmatprep.mubr.msk.f32.mxu1 %vm281_vm1, %v252_v44  ;;  %v131_v44 = vld [vmem:[%s6450_s0 + $0x3a8] sm:$0xff]  ;;  %v260_v57 = vld [vmem:[%s6450_s0 + $0x7b0] sm:$0xff] }
  0xe7   :  { %vm2402_vm8 = vcmp.gt.f32.partialorder %v1136_v55, 0.0  ;;  %v2658_v1 = vmul.f32 0.2, %v1136_v55  ;;  %v3961_v7 = vpop.f32.mrb[4].mxu0  ;;  %v4153_v8 = vpop.f32.mrb[4].mxu1 }
  0xe8   :  { %vm2530_vm9 = vcmp.gt.f32.partialorder %v1776_v56, 0.0  ;;  %v2786_v2 = vmul.f32 0.2, %v1776_v56  ;;  %vm2401_vm10 = vcmp.gt.f32.partialorder %v1131_v61, 0.0  ;;  %v2657_v3 = vmul.f32 0.2, %v1131_v61  ;;  %4119 = vmatmul.mubr.msk.f32.gmra.mrb[110].mxu0 %vm281_vm1, %v125_v59  ;;  %4311 = vmatmul.mubr.msk.f32.gmra.mrb[110].mxu1 %vm281_vm1, %v253_v60 }
  0xe9   :  { %vm2529_vm11 = vcmp.gt.f32.partialorder %v1771_v62, 0.0  ;;  %v2785_v4 = vmul.f32 0.2, %v1771_v62  ;;  %v2914_v5 = vsel %vm2402_vm8, %v1136_v55, %v2658_v1  ;;  %4121 = vmatprep.mubr.msk.f32.mxu0 %vm281_vm1, %v126_v63  ;;  %4313 = vmatprep.mubr.msk.f32.mxu1 %vm281_vm1, %v254_v0  ;;  %v1146_v13 = vadd.f32 %v3961_v7, %v5245_v28  ;;  %v1140_v15 = vpop.f32.mrb[5].mxu0  ;;  %v1780_v16 = vpop.f32.mrb[5].mxu1  ;;  %v133_v0 = vld [vmem:[%s6450_s0 + $0x3b8] sm:$0xff] }
  0xea   :  { %v3042_v6 = vsel %vm2530_vm9, %v1776_v56, %v2786_v2  ;;  %3170 = vst [vmem:[%s6452_s3 + $0x18] sm:$0xff] %v2914_v5  ;;  %v2913_v11 = vsel %vm2401_vm10, %v1131_v61, %v2657_v3  ;;  %v1786_v14 = vadd.f32 %v4153_v8, %v5245_v28  ;;  %v1141_v19 = vadd.f32 %v5245_v28, %v1140_v15  ;;  %v132_v56 = vld [vmem:[%s6450_s0 + $0x3b0] sm:$0xff]  ;;  %v261_v1 = vld [vmem:[%s6450_s0 + $0x7b8] sm:$0xff] }
  0xeb   :  { %3298 = vst [vmem:[%s6452_s3 + $0x418] sm:$0xff] %v3042_v6  ;;  %v3041_v12 = vsel %vm2529_vm11, %v1771_v62, %v2785_v4  ;;  %3169 = vst [vmem:[%s6452_s3 + $0x10] sm:$0xff] %v2913_v11  ;;  %v1781_v20 = vadd.f32 %v5245_v28, %v1780_v16  ;;  %v3964_v21 = vpop.f32.mrb[6].mxu0  ;;  %v4156_v22 = vpop.f32.mrb[6].mxu1  ;;  %vm2404_vm12 = vcmp.gt.f32.partialorder %v1146_v13, 0.0 }
  0xec   :  { %3297 = vst [vmem:[%s6452_s3 + $0x410] sm:$0xff] %v3041_v12  ;;  %v2660_v25 = vmul.f32 0.2, %v1146_v13  ;;  %vm2532_vm13 = vcmp.gt.f32.partialorder %v1786_v14, 0.0  ;;  %v2788_v26 = vmul.f32 0.2, %v1786_v14  ;;  %4122 = vmatmul.mubr.msk.f32.gmra.mrb[112].mxu0 %vm281_vm1, %v127_v9  ;;  %4314 = vmatmul.mubr.msk.f32.gmra.mrb[112].mxu1 %vm281_vm1, %v255_v10  ;;  %v1156_v32 = vadd.f32 %v3964_v21, %v5245_v28 }
  0xed   :  { %vm2403_vm14 = vcmp.gt.f32.partialorder %v1141_v19, 0.0  ;;  %v2659_v27 = vmul.f32 0.2, %v1141_v19  ;;  %vm2531_vm15 = vcmp.gt.f32.partialorder %v1781_v20, 0.0  ;;  %v2787_v29 = vmul.f32 0.2, %v1781_v20  ;;  %4124 = vmatprep.mubr.msk.f32.mxu0 %vm281_vm1, %v128_v17  ;;  %4316 = vmatprep.mubr.msk.f32.mxu1 %vm281_vm1, %v256_v18 }
  0xee   :  { %v2916_v30 = vsel %vm2404_vm12, %v1146_v13, %v2660_v25  ;;  %v3044_v31 = vsel %vm2532_vm13, %v1786_v14, %v2788_v26  ;;  %v1796_v33 = vadd.f32 %v4156_v22, %v5245_v28  ;;  %v1150_v34 = vpop.f32.mrb[7].mxu0  ;;  %v1790_v35 = vpop.f32.mrb[7].mxu1  ;;  %vm2406_vm0 = vcmp.gt.f32.partialorder %v1156_v32, 0.0  ;;  %v134_v12 = vld [vmem:[%s6450_s0 + $0x3c0] sm:$0xff]  ;;  %v263_v21 = vld [vmem:[%s6450_s0 + $0x7c8] sm:$0xff] }
  0xef   :  { %3172 = vst [vmem:[%s6452_s3 + $0x28] sm:$0xff] %v2916_v30  ;;  %3300 = vst [vmem:[%s6452_s3 + $0x428] sm:$0xff] %v3044_v31  ;;  %v2915_v38 = vsel %vm2403_vm14, %v1141_v19, %v2659_v27  ;;  %v3043_v39 = vsel %vm2531_vm15, %v1781_v20, %v2787_v29  ;;  %v1151_v40 = vadd.f32 %v5245_v28, %v1150_v34  ;;  %v3967_v42 = vpop.f32.mrb[8].mxu0  ;;  %v4159_v43 = vpop.f32.mrb[8].mxu1  ;;  %v2662_v46 = vmul.f32 0.2, %v1156_v32 }
  0xf0   :  { %v1791_v41 = vadd.f32 %v5245_v28, %v1790_v35  ;;  %3171 = vst [vmem:[%s6452_s3 + $0x20] sm:$0xff] %v2915_v38  ;;  %3299 = vst [vmem:[%s6452_s3 + $0x420] sm:$0xff] %v3043_v39  ;;  %vm2534_vm2 = vcmp.gt.f32.partialorder %v1796_v33, 0.0  ;;  %v2790_v47 = vmul.f32 0.2, %v1796_v33  ;;  %4125 = vmatmul.mubr.msk.f32.gmra.mrb[114].mxu0 %vm281_vm1, %v129_v23  ;;  %4317 = vmatmul.mubr.msk.f32.gmra.mrb[114].mxu1 %vm281_vm1, %v257_v24  ;;  %v1160_v54 = vpop.f32.mrb[9].mxu0 }
  0xf1   :  { %vm2405_vm3 = vcmp.gt.f32.partialorder %v1151_v40, 0.0  ;;  %v2661_v48 = vmul.f32 0.2, %v1151_v40  ;;  %4127 = vmatprep.mubr.msk.f32.mxu0 %vm281_vm1, %v130_v36  ;;  %4319 = vmatprep.mubr.msk.f32.mxu1 %vm281_vm1, %v258_v37  ;;  %v2918_v50 = vsel %vm2406_vm0, %v1156_v32, %v2662_v46  ;;  %v1166_v52 = vadd.f32 %v3967_v42, %v5245_v28  ;;  %v1800_v55 = vpop.f32.mrb[9].mxu1  ;;  %v262_v13 = vld [vmem:[%s6450_s0 + $0x7c0] sm:$0xff]  ;;  %v135_v20 = vld [vmem:[%s6450_s0 + $0x3c8] sm:$0xff] }
  0xf2   :  { %vm2533_vm4 = vcmp.gt.f32.partialorder %v1791_v41, 0.0  ;;  %v2789_v49 = vmul.f32 0.2, %v1791_v41  ;;  %v3046_v51 = vsel %vm2534_vm2, %v1796_v33, %v2790_v47  ;;  %v1806_v53 = vadd.f32 %v4159_v43, %v5245_v28  ;;  %3174 = vst [vmem:[%s6452_s3 + $0x38] sm:$0xff] %v2918_v50  ;;  %v136_v33 = vld [vmem:[%s6450_s0 + $0x3d0] sm:$0xff]  ;;  %v265_v42 = vld [vmem:[%s6450_s0 + $0x7d8] sm:$0xff] }
  0xf3   :  { %3302 = vst [vmem:[%s6452_s3 + $0x438] sm:$0xff] %v3046_v51  ;;  %v2917_v58 = vsel %vm2405_vm3, %v1151_v40, %v2661_v48  ;;  %v1161_v60 = vadd.f32 %v5245_v28, %v1160_v54  ;;  %v1801_v61 = vadd.f32 %v5245_v28, %v1800_v55  ;;  %v3970_v62 = vpop.f32.mrb[10].mxu0  ;;  %v4162_v63 = vpop.f32.mrb[10].mxu1  ;;  %vm2408_vm5 = vcmp.gt.f32.partialorder %v1166_v52, 0.0  ;;  %v264_v34 = vld [vmem:[%s6450_s0 + $0x7d0] sm:$0xff]  ;;  %v266_v54 = vld [vmem:[%s6450_s0 + $0x7e0] sm:$0xff] }
  0xf4   :  { %v3045_v59 = vsel %vm2533_vm4, %v1791_v41, %v2789_v49  ;;  %3173 = vst [vmem:[%s6452_s3 + $0x30] sm:$0xff] %v2917_v58  ;;  %v2664_v2 = vmul.f32 0.2, %v1166_v52  ;;  %vm2536_vm6 = vcmp.gt.f32.partialorder %v1806_v53, 0.0  ;;  %v2792_v3 = vmul.f32 0.2, %v1806_v53  ;;  %4128 = vmatmul.mubr.msk.f32.gmra.mrb[116].mxu0 %vm281_vm1, %v131_v44  ;;  %4320 = vmatmul.mubr.msk.f32.gmra.mrb[116].mxu1 %vm281_vm1, %v259_v45 }
  0xf5   :  { %3301 = vst [vmem:[%s6452_s3 + $0x430] sm:$0xff] %v3045_v59  ;;  %vm2407_vm7 = vcmp.gt.f32.partialorder %v1161_v60, 0.0  ;;  %v2663_v4 = vmul.f32 0.2, %v1161_v60  ;;  %vm2535_vm8 = vcmp.gt.f32.partialorder %v1801_v61, 0.0  ;;  %4130 = vmatprep.mubr.msk.f32.mxu0 %vm281_vm1, %v132_v56  ;;  %4322 = vmatprep.mubr.msk.f32.mxu1 %vm281_vm1, %v260_v57  ;;  %v1176_v8 = vadd.f32 %v3970_v62, %v5245_v28  ;;  %v1170_v10 = vpop.f32.mrb[11].mxu0 }
  0xf6   :  { %v2791_v5 = vmul.f32 0.2, %v1801_v61  ;;  %v2920_v6 = vsel %vm2408_vm5, %v1166_v52, %v2664_v2  ;;  %v3048_v7 = vsel %vm2536_vm6, %v1806_v53, %v2792_v3  ;;  %v1816_v9 = vadd.f32 %v4162_v63, %v5245_v28  ;;  %v1810_v11 = vpop.f32.mrb[11].mxu1  ;;  %v137_v41 = vld [vmem:[%s6450_s0 + $0x3d8] sm:$0xff]  ;;  %v138_v53 = vld [vmem:[%s6450_s0 + $0x3e0] sm:$0xff]  ;;  %v267_v62 = vld [vmem:[%s6450_s0 + $0x7e8] sm:$0xff] }
  0xf7   :  { %3176 = vst [vmem:[%s6452_s3 + $0x48] sm:$0xff] %v2920_v6  ;;  %3304 = vst [vmem:[%s6452_s3 + $0x448] sm:$0xff] %v3048_v7  ;;  %v2919_v14 = vsel %vm2407_vm7, %v1161_v60, %v2663_v4  ;;  %v1171_v16 = vadd.f32 %v5245_v28, %v1170_v10  ;;  %v1811_v17 = vadd.f32 %v5245_v28, %v1810_v11  ;;  %v3973_v18 = vpop.f32.mrb[12].mxu0  ;;  %v4165_v19 = vpop.f32.mrb[12].mxu1  ;;  %vm2410_vm9 = vcmp.gt.f32.partialorder %v1176_v8, 0.0  ;;  %v268_v10 = vld [vmem:[%s6450_s0 + $0x7f0] sm:$0xff] }
  0xf8   :  { %v3047_v15 = vsel %vm2535_vm8, %v1801_v61, %v2791_v5  ;;  %3175 = vst [vmem:[%s6452_s3 + $0x40] sm:$0xff] %v2919_v14  ;;  %v2666_v22 = vmul.f32 0.2, %v1176_v8  ;;  %vm2538_vm10 = vcmp.gt.f32.partialorder %v1816_v9, 0.0  ;;  %v2794_v23 = vmul.f32 0.2, %v1816_v9  ;;  %4131 = vmatmul.mubr.msk.f32.gmra.mrb[118].mxu0 %vm281_vm1, %v133_v0  ;;  %4323 = vmatmul.mubr.msk.f32.gmra.mrb[118].mxu1 %vm281_vm1, %v261_v1 }
  0xf9   :  { %3303 = vst [vmem:[%s6452_s3 + $0x440] sm:$0xff] %v3047_v15  ;;  %vm2409_vm11 = vcmp.gt.f32.partialorder %v1171_v16, 0.0  ;;  %v2665_v24 = vmul.f32 0.2, %v1171_v16  ;;  %vm2537_vm12 = vcmp.gt.f32.partialorder %v1811_v17, 0.0  ;;  %4133 = vmatprep.mubr.msk.f32.mxu0 %vm281_vm1, %v134_v12  ;;  %4325 = vmatprep.mubr.msk.f32.mxu1 %vm281_vm1, %v262_v13  ;;  %v1186_v29 = vadd.f32 %v3973_v18, %v5245_v28  ;;  %v1180_v31 = vpop.f32.mrb[13].mxu0 }
  0xfa   :  { %v2793_v25 = vmul.f32 0.2, %v1811_v17  ;;  %v2922_v26 = vsel %vm2410_vm9, %v1176_v8, %v2666_v22  ;;  %v3050_v27 = vsel %vm2538_vm10, %v1816_v9, %v2794_v23  ;;  %v1826_v30 = vadd.f32 %v4165_v19, %v5245_v28  ;;  %v1820_v32 = vpop.f32.mrb[13].mxu1  ;;  %v139_v61 = vld [vmem:[%s6450_s0 + $0x3e8] sm:$0xff]  ;;  %v140_v9 = vld [vmem:[%s6450_s0 + $0x3f0] sm:$0xff]  ;;  %v269_v18 = vld [vmem:[%s6450_s0 + $0x7f8] sm:$0xff] }
  0xfb   :  { %3178 = vst [vmem:[%s6452_s3 + $0x58] sm:$0xff] %v2922_v26  ;;  %3306 = vst [vmem:[%s6452_s3 + $0x458] sm:$0xff] %v3050_v27  ;;  %v2921_v35 = vsel %vm2409_vm11, %v1171_v16, %v2665_v24  ;;  %v1181_v37 = vadd.f32 %v5245_v28, %v1180_v31  ;;  %v1821_v38 = vadd.f32 %v5245_v28, %v1820_v32  ;;  %v3976_v39 = vpop.f32.mrb[14].mxu0  ;;  %v4168_v40 = vpop.f32.mrb[14].mxu1  ;;  %vm2412_vm13 = vcmp.gt.f32.partialorder %v1186_v29, 0.0 }
  0xfc   :  { %v3049_v36 = vsel %vm2537_vm12, %v1811_v17, %v2793_v25  ;;  %3177 = vst [vmem:[%s6452_s3 + $0x50] sm:$0xff] %v2921_v35  ;;  %v2668_v43 = vmul.f32 0.2, %v1186_v29  ;;  %vm2540_vm14 = vcmp.gt.f32.partialorder %v1826_v30, 0.0  ;;  %v2796_v44 = vmul.f32 0.2, %v1826_v30  ;;  %4134 = vmatmul.mubr.msk.f32.gmra.mrb[120].mxu0 %vm281_vm1, %v135_v20  ;;  %4326 = vmatmul.mubr.msk.f32.gmra.mrb[120].mxu1 %vm281_vm1, %v263_v21 }
  0xfd   :  { %3305 = vst [vmem:[%s6452_s3 + $0x450] sm:$0xff] %v3049_v36  ;;  %vm2411_vm15 = vcmp.gt.f32.partialorder %v1181_v37, 0.0  ;;  %v2667_v45 = vmul.f32 0.2, %v1181_v37  ;;  %vm2539_vm0 = vcmp.gt.f32.partialorder %v1821_v38, 0.0  ;;  %4136 = vmatprep.mubr.msk.f32.mxu0 %vm281_vm1, %v136_v33  ;;  %4328 = vmatprep.mubr.msk.f32.mxu1 %vm281_vm1, %v264_v34  ;;  %v1196_v49 = vadd.f32 %v3976_v39, %v5245_v28  ;;  %v1190_v51 = vpop.f32.mrb[15].mxu0 }
  0xfe   :  { %v2795_v46 = vmul.f32 0.2, %v1821_v38  ;;  %v2924_v47 = vsel %vm2412_vm13, %v1186_v29, %v2668_v43  ;;  %v3052_v48 = vsel %vm2540_vm14, %v1826_v30, %v2796_v44  ;;  %v1836_v50 = vadd.f32 %v4168_v40, %v5245_v28  ;;  %v1830_v52 = vpop.f32.mrb[15].mxu1  ;;  %v141_v17 = vld [vmem:[%s6450_s0 + $0x3f8] sm:$0xff] }
  0xff   :  { %3180 = vst [vmem:[%s6452_s3 + $0x68] sm:$0xff] %v2924_v47  ;;  %3308 = vst [vmem:[%s6452_s3 + $0x468] sm:$0xff] %v3052_v48  ;;  %v2923_v55 = vsel %vm2411_vm15, %v1181_v37, %v2667_v45  ;;  %v1191_v57 = vadd.f32 %v5245_v28, %v1190_v51  ;;  %v1831_v58 = vadd.f32 %v5245_v28, %v1830_v52  ;;  %v3979_v59 = vpop.f32.mrb[16].mxu0  ;;  %v4171_v60 = vpop.f32.mrb[16].mxu1  ;;  %vm2414_vm2 = vcmp.gt.f32.partialorder %v1196_v49, 0.0 }
 0x100   :  { %v3051_v56 = vsel %vm2539_vm0, %v1821_v38, %v2795_v46  ;;  %3179 = vst [vmem:[%s6452_s3 + $0x60] sm:$0xff] %v2923_v55  ;;  %v2670_v63 = vmul.f32 0.2, %v1196_v49  ;;  %vm2542_vm3 = vcmp.gt.f32.partialorder %v1836_v50, 0.0  ;;  %v2798_v0 = vmul.f32 0.2, %v1836_v50  ;;  %4137 = vmatmul.mubr.msk.f32.gmra.mrb[122].mxu0 %vm281_vm1, %v137_v41  ;;  %4329 = vmatmul.mubr.msk.f32.gmra.mrb[122].mxu1 %vm281_vm1, %v265_v42 }
 0x101   :  { %3307 = vst [vmem:[%s6452_s3 + $0x460] sm:$0xff] %v3051_v56  ;;  %vm2413_vm4 = vcmp.gt.f32.partialorder %v1191_v57, 0.0  ;;  %v2669_v1 = vmul.f32 0.2, %v1191_v57  ;;  %vm2541_vm5 = vcmp.gt.f32.partialorder %v1831_v58, 0.0  ;;  %4139 = vmatprep.mubr.msk.f32.mxu0 %vm281_vm1, %v138_v53  ;;  %4331 = vmatprep.mubr.msk.f32.mxu1 %vm281_vm1, %v266_v54  ;;  %v1206_v5 = vadd.f32 %v3979_v59, %v5245_v28  ;;  %v1200_v7 = vpop.f32.mrb[17].mxu0 }
 0x102   :  { %v2797_v2 = vmul.f32 0.2, %v1831_v58  ;;  %v2926_v3 = vsel %vm2414_vm2, %v1196_v49, %v2670_v63  ;;  %v3054_v4 = vsel %vm2542_vm3, %v1836_v50, %v2798_v0  ;;  %v1846_v6 = vadd.f32 %v4171_v60, %v5245_v28  ;;  %v1840_v8 = vpop.f32.mrb[17].mxu1 }
 0x103   :  { %3182 = vst [vmem:[%s6452_s3 + $0x78] sm:$0xff] %v2926_v3  ;;  %3310 = vst [vmem:[%s6452_s3 + $0x478] sm:$0xff] %v3054_v4  ;;  %v2925_v11 = vsel %vm2413_vm4, %v1191_v57, %v2669_v1  ;;  %v1201_v13 = vadd.f32 %v5245_v28, %v1200_v7  ;;  %v1841_v14 = vadd.f32 %v5245_v28, %v1840_v8  ;;  %v3982_v15 = vpop.f32.mrb[18].mxu0  ;;  %v4174_v16 = vpop.f32.mrb[18].mxu1  ;;  %vm2416_vm6 = vcmp.gt.f32.partialorder %v1206_v5, 0.0 }
 0x104   :  { %v3053_v12 = vsel %vm2541_vm5, %v1831_v58, %v2797_v2  ;;  %3181 = vst [vmem:[%s6452_s3 + $0x70] sm:$0xff] %v2925_v11  ;;  %v2672_v19 = vmul.f32 0.2, %v1206_v5  ;;  %vm2544_vm7 = vcmp.gt.f32.partialorder %v1846_v6, 0.0  ;;  %v2800_v20 = vmul.f32 0.2, %v1846_v6  ;;  %4140 = vmatmul.mubr.msk.f32.gmra.mrb[124].mxu0 %vm281_vm1, %v139_v61  ;;  %4332 = vmatmul.mubr.msk.f32.gmra.mrb[124].mxu1 %vm281_vm1, %v267_v62 }
 0x105   :  { %3309 = vst [vmem:[%s6452_s3 + $0x470] sm:$0xff] %v3053_v12  ;;  %vm2415_vm8 = vcmp.gt.f32.partialorder %v1201_v13, 0.0  ;;  %v2671_v21 = vmul.f32 0.2, %v1201_v13  ;;  %vm2543_vm9 = vcmp.gt.f32.partialorder %v1841_v14, 0.0  ;;  %4142 = vmatprep.mubr.msk.f32.mxu0 %vm281_vm1, %v140_v9  ;;  %4334 = vmatprep.mubr.msk.f32.mxu1 %vm281_vm1, %v268_v10  ;;  %v1216_v25 = vadd.f32 %v3982_v15, %v5245_v28  ;;  %v1210_v27 = vpop.f32.mrb[19].mxu0 }
 0x106   :  { %v2799_v22 = vmul.f32 0.2, %v1841_v14  ;;  %v2928_v23 = vsel %vm2416_vm6, %v1206_v5, %v2672_v19  ;;  %v3056_v24 = vsel %vm2544_vm7, %v1846_v6, %v2800_v20  ;;  %v1856_v26 = vadd.f32 %v4174_v16, %v5245_v28  ;;  %v1850_v29 = vpop.f32.mrb[19].mxu1 }
 0x107   :  { %3184 = vst [vmem:[%s6452_s3 + $0x88] sm:$0xff] %v2928_v23  ;;  %3312 = vst [vmem:[%s6452_s3 + $0x488] sm:$0xff] %v3056_v24  ;;  %v2927_v30 = vsel %vm2415_vm8, %v1201_v13, %v2671_v21  ;;  %v1211_v32 = vadd.f32 %v5245_v28, %v1210_v27  ;;  %v1851_v33 = vadd.f32 %v5245_v28, %v1850_v29  ;;  %v3985_v34 = vpop.f32.mrb[20].mxu0  ;;  %v4177_v35 = vpop.f32.mrb[20].mxu1  ;;  %vm2418_vm10 = vcmp.gt.f32.partialorder %v1216_v25, 0.0 }
 0x108   :  { %v3055_v31 = vsel %vm2543_vm9, %v1841_v14, %v2799_v22  ;;  %3183 = vst [vmem:[%s6452_s3 + $0x80] sm:$0xff] %v2927_v30  ;;  %v2674_v36 = vmul.f32 0.2, %v1216_v25  ;;  %vm2546_vm11 = vcmp.gt.f32.partialorder %v1856_v26, 0.0  ;;  %v2802_v37 = vmul.f32 0.2, %v1856_v26  ;;  %4143 = vmatmul.mubr.msk.f32.gmra.mrb[126].mxu0 %vm281_vm1, %v141_v17  ;;  %4335 = vmatmul.mubr.msk.f32.gmra.mrb[126].mxu1 %vm281_vm1, %v269_v18 }
 0x109   :  { %3311 = vst [vmem:[%s6452_s3 + $0x480] sm:$0xff] %v3055_v31  ;;  %vm2417_vm12 = vcmp.gt.f32.partialorder %v1211_v32, 0.0  ;;  %v2673_v38 = vmul.f32 0.2, %v1211_v32  ;;  %vm2545_vm13 = vcmp.gt.f32.partialorder %v1851_v33, 0.0  ;;  %v1226_v42 = vadd.f32 %v3985_v34, %v5245_v28  ;;  %v1220_v44 = vpop.f32.mrb[21].mxu0 }
 0x10a   :  { %v2801_v39 = vmul.f32 0.2, %v1851_v33  ;;  %v2930_v40 = vsel %vm2418_vm10, %v1216_v25, %v2674_v36  ;;  %v3058_v41 = vsel %vm2546_vm11, %v1856_v26, %v2802_v37  ;;  %v1866_v43 = vadd.f32 %v4177_v35, %v5245_v28  ;;  %v1860_v45 = vpop.f32.mrb[21].mxu1 }
 0x10b   :  { %3186 = vst [vmem:[%s6452_s3 + $0x98] sm:$0xff] %v2930_v40  ;;  %3314 = vst [vmem:[%s6452_s3 + $0x498] sm:$0xff] %v3058_v41  ;;  %v2929_v46 = vsel %vm2417_vm12, %v1211_v32, %v2673_v38  ;;  %v1221_v48 = vadd.f32 %v5245_v28, %v1220_v44  ;;  %v1861_v49 = vadd.f32 %v5245_v28, %v1860_v45  ;;  %v3988_v50 = vpop.f32.mrb[22].mxu0  ;;  %v4180_v51 = vpop.f32.mrb[22].mxu1  ;;  %vm2420_vm1 = vcmp.gt.f32.partialorder %v1226_v42, 0.0 }
 0x10c   :  { %v3057_v47 = vsel %vm2545_vm13, %v1851_v33, %v2801_v39  ;;  %3185 = vst [vmem:[%s6452_s3 + $0x90] sm:$0xff] %v2929_v46  ;;  %v2676_v52 = vmul.f32 0.2, %v1226_v42  ;;  %vm2548_vm14 = vcmp.gt.f32.partialorder %v1866_v43, 0.0  ;;  %v2804_v53 = vmul.f32 0.2, %v1866_v43 }
 0x10d   :  { %3313 = vst [vmem:[%s6452_s3 + $0x490] sm:$0xff] %v3057_v47  ;;  %vm2419_vm15 = vcmp.gt.f32.partialorder %v1221_v48, 0.0  ;;  %v2675_v54 = vmul.f32 0.2, %v1221_v48  ;;  %vm2547_vm0 = vcmp.gt.f32.partialorder %v1861_v49, 0.0  ;;  %v1236_v58 = vadd.f32 %v3988_v50, %v5245_v28  ;;  %v1230_v60 = vpop.f32.mrb[23].mxu0 }
 0x10e   :  { %v2803_v55 = vmul.f32 0.2, %v1861_v49  ;;  %v2932_v56 = vsel %vm2420_vm1, %v1226_v42, %v2676_v52  ;;  %v3060_v57 = vsel %vm2548_vm14, %v1866_v43, %v2804_v53  ;;  %v1876_v59 = vadd.f32 %v4180_v51, %v5245_v28  ;;  %v1870_v61 = vpop.f32.mrb[23].mxu1 }
 0x10f   :  { %3188 = vst [vmem:[%s6452_s3 + $0xa8] sm:$0xff] %v2932_v56  ;;  %3316 = vst [vmem:[%s6452_s3 + $0x4a8] sm:$0xff] %v3060_v57  ;;  %v2931_v62 = vsel %vm2419_vm15, %v1221_v48, %v2675_v54  ;;  %v1231_v0 = vadd.f32 %v5245_v28, %v1230_v60  ;;  %v1871_v1 = vadd.f32 %v5245_v28, %v1870_v61  ;;  %v3991_v2 = vpop.f32.mrb[24].mxu0  ;;  %v4183_v3 = vpop.f32.mrb[24].mxu1  ;;  %vm2422_vm2 = vcmp.gt.f32.partialorder %v1236_v58, 0.0 }
 0x110   :  { %v3059_v63 = vsel %vm2547_vm0, %v1861_v49, %v2803_v55  ;;  %3187 = vst [vmem:[%s6452_s3 + $0xa0] sm:$0xff] %v2931_v62  ;;  %v2678_v4 = vmul.f32 0.2, %v1236_v58  ;;  %vm2550_vm3 = vcmp.gt.f32.partialorder %v1876_v59, 0.0  ;;  %v2806_v5 = vmul.f32 0.2, %v1876_v59 }
 0x111   :  { %3315 = vst [vmem:[%s6452_s3 + $0x4a0] sm:$0xff] %v3059_v63  ;;  %vm2421_vm4 = vcmp.gt.f32.partialorder %v1231_v0, 0.0  ;;  %v2677_v6 = vmul.f32 0.2, %v1231_v0  ;;  %vm2549_vm5 = vcmp.gt.f32.partialorder %v1871_v1, 0.0  ;;  %v1246_v10 = vadd.f32 %v3991_v2, %v5245_v28  ;;  %v1240_v12 = vpop.f32.mrb[25].mxu0 }
 0x112   :  { %v2805_v7 = vmul.f32 0.2, %v1871_v1  ;;  %v2934_v8 = vsel %vm2422_vm2, %v1236_v58, %v2678_v4  ;;  %v3062_v9 = vsel %vm2550_vm3, %v1876_v59, %v2806_v5  ;;  %v1886_v11 = vadd.f32 %v4183_v3, %v5245_v28  ;;  %v1880_v13 = vpop.f32.mrb[25].mxu1 }
 0x113   :  { %3190 = vst [vmem:[%s6452_s3 + $0xb8] sm:$0xff] %v2934_v8  ;;  %3318 = vst [vmem:[%s6452_s3 + $0x4b8] sm:$0xff] %v3062_v9  ;;  %v2933_v14 = vsel %vm2421_vm4, %v1231_v0, %v2677_v6  ;;  %v1241_v16 = vadd.f32 %v5245_v28, %v1240_v12  ;;  %v1881_v17 = vadd.f32 %v5245_v28, %v1880_v13  ;;  %v3994_v18 = vpop.f32.mrb[26].mxu0  ;;  %v4186_v19 = vpop.f32.mrb[26].mxu1  ;;  %vm2424_vm6 = vcmp.gt.f32.partialorder %v1246_v10, 0.0 }
 0x114   :  { %v3061_v15 = vsel %vm2549_vm5, %v1871_v1, %v2805_v7  ;;  %3189 = vst [vmem:[%s6452_s3 + $0xb0] sm:$0xff] %v2933_v14  ;;  %v2680_v20 = vmul.f32 0.2, %v1246_v10  ;;  %vm2552_vm7 = vcmp.gt.f32.partialorder %v1886_v11, 0.0  ;;  %v2808_v21 = vmul.f32 0.2, %v1886_v11 }
 0x115   :  { %3317 = vst [vmem:[%s6452_s3 + $0x4b0] sm:$0xff] %v3061_v15  ;;  %vm2423_vm8 = vcmp.gt.f32.partialorder %v1241_v16, 0.0  ;;  %v2679_v22 = vmul.f32 0.2, %v1241_v16  ;;  %vm2551_vm9 = vcmp.gt.f32.partialorder %v1881_v17, 0.0  ;;  %v1256_v26 = vadd.f32 %v3994_v18, %v5245_v28  ;;  %v1250_v29 = vpop.f32.mrb[27].mxu0 }
 0x116   :  { %v2807_v23 = vmul.f32 0.2, %v1881_v17  ;;  %v2936_v24 = vsel %vm2424_vm6, %v1246_v10, %v2680_v20  ;;  %v3064_v25 = vsel %vm2552_vm7, %v1886_v11, %v2808_v21  ;;  %v1896_v27 = vadd.f32 %v4186_v19, %v5245_v28  ;;  %v1890_v30 = vpop.f32.mrb[27].mxu1 }
 0x117   :  { %3192 = vst [vmem:[%s6452_s3 + $0xc8] sm:$0xff] %v2936_v24  ;;  %3320 = vst [vmem:[%s6452_s3 + $0x4c8] sm:$0xff] %v3064_v25  ;;  %v2935_v31 = vsel %vm2423_vm8, %v1241_v16, %v2679_v22  ;;  %v1251_v33 = vadd.f32 %v5245_v28, %v1250_v29  ;;  %v1891_v34 = vadd.f32 %v5245_v28, %v1890_v30  ;;  %v3997_v35 = vpop.f32.mrb[28].mxu0  ;;  %v4189_v36 = vpop.f32.mrb[28].mxu1  ;;  %vm2426_vm10 = vcmp.gt.f32.partialorder %v1256_v26, 0.0 }
 0x118   :  { %v3063_v32 = vsel %vm2551_vm9, %v1881_v17, %v2807_v23  ;;  %3191 = vst [vmem:[%s6452_s3 + $0xc0] sm:$0xff] %v2935_v31  ;;  %v2682_v37 = vmul.f32 0.2, %v1256_v26  ;;  %vm2554_vm11 = vcmp.gt.f32.partialorder %v1896_v27, 0.0  ;;  %v2810_v38 = vmul.f32 0.2, %v1896_v27 }
 0x119   :  { %3319 = vst [vmem:[%s6452_s3 + $0x4c0] sm:$0xff] %v3063_v32  ;;  %vm2425_vm12 = vcmp.gt.f32.partialorder %v1251_v33, 0.0  ;;  %v2681_v39 = vmul.f32 0.2, %v1251_v33  ;;  %vm2553_vm13 = vcmp.gt.f32.partialorder %v1891_v34, 0.0  ;;  %v1266_v43 = vadd.f32 %v3997_v35, %v5245_v28  ;;  %v1260_v45 = vpop.f32.mrb[29].mxu0 }
 0x11a   :  { %v2809_v40 = vmul.f32 0.2, %v1891_v34  ;;  %v2938_v41 = vsel %vm2426_vm10, %v1256_v26, %v2682_v37  ;;  %v3066_v42 = vsel %vm2554_vm11, %v1896_v27, %v2810_v38  ;;  %v1906_v44 = vadd.f32 %v4189_v36, %v5245_v28  ;;  %v1900_v46 = vpop.f32.mrb[29].mxu1 }
 0x11b   :  { %3194 = vst [vmem:[%s6452_s3 + $0xd8] sm:$0xff] %v2938_v41  ;;  %3322 = vst [vmem:[%s6452_s3 + $0x4d8] sm:$0xff] %v3066_v42  ;;  %v2937_v47 = vsel %vm2425_vm12, %v1251_v33, %v2681_v39  ;;  %v1261_v49 = vadd.f32 %v5245_v28, %v1260_v45  ;;  %v1901_v50 = vadd.f32 %v5245_v28, %v1900_v46  ;;  %v4000_v51 = vpop.f32.mrb[30].mxu0  ;;  %v4192_v52 = vpop.f32.mrb[30].mxu1  ;;  %vm2428_vm1 = vcmp.gt.f32.partialorder %v1266_v43, 0.0 }
 0x11c   :  { %v3065_v48 = vsel %vm2553_vm13, %v1891_v34, %v2809_v40  ;;  %3193 = vst [vmem:[%s6452_s3 + $0xd0] sm:$0xff] %v2937_v47  ;;  %v2684_v53 = vmul.f32 0.2, %v1266_v43  ;;  %vm2556_vm14 = vcmp.gt.f32.partialorder %v1906_v44, 0.0  ;;  %v2812_v54 = vmul.f32 0.2, %v1906_v44 }
 0x11d   :  { %3321 = vst [vmem:[%s6452_s3 + $0x4d0] sm:$0xff] %v3065_v48  ;;  %vm2427_vm15 = vcmp.gt.f32.partialorder %v1261_v49, 0.0  ;;  %v2683_v55 = vmul.f32 0.2, %v1261_v49  ;;  %vm2555_vm0 = vcmp.gt.f32.partialorder %v1901_v50, 0.0  ;;  %v1276_v59 = vadd.f32 %v4000_v51, %v5245_v28  ;;  %v1270_v61 = vpop.f32.mrb[31].mxu0 }
 0x11e   :  { %v2811_v56 = vmul.f32 0.2, %v1901_v50  ;;  %v2940_v57 = vsel %vm2428_vm1, %v1266_v43, %v2684_v53  ;;  %v3068_v58 = vsel %vm2556_vm14, %v1906_v44, %v2812_v54  ;;  %v1916_v60 = vadd.f32 %v4192_v52, %v5245_v28  ;;  %v1910_v62 = vpop.f32.mrb[31].mxu1  ;;  %v5703_v43 = vld [vmem:[%s6451_s2] ss:$0 sm:$0xff] }
 0x11f   :  { %3196 = vst [vmem:[%s6452_s3 + $0xe8] sm:$0xff] %v2940_v57  ;;  %3324 = vst [vmem:[%s6452_s3 + $0x4e8] sm:$0xff] %v3068_v58  ;;  %v2939_v63 = vsel %vm2427_vm15, %v1261_v49, %v2683_v55  ;;  %v1271_v1 = vadd.f32 %v5245_v28, %v1270_v61  ;;  %v1911_v2 = vadd.f32 %v5245_v28, %v1910_v62  ;;  %v4003_v3 = vpop.f32.mrb[32].mxu0  ;;  %v4195_v4 = vpop.f32.mrb[32].mxu1  ;;  %vm2430_vm2 = vcmp.gt.f32.partialorder %v1276_v59, 0.0 }
 0x120   :  { %v3067_v0 = vsel %vm2555_vm0, %v1901_v50, %v2811_v56  ;;  %3195 = vst [vmem:[%s6452_s3 + $0xe0] sm:$0xff] %v2939_v63  ;;  %v2686_v5 = vmul.f32 0.2, %v1276_v59  ;;  %vm2558_vm3 = vcmp.gt.f32.partialorder %v1916_v60, 0.0  ;;  %v2814_v6 = vmul.f32 0.2, %v1916_v60 }
 0x121   :  { %3323 = vst [vmem:[%s6452_s3 + $0x4e0] sm:$0xff] %v3067_v0  ;;  %vm2429_vm4 = vcmp.gt.f32.partialorder %v1271_v1, 0.0  ;;  %v2685_v7 = vmul.f32 0.2, %v1271_v1  ;;  %vm2557_vm5 = vcmp.gt.f32.partialorder %v1911_v2, 0.0  ;;  %v1286_v11 = vadd.f32 %v4003_v3, %v5245_v28  ;;  %v1280_v13 = vpop.f32.mrb[33].mxu0 }
 0x122   :  { %v2813_v8 = vmul.f32 0.2, %v1911_v2  ;;  %v2942_v9 = vsel %vm2430_vm2, %v1276_v59, %v2686_v5  ;;  %v3070_v10 = vsel %vm2558_vm3, %v1916_v60, %v2814_v6  ;;  %v1926_v12 = vadd.f32 %v4195_v4, %v5245_v28  ;;  %v1920_v14 = vpop.f32.mrb[33].mxu1 }
 0x123   :  { %3198 = vst [vmem:[%s6452_s3 + $0xf8] sm:$0xff] %v2942_v9  ;;  %3326 = vst [vmem:[%s6452_s3 + $0x4f8] sm:$0xff] %v3070_v10  ;;  %v2941_v15 = vsel %vm2429_vm4, %v1271_v1, %v2685_v7  ;;  %v1281_v17 = vadd.f32 %v5245_v28, %v1280_v13  ;;  %v1921_v18 = vadd.f32 %v5245_v28, %v1920_v14  ;;  %v4006_v19 = vpop.f32.mrb[34].mxu0  ;;  %v4198_v20 = vpop.f32.mrb[34].mxu1  ;;  %vm2432_vm6 = vcmp.gt.f32.partialorder %v1286_v11, 0.0 }
 0x124   :  { %v3069_v16 = vsel %vm2557_vm5, %v1911_v2, %v2813_v8  ;;  %3197 = vst [vmem:[%s6452_s3 + $0xf0] sm:$0xff] %v2941_v15  ;;  %v2688_v21 = vmul.f32 0.2, %v1286_v11  ;;  %vm2560_vm7 = vcmp.gt.f32.partialorder %v1926_v12, 0.0  ;;  %v2816_v22 = vmul.f32 0.2, %v1926_v12 }
 0x125   :  { %3325 = vst [vmem:[%s6452_s3 + $0x4f0] sm:$0xff] %v3069_v16  ;;  %vm2431_vm8 = vcmp.gt.f32.partialorder %v1281_v17, 0.0  ;;  %v2687_v23 = vmul.f32 0.2, %v1281_v17  ;;  %vm2559_vm9 = vcmp.gt.f32.partialorder %v1921_v18, 0.0  ;;  %v1296_v27 = vadd.f32 %v4006_v19, %v5245_v28  ;;  %v1290_v30 = vpop.f32.mrb[35].mxu0 }
 0x126   :  { %v2815_v24 = vmul.f32 0.2, %v1921_v18  ;;  %v2944_v25 = vsel %vm2432_vm6, %v1286_v11, %v2688_v21  ;;  %v3072_v26 = vsel %vm2560_vm7, %v1926_v12, %v2816_v22  ;;  %v1936_v29 = vadd.f32 %v4198_v20, %v5245_v28  ;;  %v1930_v31 = vpop.f32.mrb[35].mxu1 }
 0x127   :  { %3200 = vst [vmem:[%s6452_s3 + $0x108] sm:$0xff] %v2944_v25  ;;  %3328 = vst [vmem:[%s6452_s3 + $0x508] sm:$0xff] %v3072_v26  ;;  %v2943_v32 = vsel %vm2431_vm8, %v1281_v17, %v2687_v23  ;;  %v1291_v34 = vadd.f32 %v5245_v28, %v1290_v30  ;;  %v1931_v35 = vadd.f32 %v5245_v28, %v1930_v31  ;;  %v4009_v36 = vpop.f32.mrb[36].mxu0  ;;  %v4201_v37 = vpop.f32.mrb[36].mxu1  ;;  %vm2434_vm10 = vcmp.gt.f32.partialorder %v1296_v27, 0.0 }
 0x128   :  { %v3071_v33 = vsel %vm2559_vm9, %v1921_v18, %v2815_v24  ;;  %3199 = vst [vmem:[%s6452_s3 + $0x100] sm:$0xff] %v2943_v32  ;;  %v2690_v38 = vmul.f32 0.2, %v1296_v27  ;;  %vm2562_vm11 = vcmp.gt.f32.partialorder %v1936_v29, 0.0  ;;  %v2818_v39 = vmul.f32 0.2, %v1936_v29 }
 0x129   :  { %3327 = vst [vmem:[%s6452_s3 + $0x500] sm:$0xff] %v3071_v33  ;;  %vm2433_vm12 = vcmp.gt.f32.partialorder %v1291_v34, 0.0  ;;  %v2689_v40 = vmul.f32 0.2, %v1291_v34  ;;  %vm2561_vm13 = vcmp.gt.f32.partialorder %v1931_v35, 0.0  ;;  %v1306_v44 = vadd.f32 %v5703_v43, %v4009_v36  ;;  %v1300_v46 = vpop.f32.mrb[37].mxu0 }
 0x12a   :  { %v2817_v41 = vmul.f32 0.2, %v1931_v35  ;;  %v2946_v42 = vsel %vm2434_vm10, %v1296_v27, %v2690_v38  ;;  %v3074_v28 = vsel %vm2562_vm11, %v1936_v29, %v2818_v39  ;;  %v1946_v45 = vadd.f32 %v5703_v43, %v4201_v37  ;;  %v1940_v47 = vpop.f32.mrb[37].mxu1 }
 0x12b   :  { %3202 = vst [vmem:[%s6452_s3 + $0x118] sm:$0xff] %v2946_v42  ;;  %3330 = vst [vmem:[%s6452_s3 + $0x518] sm:$0xff] %v3074_v28  ;;  %v2945_v48 = vsel %vm2433_vm12, %v1291_v34, %v2689_v40  ;;  %v1301_v50 = vadd.f32 %v5703_v43, %v1300_v46  ;;  %v1941_v51 = vadd.f32 %v5703_v43, %v1940_v47  ;;  %v4012_v52 = vpop.f32.mrb[38].mxu0  ;;  %v4204_v53 = vpop.f32.mrb[38].mxu1  ;;  %vm2436_vm1 = vcmp.gt.f32.partialorder %v1306_v44, 0.0 }
 0x12c   :  { %v3073_v49 = vsel %vm2561_vm13, %v1931_v35, %v2817_v41  ;;  %3201 = vst [vmem:[%s6452_s3 + $0x110] sm:$0xff] %v2945_v48  ;;  %v2692_v54 = vmul.f32 0.2, %v1306_v44  ;;  %vm2564_vm14 = vcmp.gt.f32.partialorder %v1946_v45, 0.0  ;;  %v2820_v55 = vmul.f32 0.2, %v1946_v45 }
 0x12d   :  { %3329 = vst [vmem:[%s6452_s3 + $0x510] sm:$0xff] %v3073_v49  ;;  %vm2435_vm15 = vcmp.gt.f32.partialorder %v1301_v50, 0.0  ;;  %v2691_v56 = vmul.f32 0.2, %v1301_v50  ;;  %vm2563_vm0 = vcmp.gt.f32.partialorder %v1941_v51, 0.0  ;;  %v1316_v60 = vadd.f32 %v5703_v43, %v4012_v52  ;;  %v1310_v62 = vpop.f32.mrb[39].mxu0 }
 0x12e   :  { %v2819_v57 = vmul.f32 0.2, %v1941_v51  ;;  %v2948_v58 = vsel %vm2436_vm1, %v1306_v44, %v2692_v54  ;;  %v3076_v59 = vsel %vm2564_vm14, %v1946_v45, %v2820_v55  ;;  %v1956_v61 = vadd.f32 %v5703_v43, %v4204_v53  ;;  %v1950_v63 = vpop.f32.mrb[39].mxu1 }
 0x12f   :  { %3204 = vst [vmem:[%s6452_s3 + $0x128] sm:$0xff] %v2948_v58  ;;  %3332 = vst [vmem:[%s6452_s3 + $0x528] sm:$0xff] %v3076_v59  ;;  %v2947_v0 = vsel %vm2435_vm15, %v1301_v50, %v2691_v56  ;;  %v1311_v2 = vadd.f32 %v5703_v43, %v1310_v62  ;;  %v1951_v3 = vadd.f32 %v5703_v43, %v1950_v63  ;;  %v4015_v4 = vpop.f32.mrb[40].mxu0  ;;  %v4207_v5 = vpop.f32.mrb[40].mxu1  ;;  %vm2438_vm2 = vcmp.gt.f32.partialorder %v1316_v60, 0.0 }
 0x130   :  { %v3075_v1 = vsel %vm2563_vm0, %v1941_v51, %v2819_v57  ;;  %3203 = vst [vmem:[%s6452_s3 + $0x120] sm:$0xff] %v2947_v0  ;;  %v2694_v6 = vmul.f32 0.2, %v1316_v60  ;;  %vm2566_vm3 = vcmp.gt.f32.partialorder %v1956_v61, 0.0  ;;  %v2822_v7 = vmul.f32 0.2, %v1956_v61 }
 0x131   :  { %3331 = vst [vmem:[%s6452_s3 + $0x520] sm:$0xff] %v3075_v1  ;;  %vm2437_vm4 = vcmp.gt.f32.partialorder %v1311_v2, 0.0  ;;  %v2693_v8 = vmul.f32 0.2, %v1311_v2  ;;  %vm2565_vm5 = vcmp.gt.f32.partialorder %v1951_v3, 0.0  ;;  %v1326_v12 = vadd.f32 %v5703_v43, %v4015_v4  ;;  %v1320_v14 = vpop.f32.mrb[41].mxu0 }
 0x132   :  { %v2821_v9 = vmul.f32 0.2, %v1951_v3  ;;  %v2950_v10 = vsel %vm2438_vm2, %v1316_v60, %v2694_v6  ;;  %v3078_v11 = vsel %vm2566_vm3, %v1956_v61, %v2822_v7  ;;  %v1966_v13 = vadd.f32 %v5703_v43, %v4207_v5  ;;  %v1960_v15 = vpop.f32.mrb[41].mxu1 }
 0x133   :  { %3206 = vst [vmem:[%s6452_s3 + $0x138] sm:$0xff] %v2950_v10  ;;  %3334 = vst [vmem:[%s6452_s3 + $0x538] sm:$0xff] %v3078_v11  ;;  %v2949_v16 = vsel %vm2437_vm4, %v1311_v2, %v2693_v8  ;;  %v1321_v18 = vadd.f32 %v5703_v43, %v1320_v14  ;;  %v1961_v19 = vadd.f32 %v5703_v43, %v1960_v15  ;;  %v4018_v20 = vpop.f32.mrb[42].mxu0  ;;  %v4210_v21 = vpop.f32.mrb[42].mxu1  ;;  %vm2440_vm6 = vcmp.gt.f32.partialorder %v1326_v12, 0.0 }
 0x134   :  { %v3077_v17 = vsel %vm2565_vm5, %v1951_v3, %v2821_v9  ;;  %3205 = vst [vmem:[%s6452_s3 + $0x130] sm:$0xff] %v2949_v16  ;;  %v2696_v22 = vmul.f32 0.2, %v1326_v12  ;;  %vm2568_vm7 = vcmp.gt.f32.partialorder %v1966_v13, 0.0  ;;  %v2824_v23 = vmul.f32 0.2, %v1966_v13 }
 0x135   :  { %3333 = vst [vmem:[%s6452_s3 + $0x530] sm:$0xff] %v3077_v17  ;;  %vm2439_vm8 = vcmp.gt.f32.partialorder %v1321_v18, 0.0  ;;  %v2695_v24 = vmul.f32 0.2, %v1321_v18  ;;  %vm2567_vm9 = vcmp.gt.f32.partialorder %v1961_v19, 0.0  ;;  %v1336_v29 = vadd.f32 %v5703_v43, %v4018_v20  ;;  %v1330_v31 = vpop.f32.mrb[43].mxu0 }
 0x136   :  { %v2823_v25 = vmul.f32 0.2, %v1961_v19  ;;  %v2952_v26 = vsel %vm2440_vm6, %v1326_v12, %v2696_v22  ;;  %v3080_v27 = vsel %vm2568_vm7, %v1966_v13, %v2824_v23  ;;  %v1976_v30 = vadd.f32 %v5703_v43, %v4210_v21  ;;  %v1970_v32 = vpop.f32.mrb[43].mxu1 }
 0x137   :  { %3208 = vst [vmem:[%s6452_s3 + $0x148] sm:$0xff] %v2952_v26  ;;  %3336 = vst [vmem:[%s6452_s3 + $0x548] sm:$0xff] %v3080_v27  ;;  %v2951_v33 = vsel %vm2439_vm8, %v1321_v18, %v2695_v24  ;;  %v1331_v35 = vadd.f32 %v5703_v43, %v1330_v31  ;;  %v1971_v36 = vadd.f32 %v5703_v43, %v1970_v32  ;;  %v4021_v37 = vpop.f32.mrb[44].mxu0  ;;  %v4213_v38 = vpop.f32.mrb[44].mxu1  ;;  %vm2442_vm10 = vcmp.gt.f32.partialorder %v1336_v29, 0.0 }
 0x138   :  { %v3079_v34 = vsel %vm2567_vm9, %v1961_v19, %v2823_v25  ;;  %3207 = vst [vmem:[%s6452_s3 + $0x140] sm:$0xff] %v2951_v33  ;;  %v2698_v39 = vmul.f32 0.2, %v1336_v29  ;;  %vm2570_vm11 = vcmp.gt.f32.partialorder %v1976_v30, 0.0  ;;  %v2826_v40 = vmul.f32 0.2, %v1976_v30 }
 0x139   :  { %3335 = vst [vmem:[%s6452_s3 + $0x540] sm:$0xff] %v3079_v34  ;;  %vm2441_vm12 = vcmp.gt.f32.partialorder %v1331_v35, 0.0  ;;  %v2697_v41 = vmul.f32 0.2, %v1331_v35  ;;  %vm2569_vm13 = vcmp.gt.f32.partialorder %v1971_v36, 0.0  ;;  %v1346_v45 = vadd.f32 %v5703_v43, %v4021_v37  ;;  %v1340_v47 = vpop.f32.mrb[45].mxu0 }
 0x13a   :  { %v2825_v42 = vmul.f32 0.2, %v1971_v36  ;;  %v2954_v28 = vsel %vm2442_vm10, %v1336_v29, %v2698_v39  ;;  %v3082_v44 = vsel %vm2570_vm11, %v1976_v30, %v2826_v40  ;;  %v1986_v46 = vadd.f32 %v5703_v43, %v4213_v38  ;;  %v1980_v48 = vpop.f32.mrb[45].mxu1 }
 0x13b   :  { %3210 = vst [vmem:[%s6452_s3 + $0x158] sm:$0xff] %v2954_v28  ;;  %3338 = vst [vmem:[%s6452_s3 + $0x558] sm:$0xff] %v3082_v44  ;;  %v2953_v49 = vsel %vm2441_vm12, %v1331_v35, %v2697_v41  ;;  %v1341_v51 = vadd.f32 %v5703_v43, %v1340_v47  ;;  %v1981_v52 = vadd.f32 %v5703_v43, %v1980_v48  ;;  %v4024_v53 = vpop.f32.mrb[46].mxu0  ;;  %v4216_v54 = vpop.f32.mrb[46].mxu1  ;;  %vm2444_vm1 = vcmp.gt.f32.partialorder %v1346_v45, 0.0 }
 0x13c   :  { %v3081_v50 = vsel %vm2569_vm13, %v1971_v36, %v2825_v42  ;;  %3209 = vst [vmem:[%s6452_s3 + $0x150] sm:$0xff] %v2953_v49  ;;  %v2700_v55 = vmul.f32 0.2, %v1346_v45  ;;  %vm2572_vm14 = vcmp.gt.f32.partialorder %v1986_v46, 0.0  ;;  %v2828_v56 = vmul.f32 0.2, %v1986_v46 }
 0x13d   :  { %3337 = vst [vmem:[%s6452_s3 + $0x550] sm:$0xff] %v3081_v50  ;;  %vm2443_vm15 = vcmp.gt.f32.partialorder %v1341_v51, 0.0  ;;  %v2699_v57 = vmul.f32 0.2, %v1341_v51  ;;  %vm2571_vm0 = vcmp.gt.f32.partialorder %v1981_v52, 0.0  ;;  %v1356_v61 = vadd.f32 %v5703_v43, %v4024_v53  ;;  %v1350_v63 = vpop.f32.mrb[47].mxu0 }
 0x13e   :  { %v2827_v58 = vmul.f32 0.2, %v1981_v52  ;;  %v2956_v59 = vsel %vm2444_vm1, %v1346_v45, %v2700_v55  ;;  %v3084_v60 = vsel %vm2572_vm14, %v1986_v46, %v2828_v56  ;;  %v1996_v62 = vadd.f32 %v5703_v43, %v4216_v54  ;;  %v1990_v0 = vpop.f32.mrb[47].mxu1 }
 0x13f   :  { %3212 = vst [vmem:[%s6452_s3 + $0x168] sm:$0xff] %v2956_v59  ;;  %3340 = vst [vmem:[%s6452_s3 + $0x568] sm:$0xff] %v3084_v60  ;;  %v2955_v1 = vsel %vm2443_vm15, %v1341_v51, %v2699_v57  ;;  %v1351_v3 = vadd.f32 %v5703_v43, %v1350_v63  ;;  %v1991_v4 = vadd.f32 %v5703_v43, %v1990_v0  ;;  %v4027_v5 = vpop.f32.mrb[48].mxu0  ;;  %v4219_v6 = vpop.f32.mrb[48].mxu1  ;;  %vm2446_vm2 = vcmp.gt.f32.partialorder %v1356_v61, 0.0 }
 0x140   :  { %v3083_v2 = vsel %vm2571_vm0, %v1981_v52, %v2827_v58  ;;  %3211 = vst [vmem:[%s6452_s3 + $0x160] sm:$0xff] %v2955_v1  ;;  %v2702_v7 = vmul.f32 0.2, %v1356_v61  ;;  %vm2574_vm3 = vcmp.gt.f32.partialorder %v1996_v62, 0.0  ;;  %v2830_v8 = vmul.f32 0.2, %v1996_v62 }
 0x141   :  { %3339 = vst [vmem:[%s6452_s3 + $0x560] sm:$0xff] %v3083_v2  ;;  %vm2445_vm4 = vcmp.gt.f32.partialorder %v1351_v3, 0.0  ;;  %v2701_v9 = vmul.f32 0.2, %v1351_v3  ;;  %vm2573_vm5 = vcmp.gt.f32.partialorder %v1991_v4, 0.0  ;;  %v1366_v13 = vadd.f32 %v5703_v43, %v4027_v5  ;;  %v1360_v15 = vpop.f32.mrb[49].mxu0 }
 0x142   :  { %v2829_v10 = vmul.f32 0.2, %v1991_v4  ;;  %v2958_v11 = vsel %vm2446_vm2, %v1356_v61, %v2702_v7  ;;  %v3086_v12 = vsel %vm2574_vm3, %v1996_v62, %v2830_v8  ;;  %v2006_v14 = vadd.f32 %v5703_v43, %v4219_v6  ;;  %v2000_v16 = vpop.f32.mrb[49].mxu1 }
 0x143   :  { %3214 = vst [vmem:[%s6452_s3 + $0x178] sm:$0xff] %v2958_v11  ;;  %3342 = vst [vmem:[%s6452_s3 + $0x578] sm:$0xff] %v3086_v12  ;;  %v2957_v17 = vsel %vm2445_vm4, %v1351_v3, %v2701_v9  ;;  %v1361_v19 = vadd.f32 %v5703_v43, %v1360_v15  ;;  %v2001_v20 = vadd.f32 %v5703_v43, %v2000_v16  ;;  %v4030_v21 = vpop.f32.mrb[50].mxu0  ;;  %v4222_v22 = vpop.f32.mrb[50].mxu1  ;;  %vm2448_vm6 = vcmp.gt.f32.partialorder %v1366_v13, 0.0 }
 0x144   :  { %v3085_v18 = vsel %vm2573_vm5, %v1991_v4, %v2829_v10  ;;  %3213 = vst [vmem:[%s6452_s3 + $0x170] sm:$0xff] %v2957_v17  ;;  %v2704_v23 = vmul.f32 0.2, %v1366_v13  ;;  %vm2576_vm7 = vcmp.gt.f32.partialorder %v2006_v14, 0.0  ;;  %v2832_v24 = vmul.f32 0.2, %v2006_v14 }
 0x145   :  { %3341 = vst [vmem:[%s6452_s3 + $0x570] sm:$0xff] %v3085_v18  ;;  %vm2447_vm8 = vcmp.gt.f32.partialorder %v1361_v19, 0.0  ;;  %v2703_v25 = vmul.f32 0.2, %v1361_v19  ;;  %vm2575_vm9 = vcmp.gt.f32.partialorder %v2001_v20, 0.0  ;;  %v1376_v30 = vadd.f32 %v5703_v43, %v4030_v21  ;;  %v1370_v32 = vpop.f32.mrb[51].mxu0 }
 0x146   :  { %v2831_v26 = vmul.f32 0.2, %v2001_v20  ;;  %v2960_v27 = vsel %vm2448_vm6, %v1366_v13, %v2704_v23  ;;  %v3088_v29 = vsel %vm2576_vm7, %v2006_v14, %v2832_v24  ;;  %v2016_v31 = vadd.f32 %v5703_v43, %v4222_v22  ;;  %v2010_v33 = vpop.f32.mrb[51].mxu1 }
 0x147   :  { %3216 = vst [vmem:[%s6452_s3 + $0x188] sm:$0xff] %v2960_v27  ;;  %3344 = vst [vmem:[%s6452_s3 + $0x588] sm:$0xff] %v3088_v29  ;;  %v2959_v34 = vsel %vm2447_vm8, %v1361_v19, %v2703_v25  ;;  %v1371_v36 = vadd.f32 %v5703_v43, %v1370_v32  ;;  %v2011_v37 = vadd.f32 %v5703_v43, %v2010_v33  ;;  %v4033_v38 = vpop.f32.mrb[52].mxu0  ;;  %v4225_v39 = vpop.f32.mrb[52].mxu1  ;;  %vm2450_vm10 = vcmp.gt.f32.partialorder %v1376_v30, 0.0 }
 0x148   :  { %v3087_v35 = vsel %vm2575_vm9, %v2001_v20, %v2831_v26  ;;  %3215 = vst [vmem:[%s6452_s3 + $0x180] sm:$0xff] %v2959_v34  ;;  %v2706_v40 = vmul.f32 0.2, %v1376_v30  ;;  %vm2578_vm11 = vcmp.gt.f32.partialorder %v2016_v31, 0.0  ;;  %v2834_v41 = vmul.f32 0.2, %v2016_v31 }
 0x149   :  { %3343 = vst [vmem:[%s6452_s3 + $0x580] sm:$0xff] %v3087_v35  ;;  %vm2449_vm12 = vcmp.gt.f32.partialorder %v1371_v36, 0.0  ;;  %v2705_v42 = vmul.f32 0.2, %v1371_v36  ;;  %vm2577_vm13 = vcmp.gt.f32.partialorder %v2011_v37, 0.0  ;;  %v1386_v46 = vadd.f32 %v5703_v43, %v4033_v38  ;;  %v1380_v48 = vpop.f32.mrb[53].mxu0 }
 0x14a   :  { %v2833_v28 = vmul.f32 0.2, %v2011_v37  ;;  %v2962_v44 = vsel %vm2450_vm10, %v1376_v30, %v2706_v40  ;;  %v3090_v45 = vsel %vm2578_vm11, %v2016_v31, %v2834_v41  ;;  %v2026_v47 = vadd.f32 %v5703_v43, %v4225_v39  ;;  %v2020_v49 = vpop.f32.mrb[53].mxu1 }
 0x14b   :  { %3218 = vst [vmem:[%s6452_s3 + $0x198] sm:$0xff] %v2962_v44  ;;  %3346 = vst [vmem:[%s6452_s3 + $0x598] sm:$0xff] %v3090_v45  ;;  %v2961_v50 = vsel %vm2449_vm12, %v1371_v36, %v2705_v42  ;;  %v1381_v52 = vadd.f32 %v5703_v43, %v1380_v48  ;;  %v2021_v53 = vadd.f32 %v5703_v43, %v2020_v49  ;;  %v4036_v54 = vpop.f32.mrb[54].mxu0  ;;  %v4228_v55 = vpop.f32.mrb[54].mxu1  ;;  %vm2452_vm1 = vcmp.gt.f32.partialorder %v1386_v46, 0.0 }
 0x14c   :  { %v3089_v51 = vsel %vm2577_vm13, %v2011_v37, %v2833_v28  ;;  %3217 = vst [vmem:[%s6452_s3 + $0x190] sm:$0xff] %v2961_v50  ;;  %v2708_v56 = vmul.f32 0.2, %v1386_v46  ;;  %vm2580_vm14 = vcmp.gt.f32.partialorder %v2026_v47, 0.0  ;;  %v2836_v57 = vmul.f32 0.2, %v2026_v47 }
 0x14d   :  { %3345 = vst [vmem:[%s6452_s3 + $0x590] sm:$0xff] %v3089_v51  ;;  %vm2451_vm15 = vcmp.gt.f32.partialorder %v1381_v52, 0.0  ;;  %v2707_v58 = vmul.f32 0.2, %v1381_v52  ;;  %vm2579_vm0 = vcmp.gt.f32.partialorder %v2021_v53, 0.0  ;;  %v1396_v62 = vadd.f32 %v5703_v43, %v4036_v54  ;;  %v1390_v0 = vpop.f32.mrb[55].mxu0 }
 0x14e   :  { %v2835_v59 = vmul.f32 0.2, %v2021_v53  ;;  %v2964_v60 = vsel %vm2452_vm1, %v1386_v46, %v2708_v56  ;;  %v3092_v61 = vsel %vm2580_vm14, %v2026_v47, %v2836_v57  ;;  %v2036_v63 = vadd.f32 %v5703_v43, %v4228_v55  ;;  %v2030_v1 = vpop.f32.mrb[55].mxu1 }
 0x14f   :  { %3220 = vst [vmem:[%s6452_s3 + $0x1a8] sm:$0xff] %v2964_v60  ;;  %3348 = vst [vmem:[%s6452_s3 + $0x5a8] sm:$0xff] %v3092_v61  ;;  %v2963_v2 = vsel %vm2451_vm15, %v1381_v52, %v2707_v58  ;;  %v1391_v4 = vadd.f32 %v5703_v43, %v1390_v0  ;;  %v2031_v5 = vadd.f32 %v5703_v43, %v2030_v1  ;;  %v4039_v6 = vpop.f32.mrb[56].mxu0  ;;  %v4231_v7 = vpop.f32.mrb[56].mxu1  ;;  %vm2454_vm2 = vcmp.gt.f32.partialorder %v1396_v62, 0.0 }
 0x150   :  { %v3091_v3 = vsel %vm2579_vm0, %v2021_v53, %v2835_v59  ;;  %3219 = vst [vmem:[%s6452_s3 + $0x1a0] sm:$0xff] %v2963_v2  ;;  %v2710_v8 = vmul.f32 0.2, %v1396_v62  ;;  %vm2582_vm3 = vcmp.gt.f32.partialorder %v2036_v63, 0.0  ;;  %v2838_v9 = vmul.f32 0.2, %v2036_v63 }
 0x151   :  { %3347 = vst [vmem:[%s6452_s3 + $0x5a0] sm:$0xff] %v3091_v3  ;;  %vm2453_vm4 = vcmp.gt.f32.partialorder %v1391_v4, 0.0  ;;  %v2709_v10 = vmul.f32 0.2, %v1391_v4  ;;  %vm2581_vm5 = vcmp.gt.f32.partialorder %v2031_v5, 0.0  ;;  %v1406_v14 = vadd.f32 %v5703_v43, %v4039_v6  ;;  %v1400_v16 = vpop.f32.mrb[57].mxu0 }
 0x152   :  { %v2837_v11 = vmul.f32 0.2, %v2031_v5  ;;  %v2966_v12 = vsel %vm2454_vm2, %v1396_v62, %v2710_v8  ;;  %v3094_v13 = vsel %vm2582_vm3, %v2036_v63, %v2838_v9  ;;  %v2046_v15 = vadd.f32 %v5703_v43, %v4231_v7  ;;  %v2040_v17 = vpop.f32.mrb[57].mxu1 }
 0x153   :  { %3222 = vst [vmem:[%s6452_s3 + $0x1b8] sm:$0xff] %v2966_v12  ;;  %3350 = vst [vmem:[%s6452_s3 + $0x5b8] sm:$0xff] %v3094_v13  ;;  %v2965_v18 = vsel %vm2453_vm4, %v1391_v4, %v2709_v10  ;;  %v1401_v20 = vadd.f32 %v5703_v43, %v1400_v16  ;;  %v2041_v21 = vadd.f32 %v5703_v43, %v2040_v17  ;;  %v4042_v22 = vpop.f32.mrb[58].mxu0  ;;  %v4234_v23 = vpop.f32.mrb[58].mxu1  ;;  %vm2456_vm6 = vcmp.gt.f32.partialorder %v1406_v14, 0.0 }
 0x154   :  { %v3093_v19 = vsel %vm2581_vm5, %v2031_v5, %v2837_v11  ;;  %3221 = vst [vmem:[%s6452_s3 + $0x1b0] sm:$0xff] %v2965_v18  ;;  %v2712_v24 = vmul.f32 0.2, %v1406_v14  ;;  %vm2584_vm7 = vcmp.gt.f32.partialorder %v2046_v15, 0.0  ;;  %v2840_v25 = vmul.f32 0.2, %v2046_v15 }
 0x155   :  { %3349 = vst [vmem:[%s6452_s3 + $0x5b0] sm:$0xff] %v3093_v19  ;;  %vm2455_vm8 = vcmp.gt.f32.partialorder %v1401_v20, 0.0  ;;  %v2711_v26 = vmul.f32 0.2, %v1401_v20  ;;  %vm2583_vm9 = vcmp.gt.f32.partialorder %v2041_v21, 0.0  ;;  %v1416_v31 = vadd.f32 %v5703_v43, %v4042_v22  ;;  %v1410_v33 = vpop.f32.mrb[59].mxu0 }
 0x156   :  { %v2839_v27 = vmul.f32 0.2, %v2041_v21  ;;  %v2968_v29 = vsel %vm2456_vm6, %v1406_v14, %v2712_v24  ;;  %v3096_v30 = vsel %vm2584_vm7, %v2046_v15, %v2840_v25  ;;  %v2056_v32 = vadd.f32 %v5703_v43, %v4234_v23  ;;  %v2050_v34 = vpop.f32.mrb[59].mxu1 }
 0x157   :  { %3224 = vst [vmem:[%s6452_s3 + $0x1c8] sm:$0xff] %v2968_v29  ;;  %3352 = vst [vmem:[%s6452_s3 + $0x5c8] sm:$0xff] %v3096_v30  ;;  %v2967_v35 = vsel %vm2455_vm8, %v1401_v20, %v2711_v26  ;;  %v1411_v37 = vadd.f32 %v5703_v43, %v1410_v33  ;;  %v2051_v38 = vadd.f32 %v5703_v43, %v2050_v34  ;;  %v4045_v39 = vpop.f32.mrb[60].mxu0  ;;  %v4237_v40 = vpop.f32.mrb[60].mxu1  ;;  %vm2458_vm10 = vcmp.gt.f32.partialorder %v1416_v31, 0.0 }
 0x158   :  { %v3095_v36 = vsel %vm2583_vm9, %v2041_v21, %v2839_v27  ;;  %3223 = vst [vmem:[%s6452_s3 + $0x1c0] sm:$0xff] %v2967_v35  ;;  %v2714_v41 = vmul.f32 0.2, %v1416_v31  ;;  %vm2586_vm11 = vcmp.gt.f32.partialorder %v2056_v32, 0.0  ;;  %v2842_v42 = vmul.f32 0.2, %v2056_v32 }
 0x159   :  { %3351 = vst [vmem:[%s6452_s3 + $0x5c0] sm:$0xff] %v3095_v36  ;;  %vm2457_vm12 = vcmp.gt.f32.partialorder %v1411_v37, 0.0  ;;  %v2713_v28 = vmul.f32 0.2, %v1411_v37  ;;  %vm2585_vm13 = vcmp.gt.f32.partialorder %v2051_v38, 0.0  ;;  %v1426_v47 = vadd.f32 %v5703_v43, %v4045_v39  ;;  %v1420_v49 = vpop.f32.mrb[61].mxu0 }
 0x15a   :  { %v2841_v44 = vmul.f32 0.2, %v2051_v38  ;;  %v2970_v45 = vsel %vm2458_vm10, %v1416_v31, %v2714_v41  ;;  %v3098_v46 = vsel %vm2586_vm11, %v2056_v32, %v2842_v42  ;;  %v2066_v48 = vadd.f32 %v5703_v43, %v4237_v40  ;;  %v2060_v50 = vpop.f32.mrb[61].mxu1 }
 0x15b   :  { %3226 = vst [vmem:[%s6452_s3 + $0x1d8] sm:$0xff] %v2970_v45  ;;  %3354 = vst [vmem:[%s6452_s3 + $0x5d8] sm:$0xff] %v3098_v46  ;;  %v2969_v51 = vsel %vm2457_vm12, %v1411_v37, %v2713_v28  ;;  %v1421_v53 = vadd.f32 %v5703_v43, %v1420_v49  ;;  %v2061_v54 = vadd.f32 %v5703_v43, %v2060_v50  ;;  %v4048_v55 = vpop.f32.mrb[62].mxu0  ;;  %v4240_v56 = vpop.f32.mrb[62].mxu1  ;;  %vm2460_vm1 = vcmp.gt.f32.partialorder %v1426_v47, 0.0 }
 0x15c   :  { %v3097_v52 = vsel %vm2585_vm13, %v2051_v38, %v2841_v44  ;;  %3225 = vst [vmem:[%s6452_s3 + $0x1d0] sm:$0xff] %v2969_v51  ;;  %v2716_v57 = vmul.f32 0.2, %v1426_v47  ;;  %vm2588_vm14 = vcmp.gt.f32.partialorder %v2066_v48, 0.0  ;;  %v2844_v58 = vmul.f32 0.2, %v2066_v48 }
 0x15d   :  { %3353 = vst [vmem:[%s6452_s3 + $0x5d0] sm:$0xff] %v3097_v52  ;;  %vm2459_vm15 = vcmp.gt.f32.partialorder %v1421_v53, 0.0  ;;  %v2715_v59 = vmul.f32 0.2, %v1421_v53  ;;  %vm2587_vm0 = vcmp.gt.f32.partialorder %v2061_v54, 0.0  ;;  %v1436_v63 = vadd.f32 %v5703_v43, %v4048_v55  ;;  %v1430_v1 = vpop.f32.mrb[63].mxu0 }
 0x15e   :  { %v2843_v60 = vmul.f32 0.2, %v2061_v54  ;;  %v2972_v61 = vsel %vm2460_vm1, %v1426_v47, %v2716_v57  ;;  %v3100_v62 = vsel %vm2588_vm14, %v2066_v48, %v2844_v58  ;;  %v2076_v0 = vadd.f32 %v5703_v43, %v4240_v56  ;;  %v2070_v2 = vpop.f32.mrb[63].mxu1 }
 0x15f   :  { %3228 = vst [vmem:[%s6452_s3 + $0x1e8] sm:$0xff] %v2972_v61  ;;  %3356 = vst [vmem:[%s6452_s3 + $0x5e8] sm:$0xff] %v3100_v62  ;;  %v2971_v3 = vsel %vm2459_vm15, %v1421_v53, %v2715_v59  ;;  %v1431_v5 = vadd.f32 %v5703_v43, %v1430_v1  ;;  %v2071_v6 = vadd.f32 %v5703_v43, %v2070_v2  ;;  %v4051_v7 = vpop.f32.mrb[64].mxu0  ;;  %v4243_v8 = vpop.f32.mrb[64].mxu1  ;;  %vm2462_vm2 = vcmp.gt.f32.partialorder %v1436_v63, 0.0 }
 0x160   :  { %v3099_v4 = vsel %vm2587_vm0, %v2061_v54, %v2843_v60  ;;  %3227 = vst [vmem:[%s6452_s3 + $0x1e0] sm:$0xff] %v2971_v3  ;;  %v2718_v9 = vmul.f32 0.2, %v1436_v63  ;;  %vm2590_vm3 = vcmp.gt.f32.partialorder %v2076_v0, 0.0  ;;  %v2846_v10 = vmul.f32 0.2, %v2076_v0 }
 0x161   :  { %3355 = vst [vmem:[%s6452_s3 + $0x5e0] sm:$0xff] %v3099_v4  ;;  %vm2461_vm4 = vcmp.gt.f32.partialorder %v1431_v5, 0.0  ;;  %v2717_v11 = vmul.f32 0.2, %v1431_v5  ;;  %vm2589_vm5 = vcmp.gt.f32.partialorder %v2071_v6, 0.0  ;;  %v1446_v15 = vadd.f32 %v5703_v43, %v4051_v7  ;;  %v1440_v17 = vpop.f32.mrb[65].mxu0 }
 0x162   :  { %v2845_v12 = vmul.f32 0.2, %v2071_v6  ;;  %v2974_v13 = vsel %vm2462_vm2, %v1436_v63, %v2718_v9  ;;  %v3102_v14 = vsel %vm2590_vm3, %v2076_v0, %v2846_v10  ;;  %v2086_v16 = vadd.f32 %v5703_v43, %v4243_v8  ;;  %v2080_v18 = vpop.f32.mrb[65].mxu1 }
 0x163   :  { %3230 = vst [vmem:[%s6452_s3 + $0x1f8] sm:$0xff] %v2974_v13  ;;  %3358 = vst [vmem:[%s6452_s3 + $0x5f8] sm:$0xff] %v3102_v14  ;;  %v2973_v19 = vsel %vm2461_vm4, %v1431_v5, %v2717_v11  ;;  %v1441_v21 = vadd.f32 %v5703_v43, %v1440_v17  ;;  %v2081_v22 = vadd.f32 %v5703_v43, %v2080_v18  ;;  %v4054_v23 = vpop.f32.mrb[66].mxu0  ;;  %v4246_v24 = vpop.f32.mrb[66].mxu1  ;;  %vm2464_vm6 = vcmp.gt.f32.partialorder %v1446_v15, 0.0 }
 0x164   :  { %v3101_v20 = vsel %vm2589_vm5, %v2071_v6, %v2845_v12  ;;  %3229 = vst [vmem:[%s6452_s3 + $0x1f0] sm:$0xff] %v2973_v19  ;;  %v2720_v25 = vmul.f32 0.2, %v1446_v15  ;;  %vm2592_vm7 = vcmp.gt.f32.partialorder %v2086_v16, 0.0  ;;  %v2848_v26 = vmul.f32 0.2, %v2086_v16 }
 0x165   :  { %3357 = vst [vmem:[%s6452_s3 + $0x5f0] sm:$0xff] %v3101_v20  ;;  %vm2463_vm8 = vcmp.gt.f32.partialorder %v1441_v21, 0.0  ;;  %v2719_v27 = vmul.f32 0.2, %v1441_v21  ;;  %vm2591_vm9 = vcmp.gt.f32.partialorder %v2081_v22, 0.0  ;;  %v1456_v32 = vadd.f32 %v5703_v43, %v4054_v23  ;;  %v1450_v34 = vpop.f32.mrb[67].mxu0 }
 0x166   :  { %v2847_v29 = vmul.f32 0.2, %v2081_v22  ;;  %v2976_v30 = vsel %vm2464_vm6, %v1446_v15, %v2720_v25  ;;  %v3104_v31 = vsel %vm2592_vm7, %v2086_v16, %v2848_v26  ;;  %v2096_v33 = vadd.f32 %v5703_v43, %v4246_v24  ;;  %v2090_v35 = vpop.f32.mrb[67].mxu1 }
 0x167   :  { %3232 = vst [vmem:[%s6452_s3 + $0x208] sm:$0xff] %v2976_v30  ;;  %3360 = vst [vmem:[%s6452_s3 + $0x608] sm:$0xff] %v3104_v31  ;;  %v2975_v36 = vsel %vm2463_vm8, %v1441_v21, %v2719_v27  ;;  %v1451_v38 = vadd.f32 %v5703_v43, %v1450_v34  ;;  %v2091_v39 = vadd.f32 %v5703_v43, %v2090_v35  ;;  %v4057_v40 = vpop.f32.mrb[68].mxu0  ;;  %v4249_v41 = vpop.f32.mrb[68].mxu1  ;;  %vm2466_vm10 = vcmp.gt.f32.partialorder %v1456_v32, 0.0 }
 0x168   :  { %v3103_v37 = vsel %vm2591_vm9, %v2081_v22, %v2847_v29  ;;  %3231 = vst [vmem:[%s6452_s3 + $0x200] sm:$0xff] %v2975_v36  ;;  %v2722_v42 = vmul.f32 0.2, %v1456_v32  ;;  %vm2594_vm11 = vcmp.gt.f32.partialorder %v2096_v33, 0.0  ;;  %v2850_v28 = vmul.f32 0.2, %v2096_v33 }
 0x169   :  { %3359 = vst [vmem:[%s6452_s3 + $0x600] sm:$0xff] %v3103_v37  ;;  %vm2465_vm12 = vcmp.gt.f32.partialorder %v1451_v38, 0.0  ;;  %v2721_v44 = vmul.f32 0.2, %v1451_v38  ;;  %vm2593_vm13 = vcmp.gt.f32.partialorder %v2091_v39, 0.0  ;;  %v1466_v48 = vadd.f32 %v5703_v43, %v4057_v40  ;;  %v1460_v50 = vpop.f32.mrb[69].mxu0 }
 0x16a   :  { %v2849_v45 = vmul.f32 0.2, %v2091_v39  ;;  %v2978_v46 = vsel %vm2466_vm10, %v1456_v32, %v2722_v42  ;;  %v3106_v47 = vsel %vm2594_vm11, %v2096_v33, %v2850_v28  ;;  %v2106_v49 = vadd.f32 %v5703_v43, %v4249_v41  ;;  %v2100_v51 = vpop.f32.mrb[69].mxu1 }
 0x16b   :  { %3234 = vst [vmem:[%s6452_s3 + $0x218] sm:$0xff] %v2978_v46  ;;  %3362 = vst [vmem:[%s6452_s3 + $0x618] sm:$0xff] %v3106_v47  ;;  %v2977_v52 = vsel %vm2465_vm12, %v1451_v38, %v2721_v44  ;;  %v1461_v54 = vadd.f32 %v5703_v43, %v1460_v50  ;;  %v2101_v55 = vadd.f32 %v5703_v43, %v2100_v51  ;;  %v4060_v56 = vpop.f32.mrb[70].mxu0  ;;  %v4252_v57 = vpop.f32.mrb[70].mxu1  ;;  %vm2468_vm1 = vcmp.gt.f32.partialorder %v1466_v48, 0.0 }
 0x16c   :  { %v3105_v53 = vsel %vm2593_vm13, %v2091_v39, %v2849_v45  ;;  %3233 = vst [vmem:[%s6452_s3 + $0x210] sm:$0xff] %v2977_v52  ;;  %v2724_v58 = vmul.f32 0.2, %v1466_v48  ;;  %vm2596_vm14 = vcmp.gt.f32.partialorder %v2106_v49, 0.0  ;;  %v2852_v59 = vmul.f32 0.2, %v2106_v49 }
 0x16d   :  { %3361 = vst [vmem:[%s6452_s3 + $0x610] sm:$0xff] %v3105_v53  ;;  %vm2467_vm15 = vcmp.gt.f32.partialorder %v1461_v54, 0.0  ;;  %v2723_v60 = vmul.f32 0.2, %v1461_v54  ;;  %vm2595_vm0 = vcmp.gt.f32.partialorder %v2101_v55, 0.0  ;;  %v1476_v0 = vadd.f32 %v5703_v43, %v4060_v56  ;;  %v1470_v2 = vpop.f32.mrb[71].mxu0 }
 0x16e   :  { %v2851_v61 = vmul.f32 0.2, %v2101_v55  ;;  %v2980_v62 = vsel %vm2468_vm1, %v1466_v48, %v2724_v58  ;;  %v3108_v63 = vsel %vm2596_vm14, %v2106_v49, %v2852_v59  ;;  %v2116_v1 = vadd.f32 %v5703_v43, %v4252_v57  ;;  %v2110_v3 = vpop.f32.mrb[71].mxu1 }
 0x16f   :  { %3236 = vst [vmem:[%s6452_s3 + $0x228] sm:$0xff] %v2980_v62  ;;  %3364 = vst [vmem:[%s6452_s3 + $0x628] sm:$0xff] %v3108_v63  ;;  %v2979_v4 = vsel %vm2467_vm15, %v1461_v54, %v2723_v60  ;;  %v1471_v6 = vadd.f32 %v5703_v43, %v1470_v2  ;;  %v2111_v7 = vadd.f32 %v5703_v43, %v2110_v3  ;;  %v4063_v8 = vpop.f32.mrb[72].mxu0  ;;  %v4255_v9 = vpop.f32.mrb[72].mxu1  ;;  %vm2470_vm2 = vcmp.gt.f32.partialorder %v1476_v0, 0.0 }
 0x170   :  { %v3107_v5 = vsel %vm2595_vm0, %v2101_v55, %v2851_v61  ;;  %3235 = vst [vmem:[%s6452_s3 + $0x220] sm:$0xff] %v2979_v4  ;;  %v2726_v10 = vmul.f32 0.2, %v1476_v0  ;;  %vm2598_vm3 = vcmp.gt.f32.partialorder %v2116_v1, 0.0  ;;  %v2854_v11 = vmul.f32 0.2, %v2116_v1 }
 0x171   :  { %3363 = vst [vmem:[%s6452_s3 + $0x620] sm:$0xff] %v3107_v5  ;;  %vm2469_vm4 = vcmp.gt.f32.partialorder %v1471_v6, 0.0  ;;  %v2725_v12 = vmul.f32 0.2, %v1471_v6  ;;  %vm2597_vm5 = vcmp.gt.f32.partialorder %v2111_v7, 0.0  ;;  %v1486_v16 = vadd.f32 %v5703_v43, %v4063_v8  ;;  %v1480_v18 = vpop.f32.mrb[73].mxu0 }
 0x172   :  { %v2853_v13 = vmul.f32 0.2, %v2111_v7  ;;  %v2982_v14 = vsel %vm2470_vm2, %v1476_v0, %v2726_v10  ;;  %v3110_v15 = vsel %vm2598_vm3, %v2116_v1, %v2854_v11  ;;  %v2126_v17 = vadd.f32 %v5703_v43, %v4255_v9  ;;  %v2120_v19 = vpop.f32.mrb[73].mxu1 }
 0x173   :  { %3238 = vst [vmem:[%s6452_s3 + $0x238] sm:$0xff] %v2982_v14  ;;  %3366 = vst [vmem:[%s6452_s3 + $0x638] sm:$0xff] %v3110_v15  ;;  %v2981_v20 = vsel %vm2469_vm4, %v1471_v6, %v2725_v12  ;;  %v1481_v22 = vadd.f32 %v5703_v43, %v1480_v18  ;;  %v2121_v23 = vadd.f32 %v5703_v43, %v2120_v19  ;;  %v4066_v24 = vpop.f32.mrb[74].mxu0  ;;  %v4258_v25 = vpop.f32.mrb[74].mxu1  ;;  %vm2472_vm6 = vcmp.gt.f32.partialorder %v1486_v16, 0.0 }
 0x174   :  { %v3109_v21 = vsel %vm2597_vm5, %v2111_v7, %v2853_v13  ;;  %3237 = vst [vmem:[%s6452_s3 + $0x230] sm:$0xff] %v2981_v20  ;;  %v2728_v26 = vmul.f32 0.2, %v1486_v16  ;;  %vm2600_vm7 = vcmp.gt.f32.partialorder %v2126_v17, 0.0  ;;  %v2856_v27 = vmul.f32 0.2, %v2126_v17 }
 0x175   :  { %3365 = vst [vmem:[%s6452_s3 + $0x630] sm:$0xff] %v3109_v21  ;;  %vm2471_vm8 = vcmp.gt.f32.partialorder %v1481_v22, 0.0  ;;  %v2727_v29 = vmul.f32 0.2, %v1481_v22  ;;  %vm2599_vm9 = vcmp.gt.f32.partialorder %v2121_v23, 0.0  ;;  %v1496_v33 = vadd.f32 %v5703_v43, %v4066_v24  ;;  %v1490_v35 = vpop.f32.mrb[75].mxu0 }
 0x176   :  { %v2855_v30 = vmul.f32 0.2, %v2121_v23  ;;  %v2984_v31 = vsel %vm2472_vm6, %v1486_v16, %v2728_v26  ;;  %v3112_v32 = vsel %vm2600_vm7, %v2126_v17, %v2856_v27  ;;  %v2136_v34 = vadd.f32 %v5703_v43, %v4258_v25  ;;  %v2130_v36 = vpop.f32.mrb[75].mxu1  ;;  %v6052_v7 = vld [vmem:[%s6451_s2] ss:$0 sm:$0xff] }
 0x177   :  { %3240 = vst [vmem:[%s6452_s3 + $0x248] sm:$0xff] %v2984_v31  ;;  %3368 = vst [vmem:[%s6452_s3 + $0x648] sm:$0xff] %v3112_v32  ;;  %v2983_v37 = vsel %vm2471_vm8, %v1481_v22, %v2727_v29  ;;  %v1491_v39 = vadd.f32 %v5703_v43, %v1490_v35  ;;  %v2131_v40 = vadd.f32 %v5703_v43, %v2130_v36  ;;  %v4069_v41 = vpop.f32.mrb[76].mxu0  ;;  %v4261_v42 = vpop.f32.mrb[76].mxu1  ;;  %vm2474_vm10 = vcmp.gt.f32.partialorder %v1496_v33, 0.0 }
 0x178   :  { %v3111_v38 = vsel %vm2599_vm9, %v2121_v23, %v2855_v30  ;;  %3239 = vst [vmem:[%s6452_s3 + $0x240] sm:$0xff] %v2983_v37  ;;  %v2730_v28 = vmul.f32 0.2, %v1496_v33  ;;  %vm2602_vm11 = vcmp.gt.f32.partialorder %v2136_v34, 0.0  ;;  %v2858_v44 = vmul.f32 0.2, %v2136_v34 }
 0x179   :  { %3367 = vst [vmem:[%s6452_s3 + $0x640] sm:$0xff] %v3111_v38  ;;  %vm2473_vm12 = vcmp.gt.f32.partialorder %v1491_v39, 0.0  ;;  %v2729_v45 = vmul.f32 0.2, %v1491_v39  ;;  %vm2601_vm13 = vcmp.gt.f32.partialorder %v2131_v40, 0.0  ;;  %v1506_v49 = vadd.f32 %v5703_v43, %v4069_v41  ;;  %v1500_v51 = vpop.f32.mrb[77].mxu0 }
 0x17a   :  { %v2857_v46 = vmul.f32 0.2, %v2131_v40  ;;  %v2986_v47 = vsel %vm2474_vm10, %v1496_v33, %v2730_v28  ;;  %v3114_v48 = vsel %vm2602_vm11, %v2136_v34, %v2858_v44  ;;  %v2146_v50 = vadd.f32 %v5703_v43, %v4261_v42  ;;  %v2140_v52 = vpop.f32.mrb[77].mxu1 }
 0x17b   :  { %3242 = vst [vmem:[%s6452_s3 + $0x258] sm:$0xff] %v2986_v47  ;;  %3370 = vst [vmem:[%s6452_s3 + $0x658] sm:$0xff] %v3114_v48  ;;  %v2985_v53 = vsel %vm2473_vm12, %v1491_v39, %v2729_v45  ;;  %v1501_v55 = vadd.f32 %v5703_v43, %v1500_v51  ;;  %v2141_v56 = vadd.f32 %v5703_v43, %v2140_v52  ;;  %v4072_v57 = vpop.f32.mrb[78].mxu0  ;;  %v4264_v58 = vpop.f32.mrb[78].mxu1  ;;  %vm2476_vm1 = vcmp.gt.f32.partialorder %v1506_v49, 0.0 }
 0x17c   :  { %v3113_v54 = vsel %vm2601_vm13, %v2131_v40, %v2857_v46  ;;  %3241 = vst [vmem:[%s6452_s3 + $0x250] sm:$0xff] %v2985_v53  ;;  %v2732_v59 = vmul.f32 0.2, %v1506_v49  ;;  %vm2604_vm14 = vcmp.gt.f32.partialorder %v2146_v50, 0.0  ;;  %v2860_v60 = vmul.f32 0.2, %v2146_v50 }
 0x17d   :  { %3369 = vst [vmem:[%s6452_s3 + $0x650] sm:$0xff] %v3113_v54  ;;  %vm2475_vm15 = vcmp.gt.f32.partialorder %v1501_v55, 0.0  ;;  %v2731_v61 = vmul.f32 0.2, %v1501_v55  ;;  %vm2603_vm0 = vcmp.gt.f32.partialorder %v2141_v56, 0.0  ;;  %v1516_v1 = vadd.f32 %v5703_v43, %v4072_v57  ;;  %v1510_v3 = vpop.f32.mrb[79].mxu0 }
 0x17e   :  { %v2859_v62 = vmul.f32 0.2, %v2141_v56  ;;  %v2988_v63 = vsel %vm2476_vm1, %v1506_v49, %v2732_v59  ;;  %v3116_v0 = vsel %vm2604_vm14, %v2146_v50, %v2860_v60  ;;  %v2156_v2 = vadd.f32 %v5703_v43, %v4264_v58  ;;  %v2150_v4 = vpop.f32.mrb[79].mxu1 }
 0x17f   :  { %3244 = vst [vmem:[%s6452_s3 + $0x268] sm:$0xff] %v2988_v63  ;;  %3372 = vst [vmem:[%s6452_s3 + $0x668] sm:$0xff] %v3116_v0  ;;  %v2987_v5 = vsel %vm2475_vm15, %v1501_v55, %v2731_v61  ;;  %v1511_v8 = vadd.f32 %v6052_v7, %v1510_v3  ;;  %v2151_v43 = vadd.f32 %v6052_v7, %v2150_v4  ;;  %v4075_v9 = vpop.f32.mrb[80].mxu0  ;;  %v4267_v10 = vpop.f32.mrb[80].mxu1  ;;  %vm2478_vm2 = vcmp.gt.f32.partialorder %v1516_v1, 0.0 }
 0x180   :  { %v3115_v6 = vsel %vm2603_vm0, %v2141_v56, %v2859_v62  ;;  %3243 = vst [vmem:[%s6452_s3 + $0x260] sm:$0xff] %v2987_v5  ;;  %v2734_v11 = vmul.f32 0.2, %v1516_v1  ;;  %vm2606_vm3 = vcmp.gt.f32.partialorder %v2156_v2, 0.0  ;;  %v2862_v12 = vmul.f32 0.2, %v2156_v2 }
 0x181   :  { %3371 = vst [vmem:[%s6452_s3 + $0x660] sm:$0xff] %v3115_v6  ;;  %vm2477_vm4 = vcmp.gt.f32.partialorder %v1511_v8, 0.0  ;;  %v2733_v13 = vmul.f32 0.2, %v1511_v8  ;;  %vm2605_vm5 = vcmp.gt.f32.partialorder %v2151_v43, 0.0  ;;  %v1526_v17 = vadd.f32 %v6052_v7, %v4075_v9  ;;  %v1520_v19 = vpop.f32.mrb[81].mxu0 }
 0x182   :  { %v2861_v14 = vmul.f32 0.2, %v2151_v43  ;;  %v2990_v15 = vsel %vm2478_vm2, %v1516_v1, %v2734_v11  ;;  %v3118_v16 = vsel %vm2606_vm3, %v2156_v2, %v2862_v12  ;;  %v2166_v18 = vadd.f32 %v6052_v7, %v4267_v10  ;;  %v2160_v20 = vpop.f32.mrb[81].mxu1 }
 0x183   :  { %3246 = vst [vmem:[%s6452_s3 + $0x278] sm:$0xff] %v2990_v15  ;;  %3374 = vst [vmem:[%s6452_s3 + $0x678] sm:$0xff] %v3118_v16  ;;  %v2989_v21 = vsel %vm2477_vm4, %v1511_v8, %v2733_v13  ;;  %v1521_v23 = vadd.f32 %v6052_v7, %v1520_v19  ;;  %v2161_v24 = vadd.f32 %v6052_v7, %v2160_v20  ;;  %v4078_v25 = vpop.f32.mrb[82].mxu0  ;;  %v4270_v26 = vpop.f32.mrb[82].mxu1  ;;  %vm2480_vm6 = vcmp.gt.f32.partialorder %v1526_v17, 0.0 }
 0x184   :  { %v3117_v22 = vsel %vm2605_vm5, %v2151_v43, %v2861_v14  ;;  %3245 = vst [vmem:[%s6452_s3 + $0x270] sm:$0xff] %v2989_v21  ;;  %v2736_v27 = vmul.f32 0.2, %v1526_v17  ;;  %vm2608_vm7 = vcmp.gt.f32.partialorder %v2166_v18, 0.0  ;;  %v2864_v29 = vmul.f32 0.2, %v2166_v18 }
 0x185   :  { %3373 = vst [vmem:[%s6452_s3 + $0x670] sm:$0xff] %v3117_v22  ;;  %vm2479_vm8 = vcmp.gt.f32.partialorder %v1521_v23, 0.0  ;;  %v2735_v30 = vmul.f32 0.2, %v1521_v23  ;;  %vm2607_vm9 = vcmp.gt.f32.partialorder %v2161_v24, 0.0  ;;  %v1536_v34 = vadd.f32 %v6052_v7, %v4078_v25  ;;  %v1530_v36 = vpop.f32.mrb[83].mxu0 }
 0x186   :  { %v2863_v31 = vmul.f32 0.2, %v2161_v24  ;;  %v2992_v32 = vsel %vm2480_vm6, %v1526_v17, %v2736_v27  ;;  %v3120_v33 = vsel %vm2608_vm7, %v2166_v18, %v2864_v29  ;;  %v2176_v35 = vadd.f32 %v6052_v7, %v4270_v26  ;;  %v2170_v37 = vpop.f32.mrb[83].mxu1 }
 0x187   :  { %3248 = vst [vmem:[%s6452_s3 + $0x288] sm:$0xff] %v2992_v32  ;;  %3376 = vst [vmem:[%s6452_s3 + $0x688] sm:$0xff] %v3120_v33  ;;  %v2991_v38 = vsel %vm2479_vm8, %v1521_v23, %v2735_v30  ;;  %v1531_v40 = vadd.f32 %v6052_v7, %v1530_v36  ;;  %v2171_v41 = vadd.f32 %v6052_v7, %v2170_v37  ;;  %v4081_v42 = vpop.f32.mrb[84].mxu0  ;;  %v4273_v28 = vpop.f32.mrb[84].mxu1  ;;  %vm2482_vm10 = vcmp.gt.f32.partialorder %v1536_v34, 0.0 }
 0x188   :  { %v3119_v39 = vsel %vm2607_vm9, %v2161_v24, %v2863_v31  ;;  %3247 = vst [vmem:[%s6452_s3 + $0x280] sm:$0xff] %v2991_v38  ;;  %v2738_v44 = vmul.f32 0.2, %v1536_v34  ;;  %vm2610_vm11 = vcmp.gt.f32.partialorder %v2176_v35, 0.0  ;;  %v2866_v45 = vmul.f32 0.2, %v2176_v35 }
 0x189   :  { %3375 = vst [vmem:[%s6452_s3 + $0x680] sm:$0xff] %v3119_v39  ;;  %vm2481_vm12 = vcmp.gt.f32.partialorder %v1531_v40, 0.0  ;;  %v2737_v46 = vmul.f32 0.2, %v1531_v40  ;;  %vm2609_vm13 = vcmp.gt.f32.partialorder %v2171_v41, 0.0  ;;  %v1546_v50 = vadd.f32 %v6052_v7, %v4081_v42  ;;  %v1540_v52 = vpop.f32.mrb[85].mxu0 }
 0x18a   :  { %v2865_v47 = vmul.f32 0.2, %v2171_v41  ;;  %v2994_v48 = vsel %vm2482_vm10, %v1536_v34, %v2738_v44  ;;  %v3122_v49 = vsel %vm2610_vm11, %v2176_v35, %v2866_v45  ;;  %v2186_v51 = vadd.f32 %v6052_v7, %v4273_v28  ;;  %v2180_v53 = vpop.f32.mrb[85].mxu1 }
 0x18b   :  { %3250 = vst [vmem:[%s6452_s3 + $0x298] sm:$0xff] %v2994_v48  ;;  %3378 = vst [vmem:[%s6452_s3 + $0x698] sm:$0xff] %v3122_v49  ;;  %v2993_v54 = vsel %vm2481_vm12, %v1531_v40, %v2737_v46  ;;  %v1541_v56 = vadd.f32 %v6052_v7, %v1540_v52  ;;  %v2181_v57 = vadd.f32 %v6052_v7, %v2180_v53  ;;  %v4084_v58 = vpop.f32.mrb[86].mxu0  ;;  %v4276_v59 = vpop.f32.mrb[86].mxu1  ;;  %vm2484_vm1 = vcmp.gt.f32.partialorder %v1546_v50, 0.0 }
 0x18c   :  { %v3121_v55 = vsel %vm2609_vm13, %v2171_v41, %v2865_v47  ;;  %3249 = vst [vmem:[%s6452_s3 + $0x290] sm:$0xff] %v2993_v54  ;;  %v2740_v60 = vmul.f32 0.2, %v1546_v50  ;;  %vm2612_vm14 = vcmp.gt.f32.partialorder %v2186_v51, 0.0  ;;  %v2868_v61 = vmul.f32 0.2, %v2186_v51 }
 0x18d   :  { %3377 = vst [vmem:[%s6452_s3 + $0x690] sm:$0xff] %v3121_v55  ;;  %vm2483_vm15 = vcmp.gt.f32.partialorder %v1541_v56, 0.0  ;;  %v2739_v62 = vmul.f32 0.2, %v1541_v56  ;;  %vm2611_vm0 = vcmp.gt.f32.partialorder %v2181_v57, 0.0  ;;  %v1556_v2 = vadd.f32 %v6052_v7, %v4084_v58  ;;  %v1550_v4 = vpop.f32.mrb[87].mxu0 }
 0x18e   :  { %v2867_v63 = vmul.f32 0.2, %v2181_v57  ;;  %v2996_v0 = vsel %vm2484_vm1, %v1546_v50, %v2740_v60  ;;  %v3124_v1 = vsel %vm2612_vm14, %v2186_v51, %v2868_v61  ;;  %v2196_v3 = vadd.f32 %v6052_v7, %v4276_v59  ;;  %v2190_v5 = vpop.f32.mrb[87].mxu1 }
 0x18f   :  { %3252 = vst [vmem:[%s6452_s3 + $0x2a8] sm:$0xff] %v2996_v0  ;;  %3380 = vst [vmem:[%s6452_s3 + $0x6a8] sm:$0xff] %v3124_v1  ;;  %v2995_v6 = vsel %vm2483_vm15, %v1541_v56, %v2739_v62  ;;  %v1551_v43 = vadd.f32 %v6052_v7, %v1550_v4  ;;  %v2191_v9 = vadd.f32 %v6052_v7, %v2190_v5  ;;  %v4087_v10 = vpop.f32.mrb[88].mxu0  ;;  %v4279_v11 = vpop.f32.mrb[88].mxu1  ;;  %vm2486_vm2 = vcmp.gt.f32.partialorder %v1556_v2, 0.0 }
 0x190   :  { %v3123_v8 = vsel %vm2611_vm0, %v2181_v57, %v2867_v63  ;;  %3251 = vst [vmem:[%s6452_s3 + $0x2a0] sm:$0xff] %v2995_v6  ;;  %v2742_v12 = vmul.f32 0.2, %v1556_v2  ;;  %vm2614_vm3 = vcmp.gt.f32.partialorder %v2196_v3, 0.0  ;;  %v2870_v13 = vmul.f32 0.2, %v2196_v3 }
 0x191   :  { %3379 = vst [vmem:[%s6452_s3 + $0x6a0] sm:$0xff] %v3123_v8  ;;  %vm2485_vm4 = vcmp.gt.f32.partialorder %v1551_v43, 0.0  ;;  %v2741_v14 = vmul.f32 0.2, %v1551_v43  ;;  %vm2613_vm5 = vcmp.gt.f32.partialorder %v2191_v9, 0.0  ;;  %v1566_v18 = vadd.f32 %v6052_v7, %v4087_v10  ;;  %v1560_v20 = vpop.f32.mrb[89].mxu0 }
 0x192   :  { %v2869_v15 = vmul.f32 0.2, %v2191_v9  ;;  %v2998_v16 = vsel %vm2486_vm2, %v1556_v2, %v2742_v12  ;;  %v3126_v17 = vsel %vm2614_vm3, %v2196_v3, %v2870_v13  ;;  %v2206_v19 = vadd.f32 %v6052_v7, %v4279_v11  ;;  %v2200_v21 = vpop.f32.mrb[89].mxu1 }
 0x193   :  { %3254 = vst [vmem:[%s6452_s3 + $0x2b8] sm:$0xff] %v2998_v16  ;;  %3382 = vst [vmem:[%s6452_s3 + $0x6b8] sm:$0xff] %v3126_v17  ;;  %v2997_v22 = vsel %vm2485_vm4, %v1551_v43, %v2741_v14  ;;  %v1561_v24 = vadd.f32 %v6052_v7, %v1560_v20  ;;  %v2201_v25 = vadd.f32 %v6052_v7, %v2200_v21  ;;  %v4090_v26 = vpop.f32.mrb[90].mxu0  ;;  %v4282_v27 = vpop.f32.mrb[90].mxu1  ;;  %vm2488_vm6 = vcmp.gt.f32.partialorder %v1566_v18, 0.0 }
 0x194   :  { %v3125_v23 = vsel %vm2613_vm5, %v2191_v9, %v2869_v15  ;;  %3253 = vst [vmem:[%s6452_s3 + $0x2b0] sm:$0xff] %v2997_v22  ;;  %v2744_v29 = vmul.f32 0.2, %v1566_v18  ;;  %vm2616_vm7 = vcmp.gt.f32.partialorder %v2206_v19, 0.0  ;;  %v2872_v30 = vmul.f32 0.2, %v2206_v19 }
 0x195   :  { %3381 = vst [vmem:[%s6452_s3 + $0x6b0] sm:$0xff] %v3125_v23  ;;  %vm2487_vm8 = vcmp.gt.f32.partialorder %v1561_v24, 0.0  ;;  %v2743_v31 = vmul.f32 0.2, %v1561_v24  ;;  %vm2615_vm9 = vcmp.gt.f32.partialorder %v2201_v25, 0.0  ;;  %v1576_v35 = vadd.f32 %v6052_v7, %v4090_v26  ;;  %v1570_v37 = vpop.f32.mrb[91].mxu0 }
 0x196   :  { %v2871_v32 = vmul.f32 0.2, %v2201_v25  ;;  %v3000_v33 = vsel %vm2488_vm6, %v1566_v18, %v2744_v29  ;;  %v3128_v34 = vsel %vm2616_vm7, %v2206_v19, %v2872_v30  ;;  %v2216_v36 = vadd.f32 %v6052_v7, %v4282_v27  ;;  %v2210_v38 = vpop.f32.mrb[91].mxu1 }
 0x197   :  { %3256 = vst [vmem:[%s6452_s3 + $0x2c8] sm:$0xff] %v3000_v33  ;;  %3384 = vst [vmem:[%s6452_s3 + $0x6c8] sm:$0xff] %v3128_v34  ;;  %v2999_v39 = vsel %vm2487_vm8, %v1561_v24, %v2743_v31  ;;  %v1571_v41 = vadd.f32 %v6052_v7, %v1570_v37  ;;  %v2211_v42 = vadd.f32 %v6052_v7, %v2210_v38  ;;  %v4093_v28 = vpop.f32.mrb[92].mxu0  ;;  %v4285_v44 = vpop.f32.mrb[92].mxu1  ;;  %vm2490_vm10 = vcmp.gt.f32.partialorder %v1576_v35, 0.0 }
 0x198   :  { %v3127_v40 = vsel %vm2615_vm9, %v2201_v25, %v2871_v32  ;;  %3255 = vst [vmem:[%s6452_s3 + $0x2c0] sm:$0xff] %v2999_v39  ;;  %v2746_v45 = vmul.f32 0.2, %v1576_v35  ;;  %vm2618_vm11 = vcmp.gt.f32.partialorder %v2216_v36, 0.0  ;;  %v2874_v46 = vmul.f32 0.2, %v2216_v36 }
 0x199   :  { %3383 = vst [vmem:[%s6452_s3 + $0x6c0] sm:$0xff] %v3127_v40  ;;  %vm2489_vm12 = vcmp.gt.f32.partialorder %v1571_v41, 0.0  ;;  %v2745_v47 = vmul.f32 0.2, %v1571_v41  ;;  %vm2617_vm13 = vcmp.gt.f32.partialorder %v2211_v42, 0.0  ;;  %v1586_v51 = vadd.f32 %v6052_v7, %v4093_v28  ;;  %v1580_v53 = vpop.f32.mrb[93].mxu0 }
 0x19a   :  { %v2873_v48 = vmul.f32 0.2, %v2211_v42  ;;  %v3002_v49 = vsel %vm2490_vm10, %v1576_v35, %v2746_v45  ;;  %v3130_v50 = vsel %vm2618_vm11, %v2216_v36, %v2874_v46  ;;  %v2226_v52 = vadd.f32 %v6052_v7, %v4285_v44  ;;  %v2220_v54 = vpop.f32.mrb[93].mxu1 }
 0x19b   :  { %3258 = vst [vmem:[%s6452_s3 + $0x2d8] sm:$0xff] %v3002_v49  ;;  %3386 = vst [vmem:[%s6452_s3 + $0x6d8] sm:$0xff] %v3130_v50  ;;  %v3001_v55 = vsel %vm2489_vm12, %v1571_v41, %v2745_v47  ;;  %v1581_v57 = vadd.f32 %v6052_v7, %v1580_v53  ;;  %v2221_v58 = vadd.f32 %v6052_v7, %v2220_v54  ;;  %v4096_v59 = vpop.f32.mrb[94].mxu0  ;;  %v4288_v60 = vpop.f32.mrb[94].mxu1  ;;  %vm2492_vm1 = vcmp.gt.f32.partialorder %v1586_v51, 0.0 }
 0x19c   :  { %v3129_v56 = vsel %vm2617_vm13, %v2211_v42, %v2873_v48  ;;  %3257 = vst [vmem:[%s6452_s3 + $0x2d0] sm:$0xff] %v3001_v55  ;;  %v2748_v61 = vmul.f32 0.2, %v1586_v51  ;;  %vm2620_vm14 = vcmp.gt.f32.partialorder %v2226_v52, 0.0  ;;  %v2876_v62 = vmul.f32 0.2, %v2226_v52 }
 0x19d   :  { %3385 = vst [vmem:[%s6452_s3 + $0x6d0] sm:$0xff] %v3129_v56  ;;  %vm2491_vm15 = vcmp.gt.f32.partialorder %v1581_v57, 0.0  ;;  %v2747_v63 = vmul.f32 0.2, %v1581_v57  ;;  %vm2619_vm0 = vcmp.gt.f32.partialorder %v2221_v58, 0.0  ;;  %v1596_v3 = vadd.f32 %v6052_v7, %v4096_v59  ;;  %v1590_v5 = vpop.f32.mrb[95].mxu0 }
 0x19e   :  { %v2875_v0 = vmul.f32 0.2, %v2221_v58  ;;  %v3004_v1 = vsel %vm2492_vm1, %v1586_v51, %v2748_v61  ;;  %v3132_v2 = vsel %vm2620_vm14, %v2226_v52, %v2876_v62  ;;  %v2236_v4 = vadd.f32 %v6052_v7, %v4288_v60  ;;  %v2230_v6 = vpop.f32.mrb[95].mxu1 }
 0x19f   :  { %3260 = vst [vmem:[%s6452_s3 + $0x2e8] sm:$0xff] %v3004_v1  ;;  %3388 = vst [vmem:[%s6452_s3 + $0x6e8] sm:$0xff] %v3132_v2  ;;  %v3003_v8 = vsel %vm2491_vm15, %v1581_v57, %v2747_v63  ;;  %v1591_v9 = vadd.f32 %v6052_v7, %v1590_v5  ;;  %v2231_v10 = vadd.f32 %v6052_v7, %v2230_v6  ;;  %v4099_v11 = vpop.f32.mrb[96].mxu0  ;;  %v4291_v12 = vpop.f32.mrb[96].mxu1  ;;  %vm2494_vm2 = vcmp.gt.f32.partialorder %v1596_v3, 0.0 }
 0x1a0   :  { %v3131_v43 = vsel %vm2619_vm0, %v2221_v58, %v2875_v0  ;;  %3259 = vst [vmem:[%s6452_s3 + $0x2e0] sm:$0xff] %v3003_v8  ;;  %v2750_v13 = vmul.f32 0.2, %v1596_v3  ;;  %vm2622_vm3 = vcmp.gt.f32.partialorder %v2236_v4, 0.0  ;;  %v2878_v14 = vmul.f32 0.2, %v2236_v4 }
 0x1a1   :  { %3387 = vst [vmem:[%s6452_s3 + $0x6e0] sm:$0xff] %v3131_v43  ;;  %vm2493_vm4 = vcmp.gt.f32.partialorder %v1591_v9, 0.0  ;;  %v2749_v15 = vmul.f32 0.2, %v1591_v9  ;;  %vm2621_vm5 = vcmp.gt.f32.partialorder %v2231_v10, 0.0  ;;  %v1606_v19 = vadd.f32 %v6052_v7, %v4099_v11  ;;  %v1600_v21 = vpop.f32.mrb[97].mxu0 }
 0x1a2   :  { %v2877_v16 = vmul.f32 0.2, %v2231_v10  ;;  %v3006_v17 = vsel %vm2494_vm2, %v1596_v3, %v2750_v13  ;;  %v3134_v18 = vsel %vm2622_vm3, %v2236_v4, %v2878_v14  ;;  %v2246_v20 = vadd.f32 %v6052_v7, %v4291_v12  ;;  %v2240_v22 = vpop.f32.mrb[97].mxu1 }
 0x1a3   :  { %3262 = vst [vmem:[%s6452_s3 + $0x2f8] sm:$0xff] %v3006_v17  ;;  %3390 = vst [vmem:[%s6452_s3 + $0x6f8] sm:$0xff] %v3134_v18  ;;  %v3005_v23 = vsel %vm2493_vm4, %v1591_v9, %v2749_v15  ;;  %v1601_v25 = vadd.f32 %v6052_v7, %v1600_v21  ;;  %v2241_v26 = vadd.f32 %v6052_v7, %v2240_v22  ;;  %v4102_v27 = vpop.f32.mrb[98].mxu0  ;;  %v4294_v29 = vpop.f32.mrb[98].mxu1  ;;  %vm2496_vm6 = vcmp.gt.f32.partialorder %v1606_v19, 0.0 }
 0x1a4   :  { %v3133_v24 = vsel %vm2621_vm5, %v2231_v10, %v2877_v16  ;;  %3261 = vst [vmem:[%s6452_s3 + $0x2f0] sm:$0xff] %v3005_v23  ;;  %v2752_v30 = vmul.f32 0.2, %v1606_v19  ;;  %vm2624_vm7 = vcmp.gt.f32.partialorder %v2246_v20, 0.0  ;;  %v2880_v31 = vmul.f32 0.2, %v2246_v20 }
 0x1a5   :  { %3389 = vst [vmem:[%s6452_s3 + $0x6f0] sm:$0xff] %v3133_v24  ;;  %vm2495_vm8 = vcmp.gt.f32.partialorder %v1601_v25, 0.0  ;;  %v2751_v32 = vmul.f32 0.2, %v1601_v25  ;;  %vm2623_vm9 = vcmp.gt.f32.partialorder %v2241_v26, 0.0  ;;  %v1616_v36 = vadd.f32 %v6052_v7, %v4102_v27  ;;  %v1610_v38 = vpop.f32.mrb[99].mxu0 }
 0x1a6   :  { %v2879_v33 = vmul.f32 0.2, %v2241_v26  ;;  %v3008_v34 = vsel %vm2496_vm6, %v1606_v19, %v2752_v30  ;;  %v3136_v35 = vsel %vm2624_vm7, %v2246_v20, %v2880_v31  ;;  %v2256_v37 = vadd.f32 %v6052_v7, %v4294_v29  ;;  %v2250_v39 = vpop.f32.mrb[99].mxu1 }
 0x1a7   :  { %3264 = vst [vmem:[%s6452_s3 + $0x308] sm:$0xff] %v3008_v34  ;;  %3392 = vst [vmem:[%s6452_s3 + $0x708] sm:$0xff] %v3136_v35  ;;  %v3007_v40 = vsel %vm2495_vm8, %v1601_v25, %v2751_v32  ;;  %v1611_v42 = vadd.f32 %v6052_v7, %v1610_v38  ;;  %v2251_v28 = vadd.f32 %v6052_v7, %v2250_v39  ;;  %v4105_v44 = vpop.f32.mrb[100].mxu0  ;;  %v4297_v45 = vpop.f32.mrb[100].mxu1  ;;  %vm2498_vm10 = vcmp.gt.f32.partialorder %v1616_v36, 0.0 }
 0x1a8   :  { %v3135_v41 = vsel %vm2623_vm9, %v2241_v26, %v2879_v33  ;;  %3263 = vst [vmem:[%s6452_s3 + $0x300] sm:$0xff] %v3007_v40  ;;  %v2754_v46 = vmul.f32 0.2, %v1616_v36  ;;  %vm2626_vm11 = vcmp.gt.f32.partialorder %v2256_v37, 0.0  ;;  %v2882_v47 = vmul.f32 0.2, %v2256_v37 }
 0x1a9   :  { %3391 = vst [vmem:[%s6452_s3 + $0x700] sm:$0xff] %v3135_v41  ;;  %vm2497_vm12 = vcmp.gt.f32.partialorder %v1611_v42, 0.0  ;;  %v2753_v48 = vmul.f32 0.2, %v1611_v42  ;;  %vm2625_vm13 = vcmp.gt.f32.partialorder %v2251_v28, 0.0  ;;  %v1626_v52 = vadd.f32 %v6052_v7, %v4105_v44  ;;  %v1620_v54 = vpop.f32.mrb[101].mxu0 }
 0x1aa   :  { %v2881_v49 = vmul.f32 0.2, %v2251_v28  ;;  %v3010_v50 = vsel %vm2498_vm10, %v1616_v36, %v2754_v46  ;;  %v3138_v51 = vsel %vm2626_vm11, %v2256_v37, %v2882_v47  ;;  %v2266_v53 = vadd.f32 %v6052_v7, %v4297_v45  ;;  %v2260_v55 = vpop.f32.mrb[101].mxu1 }
 0x1ab   :  { %3266 = vst [vmem:[%s6452_s3 + $0x318] sm:$0xff] %v3010_v50  ;;  %3394 = vst [vmem:[%s6452_s3 + $0x718] sm:$0xff] %v3138_v51  ;;  %v3009_v56 = vsel %vm2497_vm12, %v1611_v42, %v2753_v48  ;;  %v1621_v58 = vadd.f32 %v6052_v7, %v1620_v54  ;;  %v2261_v59 = vadd.f32 %v6052_v7, %v2260_v55  ;;  %v4108_v60 = vpop.f32.mrb[102].mxu0  ;;  %v4300_v61 = vpop.f32.mrb[102].mxu1  ;;  %vm2500_vm1 = vcmp.gt.f32.partialorder %v1626_v52, 0.0 }
 0x1ac   :  { %v3137_v57 = vsel %vm2625_vm13, %v2251_v28, %v2881_v49  ;;  %3265 = vst [vmem:[%s6452_s3 + $0x310] sm:$0xff] %v3009_v56  ;;  %v2756_v62 = vmul.f32 0.2, %v1626_v52  ;;  %vm2628_vm14 = vcmp.gt.f32.partialorder %v2266_v53, 0.0  ;;  %v2884_v63 = vmul.f32 0.2, %v2266_v53 }
 0x1ad   :  { %3393 = vst [vmem:[%s6452_s3 + $0x710] sm:$0xff] %v3137_v57  ;;  %vm2499_vm15 = vcmp.gt.f32.partialorder %v1621_v58, 0.0  ;;  %v2755_v0 = vmul.f32 0.2, %v1621_v58  ;;  %vm2627_vm0 = vcmp.gt.f32.partialorder %v2261_v59, 0.0  ;;  %v1636_v4 = vadd.f32 %v6052_v7, %v4108_v60  ;;  %v1630_v6 = vpop.f32.mrb[103].mxu0 }
 0x1ae   :  { %v2883_v1 = vmul.f32 0.2, %v2261_v59  ;;  %v3012_v2 = vsel %vm2500_vm1, %v1626_v52, %v2756_v62  ;;  %v3140_v3 = vsel %vm2628_vm14, %v2266_v53, %v2884_v63  ;;  %v2276_v5 = vadd.f32 %v6052_v7, %v4300_v61  ;;  %v2270_v8 = vpop.f32.mrb[103].mxu1 }
 0x1af   :  { %3268 = vst [vmem:[%s6452_s3 + $0x328] sm:$0xff] %v3012_v2  ;;  %3396 = vst [vmem:[%s6452_s3 + $0x728] sm:$0xff] %v3140_v3  ;;  %v3011_v43 = vsel %vm2499_vm15, %v1621_v58, %v2755_v0  ;;  %v1631_v10 = vadd.f32 %v6052_v7, %v1630_v6  ;;  %v2271_v11 = vadd.f32 %v6052_v7, %v2270_v8  ;;  %v4111_v12 = vpop.f32.mrb[104].mxu0  ;;  %v4303_v13 = vpop.f32.mrb[104].mxu1  ;;  %vm2502_vm2 = vcmp.gt.f32.partialorder %v1636_v4, 0.0 }
 0x1b0   :  { %v3139_v9 = vsel %vm2627_vm0, %v2261_v59, %v2883_v1  ;;  %3267 = vst [vmem:[%s6452_s3 + $0x320] sm:$0xff] %v3011_v43  ;;  %v2758_v14 = vmul.f32 0.2, %v1636_v4  ;;  %vm2630_vm3 = vcmp.gt.f32.partialorder %v2276_v5, 0.0  ;;  %v2886_v15 = vmul.f32 0.2, %v2276_v5 }
 0x1b1   :  { %3395 = vst [vmem:[%s6452_s3 + $0x720] sm:$0xff] %v3139_v9  ;;  %vm2501_vm4 = vcmp.gt.f32.partialorder %v1631_v10, 0.0  ;;  %v2757_v16 = vmul.f32 0.2, %v1631_v10  ;;  %vm2629_vm5 = vcmp.gt.f32.partialorder %v2271_v11, 0.0  ;;  %v1646_v20 = vadd.f32 %v6052_v7, %v4111_v12  ;;  %v1640_v22 = vpop.f32.mrb[105].mxu0 }
 0x1b2   :  { %v2885_v17 = vmul.f32 0.2, %v2271_v11  ;;  %v3014_v18 = vsel %vm2502_vm2, %v1636_v4, %v2758_v14  ;;  %v3142_v19 = vsel %vm2630_vm3, %v2276_v5, %v2886_v15  ;;  %v2286_v21 = vadd.f32 %v6052_v7, %v4303_v13  ;;  %v2280_v23 = vpop.f32.mrb[105].mxu1 }
 0x1b3   :  { %3270 = vst [vmem:[%s6452_s3 + $0x338] sm:$0xff] %v3014_v18  ;;  %3398 = vst [vmem:[%s6452_s3 + $0x738] sm:$0xff] %v3142_v19  ;;  %v3013_v24 = vsel %vm2501_vm4, %v1631_v10, %v2757_v16  ;;  %v1641_v26 = vadd.f32 %v6052_v7, %v1640_v22  ;;  %v2281_v27 = vadd.f32 %v6052_v7, %v2280_v23  ;;  %v4114_v29 = vpop.f32.mrb[106].mxu0  ;;  %v4306_v30 = vpop.f32.mrb[106].mxu1  ;;  %vm2504_vm6 = vcmp.gt.f32.partialorder %v1646_v20, 0.0 }
 0x1b4   :  { %v3141_v25 = vsel %vm2629_vm5, %v2271_v11, %v2885_v17  ;;  %3269 = vst [vmem:[%s6452_s3 + $0x330] sm:$0xff] %v3013_v24  ;;  %v2760_v31 = vmul.f32 0.2, %v1646_v20  ;;  %vm2632_vm7 = vcmp.gt.f32.partialorder %v2286_v21, 0.0  ;;  %v2888_v32 = vmul.f32 0.2, %v2286_v21 }
 0x1b5   :  { %3397 = vst [vmem:[%s6452_s3 + $0x730] sm:$0xff] %v3141_v25  ;;  %vm2503_vm8 = vcmp.gt.f32.partialorder %v1641_v26, 0.0  ;;  %v2759_v33 = vmul.f32 0.2, %v1641_v26  ;;  %vm2631_vm9 = vcmp.gt.f32.partialorder %v2281_v27, 0.0  ;;  %v1656_v37 = vadd.f32 %v6052_v7, %v4114_v29  ;;  %v1650_v39 = vpop.f32.mrb[107].mxu0 }
 0x1b6   :  { %v2887_v34 = vmul.f32 0.2, %v2281_v27  ;;  %v3016_v35 = vsel %vm2504_vm6, %v1646_v20, %v2760_v31  ;;  %v3144_v36 = vsel %vm2632_vm7, %v2286_v21, %v2888_v32  ;;  %v2296_v38 = vadd.f32 %v6052_v7, %v4306_v30  ;;  %v2290_v40 = vpop.f32.mrb[107].mxu1 }
 0x1b7   :  { %3272 = vst [vmem:[%s6452_s3 + $0x348] sm:$0xff] %v3016_v35  ;;  %3400 = vst [vmem:[%s6452_s3 + $0x748] sm:$0xff] %v3144_v36  ;;  %v3015_v41 = vsel %vm2503_vm8, %v1641_v26, %v2759_v33  ;;  %v1651_v28 = vadd.f32 %v6052_v7, %v1650_v39  ;;  %v2291_v44 = vadd.f32 %v6052_v7, %v2290_v40  ;;  %v4117_v45 = vpop.f32.mrb[108].mxu0  ;;  %v4309_v46 = vpop.f32.mrb[108].mxu1  ;;  %vm2506_vm10 = vcmp.gt.f32.partialorder %v1656_v37, 0.0 }
 0x1b8   :  { %v3143_v42 = vsel %vm2631_vm9, %v2281_v27, %v2887_v34  ;;  %3271 = vst [vmem:[%s6452_s3 + $0x340] sm:$0xff] %v3015_v41  ;;  %v2762_v47 = vmul.f32 0.2, %v1656_v37  ;;  %vm2634_vm11 = vcmp.gt.f32.partialorder %v2296_v38, 0.0  ;;  %v2890_v48 = vmul.f32 0.2, %v2296_v38 }
 0x1b9   :  { %3399 = vst [vmem:[%s6452_s3 + $0x740] sm:$0xff] %v3143_v42  ;;  %vm2505_vm12 = vcmp.gt.f32.partialorder %v1651_v28, 0.0  ;;  %v2761_v49 = vmul.f32 0.2, %v1651_v28  ;;  %vm2633_vm13 = vcmp.gt.f32.partialorder %v2291_v44, 0.0  ;;  %v1666_v53 = vadd.f32 %v6052_v7, %v4117_v45  ;;  %v1660_v55 = vpop.f32.mrb[109].mxu0 }
 0x1ba   :  { %v2889_v50 = vmul.f32 0.2, %v2291_v44  ;;  %v3018_v51 = vsel %vm2506_vm10, %v1656_v37, %v2762_v47  ;;  %v3146_v52 = vsel %vm2634_vm11, %v2296_v38, %v2890_v48  ;;  %v2306_v54 = vadd.f32 %v6052_v7, %v4309_v46  ;;  %v2300_v56 = vpop.f32.mrb[109].mxu1 }
 0x1bb   :  { %3274 = vst [vmem:[%s6452_s3 + $0x358] sm:$0xff] %v3018_v51  ;;  %3402 = vst [vmem:[%s6452_s3 + $0x758] sm:$0xff] %v3146_v52  ;;  %v3017_v57 = vsel %vm2505_vm12, %v1651_v28, %v2761_v49  ;;  %v1661_v59 = vadd.f32 %v6052_v7, %v1660_v55  ;;  %v2301_v60 = vadd.f32 %v6052_v7, %v2300_v56  ;;  %v4120_v61 = vpop.f32.mrb[110].mxu0  ;;  %v4312_v62 = vpop.f32.mrb[110].mxu1  ;;  %vm2508_vm1 = vcmp.gt.f32.partialorder %v1666_v53, 0.0 }
 0x1bc   :  { %v3145_v58 = vsel %vm2633_vm13, %v2291_v44, %v2889_v50  ;;  %3273 = vst [vmem:[%s6452_s3 + $0x350] sm:$0xff] %v3017_v57  ;;  %v2764_v63 = vmul.f32 0.2, %v1666_v53  ;;  %vm2636_vm14 = vcmp.gt.f32.partialorder %v2306_v54, 0.0  ;;  %v2892_v0 = vmul.f32 0.2, %v2306_v54 }
 0x1bd   :  { %3401 = vst [vmem:[%s6452_s3 + $0x750] sm:$0xff] %v3145_v58  ;;  %vm2507_vm15 = vcmp.gt.f32.partialorder %v1661_v59, 0.0  ;;  %v2763_v1 = vmul.f32 0.2, %v1661_v59  ;;  %vm2635_vm0 = vcmp.gt.f32.partialorder %v2301_v60, 0.0  ;;  %v1676_v5 = vadd.f32 %v6052_v7, %v4120_v61  ;;  %v1670_v8 = vpop.f32.mrb[111].mxu0 }
 0x1be   :  { %v2891_v2 = vmul.f32 0.2, %v2301_v60  ;;  %v3020_v3 = vsel %vm2508_vm1, %v1666_v53, %v2764_v63  ;;  %v3148_v4 = vsel %vm2636_vm14, %v2306_v54, %v2892_v0  ;;  %v2316_v6 = vadd.f32 %v6052_v7, %v4312_v62  ;;  %v2310_v43 = vpop.f32.mrb[111].mxu1 }
 0x1bf   :  { %3276 = vst [vmem:[%s6452_s3 + $0x368] sm:$0xff] %v3020_v3  ;;  %3404 = vst [vmem:[%s6452_s3 + $0x768] sm:$0xff] %v3148_v4  ;;  %v3019_v9 = vsel %vm2507_vm15, %v1661_v59, %v2763_v1  ;;  %v1671_v11 = vadd.f32 %v6052_v7, %v1670_v8  ;;  %v2311_v12 = vadd.f32 %v6052_v7, %v2310_v43  ;;  %v4123_v13 = vpop.f32.mrb[112].mxu0  ;;  %v4315_v14 = vpop.f32.mrb[112].mxu1  ;;  %vm2510_vm2 = vcmp.gt.f32.partialorder %v1676_v5, 0.0 }
 0x1c0   :  { %v3147_v10 = vsel %vm2635_vm0, %v2301_v60, %v2891_v2  ;;  %3275 = vst [vmem:[%s6452_s3 + $0x360] sm:$0xff] %v3019_v9  ;;  %v2766_v15 = vmul.f32 0.2, %v1676_v5  ;;  %vm2638_vm3 = vcmp.gt.f32.partialorder %v2316_v6, 0.0  ;;  %v2894_v16 = vmul.f32 0.2, %v2316_v6 }
 0x1c1   :  { %3403 = vst [vmem:[%s6452_s3 + $0x760] sm:$0xff] %v3147_v10  ;;  %vm2509_vm4 = vcmp.gt.f32.partialorder %v1671_v11, 0.0  ;;  %v2765_v17 = vmul.f32 0.2, %v1671_v11  ;;  %vm2637_vm5 = vcmp.gt.f32.partialorder %v2311_v12, 0.0  ;;  %v1686_v21 = vadd.f32 %v6052_v7, %v4123_v13  ;;  %v1680_v23 = vpop.f32.mrb[113].mxu0 }
 0x1c2   :  { %v2893_v18 = vmul.f32 0.2, %v2311_v12  ;;  %v3022_v19 = vsel %vm2510_vm2, %v1676_v5, %v2766_v15  ;;  %v3150_v20 = vsel %vm2638_vm3, %v2316_v6, %v2894_v16  ;;  %v2326_v22 = vadd.f32 %v6052_v7, %v4315_v14  ;;  %v2320_v24 = vpop.f32.mrb[113].mxu1 }
 0x1c3   :  { %3278 = vst [vmem:[%s6452_s3 + $0x378] sm:$0xff] %v3022_v19  ;;  %3406 = vst [vmem:[%s6452_s3 + $0x778] sm:$0xff] %v3150_v20  ;;  %v3021_v25 = vsel %vm2509_vm4, %v1671_v11, %v2765_v17  ;;  %v1681_v27 = vadd.f32 %v6052_v7, %v1680_v23  ;;  %v2321_v29 = vadd.f32 %v6052_v7, %v2320_v24  ;;  %v4126_v30 = vpop.f32.mrb[114].mxu0  ;;  %v4318_v31 = vpop.f32.mrb[114].mxu1  ;;  %vm2512_vm6 = vcmp.gt.f32.partialorder %v1686_v21, 0.0 }
 0x1c4   :  { %v3149_v26 = vsel %vm2637_vm5, %v2311_v12, %v2893_v18  ;;  %3277 = vst [vmem:[%s6452_s3 + $0x370] sm:$0xff] %v3021_v25  ;;  %v2768_v32 = vmul.f32 0.2, %v1686_v21  ;;  %vm2640_vm7 = vcmp.gt.f32.partialorder %v2326_v22, 0.0  ;;  %v2896_v33 = vmul.f32 0.2, %v2326_v22 }
 0x1c5   :  { %3405 = vst [vmem:[%s6452_s3 + $0x770] sm:$0xff] %v3149_v26  ;;  %vm2511_vm8 = vcmp.gt.f32.partialorder %v1681_v27, 0.0  ;;  %v2767_v34 = vmul.f32 0.2, %v1681_v27  ;;  %vm2639_vm9 = vcmp.gt.f32.partialorder %v2321_v29, 0.0  ;;  %v1696_v38 = vadd.f32 %v6052_v7, %v4126_v30  ;;  %v1690_v40 = vpop.f32.mrb[115].mxu0 }
 0x1c6   :  { %v2895_v35 = vmul.f32 0.2, %v2321_v29  ;;  %v3024_v36 = vsel %vm2512_vm6, %v1686_v21, %v2768_v32  ;;  %v3152_v37 = vsel %vm2640_vm7, %v2326_v22, %v2896_v33  ;;  %v2336_v39 = vadd.f32 %v6052_v7, %v4318_v31  ;;  %v2330_v41 = vpop.f32.mrb[115].mxu1 }
 0x1c7   :  { %3280 = vst [vmem:[%s6452_s3 + $0x388] sm:$0xff] %v3024_v36  ;;  %3408 = vst [vmem:[%s6452_s3 + $0x788] sm:$0xff] %v3152_v37  ;;  %v3023_v42 = vsel %vm2511_vm8, %v1681_v27, %v2767_v34  ;;  %v1691_v44 = vadd.f32 %v6052_v7, %v1690_v40  ;;  %v2331_v45 = vadd.f32 %v6052_v7, %v2330_v41  ;;  %v4129_v46 = vpop.f32.mrb[116].mxu0  ;;  %v4321_v47 = vpop.f32.mrb[116].mxu1  ;;  %vm2514_vm10 = vcmp.gt.f32.partialorder %v1696_v38, 0.0 }
 0x1c8   :  { %v3151_v28 = vsel %vm2639_vm9, %v2321_v29, %v2895_v35  ;;  %3279 = vst [vmem:[%s6452_s3 + $0x380] sm:$0xff] %v3023_v42  ;;  %v2770_v48 = vmul.f32 0.2, %v1696_v38  ;;  %vm2642_vm11 = vcmp.gt.f32.partialorder %v2336_v39, 0.0  ;;  %v2898_v49 = vmul.f32 0.2, %v2336_v39 }
 0x1c9   :  { %3407 = vst [vmem:[%s6452_s3 + $0x780] sm:$0xff] %v3151_v28  ;;  %vm2513_vm12 = vcmp.gt.f32.partialorder %v1691_v44, 0.0  ;;  %v2769_v50 = vmul.f32 0.2, %v1691_v44  ;;  %vm2641_vm13 = vcmp.gt.f32.partialorder %v2331_v45, 0.0  ;;  %v1706_v54 = vadd.f32 %v6052_v7, %v4129_v46  ;;  %v1700_v56 = vpop.f32.mrb[117].mxu0 }
 0x1ca   :  { %v2897_v51 = vmul.f32 0.2, %v2331_v45  ;;  %v3026_v52 = vsel %vm2514_vm10, %v1696_v38, %v2770_v48  ;;  %v3154_v53 = vsel %vm2642_vm11, %v2336_v39, %v2898_v49  ;;  %v2346_v55 = vadd.f32 %v6052_v7, %v4321_v47  ;;  %v2340_v57 = vpop.f32.mrb[117].mxu1  ;;  %v4354_v38 = vld [vmem:[%s6451_s2] ss:$0 sm:$0xff] }
 0x1cb   :  { %3282 = vst [vmem:[%s6452_s3 + $0x398] sm:$0xff] %v3026_v52  ;;  %3410 = vst [vmem:[%s6452_s3 + $0x798] sm:$0xff] %v3154_v53  ;;  %v3025_v58 = vsel %vm2513_vm12, %v1691_v44, %v2769_v50  ;;  %v1701_v60 = vadd.f32 %v6052_v7, %v1700_v56  ;;  %v2341_v61 = vadd.f32 %v6052_v7, %v2340_v57  ;;  %v4132_v62 = vpop.f32.mrb[118].mxu0  ;;  %v4324_v63 = vpop.f32.mrb[118].mxu1  ;;  %vm2516_vm1 = vcmp.gt.f32.partialorder %v1706_v54, 0.0 }
 0x1cc   :  { %v3153_v59 = vsel %vm2641_vm13, %v2331_v45, %v2897_v51  ;;  %3281 = vst [vmem:[%s6452_s3 + $0x390] sm:$0xff] %v3025_v58  ;;  %v2772_v0 = vmul.f32 0.2, %v1706_v54  ;;  %vm2644_vm14 = vcmp.gt.f32.partialorder %v2346_v55, 0.0  ;;  %v2900_v1 = vmul.f32 0.2, %v2346_v55 }
 0x1cd   :  { %3409 = vst [vmem:[%s6452_s3 + $0x790] sm:$0xff] %v3153_v59  ;;  %vm2515_vm15 = vcmp.gt.f32.partialorder %v1701_v60, 0.0  ;;  %v2771_v2 = vmul.f32 0.2, %v1701_v60  ;;  %vm2643_vm0 = vcmp.gt.f32.partialorder %v2341_v61, 0.0  ;;  %v1716_v6 = vadd.f32 %v6052_v7, %v4132_v62  ;;  %v1710_v43 = vpop.f32.mrb[119].mxu0 }
 0x1ce   :  { %v2899_v3 = vmul.f32 0.2, %v2341_v61  ;;  %v3028_v4 = vsel %vm2516_vm1, %v1706_v54, %v2772_v0  ;;  %v3156_v5 = vsel %vm2644_vm14, %v2346_v55, %v2900_v1  ;;  %v2356_v8 = vadd.f32 %v6052_v7, %v4324_v63  ;;  %v2350_v9 = vpop.f32.mrb[119].mxu1 }
 0x1cf   :  { %3284 = vst [vmem:[%s6452_s3 + $0x3a8] sm:$0xff] %v3028_v4  ;;  %3412 = vst [vmem:[%s6452_s3 + $0x7a8] sm:$0xff] %v3156_v5  ;;  %v3027_v10 = vsel %vm2515_vm15, %v1701_v60, %v2771_v2  ;;  %v1711_v12 = vadd.f32 %v6052_v7, %v1710_v43  ;;  %v2351_v13 = vadd.f32 %v6052_v7, %v2350_v9  ;;  %v4135_v14 = vpop.f32.mrb[120].mxu0  ;;  %v4327_v15 = vpop.f32.mrb[120].mxu1  ;;  %vm2518_vm2 = vcmp.gt.f32.partialorder %v1716_v6, 0.0 }
 0x1d0   :  { %v3155_v11 = vsel %vm2643_vm0, %v2341_v61, %v2899_v3  ;;  %3283 = vst [vmem:[%s6452_s3 + $0x3a0] sm:$0xff] %v3027_v10  ;;  %v2774_v16 = vmul.f32 0.2, %v1716_v6  ;;  %vm2646_vm3 = vcmp.gt.f32.partialorder %v2356_v8, 0.0  ;;  %v2902_v17 = vmul.f32 0.2, %v2356_v8 }
 0x1d1   :  { %3411 = vst [vmem:[%s6452_s3 + $0x7a0] sm:$0xff] %v3155_v11  ;;  %vm2517_vm4 = vcmp.gt.f32.partialorder %v1711_v12, 0.0  ;;  %v2773_v18 = vmul.f32 0.2, %v1711_v12  ;;  %vm2645_vm5 = vcmp.gt.f32.partialorder %v2351_v13, 0.0  ;;  %v1726_v22 = vadd.f32 %v6052_v7, %v4135_v14  ;;  %v1720_v24 = vpop.f32.mrb[121].mxu0 }
 0x1d2   :  { %v2901_v19 = vmul.f32 0.2, %v2351_v13  ;;  %v3030_v20 = vsel %vm2518_vm2, %v1716_v6, %v2774_v16  ;;  %v3158_v21 = vsel %vm2646_vm3, %v2356_v8, %v2902_v17  ;;  %v2366_v23 = vadd.f32 %v6052_v7, %v4327_v15  ;;  %v2360_v25 = vpop.f32.mrb[121].mxu1 }
 0x1d3   :  { %3286 = vst [vmem:[%s6452_s3 + $0x3b8] sm:$0xff] %v3030_v20  ;;  %3414 = vst [vmem:[%s6452_s3 + $0x7b8] sm:$0xff] %v3158_v21  ;;  %v3029_v26 = vsel %vm2517_vm4, %v1711_v12, %v2773_v18  ;;  %v1721_v29 = vadd.f32 %v6052_v7, %v1720_v24  ;;  %v2361_v30 = vadd.f32 %v6052_v7, %v2360_v25  ;;  %v4138_v31 = vpop.f32.mrb[122].mxu0  ;;  %v4330_v32 = vpop.f32.mrb[122].mxu1  ;;  %vm2520_vm6 = vcmp.gt.f32.partialorder %v1726_v22, 0.0 }
 0x1d4   :  { %v3157_v27 = vsel %vm2645_vm5, %v2351_v13, %v2901_v19  ;;  %3285 = vst [vmem:[%s6452_s3 + $0x3b0] sm:$0xff] %v3029_v26  ;;  %v2776_v33 = vmul.f32 0.2, %v1726_v22  ;;  %vm2648_vm7 = vcmp.gt.f32.partialorder %v2366_v23, 0.0  ;;  %v2904_v34 = vmul.f32 0.2, %v2366_v23 }
 0x1d5   :  { %3413 = vst [vmem:[%s6452_s3 + $0x7b0] sm:$0xff] %v3157_v27  ;;  %vm2519_vm8 = vcmp.gt.f32.partialorder %v1721_v29, 0.0  ;;  %v2775_v35 = vmul.f32 0.2, %v1721_v29  ;;  %vm2647_vm9 = vcmp.gt.f32.partialorder %v2361_v30, 0.0  ;;  %v1736_v39 = vadd.f32 %v4354_v38, %v4138_v31  ;;  %v1730_v41 = vpop.f32.mrb[123].mxu0 }
 0x1d6   :  { %v2903_v36 = vmul.f32 0.2, %v2361_v30  ;;  %v3032_v37 = vsel %vm2520_vm6, %v1726_v22, %v2776_v33  ;;  %v3160_v7 = vsel %vm2648_vm7, %v2366_v23, %v2904_v34  ;;  %v2376_v40 = vadd.f32 %v4354_v38, %v4330_v32  ;;  %v2370_v42 = vpop.f32.mrb[123].mxu1 }
 0x1d7   :  { %3288 = vst [vmem:[%s6452_s3 + $0x3c8] sm:$0xff] %v3032_v37  ;;  %3416 = vst [vmem:[%s6452_s3 + $0x7c8] sm:$0xff] %v3160_v7  ;;  %v3031_v28 = vsel %vm2519_vm8, %v1721_v29, %v2775_v35  ;;  %v1731_v45 = vadd.f32 %v4354_v38, %v1730_v41  ;;  %v2371_v46 = vadd.f32 %v4354_v38, %v2370_v42  ;;  %v4141_v47 = vpop.f32.mrb[124].mxu0  ;;  %v4333_v48 = vpop.f32.mrb[124].mxu1  ;;  %vm2522_vm10 = vcmp.gt.f32.partialorder %v1736_v39, 0.0 }
 0x1d8   :  { %v3159_v44 = vsel %vm2647_vm9, %v2361_v30, %v2903_v36  ;;  %3287 = vst [vmem:[%s6452_s3 + $0x3c0] sm:$0xff] %v3031_v28  ;;  %v2778_v49 = vmul.f32 0.2, %v1736_v39  ;;  %vm2650_vm11 = vcmp.gt.f32.partialorder %v2376_v40, 0.0  ;;  %v2906_v50 = vmul.f32 0.2, %v2376_v40 }
 0x1d9   :  { %3415 = vst [vmem:[%s6452_s3 + $0x7c0] sm:$0xff] %v3159_v44  ;;  %vm2521_vm12 = vcmp.gt.f32.partialorder %v1731_v45, 0.0  ;;  %v2777_v51 = vmul.f32 0.2, %v1731_v45  ;;  %vm2649_vm13 = vcmp.gt.f32.partialorder %v2371_v46, 0.0  ;;  %v1746_v55 = vadd.f32 %v4354_v38, %v4141_v47  ;;  %v1740_v57 = vpop.f32.mrb[125].mxu0 }
 0x1da   :  { %v2905_v52 = vmul.f32 0.2, %v2371_v46  ;;  %v3034_v53 = vsel %vm2522_vm10, %v1736_v39, %v2778_v49  ;;  %v3162_v54 = vsel %vm2650_vm11, %v2376_v40, %v2906_v50  ;;  %v2386_v56 = vadd.f32 %v4354_v38, %v4333_v48  ;;  %v2380_v58 = vpop.f32.mrb[125].mxu1 }
 0x1db   :  { %3290 = vst [vmem:[%s6452_s3 + $0x3d8] sm:$0xff] %v3034_v53  ;;  %3418 = vst [vmem:[%s6452_s3 + $0x7d8] sm:$0xff] %v3162_v54  ;;  %v3033_v59 = vsel %vm2521_vm12, %v1731_v45, %v2777_v51  ;;  %v1741_v61 = vadd.f32 %v4354_v38, %v1740_v57  ;;  %v2381_v62 = vadd.f32 %v4354_v38, %v2380_v58  ;;  %v4144_v63 = vpop.f32.mrb[126].mxu0  ;;  %v4336_v0 = vpop.f32.mrb[126].mxu1  ;;  %vm2524_vm1 = vcmp.gt.f32.partialorder %v1746_v55, 0.0 }
 0x1dc   :  { %v3161_v60 = vsel %vm2649_vm13, %v2371_v46, %v2905_v52  ;;  %3289 = vst [vmem:[%s6452_s3 + $0x3d0] sm:$0xff] %v3033_v59  ;;  %v2780_v1 = vmul.f32 0.2, %v1746_v55  ;;  %vm2652_vm14 = vcmp.gt.f32.partialorder %v2386_v56, 0.0  ;;  %v2908_v2 = vmul.f32 0.2, %v2386_v56 }
 0x1dd   :  { %3417 = vst [vmem:[%s6452_s3 + $0x7d0] sm:$0xff] %v3161_v60  ;;  %vm2523_vm15 = vcmp.gt.f32.partialorder %v1741_v61, 0.0  ;;  %v2779_v3 = vmul.f32 0.2, %v1741_v61  ;;  %vm2651_vm0 = vcmp.gt.f32.partialorder %v2381_v62, 0.0  ;;  %v1756_v8 = vadd.f32 %v4354_v38, %v4144_v63  ;;  %v1750_v9 = vpop.f32.mrb[127].mxu0 }
 0x1de   :  { %v2907_v4 = vmul.f32 0.2, %v2381_v62  ;;  %v3036_v5 = vsel %vm2524_vm1, %v1746_v55, %v2780_v1  ;;  %v3164_v6 = vsel %vm2652_vm14, %v2386_v56, %v2908_v2  ;;  %v2396_v43 = vadd.f32 %v4354_v38, %v4336_v0  ;;  %v2390_v10 = vpop.f32.mrb[127].mxu1 }
 0x1df   :  { %3292 = vst [vmem:[%s6452_s3 + $0x3e8] sm:$0xff] %v3036_v5  ;;  %3420 = vst [vmem:[%s6452_s3 + $0x7e8] sm:$0xff] %v3164_v6  ;;  %v3035_v11 = vsel %vm2523_vm15, %v1741_v61, %v2779_v3  ;;  %v1751_v13 = vadd.f32 %v4354_v38, %v1750_v9  ;;  %v2391_v14 = vadd.f32 %v4354_v38, %v2390_v10  ;;  %vm2526_vm2 = vcmp.gt.f32.partialorder %v1756_v8, 0.0 }
 0x1e0   :  { %v3163_v12 = vsel %vm2651_vm0, %v2381_v62, %v2907_v4  ;;  %3291 = vst [vmem:[%s6452_s3 + $0x3e0] sm:$0xff] %v3035_v11  ;;  %v2782_v15 = vmul.f32 0.2, %v1756_v8  ;;  %vm2654_vm3 = vcmp.gt.f32.partialorder %v2396_v43, 0.0  ;;  %v2910_v16 = vmul.f32 0.2, %v2396_v43 }
 0x1e1   :  { %3419 = vst [vmem:[%s6452_s3 + $0x7e0] sm:$0xff] %v3163_v12  ;;  %vm2525_vm4 = vcmp.gt.f32.partialorder %v1751_v13, 0.0  ;;  %v2781_v17 = vmul.f32 0.2, %v1751_v13  ;;  %vm2653_vm5 = vcmp.gt.f32.partialorder %v2391_v14, 0.0 }
 0x1e2   :  { %v2909_v18 = vmul.f32 0.2, %v2391_v14  ;;  %v3038_v19 = vsel %vm2526_vm2, %v1756_v8, %v2782_v15  ;;  %v3166_v20 = vsel %vm2654_vm3, %v2396_v43, %v2910_v16 }
 0x1e3   :  { %3294 = vst [vmem:[%s6452_s3 + $0x3f8] sm:$0xff] %v3038_v19  ;;  %3422 = vst [vmem:[%s6452_s3 + $0x7f8] sm:$0xff] %v3166_v20  ;;  %v3037_v21 = vsel %vm2525_vm4, %v1751_v13, %v2781_v17 }
 0x1e4   :  { %v3165_v22 = vsel %vm2653_vm5, %v2391_v14, %v2909_v18  ;;  %3293 = vst [vmem:[%s6452_s3 + $0x3f0] sm:$0xff] %v3037_v21 }
 0x1e5   :  { %3421 = vst [vmem:[%s6452_s3 + $0x7f0] sm:$0xff] %v3165_v22 }

// kernel: discriminator_forward.5
= control target key start
LH: loop header
LB: loop body
LE: loop exit
PB: predicated region body
PF: predicated region fallthrough
CT: control target
= control target key end

     0   :  { %v1592_v0 = vmov 0.0|0.0   ;;  %vm163_vm0 = vcmask 130048   ;;  %s3773_s1 = inlined_call_operand.vmem [shape: f32[144,128], index: 1, kind: input, shape index: {}]   ;;  %s3774_s0 = inlined_call_operand.vmem [shape: f32[512,144], index: 0, kind: input, shape index: {}]   ;;  %s3775_s2 = inlined_call_operand.vmem [shape: f32[1,128], index: 2, kind: input, shape index: {}]   ;;  %s3776_s3 = inlined_call_operand.vmem [shape: f32[1,128], index: 3, kind: input, shape index: {}]   ;;  %s3777_s4 = inlined_call_operand.vmem [shape: f32[512,128], index: 4, kind: output, shape index: {}]  }
   0x1   :  { %1544 = vmatprep.subr.bf16.mxu0 %v1592_v0  ;;  %v145_v1 = vld [vmem:[%s3773_s1] sm:$0xff]  ;;  %v146_v2 = vld [vmem:[%s3773_s1 + $0x8] sm:$0xff]  ;;  %v147_v3 = vld [vmem:[%s3773_s1 + $0x10] sm:$0xff]  ;;  %1571 = vmatprep.subr.bf16.mxu1 %v1592_v0 }
   0x2   :  { %v1545_v4 = vpack.c.bf16 %v146_v2, %v145_v1  ;;  %v148_v5 = vld [vmem:[%s3773_s1 + $0x18] sm:$0xff]  ;;  %v149_v7 = vld [vmem:[%s3773_s1 + $0x20] sm:$0xff]  ;;  %v150_v8 = vld [vmem:[%s3773_s1 + $0x28] sm:$0xff] }
   0x3   :  { %v1548_v6 = vpack.c.bf16 %v148_v5, %v147_v3  ;;  %v18_v9 = vld [vmem:[%s3774_s0 + $0x8] sm:$0xff]  ;;  %v1551_v10 = vpack.c.bf16 %v150_v8, %v149_v7  ;;  %v151_v11 = vld [vmem:[%s3773_s1 + $0x30] sm:$0xff]  ;;  %v152_v12 = vld [vmem:[%s3773_s1 + $0x38] sm:$0xff] }
   0x4   :  { %1546 = vmatpush1.bf16.msra.mxu0 %v1545_v4  ;;  %1580 = vmatpush1.bf16.msra.mxu1 %v1545_v4  ;;  %v1554_v13 = vpack.c.bf16 %v152_v12, %v151_v11  ;;  %v153_v14 = vld [vmem:[%s3773_s1 + $0x40] sm:$0xff]  ;;  %v154_v15 = vld [vmem:[%s3773_s1 + $0x48] sm:$0xff]  ;;  %v155_v17 = vld [vmem:[%s3773_s1 + $0x50] sm:$0xff] }
   0x5   :  { %1547 = vmatprep.subr.bf16.mxu0 %v1592_v0  ;;  %1572 = vmatprep.subr.bf16.mxu1 %v1592_v0  ;;  %v1557_v16 = vpack.c.bf16 %v154_v15, %v153_v14  ;;  %v156_v18 = vld [vmem:[%s3773_s1 + $0x58] sm:$0xff]  ;;  %v82_v19 = vld [vmem:[%s3774_s0 + $0x208] sm:$0xff]  ;;  %v157_v21 = vld [vmem:[%s3773_s1 + $0x60] sm:$0xff] }
   0x6   :  { %1478 = vmatprep.mubr.msk.f32.mxu0 %vm163_vm0, %v18_v9  ;;  %1510 = vmatprep.mubr.msk.f32.mxu1 %vm163_vm0, %v82_v19  ;;  %v1560_v20 = vpack.c.bf16 %v156_v18, %v155_v17  ;;  %v158_v22 = vld [vmem:[%s3773_s1 + $0x68] sm:$0xff]  ;;  %v159_v24 = vld [vmem:[%s3773_s1 + $0x70] sm:$0xff]  ;;  %v160_v25 = vld [vmem:[%s3773_s1 + $0x78] sm:$0xff] }
   0x7   :  { %v1563_v23 = vpack.c.bf16 %v158_v22, %v157_v21  ;;  %v1566_v26 = vpack.c.bf16 %v160_v25, %v159_v24  ;;  %v161_v27 = vld [vmem:[%s3773_s1 + $0x80] sm:$0xff]  ;;  %v162_v28 = vld [vmem:[%s3773_s1 + $0x88] sm:$0xff]  ;;  %v20_v31 = vld [vmem:[%s3774_s0 + $0x18] sm:$0xff] }
   0x8   :  { %1549 = vmatpush1.bf16.msra.mxu0 %v1548_v6  ;;  %1581 = vmatpush1.bf16.msra.mxu1 %v1548_v6  ;;  %v1569_v29 = vpack.c.bf16 %v162_v28, %v161_v27  ;;  %v17_v30 = vld [vmem:[%s3774_s0] sm:$0xff]  ;;  %v84_v33 = vld [vmem:[%s3774_s0 + $0x218] sm:$0xff]  ;;  %v19_v34 = vld [vmem:[%s3774_s0 + $0x10] sm:$0xff] }
   0x9   :  { %1550 = vmatprep.subr.bf16.mxu0 %v1592_v0  ;;  %1573 = vmatprep.subr.bf16.mxu1 %v1592_v0  ;;  %v81_v32 = vld [vmem:[%s3774_s0 + $0x200] sm:$0xff]  ;;  %v22_v35 = vld [vmem:[%s3774_s0 + $0x28] sm:$0xff]  ;;  %v83_v36 = vld [vmem:[%s3774_s0 + $0x210] sm:$0xff] }
   0xa   :  { %v86_v37 = vld [vmem:[%s3774_s0 + $0x228] sm:$0xff]  ;;  %v21_v38 = vld [vmem:[%s3774_s0 + $0x20] sm:$0xff]  ;;  %v24_v39 = vld [vmem:[%s3774_s0 + $0x38] sm:$0xff] }
   0xb   :  { %v85_v40 = vld [vmem:[%s3774_s0 + $0x220] sm:$0xff]  ;;  %v88_v41 = vld [vmem:[%s3774_s0 + $0x238] sm:$0xff]  ;;  %v23_v42 = vld [vmem:[%s3774_s0 + $0x30] sm:$0xff] }
   0xc   :  { %1552 = vmatpush1.bf16.msra.mxu0 %v1551_v10  ;;  %1582 = vmatpush1.bf16.msra.mxu1 %v1551_v10  ;;  %v26_v43 = vld [vmem:[%s3774_s0 + $0x48] sm:$0xff]  ;;  %v87_v44 = vld [vmem:[%s3774_s0 + $0x230] sm:$0xff]  ;;  %v25_v46 = vld [vmem:[%s3774_s0 + $0x40] sm:$0xff] }
   0xd   :  { %1553 = vmatprep.subr.bf16.mxu0 %v1592_v0  ;;  %1574 = vmatprep.subr.bf16.mxu1 %v1592_v0  ;;  %v90_v45 = vld [vmem:[%s3774_s0 + $0x248] sm:$0xff]  ;;  %v28_v47 = vld [vmem:[%s3774_s0 + $0x58] sm:$0xff]  ;;  %v89_v48 = vld [vmem:[%s3774_s0 + $0x240] sm:$0xff] }
   0xe   :  { %v92_v49 = vld [vmem:[%s3774_s0 + $0x258] sm:$0xff]  ;;  %v27_v50 = vld [vmem:[%s3774_s0 + $0x50] sm:$0xff]  ;;  %v30_v51 = vld [vmem:[%s3774_s0 + $0x68] sm:$0xff] }
   0xf   :  { %v91_v52 = vld [vmem:[%s3774_s0 + $0x250] sm:$0xff]  ;;  %v94_v53 = vld [vmem:[%s3774_s0 + $0x268] sm:$0xff]  ;;  %v29_v54 = vld [vmem:[%s3774_s0 + $0x60] sm:$0xff] }
  0x10   :  { %1555 = vmatpush1.bf16.msra.mxu0 %v1554_v13  ;;  %1583 = vmatpush1.bf16.msra.mxu1 %v1554_v13  ;;  %v32_v55 = vld [vmem:[%s3774_s0 + $0x78] sm:$0xff]  ;;  %v93_v56 = vld [vmem:[%s3774_s0 + $0x260] sm:$0xff]  ;;  %v31_v58 = vld [vmem:[%s3774_s0 + $0x70] sm:$0xff] }
  0x11   :  { %1556 = vmatprep.subr.bf16.mxu0 %v1592_v0  ;;  %1575 = vmatprep.subr.bf16.mxu1 %v1592_v0  ;;  %v96_v57 = vld [vmem:[%s3774_s0 + $0x278] sm:$0xff]  ;;  %v34_v59 = vld [vmem:[%s3774_s0 + $0x88] sm:$0xff]  ;;  %v95_v60 = vld [vmem:[%s3774_s0 + $0x270] sm:$0xff] }
  0x12   :  { %v98_v61 = vld [vmem:[%s3774_s0 + $0x288] sm:$0xff]  ;;  %v33_v62 = vld [vmem:[%s3774_s0 + $0x80] sm:$0xff]  ;;  %v36_v63 = vld [vmem:[%s3774_s0 + $0x98] sm:$0xff] }
  0x13   :  { %v100_v1 = vld [vmem:[%s3774_s0 + $0x298] sm:$0xff]  ;;  %v35_v2 = vld [vmem:[%s3774_s0 + $0x90] sm:$0xff]  ;;  %v38_v3 = vld [vmem:[%s3774_s0 + $0xa8] sm:$0xff] }
  0x14   :  { %1558 = vmatpush1.bf16.msra.mxu0 %v1557_v16  ;;  %1584 = vmatpush1.bf16.msra.mxu1 %v1557_v16  ;;  %v99_v4 = vld [vmem:[%s3774_s0 + $0x290] sm:$0xff]  ;;  %v102_v5 = vld [vmem:[%s3774_s0 + $0x2a8] sm:$0xff]  ;;  %v37_v6 = vld [vmem:[%s3774_s0 + $0xa0] sm:$0xff] }
  0x15   :  { %1559 = vmatprep.subr.bf16.mxu0 %v1592_v0  ;;  %1576 = vmatprep.subr.bf16.mxu1 %v1592_v0  ;;  %v40_v7 = vld [vmem:[%s3774_s0 + $0xb8] sm:$0xff]  ;;  %v101_v8 = vld [vmem:[%s3774_s0 + $0x2a0] sm:$0xff]  ;;  %v39_v10 = vld [vmem:[%s3774_s0 + $0xb0] sm:$0xff] }
  0x16   :  { %v104_v9 = vld [vmem:[%s3774_s0 + $0x2b8] sm:$0xff]  ;;  %v42_v11 = vld [vmem:[%s3774_s0 + $0xc8] sm:$0xff]  ;;  %v103_v12 = vld [vmem:[%s3774_s0 + $0x2b0] sm:$0xff] }
  0x17   :  { %v106_v13 = vld [vmem:[%s3774_s0 + $0x2c8] sm:$0xff]  ;;  %v41_v14 = vld [vmem:[%s3774_s0 + $0xc0] sm:$0xff]  ;;  %v44_v15 = vld [vmem:[%s3774_s0 + $0xd8] sm:$0xff] }
  0x18   :  { %1561 = vmatpush1.bf16.msra.mxu0 %v1560_v20  ;;  %1585 = vmatpush1.bf16.msra.mxu1 %v1560_v20  ;;  %v105_v16 = vld [vmem:[%s3774_s0 + $0x2c0] sm:$0xff]  ;;  %v108_v17 = vld [vmem:[%s3774_s0 + $0x2d8] sm:$0xff]  ;;  %v43_v18 = vld [vmem:[%s3774_s0 + $0xd0] sm:$0xff] }
  0x19   :  { %1562 = vmatprep.subr.bf16.mxu0 %v1592_v0  ;;  %1577 = vmatprep.subr.bf16.mxu1 %v1592_v0  ;;  %v46_v19 = vld [vmem:[%s3774_s0 + $0xe8] sm:$0xff]  ;;  %v107_v20 = vld [vmem:[%s3774_s0 + $0x2d0] sm:$0xff]  ;;  %v45_v22 = vld [vmem:[%s3774_s0 + $0xe0] sm:$0xff] }
  0x1a   :  { %v110_v21 = vld [vmem:[%s3774_s0 + $0x2e8] sm:$0xff]  ;;  %v109_v24 = vld [vmem:[%s3774_s0 + $0x2e0] sm:$0xff]  ;;  %v112_v25 = vld [vmem:[%s3774_s0 + $0x2f8] sm:$0xff] }
  0x1b   :  { %v50_v27 = vld [vmem:[%s3774_s0 + $0x108] sm:$0xff]  ;;  %v111_v28 = vld [vmem:[%s3774_s0 + $0x2f0] sm:$0xff] }
  0x1c   :  { %1564 = vmatpush1.bf16.msra.mxu0 %v1563_v23  ;;  %1586 = vmatpush1.bf16.msra.mxu1 %v1563_v23  ;;  %v48_v23 = vld [vmem:[%s3774_s0 + $0xf8] sm:$0xff] }
  0x1d   :  { %1565 = vmatprep.subr.bf16.mxu0 %v1592_v0  ;;  %1578 = vmatprep.subr.bf16.mxu1 %v1592_v0 }
  0x20   :  { %1567 = vmatpush1.bf16.msra.mxu0 %v1566_v26  ;;  %1587 = vmatpush1.bf16.msra.mxu1 %v1566_v26  ;;  %v47_v26 = vld [vmem:[%s3774_s0 + $0xf0] sm:$0xff] }
  0x21   :  { %1568 = vmatprep.subr.bf16.mxu0 %v1592_v0  ;;  %1579 = vmatprep.subr.bf16.mxu1 %v1592_v0  ;;  %v97_v0 = vld [vmem:[%s3774_s0 + $0x280] sm:$0xff] }
  0x24   :  { %1570 = vmatpush1.bf16.msra.mxu0 %v1569_v29  ;;  %1588 = vmatpush1.bf16.msra.mxu1 %v1569_v29  ;;  %v114_v29 = vld [vmem:[%s3774_s0 + $0x308] sm:$0xff] }
  0x27   :  { %421 = vmatmul.mubr.f32.vlgmr.msra.gmra.mrb[0].mxu0 %v17_v30  ;;  %581 = vmatmul.mubr.f32.vlgmr.msra.gmra.mrb[0].mxu1 %v81_v32  ;;  %v49_v30 = vld [vmem:[%s3774_s0 + $0x100] sm:$0xff] }
  0x28   :  { %1479 = vmatprep.mubr.msk.f32.mxu0 %vm163_vm0, %v20_v31  ;;  %1511 = vmatprep.mubr.msk.f32.mxu1 %vm163_vm0, %v84_v33  ;;  %v52_v31 = vld [vmem:[%s3774_s0 + $0x118] sm:$0xff]  ;;  %v113_v32 = vld [vmem:[%s3774_s0 + $0x300] sm:$0xff] }
  0x29   :  { %v116_v33 = vld [vmem:[%s3774_s0 + $0x318] sm:$0xff] }
  0x2b   :  { %426 = vmatmul.mubr.f32.gmra.mrb[2].mxu0 %v19_v34  ;;  %586 = vmatmul.mubr.f32.gmra.mrb[2].mxu1 %v83_v36  ;;  %v51_v34 = vld [vmem:[%s3774_s0 + $0x110] sm:$0xff] }
  0x2c   :  { %1480 = vmatprep.mubr.msk.f32.mxu0 %vm163_vm0, %v22_v35  ;;  %1512 = vmatprep.mubr.msk.f32.mxu1 %vm163_vm0, %v86_v37  ;;  %v54_v35 = vld [vmem:[%s3774_s0 + $0x128] sm:$0xff]  ;;  %v115_v36 = vld [vmem:[%s3774_s0 + $0x310] sm:$0xff] }
  0x2d   :  { %v118_v37 = vld [vmem:[%s3774_s0 + $0x328] sm:$0xff] }
  0x2f   :  { %431 = vmatmul.mubr.f32.gmra.mrb[4].mxu0 %v21_v38  ;;  %591 = vmatmul.mubr.f32.gmra.mrb[4].mxu1 %v85_v40  ;;  %v53_v38 = vld [vmem:[%s3774_s0 + $0x120] sm:$0xff] }
  0x30   :  { %1481 = vmatprep.mubr.msk.f32.mxu0 %vm163_vm0, %v24_v39  ;;  %1513 = vmatprep.mubr.msk.f32.mxu1 %vm163_vm0, %v88_v41  ;;  %v56_v39 = vld [vmem:[%s3774_s0 + $0x138] sm:$0xff]  ;;  %v117_v40 = vld [vmem:[%s3774_s0 + $0x320] sm:$0xff] }
  0x31   :  { %v120_v41 = vld [vmem:[%s3774_s0 + $0x338] sm:$0xff] }
  0x33   :  { %436 = vmatmul.mubr.f32.gmra.mrb[6].mxu0 %v23_v42  ;;  %596 = vmatmul.mubr.f32.gmra.mrb[6].mxu1 %v87_v44  ;;  %v55_v42 = vld [vmem:[%s3774_s0 + $0x130] sm:$0xff] }
  0x34   :  { %1482 = vmatprep.mubr.msk.f32.mxu0 %vm163_vm0, %v26_v43  ;;  %1514 = vmatprep.mubr.msk.f32.mxu1 %vm163_vm0, %v90_v45  ;;  %v58_v43 = vld [vmem:[%s3774_s0 + $0x148] sm:$0xff]  ;;  %v119_v44 = vld [vmem:[%s3774_s0 + $0x330] sm:$0xff] }
  0x35   :  { %v122_v45 = vld [vmem:[%s3774_s0 + $0x348] sm:$0xff] }
  0x37   :  { %441 = vmatmul.mubr.f32.gmra.mrb[8].mxu0 %v25_v46  ;;  %601 = vmatmul.mubr.f32.gmra.mrb[8].mxu1 %v89_v48  ;;  %v57_v46 = vld [vmem:[%s3774_s0 + $0x140] sm:$0xff] }
  0x38   :  { %1483 = vmatprep.mubr.msk.f32.mxu0 %vm163_vm0, %v28_v47  ;;  %1515 = vmatprep.mubr.msk.f32.mxu1 %vm163_vm0, %v92_v49  ;;  %v60_v47 = vld [vmem:[%s3774_s0 + $0x158] sm:$0xff]  ;;  %v121_v48 = vld [vmem:[%s3774_s0 + $0x340] sm:$0xff] }
  0x39   :  { %v124_v49 = vld [vmem:[%s3774_s0 + $0x358] sm:$0xff] }
  0x3b   :  { %446 = vmatmul.mubr.f32.gmra.mrb[10].mxu0 %v27_v50  ;;  %606 = vmatmul.mubr.f32.gmra.mrb[10].mxu1 %v91_v52  ;;  %v59_v50 = vld [vmem:[%s3774_s0 + $0x150] sm:$0xff] }
  0x3c   :  { %1484 = vmatprep.mubr.msk.f32.mxu0 %vm163_vm0, %v30_v51  ;;  %1516 = vmatprep.mubr.msk.f32.mxu1 %vm163_vm0, %v94_v53  ;;  %v62_v51 = vld [vmem:[%s3774_s0 + $0x168] sm:$0xff]  ;;  %v123_v52 = vld [vmem:[%s3774_s0 + $0x350] sm:$0xff] }
  0x3d   :  { %v126_v53 = vld [vmem:[%s3774_s0 + $0x368] sm:$0xff] }
  0x3f   :  { %451 = vmatmul.mubr.f32.gmra.mrb[12].mxu0 %v29_v54  ;;  %611 = vmatmul.mubr.f32.gmra.mrb[12].mxu1 %v93_v56  ;;  %v61_v54 = vld [vmem:[%s3774_s0 + $0x160] sm:$0xff] }
  0x40   :  { %1485 = vmatprep.mubr.msk.f32.mxu0 %vm163_vm0, %v32_v55  ;;  %1517 = vmatprep.mubr.msk.f32.mxu1 %vm163_vm0, %v96_v57  ;;  %v64_v55 = vld [vmem:[%s3774_s0 + $0x178] sm:$0xff]  ;;  %v125_v56 = vld [vmem:[%s3774_s0 + $0x360] sm:$0xff] }
  0x41   :  { %v128_v57 = vld [vmem:[%s3774_s0 + $0x378] sm:$0xff] }
  0x43   :  { %456 = vmatmul.mubr.f32.gmra.mrb[14].mxu0 %v31_v58  ;;  %616 = vmatmul.mubr.f32.gmra.mrb[14].mxu1 %v95_v60  ;;  %v63_v58 = vld [vmem:[%s3774_s0 + $0x170] sm:$0xff] }
  0x44   :  { %1486 = vmatprep.mubr.msk.f32.mxu0 %vm163_vm0, %v34_v59  ;;  %1518 = vmatprep.mubr.msk.f32.mxu1 %vm163_vm0, %v98_v61  ;;  %v66_v59 = vld [vmem:[%s3774_s0 + $0x188] sm:$0xff]  ;;  %v127_v60 = vld [vmem:[%s3774_s0 + $0x370] sm:$0xff] }
  0x45   :  { %v130_v61 = vld [vmem:[%s3774_s0 + $0x388] sm:$0xff] }
  0x47   :  { %461 = vmatmul.mubr.f32.gmra.mrb[16].mxu0 %v33_v62  ;;  %621 = vmatmul.mubr.f32.gmra.mrb[16].mxu1 %v97_v0  ;;  %v65_v62 = vld [vmem:[%s3774_s0 + $0x180] sm:$0xff] }
  0x48   :  { %1487 = vmatprep.mubr.msk.f32.mxu0 %vm163_vm0, %v36_v63  ;;  %1519 = vmatprep.mubr.msk.f32.mxu1 %vm163_vm0, %v100_v1  ;;  %v68_v63 = vld [vmem:[%s3774_s0 + $0x198] sm:$0xff]  ;;  %v129_v0 = vld [vmem:[%s3774_s0 + $0x380] sm:$0xff] }
  0x49   :  { %v132_v1 = vld [vmem:[%s3774_s0 + $0x398] sm:$0xff] }
  0x4b   :  { %466 = vmatmul.mubr.f32.gmra.mrb[18].mxu0 %v35_v2  ;;  %626 = vmatmul.mubr.f32.gmra.mrb[18].mxu1 %v99_v4  ;;  %v67_v2 = vld [vmem:[%s3774_s0 + $0x190] sm:$0xff] }
  0x4c   :  { %1488 = vmatprep.mubr.msk.f32.mxu0 %vm163_vm0, %v38_v3  ;;  %1520 = vmatprep.mubr.msk.f32.mxu1 %vm163_vm0, %v102_v5  ;;  %v70_v3 = vld [vmem:[%s3774_s0 + $0x1a8] sm:$0xff]  ;;  %v131_v4 = vld [vmem:[%s3774_s0 + $0x390] sm:$0xff] }
  0x4d   :  { %v134_v5 = vld [vmem:[%s3774_s0 + $0x3a8] sm:$0xff] }
  0x4f   :  { %471 = vmatmul.mubr.f32.gmra.mrb[20].mxu0 %v37_v6  ;;  %631 = vmatmul.mubr.f32.gmra.mrb[20].mxu1 %v101_v8  ;;  %v69_v6 = vld [vmem:[%s3774_s0 + $0x1a0] sm:$0xff] }
  0x50   :  { %1489 = vmatprep.mubr.msk.f32.mxu0 %vm163_vm0, %v40_v7  ;;  %1521 = vmatprep.mubr.msk.f32.mxu1 %vm163_vm0, %v104_v9  ;;  %v72_v7 = vld [vmem:[%s3774_s0 + $0x1b8] sm:$0xff]  ;;  %v133_v8 = vld [vmem:[%s3774_s0 + $0x3a0] sm:$0xff] }
  0x51   :  { %v136_v9 = vld [vmem:[%s3774_s0 + $0x3b8] sm:$0xff] }
  0x53   :  { %476 = vmatmul.mubr.f32.gmra.mrb[22].mxu0 %v39_v10  ;;  %636 = vmatmul.mubr.f32.gmra.mrb[22].mxu1 %v103_v12  ;;  %v71_v10 = vld [vmem:[%s3774_s0 + $0x1b0] sm:$0xff] }
  0x54   :  { %1490 = vmatprep.mubr.msk.f32.mxu0 %vm163_vm0, %v42_v11  ;;  %1522 = vmatprep.mubr.msk.f32.mxu1 %vm163_vm0, %v106_v13  ;;  %v74_v11 = vld [vmem:[%s3774_s0 + $0x1c8] sm:$0xff]  ;;  %v135_v12 = vld [vmem:[%s3774_s0 + $0x3b0] sm:$0xff] }
  0x55   :  { %v138_v13 = vld [vmem:[%s3774_s0 + $0x3c8] sm:$0xff] }
  0x57   :  { %481 = vmatmul.mubr.f32.gmra.mrb[24].mxu0 %v41_v14  ;;  %641 = vmatmul.mubr.f32.gmra.mrb[24].mxu1 %v105_v16  ;;  %v73_v14 = vld [vmem:[%s3774_s0 + $0x1c0] sm:$0xff] }
  0x58   :  { %1491 = vmatprep.mubr.msk.f32.mxu0 %vm163_vm0, %v44_v15  ;;  %1523 = vmatprep.mubr.msk.f32.mxu1 %vm163_vm0, %v108_v17  ;;  %v76_v15 = vld [vmem:[%s3774_s0 + $0x1d8] sm:$0xff]  ;;  %v137_v16 = vld [vmem:[%s3774_s0 + $0x3c0] sm:$0xff] }
  0x59   :  { %v140_v17 = vld [vmem:[%s3774_s0 + $0x3d8] sm:$0xff] }
  0x5b   :  { %486 = vmatmul.mubr.f32.gmra.mrb[26].mxu0 %v43_v18  ;;  %646 = vmatmul.mubr.f32.gmra.mrb[26].mxu1 %v107_v20  ;;  %v75_v18 = vld [vmem:[%s3774_s0 + $0x1d0] sm:$0xff] }
  0x5c   :  { %1492 = vmatprep.mubr.msk.f32.mxu0 %vm163_vm0, %v46_v19  ;;  %1524 = vmatprep.mubr.msk.f32.mxu1 %vm163_vm0, %v110_v21  ;;  %v78_v19 = vld [vmem:[%s3774_s0 + $0x1e8] sm:$0xff]  ;;  %v139_v20 = vld [vmem:[%s3774_s0 + $0x3d0] sm:$0xff] }
  0x5d   :  { %v142_v21 = vld [vmem:[%s3774_s0 + $0x3e8] sm:$0xff] }
  0x5f   :  { %491 = vmatmul.mubr.f32.gmra.mrb[28].mxu0 %v45_v22  ;;  %651 = vmatmul.mubr.f32.gmra.mrb[28].mxu1 %v109_v24  ;;  %v77_v22 = vld [vmem:[%s3774_s0 + $0x1e0] sm:$0xff] }
  0x60   :  { %1493 = vmatprep.mubr.msk.f32.mxu0 %vm163_vm0, %v48_v23  ;;  %1525 = vmatprep.mubr.msk.f32.mxu1 %vm163_vm0, %v112_v25  ;;  %v80_v23 = vld [vmem:[%s3774_s0 + $0x1f8] sm:$0xff]  ;;  %v141_v24 = vld [vmem:[%s3774_s0 + $0x3e0] sm:$0xff] }
  0x61   :  { %v144_v25 = vld [vmem:[%s3774_s0 + $0x3f8] sm:$0xff] }
  0x63   :  { %496 = vmatmul.mubr.f32.gmra.mrb[30].mxu0 %v47_v26  ;;  %656 = vmatmul.mubr.f32.gmra.mrb[30].mxu1 %v111_v28  ;;  %v79_v26 = vld [vmem:[%s3774_s0 + $0x1f0] sm:$0xff] }
  0x64   :  { %1494 = vmatprep.mubr.msk.f32.mxu0 %vm163_vm0, %v50_v27  ;;  %1526 = vmatprep.mubr.msk.f32.mxu1 %vm163_vm0, %v114_v29  ;;  %v143_v27 = vld [vmem:[%s3774_s0 + $0x3f0] sm:$0xff] }
  0x67   :  { %501 = vmatmul.mubr.f32.gmra.mrb[32].mxu0 %v49_v30  ;;  %661 = vmatmul.mubr.f32.gmra.mrb[32].mxu1 %v113_v32 }
  0x68   :  { %1495 = vmatprep.mubr.msk.f32.mxu0 %vm163_vm0, %v52_v31  ;;  %1527 = vmatprep.mubr.msk.f32.mxu1 %vm163_vm0, %v116_v33 }
  0x6b   :  { %506 = vmatmul.mubr.f32.gmra.mrb[34].mxu0 %v51_v34  ;;  %666 = vmatmul.mubr.f32.gmra.mrb[34].mxu1 %v115_v36 }
  0x6c   :  { %1496 = vmatprep.mubr.msk.f32.mxu0 %vm163_vm0, %v54_v35  ;;  %1528 = vmatprep.mubr.msk.f32.mxu1 %vm163_vm0, %v118_v37 }
  0x6f   :  { %511 = vmatmul.mubr.f32.gmra.mrb[36].mxu0 %v53_v38  ;;  %671 = vmatmul.mubr.f32.gmra.mrb[36].mxu1 %v117_v40 }
  0x70   :  { %1497 = vmatprep.mubr.msk.f32.mxu0 %vm163_vm0, %v56_v39  ;;  %1529 = vmatprep.mubr.msk.f32.mxu1 %vm163_vm0, %v120_v41 }
  0x73   :  { %516 = vmatmul.mubr.f32.gmra.mrb[38].mxu0 %v55_v42  ;;  %676 = vmatmul.mubr.f32.gmra.mrb[38].mxu1 %v119_v44 }
  0x74   :  { %1498 = vmatprep.mubr.msk.f32.mxu0 %vm163_vm0, %v58_v43  ;;  %1530 = vmatprep.mubr.msk.f32.mxu1 %vm163_vm0, %v122_v45 }
  0x77   :  { %521 = vmatmul.mubr.f32.gmra.mrb[40].mxu0 %v57_v46  ;;  %681 = vmatmul.mubr.f32.gmra.mrb[40].mxu1 %v121_v48 }
  0x78   :  { %1499 = vmatprep.mubr.msk.f32.mxu0 %vm163_vm0, %v60_v47  ;;  %1531 = vmatprep.mubr.msk.f32.mxu1 %vm163_vm0, %v124_v49 }
  0x7b   :  { %526 = vmatmul.mubr.f32.gmra.mrb[42].mxu0 %v59_v50  ;;  %686 = vmatmul.mubr.f32.gmra.mrb[42].mxu1 %v123_v52 }
  0x7c   :  { %1500 = vmatprep.mubr.msk.f32.mxu0 %vm163_vm0, %v62_v51  ;;  %1532 = vmatprep.mubr.msk.f32.mxu1 %vm163_vm0, %v126_v53 }
  0x7f   :  { %531 = vmatmul.mubr.f32.gmra.mrb[44].mxu0 %v61_v54  ;;  %691 = vmatmul.mubr.f32.gmra.mrb[44].mxu1 %v125_v56 }
  0x80   :  { %1501 = vmatprep.mubr.msk.f32.mxu0 %vm163_vm0, %v64_v55  ;;  %1533 = vmatprep.mubr.msk.f32.mxu1 %vm163_vm0, %v128_v57 }
  0x83   :  { %536 = vmatmul.mubr.f32.gmra.mrb[46].mxu0 %v63_v58  ;;  %696 = vmatmul.mubr.f32.gmra.mrb[46].mxu1 %v127_v60 }
  0x84   :  { %1502 = vmatprep.mubr.msk.f32.mxu0 %vm163_vm0, %v66_v59  ;;  %1534 = vmatprep.mubr.msk.f32.mxu1 %vm163_vm0, %v130_v61 }
  0x87   :  { %541 = vmatmul.mubr.f32.gmra.mrb[48].mxu0 %v65_v62  ;;  %701 = vmatmul.mubr.f32.gmra.mrb[48].mxu1 %v129_v0 }
  0x88   :  { %1503 = vmatprep.mubr.msk.f32.mxu0 %vm163_vm0, %v68_v63  ;;  %1535 = vmatprep.mubr.msk.f32.mxu1 %vm163_vm0, %v132_v1 }
  0x8b   :  { %546 = vmatmul.mubr.f32.gmra.mrb[50].mxu0 %v67_v2  ;;  %706 = vmatmul.mubr.f32.gmra.mrb[50].mxu1 %v131_v4 }
  0x8c   :  { %1504 = vmatprep.mubr.msk.f32.mxu0 %vm163_vm0, %v70_v3  ;;  %1536 = vmatprep.mubr.msk.f32.mxu1 %vm163_vm0, %v134_v5 }
  0x8f   :  { %551 = vmatmul.mubr.f32.gmra.mrb[52].mxu0 %v69_v6  ;;  %711 = vmatmul.mubr.f32.gmra.mrb[52].mxu1 %v133_v8 }
  0x90   :  { %1505 = vmatprep.mubr.msk.f32.mxu0 %vm163_vm0, %v72_v7  ;;  %1537 = vmatprep.mubr.msk.f32.mxu1 %vm163_vm0, %v136_v9 }
  0x93   :  { %556 = vmatmul.mubr.f32.gmra.mrb[54].mxu0 %v71_v10  ;;  %716 = vmatmul.mubr.f32.gmra.mrb[54].mxu1 %v135_v12 }
  0x94   :  { %1506 = vmatprep.mubr.msk.f32.mxu0 %vm163_vm0, %v74_v11  ;;  %1538 = vmatprep.mubr.msk.f32.mxu1 %vm163_vm0, %v138_v13 }
  0x97   :  { %561 = vmatmul.mubr.f32.gmra.mrb[56].mxu0 %v73_v14  ;;  %721 = vmatmul.mubr.f32.gmra.mrb[56].mxu1 %v137_v16 }
  0x98   :  { %1507 = vmatprep.mubr.msk.f32.mxu0 %vm163_vm0, %v76_v15  ;;  %1539 = vmatprep.mubr.msk.f32.mxu1 %vm163_vm0, %v140_v17 }
  0x9b   :  { %566 = vmatmul.mubr.f32.gmra.mrb[58].mxu0 %v75_v18  ;;  %726 = vmatmul.mubr.f32.gmra.mrb[58].mxu1 %v139_v20 }
  0x9c   :  { %1508 = vmatprep.mubr.msk.f32.mxu0 %vm163_vm0, %v78_v19  ;;  %1540 = vmatprep.mubr.msk.f32.mxu1 %vm163_vm0, %v142_v21 }
  0x9f   :  { %571 = vmatmul.mubr.f32.gmra.mrb[60].mxu0 %v77_v22  ;;  %731 = vmatmul.mubr.f32.gmra.mrb[60].mxu1 %v141_v24 }
  0xa0   :  { %1509 = vmatprep.mubr.msk.f32.mxu0 %vm163_vm0, %v80_v23  ;;  %1541 = vmatprep.mubr.msk.f32.mxu1 %vm163_vm0, %v144_v25 }
  0xa3   :  { %576 = vmatmul.mubr.f32.gmra.mrb[62].mxu0 %v79_v26  ;;  %736 = vmatmul.mubr.f32.gmra.mrb[62].mxu1 %v143_v27 }
  0xfa   :  { %v2138_v28 = vpop.f32.mrb[0].mxu0  ;;  %v2140_v30 = vpop.f32.mrb[0].mxu1 }
  0xfb   :  { %v424_v29 = vpop.f32.mrb[1].mxu0  ;;  %v584_v31 = vpop.f32.mrb[1].mxu1  ;;  %vm741_vm2 = vcmp.gt.f32.partialorder %v2138_v28, 0.0 }
  0xfc   :  { %v805_v31 = vmul.f32 0.2, %v2138_v28 }
  0xfe   :  { %v2142_v32 = vpop.f32.mrb[2].mxu0  ;;  %v2144_v34 = vpop.f32.mrb[2].mxu1 }
  0xff   :  { %v429_v33 = vpop.f32.mrb[3].mxu0  ;;  %v589_v35 = vpop.f32.mrb[3].mxu1  ;;  %v806_v25 = vmul.f32 0.2, %v2142_v32  ;;  %vm742_vm1 = vcmp.gt.f32.partialorder %v2142_v32, 0.0 }
 0x102   :  { %v2146_v36 = vpop.f32.mrb[4].mxu0  ;;  %v2148_v38 = vpop.f32.mrb[4].mxu1 }
 0x103   :  { %v434_v37 = vpop.f32.mrb[5].mxu0  ;;  %v594_v39 = vpop.f32.mrb[5].mxu1  ;;  %v807_v33 = vmul.f32 0.2, %v2146_v36  ;;  %vm743_vm3 = vcmp.gt.f32.partialorder %v2146_v36, 0.0 }
 0x104   :  { %v2211_v37 = vsel %vm742_vm1, %v2142_v32, %v806_v25 }
 0x106   :  { %v2150_v40 = vpop.f32.mrb[6].mxu0  ;;  %v2152_v42 = vpop.f32.mrb[6].mxu1 }
 0x107   :  { %v439_v41 = vpop.f32.mrb[7].mxu0  ;;  %v599_v43 = vpop.f32.mrb[7].mxu1  ;;  %v808_v39 = vmul.f32 0.2, %v2150_v40  ;;  %vm744_vm4 = vcmp.gt.f32.partialorder %v2150_v40, 0.0 }
 0x10a   :  { %v2154_v44 = vpop.f32.mrb[8].mxu0  ;;  %v2156_v46 = vpop.f32.mrb[8].mxu1 }
 0x10b   :  { %v444_v45 = vpop.f32.mrb[9].mxu0  ;;  %v604_v47 = vpop.f32.mrb[9].mxu1  ;;  %vm745_vm5 = vcmp.gt.f32.partialorder %v2154_v44, 0.0 }
 0x10c   :  { %v2218_v47 = vsel %vm741_vm2, %v2138_v28, %v805_v31 }
 0x10d   :  { %v933_v32 = vadd.f32 %v2211_v37, %v2218_v47 }
 0x10e   :  { %v2158_v48 = vpop.f32.mrb[10].mxu0  ;;  %v2160_v50 = vpop.f32.mrb[10].mxu1 }
 0x10f   :  { %v449_v49 = vpop.f32.mrb[11].mxu0  ;;  %v609_v51 = vpop.f32.mrb[11].mxu1  ;;  %vm746_vm6 = vcmp.gt.f32.partialorder %v2158_v48, 0.0 }
 0x110   :  { %v2221_v49 = vsel %vm743_vm3, %v2146_v36, %v807_v33  ;;  %v809_v51 = vmul.f32 0.2, %v2154_v44 }
 0x111   :  { %v934_v36 = vadd.f32 %v933_v32, %v2221_v49 }
 0x112   :  { %v2162_v52 = vpop.f32.mrb[12].mxu0  ;;  %v2164_v54 = vpop.f32.mrb[12].mxu1 }
 0x113   :  { %v454_v53 = vpop.f32.mrb[13].mxu0  ;;  %v614_v55 = vpop.f32.mrb[13].mxu1  ;;  %vm747_vm7 = vcmp.gt.f32.partialorder %v2162_v52, 0.0 }
 0x114   :  { %v2230_v55 = vsel %vm744_vm4, %v2150_v40, %v808_v39 }
 0x116   :  { %v2166_v56 = vpop.f32.mrb[14].mxu0  ;;  %v2168_v58 = vpop.f32.mrb[14].mxu1 }
 0x117   :  { %v459_v57 = vpop.f32.mrb[15].mxu0  ;;  %v619_v59 = vpop.f32.mrb[15].mxu1  ;;  %vm748_vm8 = vcmp.gt.f32.partialorder %v2166_v56, 0.0 }
 0x118   :  { %v810_v57 = vmul.f32 0.2, %v2158_v48 }
 0x11a   :  { %v2170_v60 = vpop.f32.mrb[16].mxu0  ;;  %v2172_v62 = vpop.f32.mrb[16].mxu1 }
 0x11b   :  { %v464_v61 = vpop.f32.mrb[17].mxu0  ;;  %v624_v63 = vpop.f32.mrb[17].mxu1  ;;  %vm749_vm9 = vcmp.gt.f32.partialorder %v2170_v60, 0.0 }
 0x11c   :  { %v2238_v63 = vsel %vm745_vm5, %v2154_v44, %v809_v51 }
 0x11e   :  { %v2174_v0 = vpop.f32.mrb[18].mxu0  ;;  %v2176_v2 = vpop.f32.mrb[18].mxu1 }
 0x11f   :  { %v469_v1 = vpop.f32.mrb[19].mxu0  ;;  %v629_v3 = vpop.f32.mrb[19].mxu1  ;;  %vm750_vm10 = vcmp.gt.f32.partialorder %v2174_v0, 0.0 }
 0x120   :  { %v811_v1 = vmul.f32 0.2, %v2162_v52  ;;  %v935_v3 = vadd.f32 %v934_v36, %v2230_v55 }
 0x122   :  { %v2178_v4 = vpop.f32.mrb[20].mxu0  ;;  %v2180_v6 = vpop.f32.mrb[20].mxu1 }
 0x123   :  { %v474_v5 = vpop.f32.mrb[21].mxu0  ;;  %v634_v7 = vpop.f32.mrb[21].mxu1  ;;  %v815_v33 = vmul.f32 0.2, %v2178_v4  ;;  %vm751_vm11 = vcmp.gt.f32.partialorder %v2178_v4, 0.0 }
 0x124   :  { %v2246_v5 = vsel %vm746_vm6, %v2158_v48, %v810_v57  ;;  %v812_v7 = vmul.f32 0.2, %v2166_v56 }
 0x126   :  { %v2182_v8 = vpop.f32.mrb[22].mxu0  ;;  %v2184_v10 = vpop.f32.mrb[22].mxu1 }
 0x127   :  { %v479_v9 = vpop.f32.mrb[23].mxu0  ;;  %v639_v11 = vpop.f32.mrb[23].mxu1  ;;  %vm752_vm12 = vcmp.gt.f32.partialorder %v2182_v8, 0.0 }
 0x12a   :  { %v2186_v12 = vpop.f32.mrb[24].mxu0  ;;  %v2188_v14 = vpop.f32.mrb[24].mxu1 }
 0x12b   :  { %v484_v13 = vpop.f32.mrb[25].mxu0  ;;  %v644_v15 = vpop.f32.mrb[25].mxu1  ;;  %v817_v36 = vmul.f32 0.2, %v2186_v12  ;;  %vm753_vm13 = vcmp.gt.f32.partialorder %v2186_v12, 0.0 }
 0x12c   :  { %v936_v13 = vadd.f32 %v935_v3, %v2238_v63  ;;  %v2254_v15 = vsel %vm747_vm7, %v2162_v52, %v811_v1 }
 0x12e   :  { %v2190_v16 = vpop.f32.mrb[26].mxu0  ;;  %v2192_v18 = vpop.f32.mrb[26].mxu1 }
 0x12f   :  { %v489_v17 = vpop.f32.mrb[27].mxu0  ;;  %v649_v19 = vpop.f32.mrb[27].mxu1  ;;  %v818_v3 = vmul.f32 0.2, %v2190_v16  ;;  %vm754_vm14 = vcmp.gt.f32.partialorder %v2190_v16, 0.0 }
 0x130   :  { %v813_v17 = vmul.f32 0.2, %v2170_v60  ;;  %v937_v19 = vadd.f32 %v936_v13, %v2246_v5 }
 0x132   :  { %v2194_v20 = vpop.f32.mrb[28].mxu0  ;;  %v2196_v22 = vpop.f32.mrb[28].mxu1  ;;  %v2270_v31 = vsel %vm749_vm9, %v2170_v60, %v813_v17 }
 0x133   :  { %v494_v21 = vpop.f32.mrb[29].mxu0  ;;  %v654_v23 = vpop.f32.mrb[29].mxu1  ;;  %v819_v17 = vmul.f32 0.2, %v2194_v20  ;;  %vm755_vm15 = vcmp.gt.f32.partialorder %v2194_v20, 0.0 }
 0x134   :  { %v2262_v21 = vsel %vm748_vm8, %v2166_v56, %v812_v7  ;;  %v814_v23 = vmul.f32 0.2, %v2174_v0 }
 0x136   :  { %v2198_v24 = vpop.f32.mrb[30].mxu0  ;;  %v2201_v27 = vpop.f32.mrb[30].mxu1 }
 0x137   :  { %v499_v26 = vpop.f32.mrb[31].mxu0  ;;  %v659_v29 = vpop.f32.mrb[31].mxu1  ;;  %vm756_vm0 = vcmp.gt.f32.partialorder %v2198_v24, 0.0 }
 0x138   :  { %v938_v29 = vadd.f32 %v937_v19, %v2254_v15 }
 0x13a   :  { %v2208_v35 = vpop.f32.mrb[32].mxu0  ;;  %v2214_v43 = vpop.f32.mrb[32].mxu1  ;;  %v939_v39 = vadd.f32 %v938_v29, %v2262_v21 }
 0x13b   :  { %v504_v41 = vpop.f32.mrb[33].mxu0  ;;  %v664_v45 = vpop.f32.mrb[33].mxu1  ;;  %vm757_vm1 = vcmp.gt.f32.partialorder %v2208_v35, 0.0 }
 0x13c   :  { %v2278_v41 = vsel %vm750_vm10, %v2174_v0, %v814_v23  ;;  %v816_v45 = vmul.f32 0.2, %v2182_v8  ;;  %v940_v57 = vadd.f32 %v939_v39, %v2270_v31  ;;  %v2306_v23 = vsel %vm754_vm14, %v2190_v16, %v818_v3 }
 0x13d   :  { %v2314_v39 = vsel %vm755_vm15, %v2194_v20, %v819_v17 }
 0x13e   :  { %v2227_v53 = vpop.f32.mrb[34].mxu0  ;;  %v2233_v28 = vpop.f32.mrb[34].mxu1  ;;  %v2292_v1 = vsel %vm752_vm12, %v2182_v8, %v816_v45  ;;  %v821_v45 = vmul.f32 0.2, %v2208_v35 }
 0x13f   :  { %v509_v59 = vpop.f32.mrb[35].mxu0  ;;  %v669_v61 = vpop.f32.mrb[35].mxu1  ;;  %vm758_vm2 = vcmp.gt.f32.partialorder %v2227_v53, 0.0 }
 0x140   :  { %v2286_v59 = vsel %vm751_vm11, %v2178_v4, %v815_v33  ;;  %v941_v61 = vadd.f32 %v940_v57, %v2278_v41 }
 0x142   :  { %v2243_v40 = vpop.f32.mrb[36].mxu0  ;;  %v2249_v11 = vpop.f32.mrb[36].mxu1  ;;  %v942_v13 = vadd.f32 %v941_v61, %v2286_v59 }
 0x143   :  { %v514_v9 = vpop.f32.mrb[37].mxu0  ;;  %v674_v44 = vpop.f32.mrb[37].mxu1  ;;  %vm759_vm3 = vcmp.gt.f32.partialorder %v2243_v40, 0.0 }
 0x144   :  { %v2300_v44 = vsel %vm753_vm13, %v2186_v12, %v817_v36  ;;  %v943_v19 = vadd.f32 %v942_v13, %v2292_v1  ;;  %v823_v13 = vmul.f32 0.2, %v2243_v40 }
 0x146   :  { %v2259_v48 = vpop.f32.mrb[38].mxu0  ;;  %v2265_v26 = vpop.f32.mrb[38].mxu1  ;;  %v944_v33 = vadd.f32 %v943_v19, %v2300_v44 }
 0x147   :  { %v519_v25 = vpop.f32.mrb[39].mxu0  ;;  %v679_v52 = vpop.f32.mrb[39].mxu1  ;;  %v824_v19 = vmul.f32 0.2, %v2259_v48  ;;  %vm760_vm4 = vcmp.gt.f32.partialorder %v2259_v48, 0.0 }
 0x148   :  { %v820_v25 = vmul.f32 0.2, %v2198_v24 }
 0x14a   :  { %v2275_v56 = vpop.f32.mrb[40].mxu0  ;;  %v2281_v32 = vpop.f32.mrb[40].mxu1  ;;  %v2320_v57 = vsel %vm756_vm0, %v2198_v24, %v820_v25 }
 0x14b   :  { %v524_v51 = vpop.f32.mrb[41].mxu0  ;;  %v684_v60 = vpop.f32.mrb[41].mxu1  ;;  %3813 = vst [vmem:[#allocation2_spill] sm:$0xff] %v2320_v57  ;;  %vm761_vm5 = vcmp.gt.f32.partialorder %v2275_v56, 0.0 }
 0x14c   :  { %v945_v51 = vadd.f32 %v944_v33, %v2306_v23  ;;  %v822_v60 = vmul.f32 0.2, %v2227_v53 }
 0x14e   :  { %v527_v0 = vpop.f32.mrb[42].mxu0  ;;  %v2295_v9 = vpop.f32.mrb[42].mxu1  ;;  %v946_v3 = vadd.f32 %v945_v51, %v2314_v39  ;;  %v2334_v17 = vsel %vm758_vm2, %v2227_v53, %v822_v60  ;;  %v2348_v60 = vsel %vm760_vm4, %v2259_v48, %v824_v19  ;;  %vm774_vm2 = vcmp.gt.f32.partialorder %v2144_v34, 0.0 }
 0x14f   :  { %v529_v7 = vpop.f32.mrb[43].mxu0  ;;  %v689_v4 = vpop.f32.mrb[43].mxu1  ;;  %3815 = vst [vmem:[#allocation4_spill] sm:$0xff] %v2334_v17  ;;  %3817 = vst [vmem:[#allocation6_spill] sm:$0xff] %v2348_v60  ;;  %vm762_vm6 = vcmp.gt.f32.partialorder %v527_v0, 0.0  ;;  %vm776_vm4 = vcmp.gt.f32.partialorder %v2152_v42, 0.0 }
 0x150   :  { %v2328_v7 = vsel %vm757_vm1, %v2208_v35, %v821_v45  ;;  %v947_v4 = vadd.f32 %v946_v3, %v2320_v57  ;;  %v825_v45 = vmul.f32 0.2, %v2275_v56  ;;  %vm773_vm1 = vcmp.gt.f32.partialorder %v2140_v30, 0.0 }
 0x151   :  { %3814 = vst [vmem:[#allocation3_spill] sm:$0xff] %v2328_v7 }
 0x152   :  { %v532_v8 = vpop.f32.mrb[44].mxu0  ;;  %v2309_v52 = vpop.f32.mrb[44].mxu1  ;;  %v948_v33 = vadd.f32 %v947_v4, %v2328_v7 }
 0x153   :  { %v534_v29 = vpop.f32.mrb[45].mxu0  ;;  %v694_v12 = vpop.f32.mrb[45].mxu1  ;;  %vm763_vm7 = vcmp.gt.f32.partialorder %v532_v8, 0.0 }
 0x154   :  { %v2342_v12 = vsel %vm759_vm3, %v2243_v40, %v823_v13  ;;  %v949_v51 = vadd.f32 %v948_v33, %v2334_v17  ;;  %v2354_v40 = vsel %vm761_vm5, %v2275_v56, %v825_v45  ;;  %v827_v13 = vmul.f32 0.2, %v532_v8 }
 0x155   :  { %3816 = vst [vmem:[#allocation5_spill] sm:$0xff] %v2342_v12  ;;  %3818 = vst [vmem:[#allocation7_spill] sm:$0xff] %v2354_v40  ;;  %vm775_vm3 = vcmp.gt.f32.partialorder %v2148_v38, 0.0  ;;  %vm777_vm5 = vcmp.gt.f32.partialorder %v2156_v46, 0.0 }
 0x156   :  { %v537_v16 = vpop.f32.mrb[46].mxu0  ;;  %v2323_v61 = vpop.f32.mrb[46].mxu1  ;;  %v950_v4 = vadd.f32 %v949_v51, %v2342_v12  ;;  %v2362_v12 = vsel %vm763_vm7, %v532_v8, %v827_v13  ;;  %vm779_vm7 = vcmp.gt.f32.partialorder %v2164_v54, 0.0 }
 0x157   :  { %v539_v36 = vpop.f32.mrb[47].mxu0  ;;  %v699_v20 = vpop.f32.mrb[47].mxu1  ;;  %v828_v48 = vmul.f32 0.2, %v537_v16  ;;  %vm764_vm8 = vcmp.gt.f32.partialorder %v537_v16, 0.0  ;;  %3820 = vst [vmem:[#allocation9_spill] sm:$0xff] %v2362_v12 }
 0x158   :  { %v826_v36 = vmul.f32 0.2, %v527_v0  ;;  %v951_v33 = vadd.f32 %v950_v4, %v2348_v60 }
 0x159   :  { %v2365_v4 = vsel %vm764_vm8, %v537_v16, %v828_v48  ;;  %vm780_vm8 = vcmp.gt.f32.partialorder %v2168_v58, 0.0 }
 0x15a   :  { %v542_v24 = vpop.f32.mrb[48].mxu0  ;;  %v2337_v29 = vpop.f32.mrb[48].mxu1  ;;  %v2357_v17 = vsel %vm762_vm6, %v527_v0, %v826_v36  ;;  %3821 = vst [vmem:[#allocation10_spill] sm:$0xff] %v2365_v4  ;;  %vm778_vm6 = vcmp.gt.f32.partialorder %v2160_v50, 0.0 }
 0x15b   :  { %v544_v25 = vpop.f32.mrb[49].mxu0  ;;  %v704_v35 = vpop.f32.mrb[49].mxu1  ;;  %3819 = vst [vmem:[#allocation8_spill] sm:$0xff] %v2357_v17  ;;  %vm765_vm9 = vcmp.gt.f32.partialorder %v542_v24, 0.0 }
 0x15e   :  { %v547_v53 = vpop.f32.mrb[50].mxu0  ;;  %v2350_v20 = vpop.f32.mrb[50].mxu1 }
 0x15f   :  { %v549_v3 = vpop.f32.mrb[51].mxu0  ;;  %v709_v25 = vpop.f32.mrb[51].mxu1  ;;  %v830_v60 = vmul.f32 0.2, %v547_v53  ;;  %vm766_vm10 = vcmp.gt.f32.partialorder %v547_v53, 0.0 }
 0x160   :  { %v952_v3 = vadd.f32 %v951_v33, %v2354_v40  ;;  %v829_v25 = vmul.f32 0.2, %v542_v24 }
 0x162   :  { %v552_v35 = vpop.f32.mrb[52].mxu0  ;;  %v2359_v7 = vpop.f32.mrb[52].mxu1  ;;  %v953_v56 = vadd.f32 %v952_v3, %v2357_v17  ;;  %v2370_v33 = vsel %vm765_vm9, %v542_v24, %v829_v25  ;;  %v2373_v3 = vsel %vm766_vm10, %v547_v53, %v830_v60  ;;  %vm781_vm9 = vcmp.gt.f32.partialorder %v2172_v62, 0.0 }
 0x163   :  { %v554_v19 = vpop.f32.mrb[53].mxu0  ;;  %v714_v51 = vpop.f32.mrb[53].mxu1  ;;  %3822 = vst [vmem:[#allocation11_spill] sm:$0xff] %v2370_v33  ;;  %vm767_vm11 = vcmp.gt.f32.partialorder %v552_v35, 0.0  ;;  %3823 = vst [vmem:[#allocation12_spill] sm:$0xff] %v2373_v3  ;;  %vm782_vm10 = vcmp.gt.f32.partialorder %v2176_v2, 0.0 }
 0x164   :  { %v954_v19 = vadd.f32 %v953_v56, %v2362_v12  ;;  %v831_v51 = vmul.f32 0.2, %v552_v35 }
 0x166   :  { %v557_v45 = vpop.f32.mrb[54].mxu0  ;;  %v2367_v36 = vpop.f32.mrb[54].mxu1  ;;  %v955_v8 = vadd.f32 %v954_v19, %v2365_v4  ;;  %v2378_v56 = vsel %vm767_vm11, %v552_v35, %v831_v51  ;;  %vm783_vm11 = vcmp.gt.f32.partialorder %v2180_v6, 0.0 }
 0x167   :  { %v559_v0 = vpop.f32.mrb[55].mxu0  ;;  %v719_v57 = vpop.f32.mrb[55].mxu1  ;;  %v832_v17 = vmul.f32 0.2, %v557_v45  ;;  %vm768_vm12 = vcmp.gt.f32.partialorder %v557_v45, 0.0 }
 0x168   :  { %v956_v0 = vadd.f32 %v955_v8, %v2370_v33 }
 0x169   :  { %v2381_v19 = vsel %vm768_vm12, %v557_v45, %v832_v17  ;;  %vm784_vm12 = vcmp.gt.f32.partialorder %v2184_v10, 0.0 }
 0x16a   :  { %v562_v13 = vpop.f32.mrb[56].mxu0  ;;  %v2375_v48 = vpop.f32.mrb[56].mxu1  ;;  %v957_v24 = vadd.f32 %v956_v0, %v2373_v3 }
 0x16b   :  { %v564_v16 = vpop.f32.mrb[57].mxu0  ;;  %v724_v40 = vpop.f32.mrb[57].mxu1  ;;  %v833_v57 = vmul.f32 0.2, %v562_v13  ;;  %vm769_vm13 = vcmp.gt.f32.partialorder %v562_v13, 0.0 }
 0x16c   :  { %v958_v16 = vadd.f32 %v957_v24, %v2378_v56  ;;  %v837_v24 = vmul.f32 0.2, %v2140_v30 }
 0x16d   :  { %v2386_v8 = vsel %vm769_vm13, %v562_v13, %v833_v57  ;;  %vm785_vm13 = vcmp.gt.f32.partialorder %v2188_v14, 0.0 }
 0x16e   :  { %v567_v25 = vpop.f32.mrb[58].mxu0  ;;  %v2383_v60 = vpop.f32.mrb[58].mxu1  ;;  %v959_v40 = vadd.f32 %v958_v16, %v2381_v19 }
 0x16f   :  { %v834_v4 = vmul.f32 0.2, %v567_v25  ;;  %v569_v53 = vpop.f32.mrb[59].mxu0  ;;  %vm770_vm14 = vcmp.gt.f32.partialorder %v567_v25, 0.0  ;;  %v729_v12 = vpop.f32.mrb[59].mxu1 }
 0x170   :  { %v960_v45 = vadd.f32 %v959_v40, %v2386_v8  ;;  %v838_v40 = vmul.f32 0.2, %v2144_v34 }
 0x171   :  { %v2389_v51 = vsel %vm770_vm14, %v567_v25, %v834_v4  ;;  %vm786_vm14 = vcmp.gt.f32.partialorder %v2192_v18, 0.0 }
 0x172   :  { %v572_v35 = vpop.f32.mrb[60].mxu0  ;;  %v2391_v17 = vpop.f32.mrb[60].mxu1  ;;  %v961_v12 = vadd.f32 %v960_v45, %v2389_v51  ;;  %v839_v45 = vmul.f32 0.2, %v2148_v38 }
 0x173   :  { %vm771_vm15 = vcmp.gt.f32.partialorder %v572_v35, 0.0  ;;  %v835_v0 = vmul.f32 0.2, %v572_v35  ;;  %v574_v3 = vpop.f32.mrb[61].mxu0  ;;  %v734_v53 = vpop.f32.mrb[61].mxu1 }
 0x175   :  { %v2394_v33 = vsel %vm771_vm15, %v572_v35, %v835_v0  ;;  %v2408_v0 = vsel %vm773_vm1, %v2140_v30, %v837_v24  ;;  %v841_v30 = vmul.f32 0.2, %v2156_v46  ;;  %vm787_vm15 = vcmp.gt.f32.partialorder %v2196_v22, 0.0 }
 0x176   :  { %v577_v13 = vpop.f32.mrb[62].mxu0  ;;  %v2398_v4 = vpop.f32.mrb[62].mxu1  ;;  %v962_v3 = vadd.f32 %v961_v12, %v2394_v33  ;;  %v2414_v12 = vsel %vm774_vm2, %v2144_v34, %v838_v40  ;;  %v842_v34 = vmul.f32 0.2, %v2160_v50  ;;  %vm789_vm1 = vcmp.gt.f32.partialorder %v2214_v43, 0.0 }
 0x177   :  { %vm772_vm0 = vcmp.gt.f32.partialorder %v577_v13, 0.0  ;;  %v836_v57 = vmul.f32 0.2, %v577_v13  ;;  %v579_v16 = vpop.f32.mrb[63].mxu0  ;;  %v739_v25 = vpop.f32.mrb[63].mxu1  ;;  %vm790_vm2 = vcmp.gt.f32.partialorder %v2233_v28, 0.0 }
 0x178   :  { %v840_v25 = vmul.f32 0.2, %v2152_v42 }
 0x179   :  { %v2403_v53 = vsel %vm772_vm0, %v577_v13, %v836_v57  ;;  %v2420_v57 = vsel %vm775_vm3, %v2148_v38, %v839_v45  ;;  %v843_v38 = vmul.f32 0.2, %v2164_v54  ;;  %vm788_vm0 = vcmp.gt.f32.partialorder %v2201_v27, 0.0 }
 0x17a   :  { %v963_v35 = vadd.f32 %v962_v3, %v2403_v53  ;;  %v2426_v3 = vsel %vm776_vm4, %v2152_v42, %v840_v25  ;;  %v844_v42 = vmul.f32 0.2, %v2168_v58  ;;  %vm791_vm3 = vcmp.gt.f32.partialorder %v2249_v11, 0.0 }
 0x17b   :  { %vm792_vm4 = vcmp.gt.f32.partialorder %v2265_v26, 0.0 }
 0x17c   :  { %v964_v16 = vadd.f32 %v963_v35, %v2408_v0  ;;  %v2432_v35 = vsel %vm777_vm5, %v2156_v46, %v841_v30  ;;  %v845_v46 = vmul.f32 0.2, %v2172_v62  ;;  %vm793_vm5 = vcmp.gt.f32.partialorder %v2281_v32, 0.0 }
 0x17e   :  { %v965_v13 = vadd.f32 %v964_v16, %v2414_v12  ;;  %v2438_v16 = vsel %vm778_vm6, %v2160_v50, %v842_v34  ;;  %v846_v50 = vmul.f32 0.2, %v2176_v2  ;;  %vm794_vm6 = vcmp.gt.f32.partialorder %v2295_v9, 0.0 }
 0x180   :  { %v966_v24 = vadd.f32 %v965_v13, %v2420_v57  ;;  %v2444_v13 = vsel %vm779_vm7, %v2164_v54, %v843_v38  ;;  %v847_v54 = vmul.f32 0.2, %v2180_v6  ;;  %vm795_vm7 = vcmp.gt.f32.partialorder %v2309_v52, 0.0 }
 0x182   :  { %v967_v40 = vadd.f32 %v966_v24, %v2426_v3  ;;  %v2450_v24 = vsel %vm780_vm8, %v2168_v58, %v844_v42  ;;  %v848_v58 = vmul.f32 0.2, %v2184_v10  ;;  %vm796_vm8 = vcmp.gt.f32.partialorder %v2323_v61, 0.0 }
 0x183   :  { %3824 = vst [vmem:[#allocation13_spill] sm:$0xff] %v2450_v24 }
 0x184   :  { %v968_v45 = vadd.f32 %v967_v40, %v2432_v35  ;;  %v2456_v40 = vsel %vm781_vm9, %v2172_v62, %v845_v46  ;;  %v849_v62 = vmul.f32 0.2, %v2188_v14  ;;  %vm797_vm9 = vcmp.gt.f32.partialorder %v2337_v29, 0.0 }
 0x185   :  { %3825 = vst [vmem:[#allocation14_spill] sm:$0xff] %v2456_v40 }
 0x186   :  { %v969_v25 = vadd.f32 %v968_v45, %v2438_v16  ;;  %v2462_v45 = vsel %vm782_vm10, %v2176_v2, %v846_v50  ;;  %v850_v2 = vmul.f32 0.2, %v2192_v18  ;;  %vm798_vm10 = vcmp.gt.f32.partialorder %v2350_v20, 0.0 }
 0x187   :  { %3826 = vst [vmem:[#allocation15_spill] sm:$0xff] %v2462_v45 }
 0x188   :  { %v970_v30 = vadd.f32 %v969_v25, %v2444_v13  ;;  %v2468_v25 = vsel %vm783_vm11, %v2180_v6, %v847_v54  ;;  %v851_v6 = vmul.f32 0.2, %v2196_v22  ;;  %vm799_vm11 = vcmp.gt.f32.partialorder %v2359_v7, 0.0 }
 0x189   :  { %3827 = vst [vmem:[#allocation16_spill] sm:$0xff] %v2468_v25 }
 0x18a   :  { %v971_v34 = vadd.f32 %v970_v30, %v2450_v24  ;;  %v2474_v30 = vsel %vm784_vm12, %v2184_v10, %v848_v58  ;;  %v852_v10 = vmul.f32 0.2, %v2201_v27  ;;  %vm800_vm12 = vcmp.gt.f32.partialorder %v2367_v36, 0.0 }
 0x18b   :  { %3828 = vst [vmem:[#allocation17_spill] sm:$0xff] %v2474_v30 }
 0x18c   :  { %v972_v38 = vadd.f32 %v971_v34, %v2456_v40  ;;  %v2480_v34 = vsel %vm785_vm13, %v2188_v14, %v849_v62  ;;  %v853_v14 = vmul.f32 0.2, %v2214_v43  ;;  %vm801_vm13 = vcmp.gt.f32.partialorder %v2375_v48, 0.0 }
 0x18d   :  { %3829 = vst [vmem:[#allocation18_spill] sm:$0xff] %v2480_v34 }
 0x18e   :  { %v973_v42 = vadd.f32 %v972_v38, %v2462_v45  ;;  %v2486_v38 = vsel %vm786_vm14, %v2192_v18, %v850_v2  ;;  %v854_v18 = vmul.f32 0.2, %v2233_v28  ;;  %vm802_vm14 = vcmp.gt.f32.partialorder %v2383_v60, 0.0 }
 0x190   :  { %v974_v46 = vadd.f32 %v973_v42, %v2468_v25  ;;  %v2492_v42 = vsel %vm787_vm15, %v2196_v22, %v851_v6  ;;  %v855_v22 = vmul.f32 0.2, %v2249_v11  ;;  %vm803_vm15 = vcmp.gt.f32.partialorder %v2391_v17, 0.0 }
 0x192   :  { %v975_v50 = vadd.f32 %v974_v46, %v2474_v30  ;;  %v2498_v46 = vsel %vm788_vm0, %v2201_v27, %v852_v10  ;;  %v856_v27 = vmul.f32 0.2, %v2265_v26  ;;  %vm804_vm0 = vcmp.gt.f32.partialorder %v2398_v4, 0.0 }
 0x194   :  { %v976_v54 = vadd.f32 %v975_v50, %v2480_v34  ;;  %v2504_v50 = vsel %vm789_vm1, %v2214_v43, %v853_v14  ;;  %v857_v43 = vmul.f32 0.2, %v2281_v32 }
 0x196   :  { %v977_v58 = vadd.f32 %v976_v54, %v2486_v38  ;;  %v2510_v54 = vsel %vm790_vm2, %v2233_v28, %v854_v18  ;;  %v858_v28 = vmul.f32 0.2, %v2295_v9 }
 0x198   :  { %v978_v62 = vadd.f32 %v977_v58, %v2492_v42  ;;  %v2516_v58 = vsel %vm791_vm3, %v2249_v11, %v855_v22  ;;  %v922_v11 = vsel %vm794_vm6, %v2295_v9, %v858_v28  ;;  %v860_v22 = vmul.f32 0.2, %v2323_v61 }
 0x19a   :  { %v979_v2 = vadd.f32 %v978_v62, %v2498_v46  ;;  %v920_v62 = vsel %vm792_vm4, %v2265_v26, %v856_v27  ;;  %v861_v27 = vmul.f32 0.2, %v2337_v29 }
 0x19c   :  { %v980_v6 = vadd.f32 %v979_v2, %v2504_v50  ;;  %v921_v2 = vsel %vm793_vm5, %v2281_v32, %v857_v43  ;;  %v924_v32 = vsel %vm796_vm8, %v2323_v61, %v860_v22  ;;  %v862_v43 = vmul.f32 0.2, %v2350_v20 }
 0x19d   :  { %v925_v9 = vsel %vm797_vm9, %v2337_v29, %v861_v27  ;;  %v865_v22 = vmul.f32 0.2, %v2375_v48  ;;  %v866_v27 = vmul.f32 0.2, %v2383_v60 }
 0x19e   :  { %v981_v10 = vadd.f32 %v980_v6, %v2510_v54  ;;  %v859_v6 = vmul.f32 0.2, %v2309_v52 }
 0x1a0   :  { %v982_v14 = vadd.f32 %v981_v10, %v2516_v58  ;;  %v923_v26 = vsel %vm795_vm7, %v2309_v52, %v859_v6  ;;  %v926_v52 = vsel %vm798_vm10, %v2350_v20, %v862_v43  ;;  %v864_v6 = vmul.f32 0.2, %v2367_v36 }
 0x1a1   :  { %v929_v20 = vsel %vm801_vm13, %v2375_v48, %v865_v22  ;;  %v867_v43 = vmul.f32 0.2, %v2391_v17 }
 0x1a2   :  { %v983_v18 = vadd.f32 %v982_v14, %v920_v62  ;;  %v928_v29 = vsel %vm800_vm12, %v2367_v36, %v864_v6 }
 0x1a3   :  { %v931_v36 = vsel %vm803_vm15, %v2391_v17, %v867_v43 }
 0x1a4   :  { %v984_v34 = vadd.f32 %v983_v18, %v921_v2 }
 0x1a6   :  { %v985_v10 = vadd.f32 %v984_v34, %v922_v11  ;;  %v863_v34 = vmul.f32 0.2, %v2359_v7 }
 0x1a8   :  { %v986_v14 = vadd.f32 %v985_v10, %v923_v26  ;;  %v927_v61 = vsel %vm799_vm11, %v2359_v7, %v863_v34  ;;  %v930_v7 = vsel %vm802_vm14, %v2383_v60, %v866_v27  ;;  %v868_v34 = vmul.f32 0.2, %v2398_v4 }
 0x1aa   :  { %v987_v18 = vadd.f32 %v986_v14, %v924_v32 }
 0x1ac   :  { %v988_v28 = vadd.f32 %v987_v18, %v925_v9 }
 0x1ae   :  { %v989_v10 = vadd.f32 %v988_v28, %v926_v52 }
 0x1b0   :  { %v990_v14 = vadd.f32 %v989_v10, %v927_v61 }
 0x1b2   :  { %v991_v18 = vadd.f32 %v990_v14, %v928_v29  ;;  %v932_v14 = vsel %vm804_vm0, %v2398_v4, %v868_v34 }
 0x1b4   :  { %v992_v28 = vadd.f32 %v991_v18, %v929_v20 }
 0x1b6   :  { %v993_v10 = vadd.f32 %v992_v28, %v930_v7 }
 0x1b8   :  { %v994_v6 = vadd.f32 %v993_v10, %v931_v36 }
 0x1ba   :  { %v995_v30 = vadd.f32 %v994_v6, %v932_v14 }
 0x1bc   :  { %v996_v25 = vrot.slane %v995_v30, 4 }
 0x1be   :  { %v997_v48 = vadd.f32 %v996_v25, %v995_v30 }
 0x1c0   :  { %v998_v22 = vrot.slane %v997_v48, 2 }
 0x1c2   :  { %v999_v45 = vadd.f32 %v998_v22, %v997_v48 }
 0x1c4   :  { %v1000_v18 = vrot.slane %v999_v45, 1 }
 0x1c6   :  { %v1001_v40 = vadd.f32 %v1000_v18, %v999_v45 }
 0x1c8   :  { %v2556_v24 = vmul.f32 0.001953125, %v1001_v40 }
 0x1ca   :  { %v2560_v60 = vsub.f32 %v2486_v38, %v2556_v24  ;;  %v2564_v27 = vsub.f32 %v2492_v42, %v2556_v24  ;;  %v2568_v17 = vsub.f32 %v2498_v46, %v2556_v24  ;;  %v2572_v4 = vsub.f32 %v2504_v50, %v2556_v24 }
 0x1cb   :  { %v2576_v40 = vsub.f32 %v2510_v54, %v2556_v24  ;;  %v2580_v45 = vsub.f32 %v2516_v58, %v2556_v24  ;;  %v2583_v25 = vsub.f32 %v920_v62, %v2556_v24  ;;  %v2586_v30 = vsub.f32 %v921_v2, %v2556_v24 }
 0x1cc   :  { %v2589_v38 = vsub.f32 %v922_v11, %v2556_v24  ;;  %v2592_v42 = vsub.f32 %v923_v26, %v2556_v24  ;;  %v2595_v46 = vsub.f32 %v924_v32, %v2556_v24  ;;  %v2598_v50 = vsub.f32 %v925_v9, %v2556_v24 }
 0x1cd   :  { %v2601_v54 = vsub.f32 %v926_v52, %v2556_v24  ;;  %v2604_v58 = vsub.f32 %v927_v61, %v2556_v24  ;;  %v2607_v62 = vsub.f32 %v928_v29, %v2556_v24  ;;  %v2610_v2 = vsub.f32 %v929_v20, %v2556_v24 }
 0x1ce   :  { %v2613_v11 = vsub.f32 %v930_v7, %v2556_v24  ;;  %v2616_v26 = vsub.f32 %v931_v36, %v2556_v24  ;;  %v2619_v32 = vsub.f32 %v932_v14, %v2556_v24  ;;  %v2623_v9 = vsub.f32 %v2218_v47, %v2556_v24 }
 0x1cf   :  { %3830 = vst [vmem:[#allocation19_spill] sm:$0xff] %v2601_v54  ;;  %3831 = vst [vmem:[#allocation20_spill] sm:$0xff] %v2604_v58  ;;  %v2627_v52 = vsub.f32 %v2211_v37, %v2556_v24  ;;  %v2631_v61 = vsub.f32 %v2221_v49, %v2556_v24  ;;  %v2639_v43 = vsub.f32 %v2230_v55, %v2556_v24 }
 0x1d0   :  { %3832 = vst [vmem:[#allocation21_spill] sm:$0xff] %v2607_v62  ;;  %3833 = vst [vmem:[#allocation22_spill] sm:$0xff] %v2610_v2  ;;  %v1068_v29 = vmul.f32 %v2623_v9, %v2623_v9  ;;  %v2643_v47 = vsub.f32 %v2238_v63, %v2556_v24  ;;  %v2649_v49 = vsub.f32 %v2246_v5, %v2556_v24 }
 0x1d1   :  { %3834 = vst [vmem:[#allocation23_spill] sm:$0xff] %v2613_v11  ;;  %v1069_v20 = vmul.f32 %v2627_v52, %v2627_v52  ;;  %v1070_v37 = vmul.f32 %v2631_v61, %v2631_v61  ;;  %v1071_v7 = vmul.f32 %v2639_v43, %v2639_v43  ;;  %v2655_v55 = vsub.f32 %v2254_v15, %v2556_v24 }
 0x1d2   :  { %v1072_v63 = vmul.f32 %v2643_v47, %v2643_v47  ;;  %v2661_v36 = vsub.f32 %v2262_v21, %v2556_v24  ;;  %v1073_v5 = vmul.f32 %v2649_v49, %v2649_v49  ;;  %v2667_v14 = vsub.f32 %v2270_v31, %v2556_v24 }
 0x1d3   :  { %v1132_v28 = vadd.f32 %v1069_v20, %v1068_v29  ;;  %v1074_v15 = vmul.f32 %v2655_v55, %v2655_v55  ;;  %v2673_v22 = vsub.f32 %v2278_v41, %v2556_v24  ;;  %v2679_v29 = vsub.f32 %v2286_v59, %v2556_v24 }
 0x1d4   :  { %v1075_v21 = vmul.f32 %v2661_v36, %v2661_v36  ;;  %v1076_v31 = vmul.f32 %v2667_v14, %v2667_v14 }
 0x1d5   :  { %v1133_v34 = vadd.f32 %v1132_v28, %v1070_v37  ;;  %v2685_v37 = vsub.f32 %v2292_v1, %v2556_v24  ;;  %v1077_v41 = vmul.f32 %v2673_v22, %v2673_v22  ;;  %v1078_v59 = vmul.f32 %v2679_v29, %v2679_v29 }
 0x1d7   :  { %v1134_v10 = vadd.f32 %v1133_v34, %v1071_v7  ;;  %v2691_v7 = vsub.f32 %v2300_v44, %v2556_v24  ;;  %v1079_v1 = vmul.f32 %v2685_v37, %v2685_v37 }
 0x1d9   :  { %v1135_v6 = vadd.f32 %v1134_v10, %v1072_v63  ;;  %v2697_v63 = vsub.f32 %v2306_v23, %v2556_v24  ;;  %v1080_v44 = vmul.f32 %v2691_v7, %v2691_v7 }
 0x1db   :  { %v1136_v48 = vadd.f32 %v1135_v6, %v1073_v5  ;;  %v2703_v5 = vsub.f32 %v2314_v39, %v2556_v24  ;;  %v1081_v23 = vmul.f32 %v2697_v63, %v2697_v63 }
 0x1dd   :  { %v1137_v18 = vadd.f32 %v1136_v48, %v1074_v15  ;;  %v3835_v15 = vld [vmem:[#allocation2_spill] sm:$0xff]  ;;  %v1082_v39 = vmul.f32 %v2703_v5, %v2703_v5 }
 0x1de   :  { %v2709_v48 = vsub.f32 %v3835_v15, %v2556_v24  ;;  %v3843_v15 = vld [vmem:[#allocation6_spill] sm:$0xff] }
 0x1df   :  { %v1138_v20 = vadd.f32 %v1137_v18, %v1075_v21  ;;  %v3837_v18 = vld [vmem:[#allocation3_spill] sm:$0xff] }
 0x1e0   :  { %3836 = vst [vmem:[#allocation2_spill] sm:$0xff] %v2709_v48 }
 0x1e1   :  { %v1139_v28 = vadd.f32 %v1138_v20, %v1076_v31  ;;  %v2715_v31 = vsub.f32 %v3837_v18, %v2556_v24  ;;  %v2733_v18 = vsub.f32 %v3843_v15, %v2556_v24  ;;  %v3848_v15 = vld [vmem:[#allocation9_spill] sm:$0xff] }
 0x1e3   :  { %v1140_v34 = vadd.f32 %v1139_v28, %v1077_v41  ;;  %3838 = vst [vmem:[#allocation3_spill] sm:$0xff] %v2715_v31  ;;  %v3839_v41 = vld [vmem:[#allocation4_spill] sm:$0xff]  ;;  %3844 = vst [vmem:[#allocation6_spill] sm:$0xff] %v2733_v18 }
 0x1e4   :  { %v2721_v28 = vsub.f32 %v3839_v41, %v2556_v24  ;;  %v3845_v41 = vld [vmem:[#allocation7_spill] sm:$0xff] }
 0x1e5   :  { %v1141_v10 = vadd.f32 %v1140_v34, %v1078_v59  ;;  %v1083_v59 = vmul.f32 %v2709_v48, %v2709_v48  ;;  %v2739_v48 = vsub.f32 %v3845_v41, %v2556_v24  ;;  %v3849_v41 = vld [vmem:[#allocation10_spill] sm:$0xff] }
 0x1e6   :  { %3840 = vst [vmem:[#allocation4_spill] sm:$0xff] %v2721_v28 }
 0x1e7   :  { %v1142_v6 = vadd.f32 %v1141_v10, %v1079_v1  ;;  %v3841_v1 = vld [vmem:[#allocation5_spill] sm:$0xff]  ;;  %3846 = vst [vmem:[#allocation7_spill] sm:$0xff] %v2739_v48 }
 0x1e8   :  { %v2727_v10 = vsub.f32 %v3841_v1, %v2556_v24  ;;  %v3847_v1 = vld [vmem:[#allocation8_spill] sm:$0xff] }
 0x1e9   :  { %v1143_v21 = vadd.f32 %v1142_v6, %v1080_v44  ;;  %v1084_v44 = vmul.f32 %v2715_v31, %v2715_v31  ;;  %v2745_v31 = vsub.f32 %v3847_v1, %v2556_v24  ;;  %v3850_v1 = vld [vmem:[#allocation11_spill] sm:$0xff] }
 0x1ea   :  { %3842 = vst [vmem:[#allocation5_spill] sm:$0xff] %v2727_v10 }
 0x1eb   :  { %v1144_v20 = vadd.f32 %v1143_v21, %v1081_v23  ;;  %v1085_v23 = vmul.f32 %v2721_v28, %v2721_v28  ;;  %v2751_v28 = vsub.f32 %v3848_v15, %v2556_v24  ;;  %v3851_v15 = vld [vmem:[#allocation12_spill] sm:$0xff] }
 0x1ed   :  { %v1145_v34 = vadd.f32 %v1144_v20, %v1082_v39  ;;  %v1086_v39 = vmul.f32 %v2727_v10, %v2727_v10  ;;  %v2757_v10 = vsub.f32 %v3849_v41, %v2556_v24  ;;  %v2775_v41 = vsub.f32 %v2378_v56, %v2556_v24 }
 0x1ef   :  { %v1146_v6 = vadd.f32 %v1145_v34, %v1083_v59  ;;  %v1087_v59 = vmul.f32 %v2733_v18, %v2733_v18  ;;  %v2763_v18 = vsub.f32 %v3850_v1, %v2556_v24  ;;  %v2781_v1 = vsub.f32 %v2381_v19, %v2556_v24 }
 0x1f0   :  { %v1094_v56 = vmul.f32 %v2775_v41, %v2775_v41 }
 0x1f1   :  { %v1147_v21 = vadd.f32 %v1146_v6, %v1084_v44  ;;  %v1088_v44 = vmul.f32 %v2739_v48, %v2739_v48  ;;  %v2769_v48 = vsub.f32 %v3851_v15, %v2556_v24  ;;  %v2787_v15 = vsub.f32 %v2386_v8, %v2556_v24 }
 0x1f2   :  { %v1095_v19 = vmul.f32 %v2781_v1, %v2781_v1 }
 0x1f3   :  { %v1148_v20 = vadd.f32 %v1147_v21, %v1085_v23  ;;  %v1089_v23 = vmul.f32 %v2745_v31, %v2745_v31  ;;  %v1096_v8 = vmul.f32 %v2787_v15, %v2787_v15 }
 0x1f5   :  { %v1149_v34 = vadd.f32 %v1148_v20, %v1086_v39  ;;  %v1090_v39 = vmul.f32 %v2751_v28, %v2751_v28 }
 0x1f7   :  { %v1150_v6 = vadd.f32 %v1149_v34, %v1087_v59  ;;  %v1091_v59 = vmul.f32 %v2757_v10, %v2757_v10 }
 0x1f9   :  { %v1151_v21 = vadd.f32 %v1150_v6, %v1088_v44  ;;  %v1092_v44 = vmul.f32 %v2763_v18, %v2763_v18 }
 0x1fb   :  { %v1152_v20 = vadd.f32 %v1151_v21, %v1089_v23  ;;  %v1093_v23 = vmul.f32 %v2769_v48, %v2769_v48 }
 0x1fd   :  { %v1153_v34 = vadd.f32 %v1152_v20, %v1090_v39  ;;  %v2793_v20 = vsub.f32 %v2389_v51, %v2556_v24 }
 0x1ff   :  { %v1154_v6 = vadd.f32 %v1153_v34, %v1091_v59  ;;  %v2799_v34 = vsub.f32 %v2394_v33, %v2556_v24  ;;  %v1097_v51 = vmul.f32 %v2793_v20, %v2793_v20 }
 0x201   :  { %v1155_v21 = vadd.f32 %v1154_v6, %v1092_v44  ;;  %v2805_v6 = vsub.f32 %v2403_v53, %v2556_v24  ;;  %v1098_v33 = vmul.f32 %v2799_v34, %v2799_v34 }
 0x203   :  { %v1156_v39 = vadd.f32 %v1155_v21, %v1093_v23  ;;  %v2811_v21 = vsub.f32 %v2408_v0, %v2556_v24  ;;  %v1099_v53 = vmul.f32 %v2805_v6, %v2805_v6 }
 0x205   :  { %v1157_v59 = vadd.f32 %v1156_v39, %v1094_v56  ;;  %v2817_v39 = vsub.f32 %v2414_v12, %v2556_v24  ;;  %v1100_v0 = vmul.f32 %v2811_v21, %v2811_v21 }
 0x207   :  { %v1158_v44 = vadd.f32 %v1157_v59, %v1095_v19  ;;  %v2823_v59 = vsub.f32 %v2420_v57, %v2556_v24  ;;  %v1101_v12 = vmul.f32 %v2817_v39, %v2817_v39 }
 0x209   :  { %v1159_v23 = vadd.f32 %v1158_v44, %v1096_v8  ;;  %3852 = vst [vmem:[#allocation8_spill] sm:$0xff] %v2823_v59  ;;  %v2829_v44 = vsub.f32 %v2426_v3, %v2556_v24  ;;  %v1102_v57 = vmul.f32 %v2823_v59, %v2823_v59 }
 0x20b   :  { %v1160_v56 = vadd.f32 %v1159_v23, %v1097_v51  ;;  %3853 = vst [vmem:[#allocation9_spill] sm:$0xff] %v2829_v44  ;;  %v2835_v23 = vsub.f32 %v2432_v35, %v2556_v24  ;;  %v1103_v3 = vmul.f32 %v2829_v44, %v2829_v44 }
 0x20d   :  { %v1161_v19 = vadd.f32 %v1160_v56, %v1098_v33  ;;  %3854 = vst [vmem:[#allocation10_spill] sm:$0xff] %v2835_v23  ;;  %v2841_v56 = vsub.f32 %v2438_v16, %v2556_v24  ;;  %v1104_v35 = vmul.f32 %v2835_v23, %v2835_v23 }
 0x20f   :  { %v1162_v8 = vadd.f32 %v1161_v19, %v1099_v53  ;;  %3855 = vst [vmem:[#allocation11_spill] sm:$0xff] %v2841_v56  ;;  %v2847_v19 = vsub.f32 %v2444_v13, %v2556_v24  ;;  %v1105_v16 = vmul.f32 %v2841_v56, %v2841_v56 }
 0x211   :  { %v1163_v51 = vadd.f32 %v1162_v8, %v1100_v0  ;;  %3856 = vst [vmem:[#allocation12_spill] sm:$0xff] %v2847_v19  ;;  %v3857_v8 = vld [vmem:[#allocation13_spill] sm:$0xff]  ;;  %v1106_v13 = vmul.f32 %v2847_v19, %v2847_v19 }
 0x212   :  { %v2853_v59 = vsub.f32 %v3857_v8, %v2556_v24  ;;  %v3862_v8 = vld [vmem:[#allocation16_spill] sm:$0xff] }
 0x213   :  { %v1164_v33 = vadd.f32 %v1163_v51, %v1101_v12  ;;  %v3859_v51 = vld [vmem:[#allocation14_spill] sm:$0xff]  ;;  %v2871_v56 = vsub.f32 %v3862_v8, %v2556_v24 }
 0x214   :  { %3858 = vst [vmem:[#allocation13_spill] sm:$0xff] %v2853_v59  ;;  %v2859_v44 = vsub.f32 %v3859_v51, %v2556_v24  ;;  %v3863_v51 = vld [vmem:[#allocation17_spill] sm:$0xff] }
 0x215   :  { %v1165_v53 = vadd.f32 %v1164_v33, %v1102_v57  ;;  %v3860_v33 = vld [vmem:[#allocation15_spill] sm:$0xff]  ;;  %v2877_v19 = vsub.f32 %v3863_v51, %v2556_v24 }
 0x216   :  { %v2865_v23 = vsub.f32 %v3860_v33, %v2556_v24  ;;  %v3864_v33 = vld [vmem:[#allocation18_spill] sm:$0xff] }
 0x217   :  { %v1166_v0 = vadd.f32 %v1165_v53, %v1103_v3  ;;  %v1107_v3 = vmul.f32 %v2853_v59, %v2853_v59  ;;  %v2883_v59 = vsub.f32 %v3864_v33, %v2556_v24  ;;  %v1111_v8 = vmul.f32 %v2877_v19, %v2877_v19 }
 0x218   :  { %3861 = vst [vmem:[#allocation14_spill] sm:$0xff] %v2865_v23  ;;  %v1114_v24 = vmul.f32 %v2564_v27, %v2564_v27  ;;  %v1115_v33 = vmul.f32 %v2568_v17, %v2568_v17 }
 0x219   :  { %v1167_v12 = vadd.f32 %v1166_v0, %v1104_v35  ;;  %v1108_v35 = vmul.f32 %v2859_v44, %v2859_v44 }
 0x21b   :  { %v1168_v57 = vadd.f32 %v1167_v12, %v1105_v16  ;;  %v1109_v16 = vmul.f32 %v2865_v23, %v2865_v23  ;;  %v1113_v23 = vmul.f32 %v2560_v60, %v2560_v60 }
 0x21d   :  { %v1169_v53 = vadd.f32 %v1168_v57, %v1106_v13  ;;  %v1110_v13 = vmul.f32 %v2871_v56, %v2871_v56 }
 0x21f   :  { %v1170_v0 = vadd.f32 %v1169_v53, %v1107_v3  ;;  %v1112_v53 = vmul.f32 %v2883_v59, %v2883_v59 }
 0x221   :  { %v1171_v12 = vadd.f32 %v1170_v0, %v1108_v35 }
 0x223   :  { %v1172_v57 = vadd.f32 %v1171_v12, %v1109_v16  ;;  %v1116_v12 = vmul.f32 %v2572_v4, %v2572_v4 }
 0x225   :  { %v1173_v3 = vadd.f32 %v1172_v57, %v1110_v13  ;;  %v1117_v57 = vmul.f32 %v2576_v40, %v2576_v40 }
 0x227   :  { %v1174_v51 = vadd.f32 %v1173_v3, %v1111_v8  ;;  %v1118_v3 = vmul.f32 %v2580_v45, %v2580_v45 }
 0x229   :  { %v1175_v35 = vadd.f32 %v1174_v51, %v1112_v53  ;;  %v1119_v51 = vmul.f32 %v2583_v25, %v2583_v25 }
 0x22b   :  { %v1176_v0 = vadd.f32 %v1175_v35, %v1113_v23  ;;  %v1120_v35 = vmul.f32 %v2586_v30, %v2586_v30 }
 0x22d   :  { %v1177_v16 = vadd.f32 %v1176_v0, %v1114_v24  ;;  %v1121_v0 = vmul.f32 %v2589_v38, %v2589_v38 }
 0x22f   :  { %v1178_v13 = vadd.f32 %v1177_v16, %v1115_v33  ;;  %v1122_v16 = vmul.f32 %v2592_v42, %v2592_v42 }
 0x231   :  { %v1179_v8 = vadd.f32 %v1178_v13, %v1116_v12  ;;  %v1123_v13 = vmul.f32 %v2595_v46, %v2595_v46 }
 0x233   :  { %v1180_v53 = vadd.f32 %v1179_v8, %v1117_v57  ;;  %v1124_v8 = vmul.f32 %v2598_v50, %v2598_v50 }
 0x235   :  { %v1181_v23 = vadd.f32 %v1180_v53, %v1118_v3  ;;  %v1125_v53 = vmul.f32 %v2601_v54, %v2601_v54 }
 0x237   :  { %v1182_v24 = vadd.f32 %v1181_v23, %v1119_v51  ;;  %v1126_v23 = vmul.f32 %v2604_v58, %v2604_v58 }
 0x239   :  { %v1183_v33 = vadd.f32 %v1182_v24, %v1120_v35  ;;  %v1127_v24 = vmul.f32 %v2607_v62, %v2607_v62 }
 0x23b   :  { %v1184_v12 = vadd.f32 %v1183_v33, %v1121_v0  ;;  %v1128_v33 = vmul.f32 %v2610_v2, %v2610_v2 }
 0x23d   :  { %v1185_v57 = vadd.f32 %v1184_v12, %v1122_v16  ;;  %v1129_v12 = vmul.f32 %v2613_v11, %v2613_v11 }
 0x23f   :  { %v1186_v3 = vadd.f32 %v1185_v57, %v1123_v13  ;;  %v1130_v57 = vmul.f32 %v2616_v26, %v2616_v26 }
 0x241   :  { %v1187_v51 = vadd.f32 %v1186_v3, %v1124_v8  ;;  %v1131_v3 = vmul.f32 %v2619_v32, %v2619_v32 }
 0x243   :  { %v1188_v35 = vadd.f32 %v1187_v51, %v1125_v53 }
 0x245   :  { %v1189_v0 = vadd.f32 %v1188_v35, %v1126_v23 }
 0x247   :  { %v1190_v16 = vadd.f32 %v1189_v0, %v1127_v24 }
 0x249   :  { %v1191_v13 = vadd.f32 %v1190_v16, %v1128_v33 }
 0x24b   :  { %v1192_v8 = vadd.f32 %v1191_v13, %v1129_v12  ;;  %v3866_v12 = vld [vmem:[#allocation3_spill] sm:$0xff]  ;;  %v3867_v13 = vld [vmem:[#allocation4_spill] sm:$0xff] }
 0x24d   :  { %v1193_v53 = vadd.f32 %v1192_v8, %v1130_v57  ;;  %v3868_v57 = vld [vmem:[#allocation5_spill] sm:$0xff]  ;;  %v3869_v8 = vld [vmem:[#allocation6_spill] sm:$0xff] }
 0x24f   :  { %v1194_v51 = vadd.f32 %v1193_v53, %v1131_v3  ;;  %v3870_v3 = vld [vmem:[#allocation7_spill] sm:$0xff] }
 0x251   :  { %v1195_v58 = vrot.slane %v1194_v51, 4 }
 0x253   :  { %v1196_v62 = vadd.f32 %v1195_v58, %v1194_v51 }
 0x255   :  { %v1197_v23 = vrot.slane %v1196_v62, 2 }
 0x257   :  { %v1198_v35 = vadd.f32 %v1197_v23, %v1196_v62 }
 0x259   :  { %v1199_v54 = vrot.slane %v1198_v35, 1 }
 0x25b   :  { %v1200_v2 = vadd.f32 %v1199_v54, %v1198_v35 }
 0x25d   :  { %v1201_v24 = vmul.f32 0.001953125, %v1200_v2 }
 0x25f   :  { %v1202_v0 = vadd.f32 1e-05, %v1201_v24 }
 0x261   :  { %1590 = vrsqrt.f32 %v1202_v0 }
 0x26b   :  { %v2929_v11 = vpop.eup %1590 }
 0x26c   :  { %v2933_v33 = vmul.f32 %v2929_v11, %v2623_v9  ;;  %v2937_v16 = vmul.f32 %v2929_v11, %v2627_v52  ;;  %v2941_v58 = vmul.f32 %v2929_v11, %v2631_v61  ;;  %v2945_v54 = vmul.f32 %v2929_v11, %v2639_v43 }
 0x26d   :  { %v2949_v62 = vmul.f32 %v2929_v11, %v2643_v47  ;;  %v2953_v2 = vmul.f32 %v2929_v11, %v2649_v49  ;;  %v2957_v9 = vmul.f32 %v2929_v11, %v2655_v55  ;;  %v2961_v52 = vmul.f32 %v2929_v11, %v2661_v36 }
 0x26e   :  { %v2965_v61 = vmul.f32 %v2929_v11, %v2667_v14  ;;  %v2969_v43 = vmul.f32 %v2929_v11, %v2673_v22  ;;  %v2973_v47 = vmul.f32 %v2929_v11, %v2679_v29  ;;  %v2977_v49 = vmul.f32 %v2929_v11, %v2685_v37  ;;  %v3865_v22 = vld [vmem:[#allocation2_spill] sm:$0xff] }
 0x26f   :  { %v2981_v55 = vmul.f32 %v2929_v11, %v2691_v7  ;;  %v2985_v36 = vmul.f32 %v2929_v11, %v2697_v63  ;;  %v2989_v14 = vmul.f32 %v2929_v11, %v2703_v5  ;;  %v2993_v29 = vmul.f32 %v2929_v11, %v3865_v22  ;;  %v3871_v22 = vld [vmem:[#allocation8_spill] sm:$0xff] }
 0x270   :  { %v2997_v37 = vmul.f32 %v2929_v11, %v3866_v12  ;;  %v3001_v7 = vmul.f32 %v2929_v11, %v3867_v13  ;;  %v3005_v63 = vmul.f32 %v2929_v11, %v3868_v57  ;;  %v3009_v5 = vmul.f32 %v2929_v11, %v3869_v8  ;;  %v3872_v12 = vld [vmem:[#allocation9_spill] sm:$0xff]  ;;  %v3874_v13 = vld [vmem:[#allocation10_spill] sm:$0xff]  ;;  %v3875_v57 = vld [vmem:[#allocation11_spill] sm:$0xff] }
 0x271   :  { %v3013_v53 = vmul.f32 %v2929_v11, %v3870_v3  ;;  %v3017_v51 = vmul.f32 %v2929_v11, %v2745_v31  ;;  %v3021_v23 = vmul.f32 %v2929_v11, %v2751_v28  ;;  %v3025_v35 = vmul.f32 %v2929_v11, %v2757_v10  ;;  %v3876_v8 = vld [vmem:[#allocation12_spill] sm:$0xff]  ;;  %v3877_v3 = vld [vmem:[#allocation13_spill] sm:$0xff] }
 0x272   :  { %v3029_v24 = vmul.f32 %v2929_v11, %v2763_v18  ;;  %v3033_v0 = vmul.f32 %v2929_v11, %v2769_v48  ;;  %v3037_v31 = vmul.f32 %v2929_v11, %v2775_v41  ;;  %v3041_v28 = vmul.f32 %v2929_v11, %v2781_v1 }
 0x273   :  { %v3045_v10 = vmul.f32 %v2929_v11, %v2787_v15  ;;  %v3049_v18 = vmul.f32 %v2929_v11, %v2793_v20  ;;  %v3053_v48 = vmul.f32 %v2929_v11, %v2799_v34  ;;  %v3057_v41 = vmul.f32 %v2929_v11, %v2805_v6 }
 0x274   :  { %v3061_v1 = vmul.f32 %v2929_v11, %v2811_v21  ;;  %v3065_v15 = vmul.f32 %v2929_v11, %v2817_v39  ;;  %v3069_v20 = vmul.f32 %v2929_v11, %v3871_v22  ;;  %v3073_v34 = vmul.f32 %v2929_v11, %v3872_v12 }
 0x275   :  { %v3077_v6 = vmul.f32 %v2929_v11, %v3874_v13  ;;  %v3081_v21 = vmul.f32 %v2929_v11, %v3875_v57  ;;  %v3085_v39 = vmul.f32 %v2929_v11, %v3876_v8  ;;  %v3089_v22 = vmul.f32 %v2929_v11, %v3877_v3 }
 0x276   :  { %3873 = vst [vmem:[#allocation15_spill] sm:$0xff] %v3073_v34  ;;  %v3093_v12 = vmul.f32 %v2929_v11, %v2859_v44  ;;  %v3878_v34 = vld [vmem:[#allocation14_spill] sm:$0xff]  ;;  %v3101_v57 = vmul.f32 %v2929_v11, %v2871_v56  ;;  %v3105_v8 = vmul.f32 %v2929_v11, %v2877_v19  ;;  %v3109_v3 = vmul.f32 %v2929_v11, %v2883_v59 }
 0x277   :  { %v3097_v13 = vmul.f32 %v2929_v11, %v3878_v34  ;;  %v3113_v44 = vmul.f32 %v2929_v11, %v2560_v60  ;;  %v3117_v34 = vmul.f32 %v2929_v11, %v2564_v27  ;;  %v3121_v56 = vmul.f32 %v2929_v11, %v2568_v17 }
 0x278   :  { %v3125_v19 = vmul.f32 %v2929_v11, %v2572_v4  ;;  %v3129_v59 = vmul.f32 %v2929_v11, %v2576_v40  ;;  %v3133_v60 = vmul.f32 %v2929_v11, %v2580_v45  ;;  %v3137_v27 = vmul.f32 %v2929_v11, %v2583_v25  ;;  %v3158_v25 = vld [vmem:[%s3775_s2] ss:$0 sm:$0xff] }
 0x279   :  { %v3141_v17 = vmul.f32 %v2929_v11, %v2586_v30  ;;  %v3145_v4 = vmul.f32 %v2929_v11, %v2589_v38  ;;  %v3149_v40 = vmul.f32 %v2929_v11, %v2592_v42  ;;  %v3153_v45 = vmul.f32 %v2929_v11, %v2595_v46 }
 0x27a   :  { %3879 = vst [vmem:[#allocation16_spill] sm:$0xff] %v3133_v60  ;;  %3880 = vst [vmem:[#allocation17_spill] sm:$0xff] %v3137_v27  ;;  %v3162_v30 = vmul.f32 %v2929_v11, %v2598_v50  ;;  %v3889_v60 = vld [vmem:[#allocation23_spill] sm:$0xff] }
 0x27b   :  { %3881 = vst [vmem:[#allocation18_spill] sm:$0xff] %v3141_v17  ;;  %3882 = vst [vmem:[#allocation2_spill] sm:$0xff] %v3145_v4  ;;  %v3885_v17 = vld [vmem:[#allocation19_spill] sm:$0xff]  ;;  %v3886_v4 = vld [vmem:[#allocation20_spill] sm:$0xff]  ;;  %v3182_v50 = vmul.f32 %v2929_v11, %v3889_v60  ;;  %v3202_v60 = vmul.f32 %v3158_v25, %v2941_v58  ;;  %v3226_v58 = vmul.f32 %v3158_v25, %v2965_v61 }
 0x27c   :  { %3883 = vst [vmem:[#allocation3_spill] sm:$0xff] %v3149_v40  ;;  %3884 = vst [vmem:[#allocation4_spill] sm:$0xff] %v3153_v45  ;;  %v3166_v38 = vmul.f32 %v2929_v11, %v3885_v17  ;;  %v3170_v42 = vmul.f32 %v2929_v11, %v3886_v4  ;;  %v3887_v40 = vld [vmem:[#allocation21_spill] sm:$0xff]  ;;  %v3888_v45 = vld [vmem:[#allocation22_spill] sm:$0xff]  ;;  %v3186_v17 = vmul.f32 %v2929_v11, %v2616_v26 }
 0x27d   :  { %v3174_v46 = vmul.f32 %v2929_v11, %v3887_v40  ;;  %v3178_v27 = vmul.f32 %v2929_v11, %v3888_v45  ;;  %v3190_v4 = vmul.f32 %v2929_v11, %v2619_v32  ;;  %v3194_v40 = vmul.f32 %v3158_v25, %v2933_v33 }
 0x27e   :  { %v3198_v45 = vmul.f32 %v3158_v25, %v2937_v16  ;;  %v3206_v26 = vmul.f32 %v3158_v25, %v2945_v54  ;;  %v3210_v11 = vmul.f32 %v3158_v25, %v2949_v62  ;;  %v3214_v32 = vmul.f32 %v3158_v25, %v2953_v2 }
 0x27f   :  { %v3218_v33 = vmul.f32 %v3158_v25, %v2957_v9  ;;  %v3222_v16 = vmul.f32 %v3158_v25, %v2961_v52  ;;  %v3230_v54 = vmul.f32 %v3158_v25, %v2969_v43  ;;  %v3234_v62 = vmul.f32 %v3158_v25, %v2973_v47 }
 0x280   :  { %v3238_v2 = vmul.f32 %v3158_v25, %v2977_v49  ;;  %v3242_v9 = vmul.f32 %v3158_v25, %v2981_v55  ;;  %v3246_v52 = vmul.f32 %v3158_v25, %v2985_v36  ;;  %v3250_v61 = vmul.f32 %v3158_v25, %v2989_v14 }
 0x281   :  { %v3254_v43 = vmul.f32 %v3158_v25, %v2993_v29  ;;  %v3258_v47 = vmul.f32 %v3158_v25, %v2997_v37  ;;  %v3262_v49 = vmul.f32 %v3158_v25, %v3001_v7  ;;  %v3266_v55 = vmul.f32 %v3158_v25, %v3005_v63 }
 0x282   :  { %v3270_v36 = vmul.f32 %v3158_v25, %v3009_v5  ;;  %v3274_v14 = vmul.f32 %v3158_v25, %v3013_v53  ;;  %v3278_v29 = vmul.f32 %v3158_v25, %v3017_v51  ;;  %v3282_v37 = vmul.f32 %v3158_v25, %v3021_v23 }
 0x283   :  { %v3286_v7 = vmul.f32 %v3158_v25, %v3025_v35  ;;  %v3290_v63 = vmul.f32 %v3158_v25, %v3029_v24  ;;  %v3294_v5 = vmul.f32 %v3158_v25, %v3033_v0  ;;  %v3298_v53 = vmul.f32 %v3158_v25, %v3037_v31 }
 0x284   :  { %v3302_v51 = vmul.f32 %v3158_v25, %v3041_v28  ;;  %v3306_v23 = vmul.f32 %v3158_v25, %v3045_v10  ;;  %v3310_v35 = vmul.f32 %v3158_v25, %v3049_v18  ;;  %v3314_v24 = vmul.f32 %v3158_v25, %v3053_v48  ;;  %v3890_v18 = vld [vmem:[#allocation15_spill] sm:$0xff] }
 0x285   :  { %v3318_v0 = vmul.f32 %v3158_v25, %v3057_v41  ;;  %v3322_v31 = vmul.f32 %v3158_v25, %v3061_v1  ;;  %v3326_v28 = vmul.f32 %v3158_v25, %v3065_v15  ;;  %v3330_v10 = vmul.f32 %v3158_v25, %v3069_v20 }
 0x286   :  { %v3334_v48 = vmul.f32 %v3158_v25, %v3890_v18  ;;  %v3338_v41 = vmul.f32 %v3158_v25, %v3077_v6  ;;  %v3342_v1 = vmul.f32 %v3158_v25, %v3081_v21  ;;  %v3346_v15 = vmul.f32 %v3158_v25, %v3085_v39 }
 0x287   :  { %v3350_v20 = vmul.f32 %v3158_v25, %v3089_v22  ;;  %v3354_v18 = vmul.f32 %v3158_v25, %v3093_v12  ;;  %v3358_v6 = vmul.f32 %v3158_v25, %v3097_v13  ;;  %v3362_v21 = vmul.f32 %v3158_v25, %v3101_v57 }
 0x288   :  { %v3366_v39 = vmul.f32 %v3158_v25, %v3105_v8  ;;  %v3370_v22 = vmul.f32 %v3158_v25, %v3109_v3  ;;  %v3374_v12 = vmul.f32 %v3158_v25, %v3113_v44  ;;  %v3378_v13 = vmul.f32 %v3158_v25, %v3117_v34 }
 0x289   :  { %v3382_v57 = vmul.f32 %v3158_v25, %v3121_v56  ;;  %v3386_v8 = vmul.f32 %v3158_v25, %v3125_v19  ;;  %v3390_v3 = vmul.f32 %v3158_v25, %v3129_v59 }
 0x28a   :  { %3891 = vst [vmem:[#allocation5_spill] sm:$0xff] %v3370_v22  ;;  %3892 = vst [vmem:[#allocation6_spill] sm:$0xff] %v3374_v12  ;;  %v3897_v22 = vld [vmem:[#allocation16_spill] sm:$0xff]  ;;  %v3898_v12 = vld [vmem:[#allocation17_spill] sm:$0xff] }
 0x28b   :  { %3893 = vst [vmem:[#allocation7_spill] sm:$0xff] %v3378_v13  ;;  %3894 = vst [vmem:[#allocation8_spill] sm:$0xff] %v3382_v57  ;;  %v3394_v44 = vmul.f32 %v3158_v25, %v3897_v22  ;;  %v3398_v34 = vmul.f32 %v3158_v25, %v3898_v12  ;;  %v3899_v13 = vld [vmem:[#allocation18_spill] sm:$0xff] }
 0x28c   :  { %3895 = vst [vmem:[#allocation9_spill] sm:$0xff] %v3386_v8  ;;  %3896 = vst [vmem:[#allocation10_spill] sm:$0xff] %v3390_v3  ;;  %v3402_v56 = vmul.f32 %v3158_v25, %v3899_v13  ;;  %v3900_v57 = vld [vmem:[#allocation2_spill] sm:$0xff]  ;;  %v3901_v8 = vld [vmem:[#allocation3_spill] sm:$0xff]  ;;  %v3423_v13 = vmul.f32 %v3158_v25, %v3162_v30  ;;  %v3443_v30 = vmul.f32 %v3158_v25, %v3182_v50 }
 0x28d   :  { %v3406_v19 = vmul.f32 %v3158_v25, %v3900_v57  ;;  %v3410_v59 = vmul.f32 %v3158_v25, %v3901_v8  ;;  %v3902_v3 = vld [vmem:[#allocation4_spill] sm:$0xff]  ;;  %v3419_v12 = vld [vmem:[%s3776_s3] ss:$0 sm:$0xff]  ;;  %v3427_v57 = vmul.f32 %v3158_v25, %v3166_v38  ;;  %v3431_v8 = vmul.f32 %v3158_v25, %v3170_v42 }
 0x28e   :  { %v3414_v22 = vmul.f32 %v3158_v25, %v3902_v3  ;;  %v3435_v3 = vmul.f32 %v3158_v25, %v3174_v46  ;;  %v3447_v38 = vmul.f32 %v3158_v25, %v3186_v17  ;;  %v3451_v42 = vmul.f32 %v3158_v25, %v3190_v4 }
 0x28f   :  { %v1346_v46 = vadd.f32 %v3419_v12, %v3194_v40  ;;  %v1349_v50 = vadd.f32 %v3419_v12, %v3206_v26  ;;  %v1350_v17 = vadd.f32 %v3419_v12, %v3210_v11  ;;  %v1353_v4 = vadd.f32 %v3419_v12, %v3222_v16 }
 0x290   :  { %3903 = vst [vmem:[#allocation11_spill] sm:$0xff] %v3414_v22  ;;  %3904 = vst [vmem:[#allocation12_spill] sm:$0xff] %v3435_v3  ;;  %v3439_v22 = vmul.f32 %v3158_v25, %v3178_v27  ;;  %v1347_v3 = vadd.f32 %v3419_v12, %v3198_v45  ;;  %v1348_v27 = vadd.f32 %v3419_v12, %v3202_v60 }
 0x291   :  { %3905 = vst [vmem:[#allocation13_spill] sm:$0xff] %v3447_v38  ;;  %v1351_v38 = vadd.f32 %v3419_v12, %v3214_v32  ;;  %v1352_v25 = vadd.f32 %v3419_v12, %v3218_v33  ;;  %v1354_v40 = vadd.f32 %v3419_v12, %v3226_v58  ;;  %v1355_v45 = vadd.f32 %v3419_v12, %v3230_v54 }
 0x292   :  { %v1356_v60 = vadd.f32 %v3419_v12, %v3234_v62  ;;  %v1357_v26 = vadd.f32 %v3419_v12, %v3238_v2  ;;  %1410 = vst [vmem:[%s3777_s4] sm:$0xff] %v1346_v46  ;;  %1411 = vst [vmem:[%s3777_s4 + $0x8] sm:$0xff] %v1347_v3  ;;  %v1358_v11 = vadd.f32 %v3419_v12, %v3242_v9 }
 0x293   :  { %1412 = vst [vmem:[%s3777_s4 + $0x10] sm:$0xff] %v1348_v27  ;;  %1413 = vst [vmem:[%s3777_s4 + $0x18] sm:$0xff] %v1349_v50  ;;  %v1359_v32 = vadd.f32 %v3419_v12, %v3246_v52  ;;  %v1360_v33 = vadd.f32 %v3419_v12, %v3250_v61  ;;  %v1361_v16 = vadd.f32 %v3419_v12, %v3254_v43  ;;  %v3910_v3 = vld [vmem:[#allocation9_spill] sm:$0xff]  ;;  %v3911_v46 = vld [vmem:[#allocation10_spill] sm:$0xff] }
 0x294   :  { %1414 = vst [vmem:[%s3777_s4 + $0x20] sm:$0xff] %v1350_v17  ;;  %1415 = vst [vmem:[%s3777_s4 + $0x28] sm:$0xff] %v1351_v38  ;;  %v1362_v58 = vadd.f32 %v3419_v12, %v3258_v47  ;;  %v1363_v54 = vadd.f32 %v3419_v12, %v3262_v49  ;;  %v1364_v62 = vadd.f32 %v3419_v12, %v3266_v55 }
 0x295   :  { %1416 = vst [vmem:[%s3777_s4 + $0x30] sm:$0xff] %v1352_v25  ;;  %1417 = vst [vmem:[%s3777_s4 + $0x38] sm:$0xff] %v1353_v4  ;;  %v1365_v2 = vadd.f32 %v3419_v12, %v3270_v36  ;;  %v1366_v9 = vadd.f32 %v3419_v12, %v3274_v14  ;;  %v1367_v52 = vadd.f32 %v3419_v12, %v3278_v29 }
 0x296   :  { %1418 = vst [vmem:[%s3777_s4 + $0x40] sm:$0xff] %v1354_v40  ;;  %1419 = vst [vmem:[%s3777_s4 + $0x48] sm:$0xff] %v1355_v45  ;;  %v1368_v61 = vadd.f32 %v3419_v12, %v3282_v37  ;;  %v1369_v43 = vadd.f32 %v3419_v12, %v3286_v7  ;;  %v1370_v47 = vadd.f32 %v3419_v12, %v3290_v63 }
 0x297   :  { %1420 = vst [vmem:[%s3777_s4 + $0x50] sm:$0xff] %v1356_v60  ;;  %1421 = vst [vmem:[%s3777_s4 + $0x58] sm:$0xff] %v1357_v26  ;;  %v1371_v49 = vadd.f32 %v3419_v12, %v3294_v5  ;;  %v1372_v55 = vadd.f32 %v3419_v12, %v3298_v53  ;;  %v1373_v36 = vadd.f32 %v3419_v12, %v3302_v51  ;;  %v3912_v4 = vld [vmem:[#allocation11_spill] sm:$0xff]  ;;  %v3913_v45 = vld [vmem:[#allocation12_spill] sm:$0xff] }
 0x298   :  { %1422 = vst [vmem:[%s3777_s4 + $0x60] sm:$0xff] %v1358_v11  ;;  %1423 = vst [vmem:[%s3777_s4 + $0x68] sm:$0xff] %v1359_v32  ;;  %v1374_v14 = vadd.f32 %v3419_v12, %v3306_v23  ;;  %v1375_v29 = vadd.f32 %v3419_v12, %v3310_v35  ;;  %v1376_v37 = vadd.f32 %v3419_v12, %v3314_v24 }
 0x299   :  { %1424 = vst [vmem:[%s3777_s4 + $0x70] sm:$0xff] %v1360_v33  ;;  %1425 = vst [vmem:[%s3777_s4 + $0x78] sm:$0xff] %v1361_v16  ;;  %v1377_v7 = vadd.f32 %v3419_v12, %v3318_v0  ;;  %v1378_v63 = vadd.f32 %v3419_v12, %v3322_v31  ;;  %v1379_v5 = vadd.f32 %v3419_v12, %v3326_v28 }
 0x29a   :  { %1426 = vst [vmem:[%s3777_s4 + $0x80] sm:$0xff] %v1362_v58  ;;  %1427 = vst [vmem:[%s3777_s4 + $0x88] sm:$0xff] %v1363_v54  ;;  %v1380_v53 = vadd.f32 %v3419_v12, %v3330_v10  ;;  %v1381_v51 = vadd.f32 %v3419_v12, %v3334_v48  ;;  %v1382_v23 = vadd.f32 %v3419_v12, %v3338_v41  ;;  %v3906_v41 = vld [vmem:[#allocation5_spill] sm:$0xff] }
 0x29b   :  { %1428 = vst [vmem:[%s3777_s4 + $0x90] sm:$0xff] %v1364_v62  ;;  %1429 = vst [vmem:[%s3777_s4 + $0x98] sm:$0xff] %v1365_v2  ;;  %v1383_v35 = vadd.f32 %v3419_v12, %v3342_v1  ;;  %v1384_v24 = vadd.f32 %v3419_v12, %v3346_v15  ;;  %v1385_v0 = vadd.f32 %v3419_v12, %v3350_v20  ;;  %v3907_v15 = vld [vmem:[#allocation6_spill] sm:$0xff] }
 0x29c   :  { %1430 = vst [vmem:[%s3777_s4 + $0xa0] sm:$0xff] %v1366_v9  ;;  %1431 = vst [vmem:[%s3777_s4 + $0xa8] sm:$0xff] %v1367_v52  ;;  %v1386_v31 = vadd.f32 %v3419_v12, %v3354_v18  ;;  %v1387_v28 = vadd.f32 %v3419_v12, %v3358_v6  ;;  %v1388_v10 = vadd.f32 %v3419_v12, %v3362_v21  ;;  %v3908_v18 = vld [vmem:[#allocation7_spill] sm:$0xff]  ;;  %v3909_v21 = vld [vmem:[#allocation8_spill] sm:$0xff] }
 0x29d   :  { %1432 = vst [vmem:[%s3777_s4 + $0xb0] sm:$0xff] %v1368_v61  ;;  %1433 = vst [vmem:[%s3777_s4 + $0xb8] sm:$0xff] %v1369_v43  ;;  %v1389_v48 = vadd.f32 %v3419_v12, %v3366_v39  ;;  %v1390_v1 = vadd.f32 %v3419_v12, %v3906_v41  ;;  %v1391_v20 = vadd.f32 %v3419_v12, %v3907_v15 }
 0x29e   :  { %1434 = vst [vmem:[%s3777_s4 + $0xc0] sm:$0xff] %v1370_v47  ;;  %1435 = vst [vmem:[%s3777_s4 + $0xc8] sm:$0xff] %v1371_v49  ;;  %v1392_v6 = vadd.f32 %v3419_v12, %v3908_v18  ;;  %v1393_v39 = vadd.f32 %v3419_v12, %v3909_v21  ;;  %v1394_v38 = vadd.f32 %v3419_v12, %v3910_v3 }
 0x29f   :  { %1436 = vst [vmem:[%s3777_s4 + $0xd0] sm:$0xff] %v1372_v55  ;;  %1437 = vst [vmem:[%s3777_s4 + $0xd8] sm:$0xff] %v1373_v36  ;;  %v1395_v27 = vadd.f32 %v3419_v12, %v3911_v46  ;;  %v1396_v50 = vadd.f32 %v3419_v12, %v3394_v44  ;;  %v1397_v17 = vadd.f32 %v3419_v12, %v3398_v34 }
 0x2a0   :  { %1438 = vst [vmem:[%s3777_s4 + $0xe0] sm:$0xff] %v1374_v14  ;;  %1439 = vst [vmem:[%s3777_s4 + $0xe8] sm:$0xff] %v1375_v29  ;;  %v1398_v44 = vadd.f32 %v3419_v12, %v3402_v56  ;;  %v1399_v34 = vadd.f32 %v3419_v12, %v3406_v19  ;;  %v1400_v25 = vadd.f32 %v3419_v12, %v3410_v59 }
 0x2a1   :  { %1440 = vst [vmem:[%s3777_s4 + $0xf0] sm:$0xff] %v1376_v37  ;;  %1441 = vst [vmem:[%s3777_s4 + $0xf8] sm:$0xff] %v1377_v7  ;;  %v1401_v40 = vadd.f32 %v3419_v12, %v3912_v4  ;;  %v1402_v56 = vadd.f32 %v3419_v12, %v3423_v13  ;;  %v1403_v19 = vadd.f32 %v3419_v12, %v3427_v57 }
 0x2a2   :  { %1442 = vst [vmem:[%s3777_s4 + $0x100] sm:$0xff] %v1378_v63  ;;  %1443 = vst [vmem:[%s3777_s4 + $0x108] sm:$0xff] %v1379_v5  ;;  %v1404_v59 = vadd.f32 %v3419_v12, %v3431_v8  ;;  %v1405_v60 = vadd.f32 %v3419_v12, %v3913_v45  ;;  %v1406_v13 = vadd.f32 %v3419_v12, %v3439_v22  ;;  %v3914_v8 = vld [vmem:[#allocation13_spill] sm:$0xff] }
 0x2a3   :  { %1444 = vst [vmem:[%s3777_s4 + $0x110] sm:$0xff] %v1380_v53  ;;  %1445 = vst [vmem:[%s3777_s4 + $0x118] sm:$0xff] %v1381_v51  ;;  %v1407_v57 = vadd.f32 %v3419_v12, %v3443_v30  ;;  %v1408_v26 = vadd.f32 %v3419_v12, %v3914_v8  ;;  %v1409_v11 = vadd.f32 %v3419_v12, %v3451_v42 }
 0x2a4   :  { %1446 = vst [vmem:[%s3777_s4 + $0x120] sm:$0xff] %v1382_v23  ;;  %1447 = vst [vmem:[%s3777_s4 + $0x128] sm:$0xff] %v1383_v35 }
 0x2a5   :  { %1448 = vst [vmem:[%s3777_s4 + $0x130] sm:$0xff] %v1384_v24  ;;  %1449 = vst [vmem:[%s3777_s4 + $0x138] sm:$0xff] %v1385_v0 }
 0x2a6   :  { %1450 = vst [vmem:[%s3777_s4 + $0x140] sm:$0xff] %v1386_v31  ;;  %1451 = vst [vmem:[%s3777_s4 + $0x148] sm:$0xff] %v1387_v28 }
 0x2a7   :  { %1452 = vst [vmem:[%s3777_s4 + $0x150] sm:$0xff] %v1388_v10  ;;  %1453 = vst [vmem:[%s3777_s4 + $0x158] sm:$0xff] %v1389_v48 }
 0x2a8   :  { %1454 = vst [vmem:[%s3777_s4 + $0x160] sm:$0xff] %v1390_v1  ;;  %1455 = vst [vmem:[%s3777_s4 + $0x168] sm:$0xff] %v1391_v20 }
 0x2a9   :  { %1456 = vst [vmem:[%s3777_s4 + $0x170] sm:$0xff] %v1392_v6  ;;  %1457 = vst [vmem:[%s3777_s4 + $0x178] sm:$0xff] %v1393_v39 }
 0x2aa   :  { %1458 = vst [vmem:[%s3777_s4 + $0x180] sm:$0xff] %v1394_v38  ;;  %1459 = vst [vmem:[%s3777_s4 + $0x188] sm:$0xff] %v1395_v27 }
 0x2ab   :  { %1460 = vst [vmem:[%s3777_s4 + $0x190] sm:$0xff] %v1396_v50  ;;  %1461 = vst [vmem:[%s3777_s4 + $0x198] sm:$0xff] %v1397_v17 }
 0x2ac   :  { %1462 = vst [vmem:[%s3777_s4 + $0x1a0] sm:$0xff] %v1398_v44  ;;  %1463 = vst [vmem:[%s3777_s4 + $0x1a8] sm:$0xff] %v1399_v34 }
 0x2ad   :  { %1464 = vst [vmem:[%s3777_s4 + $0x1b0] sm:$0xff] %v1400_v25  ;;  %1465 = vst [vmem:[%s3777_s4 + $0x1b8] sm:$0xff] %v1401_v40 }
 0x2ae   :  { %1466 = vst [vmem:[%s3777_s4 + $0x1c0] sm:$0xff] %v1402_v56  ;;  %1467 = vst [vmem:[%s3777_s4 + $0x1c8] sm:$0xff] %v1403_v19 }
 0x2af   :  { %1468 = vst [vmem:[%s3777_s4 + $0x1d0] sm:$0xff] %v1404_v59  ;;  %1469 = vst [vmem:[%s3777_s4 + $0x1d8] sm:$0xff] %v1405_v60 }
 0x2b0   :  { %1470 = vst [vmem:[%s3777_s4 + $0x1e0] sm:$0xff] %v1406_v13  ;;  %1471 = vst [vmem:[%s3777_s4 + $0x1e8] sm:$0xff] %v1407_v57 }
 0x2b1   :  { %1472 = vst [vmem:[%s3777_s4 + $0x1f0] sm:$0xff] %v1408_v26  ;;  %1473 = vst [vmem:[%s3777_s4 + $0x1f8] sm:$0xff] %v1409_v11 }

// kernel: discriminator_forward.6
= control target key start
LH: loop header
LB: loop body
LE: loop exit
PB: predicated region body
PF: predicated region fallthrough
CT: control target
= control target key end

     0   :  { %vm101_vm0 = vcmask 261120   ;;  %s1248_s1 = inlined_call_operand.vmem [shape: f32[288,128], index: 1, kind: input, shape index: {}]   ;;  %s1249_s0 = inlined_call_operand.vmem [shape: f32[128,288], index: 0, kind: input, shape index: {}]   ;;  %s1250_s2 = inlined_call_operand.vmem [shape: f32[1,128], index: 2, kind: input, shape index: {}]   ;;  %s1251_s3 = inlined_call_operand.vmem [shape: f32[1,128], index: 3, kind: input, shape index: {}]   ;;  %s1252_s4 = inlined_call_operand.vmem [shape: f32[128,128], index: 4, kind: output, shape index: {}]  }
   0x1   :  { %v81_v0 = vld [vmem:[%s1248_s1 + $0x80] sm:$0xff]  ;;  %v82_v1 = vld [vmem:[%s1248_s1 + $0x88] sm:$0xff]  ;;  %v83_v5 = vld [vmem:[%s1248_s1 + $0x90] sm:$0xff] }
   0x2   :  { %v65_v2 = vld [vmem:[%s1248_s1] sm:$0xff]  ;;  %v799_v3 = vpack.c.bf16 %v82_v1, %v81_v0  ;;  %v66_v4 = vld [vmem:[%s1248_s1 + $0x8] sm:$0xff]  ;;  %v84_v6 = vld [vmem:[%s1248_s1 + $0x98] sm:$0xff] }
   0x3   :  { %v801_v7 = vpack.c.bf16 %v66_v4, %v65_v2  ;;  %v803_v8 = vpack.c.bf16 %v84_v6, %v83_v5  ;;  %v67_v9 = vld [vmem:[%s1248_s1 + $0x10] sm:$0xff]  ;;  %v68_v10 = vld [vmem:[%s1248_s1 + $0x18] sm:$0xff]  ;;  %v85_v11 = vld [vmem:[%s1248_s1 + $0xa0] sm:$0xff] }
   0x4   :  { %800 = vmatprep.subr.bf16.mxu0 %v799_v3  ;;  %839 = vmatprep.subr.bf16.mxu1 %v799_v3  ;;  %v86_v12 = vld [vmem:[%s1248_s1 + $0xa8] sm:$0xff]  ;;  %v805_v13 = vpack.c.bf16 %v68_v10, %v67_v9  ;;  %v69_v15 = vld [vmem:[%s1248_s1 + $0x20] sm:$0xff]  ;;  %v87_v17 = vld [vmem:[%s1248_s1 + $0xb0] sm:$0xff] }
   0x5   :  { %802 = vmatpush3.bf16.msra.mxu0 %v801_v7  ;;  %847 = vmatpush3.bf16.msra.mxu1 %v801_v7  ;;  %v807_v14 = vpack.c.bf16 %v86_v12, %v85_v11  ;;  %v70_v16 = vld [vmem:[%s1248_s1 + $0x28] sm:$0xff]  ;;  %v88_v18 = vld [vmem:[%s1248_s1 + $0xb8] sm:$0xff]  ;;  %v71_v21 = vld [vmem:[%s1248_s1 + $0x30] sm:$0xff] }
   0x6   :  { %804 = vmatprep.subr.bf16.mxu0 %v803_v8  ;;  %840 = vmatprep.subr.bf16.mxu1 %v803_v8  ;;  %v809_v19 = vpack.c.bf16 %v70_v16, %v69_v15  ;;  %v811_v20 = vpack.c.bf16 %v88_v18, %v87_v17  ;;  %v72_v22 = vld [vmem:[%s1248_s1 + $0x38] sm:$0xff]  ;;  %v89_v23 = vld [vmem:[%s1248_s1 + $0xc0] sm:$0xff]  ;;  %v90_v24 = vld [vmem:[%s1248_s1 + $0xc8] sm:$0xff] }
   0x7   :  { %v18_v25 = vld [vmem:[%s1249_s0 + $0x8] sm:$0xff]  ;;  %v813_v27 = vpack.c.bf16 %v72_v22, %v71_v21  ;;  %v815_v28 = vpack.c.bf16 %v90_v24, %v89_v23  ;;  %v73_v29 = vld [vmem:[%s1248_s1 + $0x40] sm:$0xff]  ;;  %v91_v31 = vld [vmem:[%s1248_s1 + $0xd0] sm:$0xff] }
   0x8   :  { %214 = vmatprep.mubr.f32.mxu0 %v18_v25  ;;  %v54_v26 = vld [vmem:[%s1249_s0 + $0x128] sm:$0xff]  ;;  %v92_v32 = vld [vmem:[%s1248_s1 + $0xd8] sm:$0xff]  ;;  %v75_v35 = vld [vmem:[%s1248_s1 + $0x50] sm:$0xff] }
   0x9   :  { %806 = vmatpush3.bf16.msra.mxu0 %v805_v13  ;;  %848 = vmatpush3.bf16.msra.mxu1 %v805_v13  ;;  %v74_v30 = vld [vmem:[%s1248_s1 + $0x48] sm:$0xff]  ;;  %v819_v34 = vpack.c.bf16 %v92_v32, %v91_v31  ;;  %v76_v36 = vld [vmem:[%s1248_s1 + $0x58] sm:$0xff]  ;;  %v93_v37 = vld [vmem:[%s1248_s1 + $0xe0] sm:$0xff] }
   0xa   :  { %808 = vmatprep.subr.bf16.mxu0 %v807_v14  ;;  %841 = vmatprep.subr.bf16.mxu1 %v807_v14  ;;  %v817_v33 = vpack.c.bf16 %v74_v30, %v73_v29  ;;  %v94_v38 = vld [vmem:[%s1248_s1 + $0xe8] sm:$0xff]  ;;  %v821_v39 = vpack.c.bf16 %v76_v36, %v75_v35  ;;  %v77_v41 = vld [vmem:[%s1248_s1 + $0x60] sm:$0xff]  ;;  %v95_v43 = vld [vmem:[%s1248_s1 + $0xf0] sm:$0xff] }
   0xb   :  { %274 = vmatprep.mubr.f32.mxu1 %v54_v26  ;;  %v823_v40 = vpack.c.bf16 %v94_v38, %v93_v37  ;;  %v78_v42 = vld [vmem:[%s1248_s1 + $0x68] sm:$0xff]  ;;  %v96_v44 = vld [vmem:[%s1248_s1 + $0xf8] sm:$0xff]  ;;  %v79_v47 = vld [vmem:[%s1248_s1 + $0x70] sm:$0xff] }
   0xc   :  { %v825_v45 = vpack.c.bf16 %v78_v42, %v77_v41  ;;  %v827_v46 = vpack.c.bf16 %v96_v44, %v95_v43  ;;  %v80_v48 = vld [vmem:[%s1248_s1 + $0x78] sm:$0xff]  ;;  %v97_v49 = vld [vmem:[%s1248_s1 + $0x100] sm:$0xff]  ;;  %v98_v50 = vld [vmem:[%s1248_s1 + $0x108] sm:$0xff] }
   0xd   :  { %810 = vmatpush3.bf16.msra.mxu0 %v809_v19  ;;  %849 = vmatpush3.bf16.msra.mxu1 %v809_v19  ;;  %v829_v51 = vpack.c.bf16 %v80_v48, %v79_v47  ;;  %v831_v52 = vpack.c.bf16 %v98_v50, %v97_v49  ;;  %v99_v53 = vld [vmem:[%s1248_s1 + $0x110] sm:$0xff]  ;;  %v100_v54 = vld [vmem:[%s1248_s1 + $0x118] sm:$0xff]  ;;  %v17_v55 = vld [vmem:[%s1249_s0] sm:$0xff] }
   0xe   :  { %812 = vmatprep.subr.bf16.mxu0 %v811_v20  ;;  %842 = vmatprep.subr.bf16.mxu1 %v811_v20  ;;  %v53_v56 = vld [vmem:[%s1249_s0 + $0x120] sm:$0xff]  ;;  %v835_v59 = vpack.c.bf16 %v100_v54, %v99_v53  ;;  %v20_v60 = vld [vmem:[%s1249_s0 + $0x18] sm:$0xff]  ;;  %v23_v0 = vld [vmem:[%s1249_s0 + $0x30] sm:$0xff] }
   0xf   :  { %v21_v57 = vld [vmem:[%s1249_s0 + $0x20] sm:$0xff]  ;;  %v56_v61 = vld [vmem:[%s1249_s0 + $0x138] sm:$0xff]  ;;  %v59_v1 = vld [vmem:[%s1249_s0 + $0x150] sm:$0xff] }
  0x10   :  { %v57_v58 = vld [vmem:[%s1249_s0 + $0x140] sm:$0xff]  ;;  %v24_v62 = vld [vmem:[%s1249_s0 + $0x38] sm:$0xff]  ;;  %v27_v2 = vld [vmem:[%s1249_s0 + $0x50] sm:$0xff] }
  0x11   :  { %814 = vmatpush3.bf16.msra.mxu0 %v813_v27  ;;  %850 = vmatpush3.bf16.msra.mxu1 %v813_v27  ;;  %v60_v63 = vld [vmem:[%s1249_s0 + $0x158] sm:$0xff]  ;;  %v63_v3 = vld [vmem:[%s1249_s0 + $0x170] sm:$0xff]  ;;  %v26_v4 = vld [vmem:[%s1249_s0 + $0x48] sm:$0xff] }
  0x12   :  { %816 = vmatprep.subr.bf16.mxu0 %v815_v28  ;;  %843 = vmatprep.subr.bf16.mxu1 %v815_v28  ;;  %v62_v5 = vld [vmem:[%s1249_s0 + $0x168] sm:$0xff]  ;;  %v19_v7 = vld [vmem:[%s1249_s0 + $0x10] sm:$0xff]  ;;  %v29_v8 = vld [vmem:[%s1249_s0 + $0x60] sm:$0xff] }
  0x13   :  { %v30_v6 = vld [vmem:[%s1249_s0 + $0x68] sm:$0xff]  ;;  %v33_v10 = vld [vmem:[%s1249_s0 + $0x80] sm:$0xff]  ;;  %v32_v12 = vld [vmem:[%s1249_s0 + $0x78] sm:$0xff] }
  0x14   :  { %v22_v9 = vld [vmem:[%s1249_s0 + $0x28] sm:$0xff]  ;;  %v25_v11 = vld [vmem:[%s1249_s0 + $0x40] sm:$0xff]  ;;  %v28_v13 = vld [vmem:[%s1249_s0 + $0x58] sm:$0xff] }
  0x15   :  { %818 = vmatpush3.bf16.msra.mxu0 %v817_v33  ;;  %851 = vmatpush3.bf16.msra.mxu1 %v817_v33  ;;  %v36_v14 = vld [vmem:[%s1249_s0 + $0x98] sm:$0xff]  ;;  %v31_v15 = vld [vmem:[%s1249_s0 + $0x70] sm:$0xff]  ;;  %v34_v17 = vld [vmem:[%s1249_s0 + $0x88] sm:$0xff] }
  0x16   :  { %820 = vmatprep.subr.bf16.mxu0 %v819_v34  ;;  %844 = vmatprep.subr.bf16.mxu1 %v819_v34  ;;  %v35_v16 = vld [vmem:[%s1249_s0 + $0x90] sm:$0xff]  ;;  %v37_v19 = vld [vmem:[%s1249_s0 + $0xa0] sm:$0xff]  ;;  %v38_v20 = vld [vmem:[%s1249_s0 + $0xa8] sm:$0xff] }
  0x17   :  { %v39_v18 = vld [vmem:[%s1249_s0 + $0xb0] sm:$0xff]  ;;  %v40_v21 = vld [vmem:[%s1249_s0 + $0xb8] sm:$0xff]  ;;  %v42_v22 = vld [vmem:[%s1249_s0 + $0xc8] sm:$0xff] }
  0x18   :  { %v43_v23 = vld [vmem:[%s1249_s0 + $0xd0] sm:$0xff]  ;;  %v41_v24 = vld [vmem:[%s1249_s0 + $0xc0] sm:$0xff]  ;;  %v46_v25 = vld [vmem:[%s1249_s0 + $0xe8] sm:$0xff] }
  0x19   :  { %822 = vmatpush3.bf16.msra.mxu0 %v821_v39  ;;  %852 = vmatpush3.bf16.msra.mxu1 %v821_v39  ;;  %v45_v26 = vld [vmem:[%s1249_s0 + $0xe0] sm:$0xff]  ;;  %v44_v28 = vld [vmem:[%s1249_s0 + $0xd8] sm:$0xff]  ;;  %v55_v31 = vld [vmem:[%s1249_s0 + $0x130] sm:$0xff] }
  0x1a   :  { %824 = vmatprep.subr.bf16.mxu0 %v823_v40  ;;  %845 = vmatprep.subr.bf16.mxu1 %v823_v40  ;;  %v49_v27 = vld [vmem:[%s1249_s0 + $0x100] sm:$0xff]  ;;  %v52_v29 = vld [vmem:[%s1249_s0 + $0x118] sm:$0xff]  ;;  %v47_v32 = vld [vmem:[%s1249_s0 + $0xf0] sm:$0xff] }
  0x1b   :  { %v48_v30 = vld [vmem:[%s1249_s0 + $0xf8] sm:$0xff]  ;;  %v58_v33 = vld [vmem:[%s1249_s0 + $0x148] sm:$0xff]  ;;  %v51_v34 = vld [vmem:[%s1249_s0 + $0x110] sm:$0xff] }
  0x1c   :  { %v61_v35 = vld [vmem:[%s1249_s0 + $0x160] sm:$0xff]  ;;  %v50_v36 = vld [vmem:[%s1249_s0 + $0x108] sm:$0xff]  ;;  %v64_v37 = vld [vmem:[%s1249_s0 + $0x178] sm:$0xff] }
  0x1d   :  { %826 = vmatpush3.bf16.msra.mxu0 %v825_v45  ;;  %853 = vmatpush3.bf16.msra.mxu1 %v825_v45 }
  0x1e   :  { %828 = vmatprep.subr.bf16.mxu0 %v827_v46  ;;  %846 = vmatprep.subr.bf16.mxu1 %v827_v46 }
  0x21   :  { %830 = vmatpush3.bf16.msra.mxu0 %v829_v51  ;;  %854 = vmatpush3.bf16.msra.mxu1 %v829_v51 }
  0x22   :  { %832 = vmatprep.subr.bf16.mxu1 %v831_v52 }
  0x24   :  { %215 = vmatmul.mubr.f32.vlgmr.msra.gmra.mrb[0].mxu0 %v17_v55  ;;  %275 = vmatmul.mubr.f32.vlgmr.msra.gmra.mrb[0].mxu1 %v53_v56 }
  0x25   :  { %219 = vmatprep.mubr.f32.mxu0 %v21_v57  ;;  %279 = vmatprep.mubr.f32.mxu1 %v57_v58 }
  0x26   :  { %834 = vmatpush3.bf16.msra.mxu1 %v831_v52 }
  0x27   :  { %836 = vmatprep.subr.bf16.mxu1 %v835_v59 }
  0x28   :  { %220 = vmatmul.mubr.f32.gmra.mrb[2].mxu0 %v20_v60  ;;  %280 = vmatmul.mubr.f32.gmra.mrb[2].mxu1 %v56_v61 }
  0x29   :  { %224 = vmatprep.mubr.f32.mxu0 %v24_v62  ;;  %284 = vmatprep.mubr.f32.mxu1 %v60_v63 }
  0x2a   :  { %838 = vmatpush3.bf16.msra.mxu1 %v835_v59 }
  0x2c   :  { %225 = vmatmul.mubr.f32.gmra.mrb[4].mxu0 %v23_v0  ;;  %285 = vmatmul.mubr.f32.gmra.mrb[4].mxu1 %v59_v1 }
  0x2d   :  { %229 = vmatprep.mubr.f32.mxu0 %v27_v2  ;;  %289 = vmatprep.mubr.f32.mxu1 %v63_v3 }
  0x30   :  { %230 = vmatmul.mubr.f32.gmra.mrb[6].mxu0 %v26_v4  ;;  %290 = vmatmul.mubr.f32.gmra.mrb[6].mxu1 %v62_v5 }
  0x31   :  { %234 = vmatprep.mubr.f32.mxu0 %v30_v6  ;;  %775 = vmatprep.mubr.msk.f32.mxu1 %vm101_vm0, %v19_v7 }
  0x34   :  { %235 = vmatmul.mubr.f32.gmra.mrb[8].mxu0 %v29_v8  ;;  %776 = vmatmul.mubr.msk.f32.vlgmr.msra.gmra.mrb[8].mxu1 %vm101_vm0, %v22_v9 }
  0x35   :  { %239 = vmatprep.mubr.f32.mxu0 %v33_v10  ;;  %778 = vmatprep.mubr.msk.f32.mxu1 %vm101_vm0, %v25_v11 }
  0x38   :  { %240 = vmatmul.mubr.f32.gmra.mrb[10].mxu0 %v32_v12  ;;  %779 = vmatmul.mubr.msk.f32.gmra.mrb[10].mxu1 %vm101_vm0, %v28_v13 }
  0x39   :  { %244 = vmatprep.mubr.f32.mxu0 %v36_v14  ;;  %781 = vmatprep.mubr.msk.f32.mxu1 %vm101_vm0, %v31_v15 }
  0x3c   :  { %245 = vmatmul.mubr.f32.gmra.mrb[12].mxu0 %v35_v16  ;;  %782 = vmatmul.mubr.msk.f32.gmra.mrb[12].mxu1 %vm101_vm0, %v34_v17 }
  0x3d   :  { %249 = vmatprep.mubr.f32.mxu0 %v39_v18  ;;  %784 = vmatprep.mubr.msk.f32.mxu1 %vm101_vm0, %v37_v19 }
  0x40   :  { %250 = vmatmul.mubr.f32.gmra.mrb[14].mxu0 %v38_v20  ;;  %785 = vmatmul.mubr.msk.f32.gmra.mrb[14].mxu1 %vm101_vm0, %v40_v21 }
  0x41   :  { %254 = vmatprep.mubr.f32.mxu0 %v42_v22  ;;  %787 = vmatprep.mubr.msk.f32.mxu1 %vm101_vm0, %v43_v23 }
  0x44   :  { %255 = vmatmul.mubr.f32.gmra.mrb[16].mxu0 %v41_v24  ;;  %788 = vmatmul.mubr.msk.f32.gmra.mrb[16].mxu1 %vm101_vm0, %v46_v25 }
  0x45   :  { %259 = vmatprep.mubr.f32.mxu0 %v45_v26  ;;  %790 = vmatprep.mubr.msk.f32.mxu1 %vm101_vm0, %v49_v27 }
  0x48   :  { %260 = vmatmul.mubr.f32.gmra.mrb[18].mxu0 %v44_v28  ;;  %791 = vmatmul.mubr.msk.f32.gmra.mrb[18].mxu1 %vm101_vm0, %v52_v29 }
  0x49   :  { %264 = vmatprep.mubr.f32.mxu0 %v48_v30  ;;  %793 = vmatprep.mubr.msk.f32.mxu1 %vm101_vm0, %v55_v31 }
  0x4c   :  { %265 = vmatmul.mubr.f32.gmra.mrb[20].mxu0 %v47_v32  ;;  %794 = vmatmul.mubr.msk.f32.gmra.mrb[20].mxu1 %vm101_vm0, %v58_v33 }
  0x4d   :  { %269 = vmatprep.mubr.f32.mxu0 %v51_v34  ;;  %796 = vmatprep.mubr.msk.f32.mxu1 %vm101_vm0, %v61_v35 }
  0x50   :  { %270 = vmatmul.mubr.f32.gmra.mrb[22].mxu0 %v50_v36  ;;  %797 = vmatmul.mubr.msk.f32.gmra.mrb[22].mxu1 %vm101_vm0, %v64_v37 }
  0xf7   :  { %v699_v38 = vpop.f32.mrb[0].mxu0  ;;  %v735_v39 = vpop.f32.mrb[0].mxu1 }
  0xf8   :  { %v700_v40 = vpop.f32.mrb[1].mxu0  ;;  %v736_v41 = vpop.f32.mrb[1].mxu1 }
  0xf9   :  { %v701_v42 = vadd.f32 %v700_v40, %v699_v38  ;;  %v1150_v43 = vadd.f32 %v736_v41, %v735_v39 }
  0xfb   :  { %v702_v44 = vpop.f32.mrb[2].mxu0  ;;  %v738_v45 = vpop.f32.mrb[2].mxu1 }
  0xfc   :  { %v703_v46 = vpop.f32.mrb[3].mxu0  ;;  %v739_v47 = vpop.f32.mrb[3].mxu1 }
  0xfd   :  { %v704_v48 = vadd.f32 %v703_v46, %v702_v44  ;;  %v1152_v49 = vadd.f32 %v739_v47, %v738_v45 }
  0xff   :  { %v705_v50 = vpop.f32.mrb[4].mxu0  ;;  %v741_v51 = vpop.f32.mrb[4].mxu1 }
 0x100   :  { %v706_v52 = vpop.f32.mrb[5].mxu0  ;;  %v742_v53 = vpop.f32.mrb[5].mxu1 }
 0x101   :  { %v707_v54 = vadd.f32 %v706_v52, %v705_v50  ;;  %v1154_v55 = vadd.f32 %v742_v53, %v741_v51 }
 0x103   :  { %v708_v56 = vpop.f32.mrb[6].mxu0  ;;  %v744_v57 = vpop.f32.mrb[6].mxu1 }
 0x104   :  { %v709_v58 = vpop.f32.mrb[7].mxu0  ;;  %v745_v59 = vpop.f32.mrb[7].mxu1 }
 0x105   :  { %v710_v60 = vadd.f32 %v709_v58, %v708_v56  ;;  %v1156_v61 = vadd.f32 %v745_v59, %v744_v57 }
 0x107   :  { %v711_v62 = vpop.f32.mrb[8].mxu0  ;;  %v777_v63 = vpop.f32.mrb[8].mxu1 }
 0x108   :  { %v367_v0 = vadd.f32 %v777_v63, %v704_v48  ;;  %v712_v1 = vpop.f32.mrb[9].mxu0  ;;  %v361_v2 = vpop.f32.mrb[9].mxu1 }
 0x109   :  { %v713_v3 = vadd.f32 %v712_v1, %v711_v62  ;;  %v362_v4 = vadd.f32 %v701_v42, %v361_v2 }
 0x10a   :  { %vm441_vm1 = vcmp.gt.f32.partialorder %v367_v0, 0.0  ;;  %v457_v5 = vmul.f32 0.2, %v367_v0 }
 0x10b   :  { %vm440_vm2 = vcmp.gt.f32.partialorder %v362_v4, 0.0  ;;  %v456_v6 = vmul.f32 0.2, %v362_v4  ;;  %v714_v7 = vpop.f32.mrb[10].mxu0  ;;  %v780_v8 = vpop.f32.mrb[10].mxu1 }
 0x10c   :  { %v1158_v9 = vsel %vm441_vm1, %v367_v0, %v457_v5  ;;  %v377_v10 = vadd.f32 %v780_v8, %v710_v60  ;;  %v715_v11 = vpop.f32.mrb[11].mxu0  ;;  %v371_v12 = vpop.f32.mrb[11].mxu1 }
 0x10d   :  { %v1160_v13 = vsel %vm440_vm2, %v362_v4, %v456_v6  ;;  %v716_v14 = vadd.f32 %v715_v11, %v714_v7  ;;  %v372_v15 = vadd.f32 %v707_v54, %v371_v12 }
 0x10e   :  { %v488_v16 = vadd.f32 %v1158_v9, %v1160_v13  ;;  %v459_v17 = vmul.f32 0.2, %v377_v10  ;;  %vm443_vm4 = vcmp.gt.f32.partialorder %v377_v10, 0.0 }
 0x10f   :  { %vm442_vm3 = vcmp.gt.f32.partialorder %v372_v15, 0.0  ;;  %v458_v18 = vmul.f32 0.2, %v372_v15  ;;  %v717_v19 = vpop.f32.mrb[12].mxu0  ;;  %v783_v20 = vpop.f32.mrb[12].mxu1 }
 0x110   :  { %v387_v21 = vadd.f32 %v783_v20, %v716_v14  ;;  %v718_v22 = vpop.f32.mrb[13].mxu0  ;;  %v381_v23 = vpop.f32.mrb[13].mxu1  ;;  %v1167_v29 = vsel %vm443_vm4, %v377_v10, %v459_v17 }
 0x111   :  { %v1164_v24 = vsel %vm442_vm3, %v372_v15, %v458_v18  ;;  %v719_v25 = vadd.f32 %v718_v22, %v717_v19  ;;  %v382_v26 = vadd.f32 %v713_v3, %v381_v23 }
 0x112   :  { %v489_v27 = vadd.f32 %v488_v16, %v1164_v24  ;;  %v461_v28 = vmul.f32 0.2, %v387_v21  ;;  %vm445_vm6 = vcmp.gt.f32.partialorder %v387_v21, 0.0 }
 0x113   :  { %vm444_vm5 = vcmp.gt.f32.partialorder %v382_v26, 0.0  ;;  %v460_v30 = vmul.f32 0.2, %v382_v26  ;;  %v720_v31 = vpop.f32.mrb[14].mxu0  ;;  %v786_v32 = vpop.f32.mrb[14].mxu1 }
 0x114   :  { %v490_v33 = vadd.f32 %v489_v27, %v1167_v29  ;;  %v721_v34 = vpop.f32.mrb[15].mxu0  ;;  %v391_v35 = vpop.f32.mrb[15].mxu1  ;;  %v1173_v40 = vsel %vm445_vm6, %v387_v21, %v461_v28 }
 0x115   :  { %v1170_v36 = vsel %vm444_vm5, %v382_v26, %v460_v30  ;;  %v722_v37 = vadd.f32 %v721_v34, %v720_v31  ;;  %v392_v38 = vadd.f32 %v719_v25, %v391_v35 }
 0x116   :  { %v491_v39 = vadd.f32 %v490_v33, %v1170_v36 }
 0x117   :  { %v397_v41 = vadd.f32 %v786_v32, %v722_v37  ;;  %vm446_vm7 = vcmp.gt.f32.partialorder %v392_v38, 0.0  ;;  %v462_v42 = vmul.f32 0.2, %v392_v38  ;;  %v723_v44 = vpop.f32.mrb[16].mxu0  ;;  %v789_v45 = vpop.f32.mrb[16].mxu1 }
 0x118   :  { %v492_v46 = vadd.f32 %v491_v39, %v1173_v40  ;;  %v724_v47 = vpop.f32.mrb[17].mxu0  ;;  %v401_v48 = vpop.f32.mrb[17].mxu1 }
 0x119   :  { %vm447_vm8 = vcmp.gt.f32.partialorder %v397_v41, 0.0  ;;  %v463_v50 = vmul.f32 0.2, %v397_v41  ;;  %v1176_v51 = vsel %vm446_vm7, %v392_v38, %v462_v42  ;;  %v725_v52 = vadd.f32 %v724_v47, %v723_v44 }
 0x11a   :  { %v493_v53 = vadd.f32 %v492_v46, %v1176_v51 }
 0x11b   :  { %v1179_v54 = vsel %vm447_vm8, %v397_v41, %v463_v50  ;;  %v402_v56 = vadd.f32 %v725_v52, %v401_v48  ;;  %v726_v57 = vpop.f32.mrb[18].mxu0  ;;  %v792_v58 = vpop.f32.mrb[18].mxu1 }
 0x11c   :  { %v494_v59 = vadd.f32 %v493_v53, %v1179_v54  ;;  %v727_v60 = vpop.f32.mrb[19].mxu0  ;;  %v411_v62 = vpop.f32.mrb[19].mxu1 }
 0x11d   :  { %vm448_vm9 = vcmp.gt.f32.partialorder %v402_v56, 0.0  ;;  %v464_v63 = vmul.f32 0.2, %v402_v56  ;;  %v728_v0 = vadd.f32 %v727_v60, %v726_v57 }
 0x11f   :  { %v480_v1 = vsel %vm448_vm9, %v402_v56, %v464_v63  ;;  %v407_v2 = vadd.f32 %v789_v45, %v728_v0  ;;  %v729_v3 = vpop.f32.mrb[20].mxu0  ;;  %v795_v4 = vpop.f32.mrb[20].mxu1 }
 0x120   :  { %v495_v5 = vadd.f32 %v494_v59, %v480_v1  ;;  %v427_v6 = vadd.f32 %v795_v4, %v1152_v49  ;;  %v730_v7 = vpop.f32.mrb[21].mxu0  ;;  %v421_v8 = vpop.f32.mrb[21].mxu1 }
 0x121   :  { %vm449_vm10 = vcmp.gt.f32.partialorder %v407_v2, 0.0  ;;  %v465_v10 = vmul.f32 0.2, %v407_v2  ;;  %v731_v11 = vadd.f32 %v730_v7, %v729_v3  ;;  %v422_v12 = vadd.f32 %v1150_v43, %v421_v8 }
 0x122   :  { %v469_v30 = vmul.f32 0.2, %v427_v6  ;;  %vm453_vm14 = vcmp.gt.f32.partialorder %v427_v6, 0.0 }
 0x123   :  { %v481_v14 = vsel %vm449_vm10, %v407_v2, %v465_v10  ;;  %v412_v15 = vadd.f32 %v731_v11, %v411_v62  ;;  %v732_v16 = vpop.f32.mrb[22].mxu0  ;;  %v798_v17 = vpop.f32.mrb[22].mxu1  ;;  %v468_v28 = vmul.f32 0.2, %v422_v12  ;;  %vm452_vm13 = vcmp.gt.f32.partialorder %v422_v12, 0.0 }
 0x124   :  { %v496_v18 = vadd.f32 %v495_v5, %v481_v14  ;;  %v437_v19 = vadd.f32 %v798_v17, %v1156_v61  ;;  %v733_v20 = vpop.f32.mrb[23].mxu0  ;;  %v431_v21 = vpop.f32.mrb[23].mxu1  ;;  %v485_v35 = vsel %vm453_vm14, %v427_v6, %v469_v30 }
 0x125   :  { %vm450_vm11 = vcmp.gt.f32.partialorder %v412_v15, 0.0  ;;  %v466_v22 = vmul.f32 0.2, %v412_v15  ;;  %v734_v23 = vadd.f32 %v733_v20, %v732_v16  ;;  %v432_v49 = vadd.f32 %v1154_v55, %v431_v21 }
 0x126   :  { %v484_v33 = vsel %vm452_vm13, %v422_v12, %v468_v28  ;;  %v471_v37 = vmul.f32 0.2, %v437_v19  ;;  %vm455_vm0 = vcmp.gt.f32.partialorder %v437_v19, 0.0 }
 0x127   :  { %v482_v25 = vsel %vm450_vm11, %v412_v15, %v466_v22  ;;  %v417_v26 = vadd.f32 %v792_v58, %v734_v23  ;;  %v470_v61 = vmul.f32 0.2, %v432_v49  ;;  %vm454_vm15 = vcmp.gt.f32.partialorder %v432_v49, 0.0 }
 0x128   :  { %v497_v27 = vadd.f32 %v496_v18, %v482_v25  ;;  %v487_v41 = vsel %vm455_vm0, %v437_v19, %v471_v37 }
 0x129   :  { %vm451_vm12 = vcmp.gt.f32.partialorder %v417_v26, 0.0  ;;  %v467_v43 = vmul.f32 0.2, %v417_v26  ;;  %v486_v55 = vsel %vm454_vm15, %v432_v49, %v470_v61 }
 0x12b   :  { %v483_v31 = vsel %vm451_vm12, %v417_v26, %v467_v43 }
 0x12c   :  { %v498_v32 = vadd.f32 %v497_v27, %v483_v31 }
 0x12e   :  { %v499_v34 = vadd.f32 %v498_v32, %v484_v33 }
 0x130   :  { %v500_v38 = vadd.f32 %v499_v34, %v485_v35 }
 0x132   :  { %v501_v39 = vadd.f32 %v500_v38, %v486_v55 }
 0x134   :  { %v502_v42 = vadd.f32 %v501_v39, %v487_v41 }
 0x136   :  { %v503_v44 = vrot.slane %v502_v42, 4 }
 0x138   :  { %v504_v45 = vadd.f32 %v503_v44, %v502_v42 }
 0x13a   :  { %v505_v46 = vrot.slane %v504_v45, 2 }
 0x13c   :  { %v506_v47 = vadd.f32 %v505_v46, %v504_v45 }
 0x13e   :  { %v507_v48 = vrot.slane %v506_v47, 1 }
 0x140   :  { %v508_v50 = vadd.f32 %v507_v48, %v506_v47 }
 0x142   :  { %v510_v52 = vmul.f32 0.0078125, %v508_v50 }
 0x144   :  { %v511_v53 = vsub.f32 %v1160_v13, %v510_v52  ;;  %v512_v56 = vsub.f32 %v1158_v9, %v510_v52  ;;  %v513_v57 = vsub.f32 %v1164_v24, %v510_v52  ;;  %v514_v58 = vsub.f32 %v1167_v29, %v510_v52 }
 0x145   :  { %v515_v59 = vsub.f32 %v1170_v36, %v510_v52  ;;  %v516_v60 = vsub.f32 %v1173_v40, %v510_v52  ;;  %v517_v62 = vsub.f32 %v1176_v51, %v510_v52  ;;  %v518_v63 = vsub.f32 %v1179_v54, %v510_v52 }
 0x146   :  { %v519_v0 = vsub.f32 %v480_v1, %v510_v52  ;;  %v520_v2 = vsub.f32 %v481_v14, %v510_v52  ;;  %v521_v3 = vsub.f32 %v482_v25, %v510_v52  ;;  %v522_v4 = vsub.f32 %v483_v31, %v510_v52 }
 0x147   :  { %v523_v5 = vsub.f32 %v484_v33, %v510_v52  ;;  %v524_v13 = vsub.f32 %v485_v35, %v510_v52  ;;  %v525_v6 = vsub.f32 %v486_v55, %v510_v52  ;;  %v526_v9 = vsub.f32 %v487_v41, %v510_v52 }
 0x148   :  { %v527_v7 = vmul.f32 %v511_v53, %v511_v53  ;;  %v528_v24 = vmul.f32 %v512_v56, %v512_v56  ;;  %v529_v8 = vmul.f32 %v513_v57, %v513_v57  ;;  %v530_v10 = vmul.f32 %v514_v58, %v514_v58 }
 0x149   :  { %v531_v11 = vmul.f32 %v515_v59, %v515_v59  ;;  %v532_v12 = vmul.f32 %v516_v60, %v516_v60  ;;  %v533_v15 = vmul.f32 %v517_v62, %v517_v62  ;;  %v534_v1 = vmul.f32 %v518_v63, %v518_v63 }
 0x14a   :  { %v543_v29 = vadd.f32 %v528_v24, %v527_v7  ;;  %v535_v16 = vmul.f32 %v519_v0, %v519_v0  ;;  %v536_v18 = vmul.f32 %v520_v2, %v520_v2  ;;  %v537_v20 = vmul.f32 %v521_v3, %v521_v3  ;;  %v665_v7 = vld [vmem:[%s1250_s2] ss:$0 sm:$0xff] }
 0x14b   :  { %v538_v22 = vmul.f32 %v522_v4, %v522_v4  ;;  %v539_v49 = vmul.f32 %v523_v5, %v523_v5  ;;  %v540_v26 = vmul.f32 %v524_v13, %v524_v13  ;;  %v541_v28 = vmul.f32 %v525_v6, %v525_v6 }
 0x14c   :  { %v544_v36 = vadd.f32 %v543_v29, %v529_v8  ;;  %v542_v30 = vmul.f32 %v526_v9, %v526_v9 }
 0x14e   :  { %v545_v40 = vadd.f32 %v544_v36, %v530_v10 }
 0x150   :  { %v546_v51 = vadd.f32 %v545_v40, %v531_v11 }
 0x152   :  { %v547_v54 = vadd.f32 %v546_v51, %v532_v12  ;;  %v666_v51 = vld [vmem:[%s1251_s3] ss:$0 sm:$0xff] }
 0x154   :  { %v548_v14 = vadd.f32 %v547_v54, %v533_v15 }
 0x156   :  { %v549_v17 = vadd.f32 %v548_v14, %v534_v1 }
 0x158   :  { %v550_v19 = vadd.f32 %v549_v17, %v535_v16 }
 0x15a   :  { %v551_v21 = vadd.f32 %v550_v19, %v536_v18 }
 0x15c   :  { %v552_v23 = vadd.f32 %v551_v21, %v537_v20 }
 0x15e   :  { %v553_v25 = vadd.f32 %v552_v23, %v538_v22 }
 0x160   :  { %v554_v27 = vadd.f32 %v553_v25, %v539_v49 }
 0x162   :  { %v555_v43 = vadd.f32 %v554_v27, %v540_v26 }
 0x164   :  { %v556_v31 = vadd.f32 %v555_v43, %v541_v28 }
 0x166   :  { %v557_v32 = vadd.f32 %v556_v31, %v542_v30 }
 0x168   :  { %v558_v33 = vrot.slane %v557_v32, 4 }
 0x16a   :  { %v559_v61 = vadd.f32 %v558_v33, %v557_v32 }
 0x16c   :  { %v560_v34 = vrot.slane %v559_v61, 2 }
 0x16e   :  { %v561_v35 = vadd.f32 %v560_v34, %v559_v61 }
 0x170   :  { %v562_v37 = vrot.slane %v561_v35, 1 }
 0x172   :  { %v563_v38 = vadd.f32 %v562_v37, %v561_v35 }
 0x174   :  { %v564_v55 = vmul.f32 0.0078125, %v563_v38 }
 0x176   :  { %v565_v39 = vadd.f32 1e-05, %v564_v55 }
 0x178   :  { %855 = vrsqrt.f32 %v565_v39 }
 0x182   :  { %v856_v41 = vpop.eup %855 }
 0x183   :  { %v567_v42 = vmul.f32 %v856_v41, %v511_v53  ;;  %v568_v44 = vmul.f32 %v856_v41, %v512_v56  ;;  %v569_v45 = vmul.f32 %v856_v41, %v513_v57  ;;  %v570_v46 = vmul.f32 %v856_v41, %v514_v58 }
 0x184   :  { %v571_v47 = vmul.f32 %v856_v41, %v515_v59  ;;  %v572_v48 = vmul.f32 %v856_v41, %v516_v60  ;;  %v573_v50 = vmul.f32 %v856_v41, %v517_v62  ;;  %v574_v52 = vmul.f32 %v856_v41, %v518_v63 }
 0x185   :  { %v575_v24 = vmul.f32 %v856_v41, %v519_v0  ;;  %v576_v8 = vmul.f32 %v856_v41, %v520_v2  ;;  %v577_v29 = vmul.f32 %v856_v41, %v521_v3  ;;  %v578_v10 = vmul.f32 %v856_v41, %v522_v4 }
 0x186   :  { %v579_v36 = vmul.f32 %v856_v41, %v523_v5  ;;  %v580_v11 = vmul.f32 %v856_v41, %v524_v13  ;;  %v581_v40 = vmul.f32 %v856_v41, %v525_v6  ;;  %v582_v12 = vmul.f32 %v856_v41, %v526_v9 }
 0x187   :  { %v590_v53 = vmul.f32 %v665_v7, %v567_v42  ;;  %v591_v56 = vmul.f32 %v665_v7, %v568_v44  ;;  %v592_v57 = vmul.f32 %v665_v7, %v569_v45  ;;  %v593_v58 = vmul.f32 %v665_v7, %v570_v46 }
 0x188   :  { %v594_v59 = vmul.f32 %v665_v7, %v571_v47  ;;  %v595_v60 = vmul.f32 %v665_v7, %v572_v48  ;;  %v596_v62 = vmul.f32 %v665_v7, %v573_v50  ;;  %v597_v63 = vmul.f32 %v665_v7, %v574_v52 }
 0x189   :  { %v598_v0 = vmul.f32 %v665_v7, %v575_v24  ;;  %v599_v2 = vmul.f32 %v665_v7, %v576_v8  ;;  %v600_v3 = vmul.f32 %v665_v7, %v577_v29  ;;  %v601_v4 = vmul.f32 %v665_v7, %v578_v10 }
 0x18a   :  { %v602_v5 = vmul.f32 %v665_v7, %v579_v36  ;;  %v603_v13 = vmul.f32 %v665_v7, %v580_v11  ;;  %v604_v6 = vmul.f32 %v665_v7, %v581_v40  ;;  %v605_v9 = vmul.f32 %v665_v7, %v582_v12 }
 0x18b   :  { %v613_v15 = vadd.f32 %v666_v51, %v590_v53  ;;  %v614_v54 = vadd.f32 %v666_v51, %v591_v56  ;;  %v615_v1 = vadd.f32 %v666_v51, %v592_v57  ;;  %v616_v14 = vadd.f32 %v666_v51, %v593_v58 }
 0x18c   :  { %v617_v16 = vadd.f32 %v666_v51, %v594_v59  ;;  %v618_v17 = vadd.f32 %v666_v51, %v595_v60  ;;  %v619_v18 = vadd.f32 %v666_v51, %v596_v62  ;;  %v620_v19 = vadd.f32 %v666_v51, %v597_v63 }
 0x18d   :  { %v621_v20 = vadd.f32 %v666_v51, %v598_v0  ;;  %v622_v21 = vadd.f32 %v666_v51, %v599_v2  ;;  %v623_v22 = vadd.f32 %v666_v51, %v600_v3  ;;  %v624_v23 = vadd.f32 %v666_v51, %v601_v4  ;;  %629 = vst [vmem:[%s1252_s4] sm:$0xff] %v613_v15 }
 0x18e   :  { %630 = vst [vmem:[%s1252_s4 + $0x8] sm:$0xff] %v614_v54  ;;  %631 = vst [vmem:[%s1252_s4 + $0x10] sm:$0xff] %v615_v1  ;;  %v625_v49 = vadd.f32 %v666_v51, %v602_v5  ;;  %v626_v25 = vadd.f32 %v666_v51, %v603_v13  ;;  %v627_v26 = vadd.f32 %v666_v51, %v604_v6 }
 0x18f   :  { %632 = vst [vmem:[%s1252_s4 + $0x18] sm:$0xff] %v616_v14  ;;  %v628_v27 = vadd.f32 %v666_v51, %v605_v9  ;;  %633 = vst [vmem:[%s1252_s4 + $0x20] sm:$0xff] %v617_v16 }
 0x190   :  { %634 = vst [vmem:[%s1252_s4 + $0x28] sm:$0xff] %v618_v17  ;;  %635 = vst [vmem:[%s1252_s4 + $0x30] sm:$0xff] %v619_v18 }
 0x191   :  { %636 = vst [vmem:[%s1252_s4 + $0x38] sm:$0xff] %v620_v19  ;;  %637 = vst [vmem:[%s1252_s4 + $0x40] sm:$0xff] %v621_v20 }
 0x192   :  { %638 = vst [vmem:[%s1252_s4 + $0x48] sm:$0xff] %v622_v21  ;;  %639 = vst [vmem:[%s1252_s4 + $0x50] sm:$0xff] %v623_v22 }
 0x193   :  { %640 = vst [vmem:[%s1252_s4 + $0x58] sm:$0xff] %v624_v23  ;;  %641 = vst [vmem:[%s1252_s4 + $0x60] sm:$0xff] %v625_v49 }
 0x194   :  { %642 = vst [vmem:[%s1252_s4 + $0x68] sm:$0xff] %v626_v25  ;;  %643 = vst [vmem:[%s1252_s4 + $0x70] sm:$0xff] %v627_v26 }
 0x195   :  { %644 = vst [vmem:[%s1252_s4 + $0x78] sm:$0xff] %v628_v27 }

// kernel: discriminator_forward.7
= control target key start
LH: loop header
LB: loop body
LE: loop exit
PB: predicated region body
PF: predicated region fallthrough
CT: control target
= control target key end

     0   :  { %vm80_vm0 = vcmask 261120   ;;  %vm528_vm1 = vmmov 0   ;;  %vm357_vm6 = vcmask 254976   ;;  %vm379_vm7 = vcmask 1024   ;;  %s738_s1 = inlined_call_operand.vmem [shape: f32[288,32], index: 1, kind: input, shape index: {}]   ;;  %s739_s0 = inlined_call_operand.vmem [shape: f32[32,288], index: 0, kind: input, shape index: {}]   ;;  %s740_s2 = inlined_call_operand.vmem [shape: f32[1,32], index: 2, kind: input, shape index: {}]   ;;  %s741_s3 = inlined_call_operand.vmem [shape: f32[32,32], index: 3, kind: input, shape index: {}]   ;;  %s742_s4 = inlined_call_operand.vmem [shape: f32[2,32], index: 4, kind: input, shape index: {}]   ;;  %s743_s5 = inlined_call_operand.<no memory space> [shape: f32[1,1], index: 5, kind: input, shape index: {}]   ;;  %s744_s6 = inlined_call_operand.vmem [shape: f32[2,1], index: 6, kind: output, shape index: {}]  }
   0x1   :  { %v53_v0 = vld [vmem:[%s738_s1 + $0x80] sm:$0xff]  ;;  %v54_v1 = vld [vmem:[%s738_s1 + $0x88] sm:$0xff]  ;;  %v55_v5 = vld [vmem:[%s738_s1 + $0x90] sm:$0xff] }
   0x2   :  { %v37_v2 = vld [vmem:[%s738_s1] sm:$0xff]  ;;  %v474_v3 = vpack.c.bf16 %v54_v1, %v53_v0  ;;  %v38_v4 = vld [vmem:[%s738_s1 + $0x8] sm:$0xff]  ;;  %v56_v6 = vld [vmem:[%s738_s1 + $0x98] sm:$0xff] }
   0x3   :  { %v476_v7 = vpack.c.bf16 %v38_v4, %v37_v2  ;;  %v478_v8 = vpack.c.bf16 %v56_v6, %v55_v5  ;;  %v39_v9 = vld [vmem:[%s738_s1 + $0x10] sm:$0xff]  ;;  %v40_v10 = vld [vmem:[%s738_s1 + $0x18] sm:$0xff]  ;;  %v57_v11 = vld [vmem:[%s738_s1 + $0xa0] sm:$0xff]  ;;  %v527_v2 = vmov 0.0|0.0  }
   0x4   :  { %475 = vmatprep.subr.bf16.mxu0 %v474_v3  ;;  %v58_v12 = vld [vmem:[%s738_s1 + $0xa8] sm:$0xff]  ;;  %v480_v13 = vpack.c.bf16 %v40_v10, %v39_v9  ;;  %v41_v15 = vld [vmem:[%s738_s1 + $0x20] sm:$0xff]  ;;  %v59_v17 = vld [vmem:[%s738_s1 + $0xb0] sm:$0xff]  ;;  %v529_v3 = vmov 0.0  }
   0x5   :  { %477 = vmatpush3.bf16.msra.mxu0 %v476_v7  ;;  %v482_v14 = vpack.c.bf16 %v58_v12, %v57_v11  ;;  %v42_v16 = vld [vmem:[%s738_s1 + $0x28] sm:$0xff]  ;;  %v60_v18 = vld [vmem:[%s738_s1 + $0xb8] sm:$0xff]  ;;  %v43_v21 = vld [vmem:[%s738_s1 + $0x30] sm:$0xff] }
   0x6   :  { %479 = vmatprep.subr.bf16.mxu0 %v478_v8  ;;  %v484_v19 = vpack.c.bf16 %v42_v16, %v41_v15  ;;  %v486_v20 = vpack.c.bf16 %v60_v18, %v59_v17  ;;  %v44_v22 = vld [vmem:[%s738_s1 + $0x38] sm:$0xff]  ;;  %v61_v23 = vld [vmem:[%s738_s1 + $0xc0] sm:$0xff]  ;;  %v62_v24 = vld [vmem:[%s738_s1 + $0xc8] sm:$0xff] }
   0x7   :  { %v69_v25 = vld [vmem:[%s738_s1 + $0x100] sm:$0xff]  ;;  %v70_v26 = vld [vmem:[%s738_s1 + $0x108] sm:$0xff]  ;;  %v488_v29 = vpack.c.bf16 %v44_v22, %v43_v21  ;;  %v71_v30 = vld [vmem:[%s738_s1 + $0x110] sm:$0xff]  ;;  %v490_v32 = vpack.c.bf16 %v62_v24, %v61_v23 }
   0x8   :  { %v506_v27 = vpack.c.bf16 %v70_v26, %v69_v25  ;;  %v26_v28 = vld [vmem:[%s739_s0 + $0x8] sm:$0xff]  ;;  %v72_v31 = vld [vmem:[%s738_s1 + $0x118] sm:$0xff]  ;;  %v45_v33 = vld [vmem:[%s738_s1 + $0x40] sm:$0xff] }
   0x9   :  { %481 = vmatpush3.bf16.msra.mxu0 %v480_v13  ;;  %157 = vmatprep.mubr.f32.mxu0 %v26_v28  ;;  %v46_v34 = vld [vmem:[%s738_s1 + $0x48] sm:$0xff]  ;;  %v510_v35 = vpack.c.bf16 %v72_v31, %v71_v30  ;;  %v27_v36 = vld [vmem:[%s739_s0 + $0x10] sm:$0xff]  ;;  %v64_v38 = vld [vmem:[%s738_s1 + $0xd8] sm:$0xff] }
   0xa   :  { %483 = vmatprep.subr.bf16.mxu0 %v482_v14  ;;  %507 = vmatprep.subr.bf16.mxu1 %v506_v27  ;;  %v63_v37 = vld [vmem:[%s738_s1 + $0xd0] sm:$0xff]  ;;  %v492_v39 = vpack.c.bf16 %v46_v34, %v45_v33  ;;  %v48_v42 = vld [vmem:[%s738_s1 + $0x58] sm:$0xff]  ;;  %v65_v43 = vld [vmem:[%s738_s1 + $0xe0] sm:$0xff] }
   0xb   :  { %509 = vmatpush3.bf16.msra.mxu1 %v506_v27  ;;  %457 = vmatprep.mubr.msk.f32.mxu1 %vm80_vm0, %v27_v36  ;;  %v494_v40 = vpack.c.bf16 %v64_v38, %v63_v37  ;;  %v47_v41 = vld [vmem:[%s738_s1 + $0x50] sm:$0xff]  ;;  %v66_v44 = vld [vmem:[%s738_s1 + $0xe8] sm:$0xff]  ;;  %v33_v46 = vld [vmem:[%s739_s0 + $0x40] sm:$0xff] }
   0xc   :  { %511 = vmatprep.subr.bf16.mxu1 %v510_v35  ;;  %v30_v45 = vld [vmem:[%s739_s0 + $0x28] sm:$0xff]  ;;  %v496_v47 = vpack.c.bf16 %v48_v42, %v47_v41  ;;  %v498_v48 = vpack.c.bf16 %v66_v44, %v65_v43  ;;  %v49_v49 = vld [vmem:[%s738_s1 + $0x60] sm:$0xff]  ;;  %v67_v51 = vld [vmem:[%s738_s1 + $0xf0] sm:$0xff] }
   0xd   :  { %485 = vmatpush3.bf16.msra.mxu0 %v484_v19  ;;  %v50_v50 = vld [vmem:[%s738_s1 + $0x68] sm:$0xff]  ;;  %v68_v52 = vld [vmem:[%s738_s1 + $0xf8] sm:$0xff]  ;;  %v51_v56 = vld [vmem:[%s738_s1 + $0x70] sm:$0xff] }
   0xe   :  { %487 = vmatprep.subr.bf16.mxu0 %v486_v20  ;;  %v36_v53 = vld [vmem:[%s739_s0 + $0x58] sm:$0xff]  ;;  %v500_v54 = vpack.c.bf16 %v50_v50, %v49_v49  ;;  %v502_v55 = vpack.c.bf16 %v68_v52, %v67_v51  ;;  %v25_v59 = vld [vmem:[%s739_s0] sm:$0xff]  ;;  %v31_v63 = vld [vmem:[%s739_s0 + $0x30] sm:$0xff] }
   0xf   :  { %513 = vmatpush3.bf16.msra.mxu1 %v510_v35  ;;  %v52_v57 = vld [vmem:[%s738_s1 + $0x78] sm:$0xff]  ;;  %v29_v60 = vld [vmem:[%s739_s0 + $0x20] sm:$0xff]  ;;  %v35_v0 = vld [vmem:[%s739_s0 + $0x50] sm:$0xff] }
  0x10   :  { %v504_v58 = vpack.c.bf16 %v52_v57, %v51_v56  ;;  %v28_v61 = vld [vmem:[%s739_s0 + $0x18] sm:$0xff]  ;;  %v34_v1 = vld [vmem:[%s739_s0 + $0x48] sm:$0xff]  ;;  %514 = vmatprep.subr.bf16.mxu1 %v527_v2  ;;  %v385_v10 = vld [vmem:[%s740_s2] ss:$0 sm:$0xff] }
  0x11   :  { %489 = vmatpush3.bf16.msra.mxu0 %v488_v29  ;;  %v32_v62 = vld [vmem:[%s739_s0 + $0x38] sm:$0xff]  ;;  %v275_v25 = vld [vmem:[%s741_s3] sm:$0xff]  ;;  %v276_v28 = vld [vmem:[%s741_s3 + $0x8] sm:$0xff] }
  0x12   :  { %491 = vmatprep.subr.bf16.mxu0 %v490_v32  ;;  %458 = vmatmul.mubr.msk.f32.vlgmr.msra.gmra.mrb[0].mxu1 %vm80_vm0, %v30_v45  ;;  %v277_v41 = vld [vmem:[%s741_s3 + $0x10] sm:$0xff]  ;;  %v278_v42 = vld [vmem:[%s741_s3 + $0x18] sm:$0xff] }
  0x13   :  { %460 = vmatprep.mubr.msk.f32.mxu1 %vm80_vm0, %v33_v46 }
  0x15   :  { %493 = vmatpush3.bf16.msra.mxu0 %v492_v39 }
  0x16   :  { %495 = vmatprep.subr.bf16.mxu0 %v494_v40  ;;  %461 = vmatmul.mubr.msk.f32.gmra.mrb[2].mxu1 %vm80_vm0, %v36_v53 }
  0x17   :  { %471 = vmatprep.mubr.msk.f32.mxu1 %vm528_vm1, %v529_v3 }
  0x19   :  { %497 = vmatpush3.bf16.msra.mxu0 %v496_v47  ;;  %v283_v47 = vld [vmem:[%s742_s4] sm:$0x3] }
  0x1a   :  { %499 = vmatprep.subr.bf16.mxu0 %v498_v48  ;;  %v11_v48 = vstv %s743_s5 }
  0x1b   :  { %12 = vst [vmem:[#allocation2] sm:$0x1] %v11_v48 }
  0x1d   :  { %501 = vmatpush3.bf16.msra.mxu0 %v500_v54 }
  0x1e   :  { %503 = vmatprep.subr.bf16.mxu0 %v502_v55 }
  0x21   :  { %505 = vmatpush3.bf16.msra.mxu0 %v504_v58 }
  0x22   :  { %v391_v52 = vld [vmem:[#allocation2] ss:$0 sm:$0xff] }
  0x24   :  { %158 = vmatmul.mubr.f32.vlgmr.msra.gmra.mrb[0].mxu0 %v25_v59 }
  0x25   :  { %162 = vmatprep.mubr.f32.mxu0 %v29_v60 }
  0x28   :  { %163 = vmatmul.mubr.f32.gmra.mrb[2].mxu0 %v28_v61 }
  0x29   :  { %167 = vmatprep.mubr.f32.mxu0 %v32_v62 }
  0x2c   :  { %168 = vmatmul.mubr.f32.gmra.mrb[4].mxu0 %v31_v63 }
  0x2d   :  { %172 = vmatprep.mubr.f32.mxu0 %v35_v0 }
  0x30   :  { %173 = vmatmul.mubr.f32.gmra.mrb[6].mxu0 %v34_v1 }
  0xe5   :  { %v459_v4 = vpop.f32.mrb[0].mxu1 }
  0xe6   :  { %v244_v5 = vpop.f32.mrb[1].mxu1 }
  0xe9   :  { %v462_v6 = vpop.f32.mrb[2].mxu1 }
  0xea   :  { %v254_v7 = vpop.f32.mrb[3].mxu1 }
  0xf7   :  { %v424_v8 = vpop.f32.mrb[0].mxu0 }
  0xf8   :  { %v425_v9 = vpop.f32.mrb[1].mxu0 }
  0xf9   :  { %v426_v11 = vadd.f32 %v425_v9, %v424_v8 }
  0xfb   :  { %v427_v12 = vpop.f32.mrb[2].mxu0  ;;  %v160_v13 = vadd.f32 %v426_v11, %v385_v10 }
  0xfc   :  { %v428_v14 = vpop.f32.mrb[3].mxu0 }
  0xfd   :  { %v429_v15 = vadd.f32 %v428_v14, %v427_v12  ;;  %v245_v16 = vadd.f32 %v244_v5, %v160_v13 }
  0xff   :  { %v165_v17 = vadd.f32 %v429_v15, %v385_v10  ;;  %v267_v18 = vmul.f32 0.2, %v245_v16  ;;  %v430_v19 = vpop.f32.mrb[4].mxu0  ;;  %vm263_vm2 = vcmp.gt.f32.partialorder %v245_v16, 0.0 }
 0x100   :  { %v431_v20 = vpop.f32.mrb[5].mxu0 }
 0x101   :  { %v250_v21 = vadd.f32 %v459_v4, %v165_v17  ;;  %v432_v22 = vadd.f32 %v431_v20, %v430_v19  ;;  %v271_v24 = vsel %vm263_vm2, %v245_v16, %v267_v18 }
 0x102   :  { %v279_v33 = vmul.f32 %v275_v25, %v271_v24 }
 0x103   :  { %vm264_vm3 = vcmp.gt.f32.partialorder %v250_v21, 0.0  ;;  %v268_v23 = vmul.f32 0.2, %v250_v21  ;;  %v433_v26 = vpop.f32.mrb[6].mxu0  ;;  %v170_v27 = vadd.f32 %v432_v22, %v385_v10 }
 0x104   :  { %v434_v29 = vpop.f32.mrb[7].mxu0 }
 0x105   :  { %v272_v30 = vsel %vm264_vm3, %v250_v21, %v268_v23  ;;  %v435_v31 = vadd.f32 %v434_v29, %v433_v26  ;;  %v255_v32 = vadd.f32 %v254_v7, %v170_v27 }
 0x106   :  { %v280_v34 = vmul.f32 %v276_v28, %v272_v30 }
 0x107   :  { %v175_v35 = vadd.f32 %v435_v31, %v385_v10  ;;  %v269_v36 = vmul.f32 0.2, %v255_v32  ;;  %vm265_vm4 = vcmp.gt.f32.partialorder %v255_v32, 0.0 }
 0x108   :  { %v515_v37 = vpack.c.bf16 %v280_v34, %v279_v33 }
 0x109   :  { %v260_v38 = vadd.f32 %v462_v6, %v175_v35  ;;  %v273_v40 = vsel %vm265_vm4, %v255_v32, %v269_v36 }
 0x10a   :  { %516 = vmatpush3.bf16.msra.mxu1 %v515_v37  ;;  %v281_v44 = vmul.f32 %v277_v41, %v273_v40 }
 0x10b   :  { %vm266_vm5 = vcmp.gt.f32.partialorder %v260_v38, 0.0  ;;  %v270_v39 = vmul.f32 0.2, %v260_v38  ;;  %517 = vmatprep.subr.bf16.mxu1 %v527_v2 }
 0x10d   :  { %v274_v43 = vsel %vm266_vm5, %v260_v38, %v270_v39 }
 0x10e   :  { %v282_v45 = vmul.f32 %v278_v42, %v274_v43 }
 0x110   :  { %v518_v46 = vpack.c.bf16 %v282_v45, %v281_v44 }
 0x112   :  { %519 = vmatpush3.bf16.msra.mxu1 %v518_v46 }
 0x115   :  { %472 = vmatmul.mubr.msk.f32.vlgmr.msra.gmra.mrb[4].mxu1 %vm80_vm0, %v283_v47 }
 0x1e8   :  { %v353_v49 = vpop.f32.mrb[4].mxu1 }
 0x1e9   :  { %v473_v50 = vpop.f32.mrb[5].mxu1  ;;  %v358_v51 = vsel %vm357_vm6, %v353_v49, 0.0 }
 0x1ea   :  { %359 = vadd.xlane.f32.xlu0 %v358_v51 }
 0x277   :  { %v360_v53 = vpop.xlane.xlu0 %359 }
 0x278   :  { %v368_v54 = vadd.f32 %v391_v52, %v360_v53 }
 0x27a   :  { %v369_v55 = vand.u32 2147483647, %v368_v54  ;;  %vm373_vm8 = vcmp.ge.f32.partialorder %v368_v54, 0.0 }
 0x27c   :  { %v370_v56 = vsub.f32 0.0, %v369_v55 }
 0x27e   :  { %v371_v57 = vmul.f32 1.442695, %v370_v56 }
 0x280   :  { %523 = vpow2.f32 %v371_v57 }
 0x28a   :  { %v524_v58 = vpop.eup %523 }
 0x28b   :  { %v374_v59 = vadd.f32 1.0, %v524_v58 }
 0x28d   :  { %525 = vrcp.f32 %v374_v59 }
 0x297   :  { %v526_v60 = vpop.eup %525 }
 0x298   :  { %v377_v61 = vmul.f32 %v526_v60, %v524_v58 }
 0x29a   :  { %v378_v62 = vsel %vm373_vm8, %v526_v60, %v377_v61 }
 0x29b   :  { %380 = vst.msk [vmem:[%s744_s6] sm:$0x3] %vm379_vm7, %v378_v62 }

</bundles_post_ra>
